<compile_context>
chip_gen: v7x
topology: tpu7x:2x2x1
jax: 0.10.0
libtpu: 0.0.40
codegen_flags: <defaults>
</compile_context>

<pallas_src>
import jax
import jax.numpy as jnp
from jax import lax
from jax.experimental import pallas as pl
from jax.experimental.pallas import tpu as pltpu

LRELU_SLOPE = 0.1


# ----------------------------------------------------------------------------
# helpers shared by the Pallas path and the pure-JAX reference
# ----------------------------------------------------------------------------
def _round_up(v, m):
    return (v + m - 1) // m * m


def _sigmoid(x):
    return 1.0 / (1.0 + jnp.exp(-x))


def _apply_act(x, act):
    if act == "none":
        return x
    if act == "relu":
        return jnp.maximum(x, 0.0)
    if act == "lrelu":
        return jnp.where(x >= 0, x, LRELU_SLOPE * x)
    if act == "sigmoid":
        return _sigmoid(x)
    raise ValueError(act)


# ----------------------------------------------------------------------------
# lane-dense flat layout geometry
# ----------------------------------------------------------------------------
def _geom(H, W):
    Wp = W + 2                      # row width incl. 1 left + 1 right pad col
    n = H * Wp                      # flat output length (incl. 2 scratch cols)
    n_al = _round_up(n, 128)        # lane-aligned output length
    LP = n_al + 3 * Wp              # padded flat input length (taps in range)
    return Wp, n, n_al, LP


def _pad_flat(x, LP):
    """(B,C,H,W) -> (B, C8, LP): channels padded to x8, 1 top / 2 bottom pad
    rows, 1 left / 1 right pad cols, flattened, zero-extended to LP."""
    B, C, H, W = x.shape
    Wp = W + 2
    Cp = _round_up(C, 8)
    xp = jnp.pad(x.astype(jnp.float32),
                 ((0, 0), (0, Cp - C), (1, 2), (1, 1)))
    xp = xp.reshape(B, Cp, (H + 3) * Wp)
    return jnp.pad(xp, ((0, 0), (0, 0), (0, LP - (H + 3) * Wp)))


def _prep_w3x3(w, b):
    """(Cout,Cin,3,3) -> (Cout8, 9*Cin8) tap-major (ky,kx,cin) + bias (Cout8,1)."""
    cout, cin = w.shape[0], w.shape[1]
    cop, cip = _round_up(cout, 8), _round_up(cin, 8)
    wp = jnp.pad(w.astype(jnp.float32),
                 ((0, cop - cout), (0, cip - cin), (0, 0), (0, 0)))
    wf = jnp.transpose(wp, (0, 2, 3, 1)).reshape(cop, 9 * cip)
    bf = jnp.zeros((cop, 1), jnp.float32)
    if b is not None:
        bf = bf.at[:cout, 0].set(b.astype(jnp.float32))
    return wf, bf


def _col_mask(H, W):
    """(1, n_al) f32: 1 for real pixels, 0 for scratch / alignment columns."""
    Wp, n, n_al, _ = _geom(H, W)
    col = jnp.arange(n_al, dtype=jnp.int32)
    return ((col % Wp < W) & (col < n)).astype(jnp.float32).reshape(1, n_al)


def _unflatten(out, cout, H, W):
    """(B, Cout8, n_al) kernel output -> (B, Cout, H, W)."""
    Wp, n, _, _ = _geom(H, W)
    B = out.shape[0]
    return out[:, :cout, :n].reshape(B, cout, H, Wp)[:, :, :, :W]


# ----------------------------------------------------------------------------
# in-kernel building blocks
# ----------------------------------------------------------------------------
def _zero_halo(pad_ref, Wp, n_al, LP):
    """Clear only the halo columns of the padded scratch (interior is fully
    overwritten by every masked interior write)."""
    rows = pad_ref.shape[0]
    z = jnp.zeros((rows, 2 * Wp), jnp.float32)
    pad_ref[:, 0:2 * Wp] = z
    pad_ref[:, Wp + n_al:LP] = z


def _conv_taps(src, w, b, Wp, n_al, act):
    """One fused 3x3 conv: stack the 9 shifted taps once and do a single
    deep-K MXU matmul (K = 9*Cin8) instead of 9 shallow dots."""
    taps = [src(ky * Wp + kx) for ky in range(3) for kx in range(3)]
    stk = jnp.concatenate(taps, axis=0)                     # (9*Cin8, n_al)
    acc = jnp.dot(w, stk, preferred_element_type=jnp.float32) + b
    return _apply_act(acc, act)


# ----------------------------------------------------------------------------
# Pallas kernel 1: fused chain of conv3x3 (padding=1) layers
#   (used for CALayer.process and the modulation_add 3-conv chain)
# ----------------------------------------------------------------------------
def _conv3x3_chain_pallas(x, layers):
    B, Cin, H, W = x.shape
    Wp, n, n_al, LP = _geom(H, W)
    Cin_p = _round_up(Cin, 8)

    xp = _pad_flat(x, LP)
    mask = _col_mask(H, W)

    n_layers = len(layers)
    ws, bs, acts, couts = [], [], [], []
    for L in layers:
        wf, bf = _prep_w3x3(L["w"], L["b"])
        ws.append(wf)
        bs.append(bf)
        acts.append(L["act"])
        couts.append(L["w"].shape[0])
    cout_last = couts[-1]
    cout_last_p = _round_up(cout_last, 8)
    c_scr = max([_round_up(c, 8) for c in couts[:-1]], default=8)

    def kernel(*refs):
        x_ref, m_ref = refs[0], refs[1]
        wb = refs[2:2 + 2 * n_layers]
        out_ref = refs[2 + 2 * n_layers]
        pad_ref = refs[3 + 2 * n_layers]

        _zero_halo(pad_ref, Wp, n_al, LP)
        mask_v = m_ref[...]

        def src_in(off):
            return x_ref[0, :, off:off + n_al]

        acc = _conv_taps(src_in, wb[0][...], wb[1][...], Wp, n_al, acts[0])
        for li in range(1, n_layers):
            cp = _round_up(couts[li - 1], 8)
            # re-pad the previous activation inside VMEM (never leaves chip)
            pad_ref[0:cp, Wp + 1:Wp + 1 + n_al] = acc * mask_v

            def src_mid(off, cp=cp):
                return pad_ref[0:cp, off:off + n_al]

            acc = _conv_taps(src_mid, wb[2 * li][...], wb[2 * li + 1][...],
                             Wp, n_al, acts[li])
        out_ref[0] = acc

    in_specs = [pl.BlockSpec((1, Cin_p, LP), lambda i: (i, 0, 0)),
                pl.BlockSpec((1, n_al), lambda i: (0, 0))]
    args = [xp, mask]
    for wf, bf in zip(ws, bs):
        in_specs.append(pl.BlockSpec(wf.shape, lambda i: (0, 0)))
        in_specs.append(pl.BlockSpec(bf.shape, lambda i: (0, 0)))
        args += [wf, bf]

    out = pl.pallas_call(
        kernel,
        out_shape=jax.ShapeDtypeStruct((B, cout_last_p, n_al), jnp.float32),
        grid=(B,),
        in_specs=in_specs,
        out_specs=pl.BlockSpec((1, cout_last_p, n_al), lambda i: (i, 0, 0)),
        scratch_shapes=[pltpu.VMEM((c_scr, LP), jnp.float32)],
        compiler_params=pltpu.CompilerParams(
            dimension_semantics=("parallel",)),
    )(*args)
    return _unflatten(out, cout_last, H, W)


# ----------------------------------------------------------------------------
# Pallas kernel 2: fused [optional pre conv3x3] + UNetConvBlock
#   conv3x3+LReLU -> conv3x3+LReLU -> + conv1x1(identity of block input)
# ----------------------------------------------------------------------------
def _unet_block_pallas(x, bp, pre=None):
    B, Cin, H, W = x.shape
    Wp, n, n_al, LP = _geom(H, W)
    Cin_p = _round_up(Cin, 8)
    have_pre = pre is not None
    Cb = pre["w"].shape[0] if have_pre else Cin          # block-input channels
    Cb_p = _round_up(Cb, 8)
    Cout = bp["conv1"]["w"].shape[0]
    Cout_p = _round_up(Cout, 8)

    xp = _pad_flat(x, LP)
    mask = _col_mask(H, W)

    wlist = []
    if have_pre:
        wlist += list(_prep_w3x3(pre["w"], pre["b"]))
    wlist += list(_prep_w3x3(bp["conv1"]["w"], bp["conv1"]["b"]))
    wlist += list(_prep_w3x3(bp["conv2"]["w"], bp["conv2"]["b"]))
    wid = jnp.zeros((Cout_p, Cb_p), jnp.float32).at[:Cout, :Cb].set(
        bp["identity"]["w"][:, :, 0, 0].astype(jnp.float32))
    bid = jnp.zeros((Cout_p, 1), jnp.float32).at[:Cout, 0].set(
        bp["identity"]["b"].astype(jnp.float32))
    wlist += [wid, bid]

    def kernel(*refs):
        x_ref, m_ref = refs[0], refs[1]
        k = 2
        if have_pre:
            wpre_ref, bpre_ref = refs[k], refs[k + 1]
            k += 2
        w1_ref, b1_ref, w2_ref, b2_ref, wid_ref, bid_ref = refs[k:k + 6]
        out_ref, pad_ref = refs[k + 6], refs[k + 7]

        _zero_halo(pad_ref, Wp, n_al, LP)
        mask_v = m_ref[...]

        def src_in(off):
            return x_ref[0, :, off:off + n_al]

        if have_pre:
            blk_in = _conv_taps(src_in, wpre_ref[...], bpre_ref[...],
                                Wp, n_al, "none") * mask_v
            pad_ref[0:Cb_p, Wp + 1:Wp + 1 + n_al] = blk_in

            def src_blk(off):
                return pad_ref[0:Cb_p, off:off + n_al]
        else:
            blk_in = x_ref[0, :, Wp + 1:Wp + 1 + n_al]   # center tap (reused)
            src_blk = src_in

        # 1x1 identity branch of the block (uses the center-tap slice)
        ident = jnp.dot(wid_ref[...], blk_in,
                        preferred_element_type=jnp.float32) + bid_ref[...]

        # conv_1 + LeakyReLU, re-padded in VMEM for conv_2
        a1 = _conv_taps(src_blk, w1_ref[...], b1_ref[...], Wp, n_al, "lrelu")
        pad_ref[0:Cout_p, Wp + 1:Wp + 1 + n_al] = a1 * mask_v

        def src_mid(off):
            return pad_ref[0:Cout_p, off:off + n_al]

        a2 = _conv_taps(src_mid, w2_ref[...], b2_ref[...], Wp, n_al, "lrelu")
        out_ref[0] = a2 + ident

    in_specs = [pl.BlockSpec((1, Cin_p, LP), lambda i: (i, 0, 0)),
                pl.BlockSpec((1, n_al), lambda i: (0, 0))]
    for arr in wlist:
        in_specs.append(pl.BlockSpec(arr.shape, lambda i: (0, 0)))

    out = pl.pallas_call(
        kernel,
        out_shape=jax.ShapeDtypeStruct((B, Cout_p, n_al), jnp.float32),
        grid=(B,),
        in_specs=in_specs,
        out_specs=pl.BlockSpec((1, Cout_p, n_al), lambda i: (i, 0, 0)),
        scratch_shapes=[pltpu.VMEM((max(Cb_p, Cout_p), LP), jnp.float32)],
        compiler_params=pltpu.CompilerParams(
            dimension_semantics=("parallel",)),
    )(xp, mask, *wlist)
    return _unflatten(out, Cout, H, W)


# ----------------------------------------------------------------------------
# Pallas kernel 3: element-wise L_hat + per-pixel channel mean (alpha in SMEM)
# ----------------------------------------------------------------------------
def _lhat_pallas(low, illu, noise, refl, alpha):
    B, C, H, W = refl.shape
    HW = H * W
    a = jnp.asarray(alpha, jnp.float32).reshape(1)
    il = illu.astype(jnp.float32).reshape(B, 1, HW)
    rf = refl.astype(jnp.float32).reshape(B, C, HW)
    ns = noise.astype(jnp.float32).reshape(B, C, HW)
    lo = low.astype(jnp.float32).reshape(B, C, HW)

    def kernel(a_ref, il_ref, rf_ref, ns_ref, lo_ref, lh_ref, mean_ref):
        av = a_ref[0]
        r = rf_ref[0]
        lh = (1.0 - av * r * r) * il_ref[0] - av * r * (ns_ref[0] - lo_ref[0])
        lh_ref[0] = lh
        mean_ref[0] = jnp.mean(lh, axis=0, keepdims=True)

    lh, mean = pl.pallas_call(
        kernel,
        out_shape=(jax.ShapeDtypeStruct((B, C, HW), jnp.float32),
                   jax.ShapeDtypeStruct((B, 1, HW), jnp.float32)),
        grid=(B,),
        in_specs=[
            pl.BlockSpec(memory_space=pltpu.MemorySpace.SMEM),
            pl.BlockSpec((1, 1, HW), lambda i: (i, 0, 0)),
            pl.BlockSpec((1, C, HW), lambda i: (i, 0, 0)),
            pl.BlockSpec((1, C, HW), lambda i: (i, 0, 0)),
            pl.BlockSpec((1, C, HW), lambda i: (i, 0, 0)),
        ],
        out_specs=(pl.BlockSpec((1, C, HW), lambda i: (i, 0, 0)),
                   pl.BlockSpec((1, 1, HW), lambda i: (i, 0, 0))),
        compiler_params=pltpu.CompilerParams(
            dimension_semantics=("parallel",)),
    )(a, il, rf, ns, lo)
    return lh.reshape(B, C, H, W), mean.reshape(B, 1, H, W)


# ----------------------------------------------------------------------------
# pure-JAX reference implementations (for verification)
# ----------------------------------------------------------------------------
def _conv_ref(x, w, b, stride=1, pad=0):
    y = lax.conv_general_dilated(
        x, w, (stride, stride), [(pad, pad), (pad, pad)],
        dimension_numbers=("NCHW", "OIHW", "NCHW"),
        precision=lax.Precision.HIGHEST)
    if b is not None:
        y = y + b[None, :, None, None]
    return y


def _chain_ref(x, layers):
    y = x
    for L in layers:
        y = _apply_act(_conv_ref(y, L["w"], L["b"], 1, 1), L["act"])
    return y


def _block_ref(x, bp, pre=None):
    if pre is not None:
        x = _conv_ref(x, pre["w"], pre["b"], 1, 1)
    out = _conv_ref(x, bp["conv1"]["w"], bp["conv1"]["b"], 1, 1)
    out = jnp.where(out >= 0, out, LRELU_SLOPE * out)
    out = _conv_ref(out, bp["conv2"]["w"], bp["conv2"]["b"], 1, 1)
    out = jnp.where(out >= 0, out, LRELU_SLOPE * out)
    return out + _conv_ref(x, bp["identity"]["w"], bp["identity"]["b"], 1, 0)


def _lhat_ref(low, illu, noise, refl, alpha):
    lh = (1.0 - alpha * refl * refl) * illu - alpha * refl * (noise - low)
    return lh, jnp.mean(lh, axis=1, keepdims=True)


# ----------------------------------------------------------------------------
# glue ops shared by both paths (left to XLA: tiny / data-reorg work)
# ----------------------------------------------------------------------------
def _conv1x1(x, w, b):
    y = jnp.einsum("oi,bihw->bohw", w[:, :, 0, 0], x,
                   precision=lax.Precision.HIGHEST)
    if b is not None:
        y = y + b[None, :, None, None]
    return y


def _down2x2(x, w, b):
    y = lax.conv_general_dilated(
        x, w, (2, 2), [(0, 0), (0, 0)],
        dimension_numbers=("NCHW", "OIHW", "NCHW"),
        precision=lax.Precision.HIGHEST)
    return y + b[None, :, None, None]


def _bilinear_resize(x, out_h, out_w, align_corners):
    B, C, H, W = x.shape

    def src_idx(out_size, in_size):
        i = jnp.arange(out_size, dtype=jnp.float32)
        if align_corners:
            src = (jnp.zeros_like(i) if out_size == 1
                   else i * (in_size - 1) / (out_size - 1))
        else:
            src = (i + 0.5) * (in_size / out_size) - 0.5
        src = jnp.clip(src, 0.0, in_size - 1)
        i0 = jnp.clip(jnp.floor(src).astype(jnp.int32), 0, in_size - 1)
        i1 = jnp.minimum(i0 + 1, in_size - 1)
        return i0, i1, src - i0.astype(jnp.float32)

    h0, h1, fh = src_idx(out_h, H)
    w0, w1, fw = src_idx(out_w, W)
    xh = (x[:, :, h0, :] * (1.0 - fh)[None, None, :, None]
          + x[:, :, h1, :] * fh[None, None, :, None])
    return (xh[:, :, :, w0] * (1.0 - fw)[None, None, None, :]
            + xh[:, :, :, w1] * fw[None, None, None, :])


def _ca_layer(x, cp, chain_fn):
    y = chain_fn(x, [dict(w=cp["p0"]["w"], b=cp["p0"]["b"], act="relu"),
                     dict(w=cp["p1"]["w"], b=cp["p1"]["b"], act="none")])
    y = jnp.mean(y, axis=(2, 3), keepdims=True)            # AdaptiveAvgPool2d(1)
    z = jnp.maximum(_conv1x1(y, cp["d0"]["w"], cp["d0"]["b"]), 0.0)
    z = _sigmoid(_conv1x1(z, cp["d1"]["w"], cp["d1"]["b"]))
    return z * y + x


def _unet_forward(x, up, chain_fn, block_fn):
    x1 = block_fn(x, up["conv1"], pre=up["convpre"])
    x2 = block_fn(_down2x2(x1, up["down1"]["w"], up["down1"]["b"]), up["conv2"])
    x3 = block_fn(_down2x2(x2, up["down2"]["w"], up["down2"]["b"]), up["conv3"])

    g = jnp.mean(x3, axis=(2, 3), keepdims=True)            # Global branch
    g = _conv1x1(g, up["global1"]["w"], up["global1"]["b"])
    g = jnp.where(g >= 0, g, 0.2 * g)
    g = _conv1x1(g, up["global2"]["w"], up["global2"]["b"])
    h, w = x3.shape[2], x3.shape[3]
    g = jnp.tile(g, (1, 1, h, w))

    x3 = block_fn(jnp.concatenate([g, x3], axis=1), up["context_g"])
    x3 = _bilinear_resize(x3, 2 * h, 2 * w, align_corners=False)

    m2 = _conv1x1(jnp.concatenate([x2, x3], axis=1),
                  up["merge2_0"]["w"], up["merge2_0"]["b"])
    m2 = _ca_layer(m2, up["merge2_ca"], chain_fn)
    x2 = block_fn(m2, up["context2"], pre=up["merge2_2"])   # fused merge2[2]+block
    x2 = _bilinear_resize(x2, 4 * h, 4 * w, align_corners=False)

    m1 = _conv1x1(jnp.concatenate([x1, x2], axis=1),
                  up["merge1_0"]["w"], up["merge1_0"]["b"])
    m1 = _ca_layer(m1, up["merge1_ca"], chain_fn)
    x1 = block_fn(m1, up["context1"], pre=up["merge1_2"])   # fused merge1[2]+block
    del x1
    # conv_last / L_prior is dead code in IlluminationBlock.forward -> skipped.
    return x3


def _illumination_forward(low, illu, noise, refl, alpha, mu, params,
                          chain_fn, block_fn, lhat_fn):
    del mu                       # accepted but unused by the original forward
    l_feat = _unet_forward(illu, params["unet"], chain_fn, block_fn)
    l_hat, illu_mean = lhat_fn(low, illu, noise, refl, alpha)
    feat = _bilinear_resize(l_feat, illu.shape[2], illu.shape[3],
                            align_corners=True)
    ma = params["mod_add"]
    m = chain_fn(feat, [dict(w=ma["a0"]["w"], b=ma["a0"]["b"], act="relu"),
                        dict(w=ma["a1"]["w"], b=ma["a1"]["b"], act="relu"),
                        dict(w=ma["a2"]["w"], b=ma["a2"]["b"], act="sigmoid")])
    return illu_mean + m, l_hat


@jax.jit
def illumination_block_pallas(low, illu, noise, refl, alpha, mu, params):
    return _illumination_forward(low, illu, noise, refl, alpha, mu, params,
                                 _conv3x3_chain_pallas, _unet_block_pallas,
                                 _lhat_pallas)


@jax.jit
def illumination_block_ref(low, illu, noise, refl, alpha, mu, params):
    return _illumination_forward(low, illu, noise, refl, alpha, mu, params,
                                 _chain_ref, _block_ref, _lhat_ref)


# ----------------------------------------------------------------------------
# parameter construction (deterministic random init)
# ----------------------------------------------------------------------------
def _init_conv(key, cout, cin, k, bias=True):
    kw, kb = jax.random.split(key)
    return {"w": 0.1 * jax.random.normal(kw, (cout, cin, k, k), jnp.float32),
            "b": (0.1 * jax.random.normal(kb, (cout,), jnp.float32)
                  if bias else None)}


def init_params(key, channels=6, mid_channels=8, illu_channel=1,
                unet_in_channels=1):
    keys = iter(jax.random.split(key, 64))

    def conv(cout, cin, k, bias=True):
        return _init_conv(next(keys), cout, cin, k, bias)

    def block(cout, cin):
        return {"identity": conv(cout, cin, 1),
                "conv1": conv(cout, cin, 3),
                "conv2": conv(cout, cout, 3)}

    c = channels
    unet = {
        "convpre": conv(c, unet_in_channels, 3),
        "conv1": block(c, c),
        "down1": conv(2 * c, c, 2),
        "conv2": block(2 * c, 2 * c),
        "down2": conv(4 * c, 2 * c, 2),
        "conv3": block(4 * c, 4 * c),
        "global1": conv(4 * c, 4 * c, 1),
        "global2": conv(4 * c, 4 * c, 1),
        "context_g": block(4 * c, 8 * c),
        "context2": block(2 * c, 2 * c),
        "context1": block(c, c),
        "merge2_0": conv(4 * c, 6 * c, 1),
        "merge2_ca": {"p0": conv(4 * c, 4 * c, 3), "p1": conv(4 * c, 4 * c, 3),
                      "d0": conv(c, 4 * c, 1), "d1": conv(4 * c, c, 1)},
        "merge2_2": conv(2 * c, 4 * c, 3),
        "merge1_0": conv(c, 3 * c, 1),
        "merge1_ca": {"p0": conv(c, c, 3), "p1": conv(c, c, 3),
                      "d0": conv(c // 2, c, 1), "d1": conv(c, c // 2, 1)},
        "merge1_2": conv(c, c, 3),
        "conv_last": conv(1, c, 3),      # kept for completeness (unused)
    }
    mod_add = {"a0": conv(mid_channels, 4 * c, 3, bias=False),
               "a1": conv(mid_channels, mid_channels, 3, bias=False),
               "a2": conv(illu_channel, mid_channels, 3, bias=False)}
    return {"unet": unet, "mod_add": mod_add}


# ----------------------------------------------------------------------------
if __name__ == "__main__":
    root = jax.random.PRNGKey(0)
    k_par, k_lo, k_il, k_no, k_re = jax.random.split(root, 5)

    B, H, W = 2, 16, 16
    low_light = jax.random.uniform(k_lo, (B, 3, H, W), jnp.float32)
    illu = jax.random.uniform(k_il, (B, 1, H, W), jnp.float32,
                              minval=0.1, maxval=1.0)
    noise = 0.1 * jax.random.normal(k_no, (B, 3, H, W), jnp.float32)
    refl = jax.random.uniform(k_re, (B, 3, H, W), jnp.float32)
    alpha = jnp.float32(0.8)
    mu = jnp.float32(0.5)

    params = init_params(k_par)

    out_illu, out_lhat = jax.block_until_ready(
        illumination_block_pallas(low_light, illu, noise, refl, alpha, mu,
                                  params))
    ref_illu, ref_lhat = jax.block_until_ready(
        illumination_block_ref(low_light, illu, noise, refl, alpha, mu,
                               params))

    assert out_illu.shape == (B, 1, H, W)
    assert out_lhat.shape == (B, 3, H, W)
    err_i = float(jnp.max(jnp.abs(out_illu - ref_illu)))
    err_l = float(jnp.max(jnp.abs(out_lhat - ref_lhat)))
    assert err_i < 5e-3 and err_l < 1e-3, (err_i, err_l)
    print("KERNEL_OK")
</pallas_src>

<mosaic_0001>
module attributes {stable_mosaic.version = 11 : i64} {
  func.func @kernel(%arg0: i32, %arg1: memref<1x8x438xf32, #tpu.memory_space<vmem>>, %arg2: memref<1x384xf32, #tpu.memory_space<vmem>>, %arg3: memref<8x72xf32, #tpu.memory_space<vmem>>, %arg4: memref<8x1xf32, #tpu.memory_space<vmem>>, %arg5: memref<8x72xf32, #tpu.memory_space<vmem>>, %arg6: memref<8x1xf32, #tpu.memory_space<vmem>>, %arg7: memref<8x72xf32, #tpu.memory_space<vmem>>, %arg8: memref<8x1xf32, #tpu.memory_space<vmem>>, %arg9: memref<8x8xf32, #tpu.memory_space<vmem>>, %arg10: memref<8x1xf32, #tpu.memory_space<vmem>>, %arg11: memref<1x8x384xf32, #tpu.memory_space<vmem>>, %arg12: memref<8x438xf32, #tpu.memory_space<vmem>>) attributes {dimension_semantics = [#tpu.dimension_semantics<parallel>], iteration_bounds = array<i64: 2>, scalar_prefetch = 0 : i64, scratch_operands = 1 : i64, tpu.core_type = #tpu.core_type<tc>, window_params = [{transform_indices = @transform_0, window_bounds = array<i64: 1, 8, 438>}, {pipeline_mode = #tpu.pipeline_mode<synchronous>, transform_indices = @transform_1, window_bounds = array<i64: 1, 384>}, {pipeline_mode = #tpu.pipeline_mode<synchronous>, transform_indices = @transform_2, window_bounds = array<i64: 8, 72>}, {pipeline_mode = #tpu.pipeline_mode<synchronous>, transform_indices = @transform_3, window_bounds = array<i64: 8, 1>}, {pipeline_mode = #tpu.pipeline_mode<synchronous>, transform_indices = @transform_4, window_bounds = array<i64: 8, 72>}, {pipeline_mode = #tpu.pipeline_mode<synchronous>, transform_indices = @transform_5, window_bounds = array<i64: 8, 1>}, {pipeline_mode = #tpu.pipeline_mode<synchronous>, transform_indices = @transform_6, window_bounds = array<i64: 8, 72>}, {pipeline_mode = #tpu.pipeline_mode<synchronous>, transform_indices = @transform_7, window_bounds = array<i64: 8, 1>}, {pipeline_mode = #tpu.pipeline_mode<synchronous>, transform_indices = @transform_8, window_bounds = array<i64: 8, 8>}, {pipeline_mode = #tpu.pipeline_mode<synchronous>, transform_indices = @transform_9, window_bounds = array<i64: 8, 1>}, {transform_indices = @transform_10, window_bounds = array<i64: 1, 8, 384>}]} {
    %cst = arith.constant 0.000000e+00 : f32
    %0 = vector.broadcast %cst : f32 to vector<8x36xf32>
    %c0 = arith.constant 0 : index
    %c0_0 = arith.constant 0 : index
    %1 = vector.load %arg12[%c0, %c0_0] : memref<8x438xf32, #tpu.memory_space<vmem>>, vector<8x36xf32>
    tpu.vector_store %arg12[%c0, %c0_0], %0 {strides = array<i32>} : memref<8x438xf32, #tpu.memory_space<vmem>>, vector<8x36xf32>,
    %c0_1 = arith.constant 0 : index
    %c402 = arith.constant 402 : index
    %2 = vector.load %arg12[%c0_1, %c402] : memref<8x438xf32, #tpu.memory_space<vmem>>, vector<8x36xf32>
    tpu.vector_store %arg12[%c0_1, %c402], %0 {strides = array<i32>} : memref<8x438xf32, #tpu.memory_space<vmem>>, vector<8x36xf32>,
    %c0_2 = arith.constant 0 : index
    %c0_3 = arith.constant 0 : index
    %3 = vector.load %arg2[%c0_2, %c0_3] : memref<1x384xf32, #tpu.memory_space<vmem>>, vector<1x384xf32>
    %c0_4 = arith.constant 0 : index
    %c0_5 = arith.constant 0 : index
    %4 = vector.load %arg3[%c0_4, %c0_5] : memref<8x72xf32, #tpu.memory_space<vmem>>, vector<8x72xf32>
    %c0_6 = arith.constant 0 : index
    %c0_7 = arith.constant 0 : index
    %5 = vector.load %arg4[%c0_6, %c0_7] : memref<8x1xf32, #tpu.memory_space<vmem>>, vector<8x1xf32>
    %c0_8 = arith.constant 0 : index
    %c0_9 = arith.constant 0 : index
    %c0_10 = arith.constant 0 : index
    %6 = vector.load %arg1[%c0_8, %c0_9, %c0_10] : memref<1x8x438xf32, #tpu.memory_space<vmem>>, vector<1x8x384xf32>
    %7 = vector.shape_cast %6 : vector<1x8x384xf32> to vector<8x384xf32>
    %c0_11 = arith.constant 0 : index
    %c0_12 = arith.constant 0 : index
    %c1 = arith.constant 1 : index
    %8 = vector.load %arg1[%c0_11, %c0_12, %c1] : memref<1x8x438xf32, #tpu.memory_space<vmem>>, vector<1x8x384xf32>
    %9 = vector.shape_cast %8 : vector<1x8x384xf32> to vector<8x384xf32>
    %c0_13 = arith.constant 0 : index
    %c0_14 = arith.constant 0 : index
    %c2 = arith.constant 2 : index
    %10 = vector.load %arg1[%c0_13, %c0_14, %c2] : memref<1x8x438xf32, #tpu.memory_space<vmem>>, vector<1x8x384xf32>
    %11 = vector.shape_cast %10 : vector<1x8x384xf32> to vector<8x384xf32>
    %c0_15 = arith.constant 0 : index
    %c0_16 = arith.constant 0 : index
    %c18 = arith.constant 18 : index
    %12 = vector.load %arg1[%c0_15, %c0_16, %c18] : memref<1x8x438xf32, #tpu.memory_space<vmem>>, vector<1x8x384xf32>
    %13 = vector.shape_cast %12 : vector<1x8x384xf32> to vector<8x384xf32>
    %c0_17 = arith.constant 0 : index
    %c0_18 = arith.constant 0 : index
    %c19 = arith.constant 19 : index
    %14 = vector.load %arg1[%c0_17, %c0_18, %c19] : memref<1x8x438xf32, #tpu.memory_space<vmem>>, vector<1x8x384xf32>
    %15 = vector.shape_cast %14 : vector<1x8x384xf32> to vector<8x384xf32>
    %c0_19 = arith.constant 0 : index
    %c0_20 = arith.constant 0 : index
    %c20 = arith.constant 20 : index
    %16 = vector.load %arg1[%c0_19, %c0_20, %c20] : memref<1x8x438xf32, #tpu.memory_space<vmem>>, vector<1x8x384xf32>
    %17 = vector.shape_cast %16 : vector<1x8x384xf32> to vector<8x384xf32>
    %c0_21 = arith.constant 0 : index
    %c0_22 = arith.constant 0 : index
    %c36 = arith.constant 36 : index
    %18 = vector.load %arg1[%c0_21, %c0_22, %c36] : memref<1x8x438xf32, #tpu.memory_space<vmem>>, vector<1x8x384xf32>
    %19 = vector.shape_cast %18 : vector<1x8x384xf32> to vector<8x384xf32>
    %c0_23 = arith.constant 0 : index
    %c0_24 = arith.constant 0 : index
    %c37 = arith.constant 37 : index
    %20 = vector.load %arg1[%c0_23, %c0_24, %c37] : memref<1x8x438xf32, #tpu.memory_space<vmem>>, vector<1x8x384xf32>
    %21 = vector.shape_cast %20 : vector<1x8x384xf32> to vector<8x384xf32>
    %c0_25 = arith.constant 0 : index
    %c0_26 = arith.constant 0 : index
    %c38 = arith.constant 38 : index
    %22 = vector.load %arg1[%c0_25, %c0_26, %c38] : memref<1x8x438xf32, #tpu.memory_space<vmem>>, vector<1x8x384xf32>
    %23 = vector.shape_cast %22 : vector<1x8x384xf32> to vector<8x384xf32>
    %24 = tpu.concatenate %7, %9, %11, %13, %15, %17, %19, %21, %23 in 0 : vector<8x384xf32>, vector<8x384xf32>, vector<8x384xf32>, vector<8x384xf32>, vector<8x384xf32>, vector<8x384xf32>, vector<8x384xf32>, vector<8x384xf32>, vector<8x384xf32> -> vector<72x384xf32>
    %cst_27 = arith.constant dense<0.000000e+00> : vector<8x384xf32>
    %25 = tpu.matmul %4, %24, %cst_27 {dimension_numbers = #tpu.dot_dimension_numbers<[1], [0], [0], [1], [0, 0, 1, 1], [], []>} : vector<8x72xf32>, vector<72x384xf32>, vector<8x384xf32> -> vector<8x384xf32>
    %26 = vector.broadcast %5 : vector<8x1xf32> to vector<8x384xf32>
    %27 = arith.addf %25, %26 : vector<8x384xf32>
    %28 = vector.broadcast %3 : vector<1x384xf32> to vector<8x384xf32>
    %29 = arith.mulf %27, %28 : vector<8x384xf32>
    %c0_28 = arith.constant 0 : index
    %c19_29 = arith.constant 19 : index
    %30 = vector.load %arg12[%c0_28, %c19_29] : memref<8x438xf32, #tpu.memory_space<vmem>>, vector<8x384xf32>
    tpu.vector_store %arg12[%c0_28, %c19_29], %29 {strides = array<i32>} : memref<8x438xf32, #tpu.memory_space<vmem>>, vector<8x384xf32>,
    %c0_30 = arith.constant 0 : index
    %c0_31 = arith.constant 0 : index
    %31 = vector.load %arg9[%c0_30, %c0_31] : memref<8x8xf32, #tpu.memory_space<vmem>>, vector<8x8xf32>
    %cst_32 = arith.constant dense<0.000000e+00> : vector<8x384xf32>
    %32 = tpu.matmul %31, %29, %cst_32 {dimension_numbers = #tpu.dot_dimension_numbers<[1], [0], [0], [1], [0, 0, 1, 1], [], []>} : vector<8x8xf32>, vector<8x384xf32>, vector<8x384xf32> -> vector<8x384xf32>
    %c0_33 = arith.constant 0 : index
    %c0_34 = arith.constant 0 : index
    %33 = vector.load %arg10[%c0_33, %c0_34] : memref<8x1xf32, #tpu.memory_space<vmem>>, vector<8x1xf32>
    %34 = vector.broadcast %33 : vector<8x1xf32> to vector<8x384xf32>
    %35 = arith.addf %32, %34 : vector<8x384xf32>
    %c0_35 = arith.constant 0 : index
    %c0_36 = arith.constant 0 : index
    %36 = vector.load %arg5[%c0_35, %c0_36] : memref<8x72xf32, #tpu.memory_space<vmem>>, vector<8x72xf32>
    %c0_37 = arith.constant 0 : index
    %c0_38 = arith.constant 0 : index
    %37 = vector.load %arg6[%c0_37, %c0_38] : memref<8x1xf32, #tpu.memory_space<vmem>>, vector<8x1xf32>
    %c0_39 = arith.constant 0 : index
    %c0_40 = arith.constant 0 : index
    %38 = vector.load %arg12[%c0_39, %c0_40] : memref<8x438xf32, #tpu.memory_space<vmem>>, vector<8x384xf32>
    %c0_41 = arith.constant 0 : index
    %c1_42 = arith.constant 1 : index
    %39 = vector.load %arg12[%c0_41, %c1_42] : memref<8x438xf32, #tpu.memory_space<vmem>>, vector<8x384xf32>
    %c0_43 = arith.constant 0 : index
    %c2_44 = arith.constant 2 : index
    %40 = vector.load %arg12[%c0_43, %c2_44] : memref<8x438xf32, #tpu.memory_space<vmem>>, vector<8x384xf32>
    %c0_45 = arith.constant 0 : index
    %c18_46 = arith.constant 18 : index
    %41 = vector.load %arg12[%c0_45, %c18_46] : memref<8x438xf32, #tpu.memory_space<vmem>>, vector<8x384xf32>
    %c0_47 = arith.constant 0 : index
    %c19_48 = arith.constant 19 : index
    %42 = vector.load %arg12[%c0_47, %c19_48] : memref<8x438xf32, #tpu.memory_space<vmem>>, vector<8x384xf32>
    %c0_49 = arith.constant 0 : index
    %c20_50 = arith.constant 20 : index
    %43 = vector.load %arg12[%c0_49, %c20_50] : memref<8x438xf32, #tpu.memory_space<vmem>>, vector<8x384xf32>
    %c0_51 = arith.constant 0 : index
    %c36_52 = arith.constant 36 : index
    %44 = vector.load %arg12[%c0_51, %c36_52] : memref<8x438xf32, #tpu.memory_space<vmem>>, vector<8x384xf32>
    %c0_53 = arith.constant 0 : index
    %c37_54 = arith.constant 37 : index
    %45 = vector.load %arg12[%c0_53, %c37_54] : memref<8x438xf32, #tpu.memory_space<vmem>>, vector<8x384xf32>
    %c0_55 = arith.constant 0 : index
    %c38_56 = arith.constant 38 : index
    %46 = vector.load %arg12[%c0_55, %c38_56] : memref<8x438xf32, #tpu.memory_space<vmem>>, vector<8x384xf32>
    %47 = tpu.concatenate %38, %39, %40, %41, %42, %43, %44, %45, %46 in 0 : vector<8x384xf32>, vector<8x384xf32>, vector<8x384xf32>, vector<8x384xf32>, vector<8x384xf32>, vector<8x384xf32>, vector<8x384xf32>, vector<8x384xf32>, vector<8x384xf32> -> vector<72x384xf32>
    %cst_57 = arith.constant dense<0.000000e+00> : vector<8x384xf32>
    %48 = tpu.matmul %36, %47, %cst_57 {dimension_numbers = #tpu.dot_dimension_numbers<[1], [0], [0], [1], [0, 0, 1, 1], [], []>} : vector<8x72xf32>, vector<72x384xf32>, vector<8x384xf32> -> vector<8x384xf32>
    %49 = vector.broadcast %37 : vector<8x1xf32> to vector<8x384xf32>
    %50 = arith.addf %48, %49 : vector<8x384xf32>
    %cst_58 = arith.constant 0.000000e+00 : f32
    %51 = vector.broadcast %cst_58 : f32 to vector<8x384xf32>
    %52 = arith.cmpf oge, %50, %51 : vector<8x384xf32>
    %cst_59 = arith.constant 1.000000e-01 : f32
    %53 = vector.broadcast %cst_59 : f32 to vector<8x384xf32>
    %54 = arith.mulf %53, %50 : vector<8x384xf32>
    %55 = arith.select %52, %50, %54 : vector<8x384xi1>, vector<8x384xf32>
    %56 = vector.broadcast %3 : vector<1x384xf32> to vector<8x384xf32>
    %57 = arith.mulf %55, %56 : vector<8x384xf32>
    %c0_60 = arith.constant 0 : index
    %c19_61 = arith.constant 19 : index
    %58 = vector.load %arg12[%c0_60, %c19_61] : memref<8x438xf32, #tpu.memory_space<vmem>>, vector<8x384xf32>
    tpu.vector_store %arg12[%c0_60, %c19_61], %57 {strides = array<i32>} : memref<8x438xf32, #tpu.memory_space<vmem>>, vector<8x384xf32>,
    %c0_62 = arith.constant 0 : index
    %c0_63 = arith.constant 0 : index
    %59 = vector.load %arg7[%c0_62, %c0_63] : memref<8x72xf32, #tpu.memory_space<vmem>>, vector<8x72xf32>
    %c0_64 = arith.constant 0 : index
    %c0_65 = arith.constant 0 : index
    %60 = vector.load %arg8[%c0_64, %c0_65] : memref<8x1xf32, #tpu.memory_space<vmem>>, vector<8x1xf32>
    %c0_66 = arith.constant 0 : index
    %c0_67 = arith.constant 0 : index
    %61 = vector.load %arg12[%c0_66, %c0_67] : memref<8x438xf32, #tpu.memory_space<vmem>>, vector<8x384xf32>
    %c0_68 = arith.constant 0 : index
    %c1_69 = arith.constant 1 : index
    %62 = vector.load %arg12[%c0_68, %c1_69] : memref<8x438xf32, #tpu.memory_space<vmem>>, vector<8x384xf32>
    %c0_70 = arith.constant 0 : index
    %c2_71 = arith.constant 2 : index
    %63 = vector.load %arg12[%c0_70, %c2_71] : memref<8x438xf32, #tpu.memory_space<vmem>>, vector<8x384xf32>
    %c0_72 = arith.constant 0 : index
    %c18_73 = arith.constant 18 : index
    %64 = vector.load %arg12[%c0_72, %c18_73] : memref<8x438xf32, #tpu.memory_space<vmem>>, vector<8x384xf32>
    %c0_74 = arith.constant 0 : index
    %c19_75 = arith.constant 19 : index
    %65 = vector.load %arg12[%c0_74, %c19_75] : memref<8x438xf32, #tpu.memory_space<vmem>>, vector<8x384xf32>
    %c0_76 = arith.constant 0 : index
    %c20_77 = arith.constant 20 : index
    %66 = vector.load %arg12[%c0_76, %c20_77] : memref<8x438xf32, #tpu.memory_space<vmem>>, vector<8x384xf32>
    %c0_78 = arith.constant 0 : index
    %c36_79 = arith.constant 36 : index
    %67 = vector.load %arg12[%c0_78, %c36_79] : memref<8x438xf32, #tpu.memory_space<vmem>>, vector<8x384xf32>
    %c0_80 = arith.constant 0 : index
    %c37_81 = arith.constant 37 : index
    %68 = vector.load %arg12[%c0_80, %c37_81] : memref<8x438xf32, #tpu.memory_space<vmem>>, vector<8x384xf32>
    %c0_82 = arith.constant 0 : index
    %c38_83 = arith.constant 38 : index
    %69 = vector.load %arg12[%c0_82, %c38_83] : memref<8x438xf32, #tpu.memory_space<vmem>>, vector<8x384xf32>
    %70 = tpu.concatenate %61, %62, %63, %64, %65, %66, %67, %68, %69 in 0 : vector<8x384xf32>, vector<8x384xf32>, vector<8x384xf32>, vector<8x384xf32>, vector<8x384xf32>, vector<8x384xf32>, vector<8x384xf32>, vector<8x384xf32>, vector<8x384xf32> -> vector<72x384xf32>
    %cst_84 = arith.constant dense<0.000000e+00> : vector<8x384xf32>
    %71 = tpu.matmul %59, %70, %cst_84 {dimension_numbers = #tpu.dot_dimension_numbers<[1], [0], [0], [1], [0, 0, 1, 1], [], []>} : vector<8x72xf32>, vector<72x384xf32>, vector<8x384xf32> -> vector<8x384xf32>
    %72 = vector.broadcast %60 : vector<8x1xf32> to vector<8x384xf32>
    %73 = arith.addf %71, %72 : vector<8x384xf32>
    %cst_85 = arith.constant 0.000000e+00 : f32
    %74 = vector.broadcast %cst_85 : f32 to vector<8x384xf32>
    %75 = arith.cmpf oge, %73, %74 : vector<8x384xf32>
    %cst_86 = arith.constant 1.000000e-01 : f32
    %76 = vector.broadcast %cst_86 : f32 to vector<8x384xf32>
    %77 = arith.mulf %76, %73 : vector<8x384xf32>
    %78 = arith.select %75, %73, %77 : vector<8x384xi1>, vector<8x384xf32>
    %79 = arith.addf %78, %35 : vector<8x384xf32>
    %c0_87 = arith.constant 0 : index
    %c0_88 = arith.constant 0 : index
    %c0_89 = arith.constant 0 : index
    %80 = vector.load %arg11[%c0_87, %c0_88, %c0_89] : memref<1x8x384xf32, #tpu.memory_space<vmem>>, vector<1x8x384xf32>
    %81 = vector.shape_cast %80 : vector<1x8x384xf32> to vector<8x384xf32>
    %82 = vector.shape_cast %79 : vector<8x384xf32> to vector<1x8x384xf32>
    tpu.vector_store %arg11[%c0_87, %c0_88, %c0_89], %82 {strides = array<i32>} : memref<1x8x384xf32, #tpu.memory_space<vmem>>, vector<1x8x384xf32>,
    return
  }
  func.func @transform_0(%arg0: i32) -> (i32, i32, i32) {
    %c0_i32 = arith.constant 0 : i32
    %c0_i32_0 = arith.constant 0 : i32
    %c0_i32_1 = arith.constant 0 : i32
    return %arg0, %c0_i32, %c0_i32_0 : i32, i32, i32
  }
  func.func @transform_1(%arg0: i32) -> (i32, i32) {
    %c0_i32 = arith.constant 0 : i32
    %c0_i32_0 = arith.constant 0 : i32
    %c0_i32_1 = arith.constant 0 : i32
    return %c0_i32, %c0_i32_0 : i32, i32
  }
  func.func @transform_2(%arg0: i32) -> (i32, i32) {
    %c0_i32 = arith.constant 0 : i32
    %c0_i32_0 = arith.constant 0 : i32
    %c0_i32_1 = arith.constant 0 : i32
    return %c0_i32, %c0_i32_0 : i32, i32
  }
  func.func @transform_3(%arg0: i32) -> (i32, i32) {
    %c0_i32 = arith.constant 0 : i32
    %c0_i32_0 = arith.constant 0 : i32
    %c0_i32_1 = arith.constant 0 : i32
    return %c0_i32, %c0_i32_0 : i32, i32
  }
  func.func @transform_4(%arg0: i32) -> (i32, i32) {
    %c0_i32 = arith.constant 0 : i32
    %c0_i32_0 = arith.constant 0 : i32
    %c0_i32_1 = arith.constant 0 : i32
    return %c0_i32, %c0_i32_0 : i32, i32
  }
  func.func @transform_5(%arg0: i32) -> (i32, i32) {
    %c0_i32 = arith.constant 0 : i32
    %c0_i32_0 = arith.constant 0 : i32
    %c0_i32_1 = arith.constant 0 : i32
    return %c0_i32, %c0_i32_0 : i32, i32
  }
  func.func @transform_6(%arg0: i32) -> (i32, i32) {
    %c0_i32 = arith.constant 0 : i32
    %c0_i32_0 = arith.constant 0 : i32
    %c0_i32_1 = arith.constant 0 : i32
    return %c0_i32, %c0_i32_0 : i32, i32
  }
  func.func @transform_7(%arg0: i32) -> (i32, i32) {
    %c0_i32 = arith.constant 0 : i32
    %c0_i32_0 = arith.constant 0 : i32
    %c0_i32_1 = arith.constant 0 : i32
    return %c0_i32, %c0_i32_0 : i32, i32
  }
  func.func @transform_8(%arg0: i32) -> (i32, i32) {
    %c0_i32 = arith.constant 0 : i32
    %c0_i32_0 = arith.constant 0 : i32
    %c0_i32_1 = arith.constant 0 : i32
    return %c0_i32, %c0_i32_0 : i32, i32
  }
  func.func @transform_9(%arg0: i32) -> (i32, i32) {
    %c0_i32 = arith.constant 0 : i32
    %c0_i32_0 = arith.constant 0 : i32
    %c0_i32_1 = arith.constant 0 : i32
    return %c0_i32, %c0_i32_0 : i32, i32
  }
  func.func @transform_10(%arg0: i32) -> (i32, i32, i32) {
    %c0_i32 = arith.constant 0 : i32
    %c0_i32_0 = arith.constant 0 : i32
    %c0_i32_1 = arith.constant 0 : i32
    return %arg0, %c0_i32, %c0_i32_0 : i32, i32, i32
  }
}

module attributes {stable_mosaic.version = 11 : i64} {
  func.func @kernel(%arg0: i32, %arg1: memref<1x16x158xf32, #tpu.memory_space<vmem>>, %arg2: memref<1x128xf32, #tpu.memory_space<vmem>>, %arg3: memref<16x144xf32, #tpu.memory_space<vmem>>, %arg4: memref<16x1xf32, #tpu.memory_space<vmem>>, %arg5: memref<16x144xf32, #tpu.memory_space<vmem>>, %arg6: memref<16x1xf32, #tpu.memory_space<vmem>>, %arg7: memref<16x16xf32, #tpu.memory_space<vmem>>, %arg8: memref<16x1xf32, #tpu.memory_space<vmem>>, %arg9: memref<1x16x128xf32, #tpu.memory_space<vmem>>, %arg10: memref<16x158xf32, #tpu.memory_space<vmem>>) attributes {dimension_semantics = [#tpu.dimension_semantics<parallel>], iteration_bounds = array<i64: 2>, scalar_prefetch = 0 : i64, scratch_operands = 1 : i64, tpu.core_type = #tpu.core_type<tc>, window_params = [{transform_indices = @transform_0, window_bounds = array<i64: 1, 16, 158>}, {pipeline_mode = #tpu.pipeline_mode<synchronous>, transform_indices = @transform_1, window_bounds = array<i64: 1, 128>}, {pipeline_mode = #tpu.pipeline_mode<synchronous>, transform_indices = @transform_2, window_bounds = array<i64: 16, 144>}, {pipeline_mode = #tpu.pipeline_mode<synchronous>, transform_indices = @transform_3, window_bounds = array<i64: 16, 1>}, {pipeline_mode = #tpu.pipeline_mode<synchronous>, transform_indices = @transform_4, window_bounds = array<i64: 16, 144>}, {pipeline_mode = #tpu.pipeline_mode<synchronous>, transform_indices = @transform_5, window_bounds = array<i64: 16, 1>}, {pipeline_mode = #tpu.pipeline_mode<synchronous>, transform_indices = @transform_6, window_bounds = array<i64: 16, 16>}, {pipeline_mode = #tpu.pipeline_mode<synchronous>, transform_indices = @transform_7, window_bounds = array<i64: 16, 1>}, {transform_indices = @transform_8, window_bounds = array<i64: 1, 16, 128>}]} {
    %cst = arith.constant 0.000000e+00 : f32
    %0 = vector.broadcast %cst : f32 to vector<16x20xf32>
    %c0 = arith.constant 0 : index
    %c0_0 = arith.constant 0 : index
    %1 = vector.load %arg10[%c0, %c0_0] : memref<16x158xf32, #tpu.memory_space<vmem>>, vector<16x20xf32>
    tpu.vector_store %arg10[%c0, %c0_0], %0 {strides = array<i32>} : memref<16x158xf32, #tpu.memory_space<vmem>>, vector<16x20xf32>,
    %c0_1 = arith.constant 0 : index
    %c138 = arith.constant 138 : index
    %2 = vector.load %arg10[%c0_1, %c138] : memref<16x158xf32, #tpu.memory_space<vmem>>, vector<16x20xf32>
    tpu.vector_store %arg10[%c0_1, %c138], %0 {strides = array<i32>} : memref<16x158xf32, #tpu.memory_space<vmem>>, vector<16x20xf32>,
    %c0_2 = arith.constant 0 : index
    %c0_3 = arith.constant 0 : index
    %3 = vector.load %arg2[%c0_2, %c0_3] : memref<1x128xf32, #tpu.memory_space<vmem>>, vector<1x128xf32>
    %c0_4 = arith.constant 0 : index
    %c0_5 = arith.constant 0 : index
    %c11 = arith.constant 11 : index
    %4 = vector.load %arg1[%c0_4, %c0_5, %c11] : memref<1x16x158xf32, #tpu.memory_space<vmem>>, vector<1x16x128xf32>
    %5 = vector.shape_cast %4 : vector<1x16x128xf32> to vector<16x128xf32>
    %c0_6 = arith.constant 0 : index
    %c0_7 = arith.constant 0 : index
    %6 = vector.load %arg7[%c0_6, %c0_7] : memref<16x16xf32, #tpu.memory_space<vmem>>, vector<16x16xf32>
    %cst_8 = arith.constant dense<0.000000e+00> : vector<16x128xf32>
    %7 = tpu.matmul %6, %5, %cst_8 {dimension_numbers = #tpu.dot_dimension_numbers<[1], [0], [0], [1], [0, 0, 1, 1], [], []>} : vector<16x16xf32>, vector<16x128xf32>, vector<16x128xf32> -> vector<16x128xf32>
    %c0_9 = arith.constant 0 : index
    %c0_10 = arith.constant 0 : index
    %8 = vector.load %arg8[%c0_9, %c0_10] : memref<16x1xf32, #tpu.memory_space<vmem>>, vector<16x1xf32>
    %9 = vector.broadcast %8 : vector<16x1xf32> to vector<16x128xf32>
    %10 = arith.addf %7, %9 : vector<16x128xf32>
    %c0_11 = arith.constant 0 : index
    %c0_12 = arith.constant 0 : index
    %11 = vector.load %arg3[%c0_11, %c0_12] : memref<16x144xf32, #tpu.memory_space<vmem>>, vector<16x144xf32>
    %c0_13 = arith.constant 0 : index
    %c0_14 = arith.constant 0 : index
    %12 = vector.load %arg4[%c0_13, %c0_14] : memref<16x1xf32, #tpu.memory_space<vmem>>, vector<16x1xf32>
    %c0_15 = arith.constant 0 : index
    %c0_16 = arith.constant 0 : index
    %c0_17 = arith.constant 0 : index
    %13 = vector.load %arg1[%c0_15, %c0_16, %c0_17] : memref<1x16x158xf32, #tpu.memory_space<vmem>>, vector<1x16x128xf32>
    %14 = vector.shape_cast %13 : vector<1x16x128xf32> to vector<16x128xf32>
    %c0_18 = arith.constant 0 : index
    %c0_19 = arith.constant 0 : index
    %c1 = arith.constant 1 : index
    %15 = vector.load %arg1[%c0_18, %c0_19, %c1] : memref<1x16x158xf32, #tpu.memory_space<vmem>>, vector<1x16x128xf32>
    %16 = vector.shape_cast %15 : vector<1x16x128xf32> to vector<16x128xf32>
    %c0_20 = arith.constant 0 : index
    %c0_21 = arith.constant 0 : index
    %c2 = arith.constant 2 : index
    %17 = vector.load %arg1[%c0_20, %c0_21, %c2] : memref<1x16x158xf32, #tpu.memory_space<vmem>>, vector<1x16x128xf32>
    %18 = vector.shape_cast %17 : vector<1x16x128xf32> to vector<16x128xf32>
    %c0_22 = arith.constant 0 : index
    %c0_23 = arith.constant 0 : index
    %c10 = arith.constant 10 : index
    %19 = vector.load %arg1[%c0_22, %c0_23, %c10] : memref<1x16x158xf32, #tpu.memory_space<vmem>>, vector<1x16x128xf32>
    %20 = vector.shape_cast %19 : vector<1x16x128xf32> to vector<16x128xf32>
    %c0_24 = arith.constant 0 : index
    %c0_25 = arith.constant 0 : index
    %c11_26 = arith.constant 11 : index
    %21 = vector.load %arg1[%c0_24, %c0_25, %c11_26] : memref<1x16x158xf32, #tpu.memory_space<vmem>>, vector<1x16x128xf32>
    %22 = vector.shape_cast %21 : vector<1x16x128xf32> to vector<16x128xf32>
    %c0_27 = arith.constant 0 : index
    %c0_28 = arith.constant 0 : index
    %c12 = arith.constant 12 : index
    %23 = vector.load %arg1[%c0_27, %c0_28, %c12] : memref<1x16x158xf32, #tpu.memory_space<vmem>>, vector<1x16x128xf32>
    %24 = vector.shape_cast %23 : vector<1x16x128xf32> to vector<16x128xf32>
    %c0_29 = arith.constant 0 : index
    %c0_30 = arith.constant 0 : index
    %c20 = arith.constant 20 : index
    %25 = vector.load %arg1[%c0_29, %c0_30, %c20] : memref<1x16x158xf32, #tpu.memory_space<vmem>>, vector<1x16x128xf32>
    %26 = vector.shape_cast %25 : vector<1x16x128xf32> to vector<16x128xf32>
    %c0_31 = arith.constant 0 : index
    %c0_32 = arith.constant 0 : index
    %c21 = arith.constant 21 : index
    %27 = vector.load %arg1[%c0_31, %c0_32, %c21] : memref<1x16x158xf32, #tpu.memory_space<vmem>>, vector<1x16x128xf32>
    %28 = vector.shape_cast %27 : vector<1x16x128xf32> to vector<16x128xf32>
    %c0_33 = arith.constant 0 : index
    %c0_34 = arith.constant 0 : index
    %c22 = arith.constant 22 : index
    %29 = vector.load %arg1[%c0_33, %c0_34, %c22] : memref<1x16x158xf32, #tpu.memory_space<vmem>>, vector<1x16x128xf32>
    %30 = vector.shape_cast %29 : vector<1x16x128xf32> to vector<16x128xf32>
    %31 = tpu.concatenate %14, %16, %18, %20, %22, %24, %26, %28, %30 in 0 : vector<16x128xf32>, vector<16x128xf32>, vector<16x128xf32>, vector<16x128xf32>, vector<16x128xf32>, vector<16x128xf32>, vector<16x128xf32>, vector<16x128xf32>, vector<16x128xf32> -> vector<144x128xf32>
    %cst_35 = arith.constant dense<0.000000e+00> : vector<16x128xf32>
    %32 = tpu.matmul %11, %31, %cst_35 {dimension_numbers = #tpu.dot_dimension_numbers<[1], [0], [0], [1], [0, 0, 1, 1], [], []>} : vector<16x144xf32>, vector<144x128xf32>, vector<16x128xf32> -> vector<16x128xf32>
    %33 = vector.broadcast %12 : vector<16x1xf32> to vector<16x128xf32>
    %34 = arith.addf %32, %33 : vector<16x128xf32>
    %cst_36 = arith.constant 0.000000e+00 : f32
    %35 = vector.broadcast %cst_36 : f32 to vector<16x128xf32>
    %36 = arith.cmpf oge, %34, %35 : vector<16x128xf32>
    %cst_37 = arith.constant 1.000000e-01 : f32
    %37 = vector.broadcast %cst_37 : f32 to vector<16x128xf32>
    %38 = arith.mulf %37, %34 : vector<16x128xf32>
    %39 = arith.select %36, %34, %38 : vector<16x128xi1>, vector<16x128xf32>
    %40 = vector.broadcast %3 : vector<1x128xf32> to vector<16x128xf32>
    %41 = arith.mulf %39, %40 : vector<16x128xf32>
    %c0_38 = arith.constant 0 : index
    %c11_39 = arith.constant 11 : index
    %42 = vector.load %arg10[%c0_38, %c11_39] : memref<16x158xf32, #tpu.memory_space<vmem>>, vector<16x128xf32>
    tpu.vector_store %arg10[%c0_38, %c11_39], %41 {strides = array<i32>} : memref<16x158xf32, #tpu.memory_space<vmem>>, vector<16x128xf32>,
    %c0_40 = arith.constant 0 : index
    %c0_41 = arith.constant 0 : index
    %43 = vector.load %arg5[%c0_40, %c0_41] : memref<16x144xf32, #tpu.memory_space<vmem>>, vector<16x144xf32>
    %c0_42 = arith.constant 0 : index
    %c0_43 = arith.constant 0 : index
    %44 = vector.load %arg6[%c0_42, %c0_43] : memref<16x1xf32, #tpu.memory_space<vmem>>, vector<16x1xf32>
    %c0_44 = arith.constant 0 : index
    %c0_45 = arith.constant 0 : index
    %45 = vector.load %arg10[%c0_44, %c0_45] : memref<16x158xf32, #tpu.memory_space<vmem>>, vector<16x128xf32>
    %c0_46 = arith.constant 0 : index
    %c1_47 = arith.constant 1 : index
    %46 = vector.load %arg10[%c0_46, %c1_47] : memref<16x158xf32, #tpu.memory_space<vmem>>, vector<16x128xf32>
    %c0_48 = arith.constant 0 : index
    %c2_49 = arith.constant 2 : index
    %47 = vector.load %arg10[%c0_48, %c2_49] : memref<16x158xf32, #tpu.memory_space<vmem>>, vector<16x128xf32>
    %c0_50 = arith.constant 0 : index
    %c10_51 = arith.constant 10 : index
    %48 = vector.load %arg10[%c0_50, %c10_51] : memref<16x158xf32, #tpu.memory_space<vmem>>, vector<16x128xf32>
    %c0_52 = arith.constant 0 : index
    %c11_53 = arith.constant 11 : index
    %49 = vector.load %arg10[%c0_52, %c11_53] : memref<16x158xf32, #tpu.memory_space<vmem>>, vector<16x128xf32>
    %c0_54 = arith.constant 0 : index
    %c12_55 = arith.constant 12 : index
    %50 = vector.load %arg10[%c0_54, %c12_55] : memref<16x158xf32, #tpu.memory_space<vmem>>, vector<16x128xf32>
    %c0_56 = arith.constant 0 : index
    %c20_57 = arith.constant 20 : index
    %51 = vector.load %arg10[%c0_56, %c20_57] : memref<16x158xf32, #tpu.memory_space<vmem>>, vector<16x128xf32>
    %c0_58 = arith.constant 0 : index
    %c21_59 = arith.constant 21 : index
    %52 = vector.load %arg10[%c0_58, %c21_59] : memref<16x158xf32, #tpu.memory_space<vmem>>, vector<16x128xf32>
    %c0_60 = arith.constant 0 : index
    %c22_61 = arith.constant 22 : index
    %53 = vector.load %arg10[%c0_60, %c22_61] : memref<16x158xf32, #tpu.memory_space<vmem>>, vector<16x128xf32>
    %54 = tpu.concatenate %45, %46, %47, %48, %49, %50, %51, %52, %53 in 0 : vector<16x128xf32>, vector<16x128xf32>, vector<16x128xf32>, vector<16x128xf32>, vector<16x128xf32>, vector<16x128xf32>, vector<16x128xf32>, vector<16x128xf32>, vector<16x128xf32> -> vector<144x128xf32>
    %cst_62 = arith.constant dense<0.000000e+00> : vector<16x128xf32>
    %55 = tpu.matmul %43, %54, %cst_62 {dimension_numbers = #tpu.dot_dimension_numbers<[1], [0], [0], [1], [0, 0, 1, 1], [], []>} : vector<16x144xf32>, vector<144x128xf32>, vector<16x128xf32> -> vector<16x128xf32>
    %56 = vector.broadcast %44 : vector<16x1xf32> to vector<16x128xf32>
    %57 = arith.addf %55, %56 : vector<16x128xf32>
    %cst_63 = arith.constant 0.000000e+00 : f32
    %58 = vector.broadcast %cst_63 : f32 to vector<16x128xf32>
    %59 = arith.cmpf oge, %57, %58 : vector<16x128xf32>
    %cst_64 = arith.constant 1.000000e-01 : f32
    %60 = vector.broadcast %cst_64 : f32 to vector<16x128xf32>
    %61 = arith.mulf %60, %57 : vector<16x128xf32>
    %62 = arith.select %59, %57, %61 : vector<16x128xi1>, vector<16x128xf32>
    %63 = arith.addf %62, %10 : vector<16x128xf32>
    %c0_65 = arith.constant 0 : index
    %c0_66 = arith.constant 0 : index
    %c0_67 = arith.constant 0 : index
    %64 = vector.load %arg9[%c0_65, %c0_66, %c0_67] : memref<1x16x128xf32, #tpu.memory_space<vmem>>, vector<1x16x128xf32>
    %65 = vector.shape_cast %64 : vector<1x16x128xf32> to vector<16x128xf32>
    %66 = vector.shape_cast %63 : vector<16x128xf32> to vector<1x16x128xf32>
    tpu.vector_store %arg9[%c0_65, %c0_66, %c0_67], %66 {strides = array<i32>} : memref<1x16x128xf32, #tpu.memory_space<vmem>>, vector<1x16x128xf32>,
    return
  }
  func.func @transform_0(%arg0: i32) -> (i32, i32, i32) {
    %c0_i32 = arith.constant 0 : i32
    %c0_i32_0 = arith.constant 0 : i32
    %c0_i32_1 = arith.constant 0 : i32
    return %arg0, %c0_i32, %c0_i32_0 : i32, i32, i32
  }
  func.func @transform_1(%arg0: i32) -> (i32, i32) {
    %c0_i32 = arith.constant 0 : i32
    %c0_i32_0 = arith.constant 0 : i32
    %c0_i32_1 = arith.constant 0 : i32
    return %c0_i32, %c0_i32_0 : i32, i32
  }
  func.func @transform_2(%arg0: i32) -> (i32, i32) {
    %c0_i32 = arith.constant 0 : i32
    %c0_i32_0 = arith.constant 0 : i32
    %c0_i32_1 = arith.constant 0 : i32
    return %c0_i32, %c0_i32_0 : i32, i32
  }
  func.func @transform_3(%arg0: i32) -> (i32, i32) {
    %c0_i32 = arith.constant 0 : i32
    %c0_i32_0 = arith.constant 0 : i32
    %c0_i32_1 = arith.constant 0 : i32
    return %c0_i32, %c0_i32_0 : i32, i32
  }
  func.func @transform_4(%arg0: i32) -> (i32, i32) {
    %c0_i32 = arith.constant 0 : i32
    %c0_i32_0 = arith.constant 0 : i32
    %c0_i32_1 = arith.constant 0 : i32
    return %c0_i32, %c0_i32_0 : i32, i32
  }
  func.func @transform_5(%arg0: i32) -> (i32, i32) {
    %c0_i32 = arith.constant 0 : i32
    %c0_i32_0 = arith.constant 0 : i32
    %c0_i32_1 = arith.constant 0 : i32
    return %c0_i32, %c0_i32_0 : i32, i32
  }
  func.func @transform_6(%arg0: i32) -> (i32, i32) {
    %c0_i32 = arith.constant 0 : i32
    %c0_i32_0 = arith.constant 0 : i32
    %c0_i32_1 = arith.constant 0 : i32
    return %c0_i32, %c0_i32_0 : i32, i32
  }
  func.func @transform_7(%arg0: i32) -> (i32, i32) {
    %c0_i32 = arith.constant 0 : i32
    %c0_i32_0 = arith.constant 0 : i32
    %c0_i32_1 = arith.constant 0 : i32
    return %c0_i32, %c0_i32_0 : i32, i32
  }
  func.func @transform_8(%arg0: i32) -> (i32, i32, i32) {
    %c0_i32 = arith.constant 0 : i32
    %c0_i32_0 = arith.constant 0 : i32
    %c0_i32_1 = arith.constant 0 : i32
    return %arg0, %c0_i32, %c0_i32_0 : i32, i32, i32
  }
}

module attributes {stable_mosaic.version = 11 : i64} {
  func.func @kernel(%arg0: i32, %arg1: memref<1x24x146xf32, #tpu.memory_space<vmem>>, %arg2: memref<1x128xf32, #tpu.memory_space<vmem>>, %arg3: memref<24x216xf32, #tpu.memory_space<vmem>>, %arg4: memref<24x1xf32, #tpu.memory_space<vmem>>, %arg5: memref<24x216xf32, #tpu.memory_space<vmem>>, %arg6: memref<24x1xf32, #tpu.memory_space<vmem>>, %arg7: memref<24x24xf32, #tpu.memory_space<vmem>>, %arg8: memref<24x1xf32, #tpu.memory_space<vmem>>, %arg9: memref<1x24x128xf32, #tpu.memory_space<vmem>>, %arg10: memref<24x146xf32, #tpu.memory_space<vmem>>) attributes {dimension_semantics = [#tpu.dimension_semantics<parallel>], iteration_bounds = array<i64: 2>, scalar_prefetch = 0 : i64, scratch_operands = 1 : i64, tpu.core_type = #tpu.core_type<tc>, window_params = [{transform_indices = @transform_0, window_bounds = array<i64: 1, 24, 146>}, {pipeline_mode = #tpu.pipeline_mode<synchronous>, transform_indices = @transform_1, window_bounds = array<i64: 1, 128>}, {pipeline_mode = #tpu.pipeline_mode<synchronous>, transform_indices = @transform_2, window_bounds = array<i64: 24, 216>}, {pipeline_mode = #tpu.pipeline_mode<synchronous>, transform_indices = @transform_3, window_bounds = array<i64: 24, 1>}, {pipeline_mode = #tpu.pipeline_mode<synchronous>, transform_indices = @transform_4, window_bounds = array<i64: 24, 216>}, {pipeline_mode = #tpu.pipeline_mode<synchronous>, transform_indices = @transform_5, window_bounds = array<i64: 24, 1>}, {pipeline_mode = #tpu.pipeline_mode<synchronous>, transform_indices = @transform_6, window_bounds = array<i64: 24, 24>}, {pipeline_mode = #tpu.pipeline_mode<synchronous>, transform_indices = @transform_7, window_bounds = array<i64: 24, 1>}, {transform_indices = @transform_8, window_bounds = array<i64: 1, 24, 128>}]} {
    %cst = arith.constant 0.000000e+00 : f32
    %0 = vector.broadcast %cst : f32 to vector<24x12xf32>
    %c0 = arith.constant 0 : index
    %c0_0 = arith.constant 0 : index
    %1 = vector.load %arg10[%c0, %c0_0] : memref<24x146xf32, #tpu.memory_space<vmem>>, vector<24x12xf32>
    tpu.vector_store %arg10[%c0, %c0_0], %0 {strides = array<i32>} : memref<24x146xf32, #tpu.memory_space<vmem>>, vector<24x12xf32>,
    %c0_1 = arith.constant 0 : index
    %c134 = arith.constant 134 : index
    %2 = vector.load %arg10[%c0_1, %c134] : memref<24x146xf32, #tpu.memory_space<vmem>>, vector<24x12xf32>
    tpu.vector_store %arg10[%c0_1, %c134], %0 {strides = array<i32>} : memref<24x146xf32, #tpu.memory_space<vmem>>, vector<24x12xf32>,
    %c0_2 = arith.constant 0 : index
    %c0_3 = arith.constant 0 : index
    %3 = vector.load %arg2[%c0_2, %c0_3] : memref<1x128xf32, #tpu.memory_space<vmem>>, vector<1x128xf32>
    %c0_4 = arith.constant 0 : index
    %c0_5 = arith.constant 0 : index
    %c7 = arith.constant 7 : index
    %4 = vector.load %arg1[%c0_4, %c0_5, %c7] : memref<1x24x146xf32, #tpu.memory_space<vmem>>, vector<1x24x128xf32>
    %5 = vector.shape_cast %4 : vector<1x24x128xf32> to vector<24x128xf32>
    %c0_6 = arith.constant 0 : index
    %c0_7 = arith.constant 0 : index
    %6 = vector.load %arg7[%c0_6, %c0_7] : memref<24x24xf32, #tpu.memory_space<vmem>>, vector<24x24xf32>
    %cst_8 = arith.constant dense<0.000000e+00> : vector<24x128xf32>
    %7 = tpu.matmul %6, %5, %cst_8 {dimension_numbers = #tpu.dot_dimension_numbers<[1], [0], [0], [1], [0, 0, 1, 1], [], []>} : vector<24x24xf32>, vector<24x128xf32>, vector<24x128xf32> -> vector<24x128xf32>
    %c0_9 = arith.constant 0 : index
    %c0_10 = arith.constant 0 : index
    %8 = vector.load %arg8[%c0_9, %c0_10] : memref<24x1xf32, #tpu.memory_space<vmem>>, vector<24x1xf32>
    %9 = vector.broadcast %8 : vector<24x1xf32> to vector<24x128xf32>
    %10 = arith.addf %7, %9 : vector<24x128xf32>
    %c0_11 = arith.constant 0 : index
    %c0_12 = arith.constant 0 : index
    %11 = vector.load %arg3[%c0_11, %c0_12] : memref<24x216xf32, #tpu.memory_space<vmem>>, vector<24x216xf32>
    %c0_13 = arith.constant 0 : index
    %c0_14 = arith.constant 0 : index
    %12 = vector.load %arg4[%c0_13, %c0_14] : memref<24x1xf32, #tpu.memory_space<vmem>>, vector<24x1xf32>
    %c0_15 = arith.constant 0 : index
    %c0_16 = arith.constant 0 : index
    %c0_17 = arith.constant 0 : index
    %13 = vector.load %arg1[%c0_15, %c0_16, %c0_17] : memref<1x24x146xf32, #tpu.memory_space<vmem>>, vector<1x24x128xf32>
    %14 = vector.shape_cast %13 : vector<1x24x128xf32> to vector<24x128xf32>
    %c0_18 = arith.constant 0 : index
    %c0_19 = arith.constant 0 : index
    %c1 = arith.constant 1 : index
    %15 = vector.load %arg1[%c0_18, %c0_19, %c1] : memref<1x24x146xf32, #tpu.memory_space<vmem>>, vector<1x24x128xf32>
    %16 = vector.shape_cast %15 : vector<1x24x128xf32> to vector<24x128xf32>
    %c0_20 = arith.constant 0 : index
    %c0_21 = arith.constant 0 : index
    %c2 = arith.constant 2 : index
    %17 = vector.load %arg1[%c0_20, %c0_21, %c2] : memref<1x24x146xf32, #tpu.memory_space<vmem>>, vector<1x24x128xf32>
    %18 = vector.shape_cast %17 : vector<1x24x128xf32> to vector<24x128xf32>
    %c0_22 = arith.constant 0 : index
    %c0_23 = arith.constant 0 : index
    %c6 = arith.constant 6 : index
    %19 = vector.load %arg1[%c0_22, %c0_23, %c6] : memref<1x24x146xf32, #tpu.memory_space<vmem>>, vector<1x24x128xf32>
    %20 = vector.shape_cast %19 : vector<1x24x128xf32> to vector<24x128xf32>
    %c0_24 = arith.constant 0 : index
    %c0_25 = arith.constant 0 : index
    %c7_26 = arith.constant 7 : index
    %21 = vector.load %arg1[%c0_24, %c0_25, %c7_26] : memref<1x24x146xf32, #tpu.memory_space<vmem>>, vector<1x24x128xf32>
    %22 = vector.shape_cast %21 : vector<1x24x128xf32> to vector<24x128xf32>
    %c0_27 = arith.constant 0 : index
    %c0_28 = arith.constant 0 : index
    %c8 = arith.constant 8 : index
    %23 = vector.load %arg1[%c0_27, %c0_28, %c8] : memref<1x24x146xf32, #tpu.memory_space<vmem>>, vector<1x24x128xf32>
    %24 = vector.shape_cast %23 : vector<1x24x128xf32> to vector<24x128xf32>
    %c0_29 = arith.constant 0 : index
    %c0_30 = arith.constant 0 : index
    %c12 = arith.constant 12 : index
    %25 = vector.load %arg1[%c0_29, %c0_30, %c12] : memref<1x24x146xf32, #tpu.memory_space<vmem>>, vector<1x24x128xf32>
    %26 = vector.shape_cast %25 : vector<1x24x128xf32> to vector<24x128xf32>
    %c0_31 = arith.constant 0 : index
    %c0_32 = arith.constant 0 : index
    %c13 = arith.constant 13 : index
    %27 = vector.load %arg1[%c0_31, %c0_32, %c13] : memref<1x24x146xf32, #tpu.memory_space<vmem>>, vector<1x24x128xf32>
    %28 = vector.shape_cast %27 : vector<1x24x128xf32> to vector<24x128xf32>
    %c0_33 = arith.constant 0 : index
    %c0_34 = arith.constant 0 : index
    %c14 = arith.constant 14 : index
    %29 = vector.load %arg1[%c0_33, %c0_34, %c14] : memref<1x24x146xf32, #tpu.memory_space<vmem>>, vector<1x24x128xf32>
    %30 = vector.shape_cast %29 : vector<1x24x128xf32> to vector<24x128xf32>
    %31 = tpu.concatenate %14, %16, %18, %20, %22, %24, %26, %28, %30 in 0 : vector<24x128xf32>, vector<24x128xf32>, vector<24x128xf32>, vector<24x128xf32>, vector<24x128xf32>, vector<24x128xf32>, vector<24x128xf32>, vector<24x128xf32>, vector<24x128xf32> -> vector<216x128xf32>
    %cst_35 = arith.constant dense<0.000000e+00> : vector<24x128xf32>
    %32 = tpu.matmul %11, %31, %cst_35 {dimension_numbers = #tpu.dot_dimension_numbers<[1], [0], [0], [1], [0, 0, 1, 1], [], []>} : vector<24x216xf32>, vector<216x128xf32>, vector<24x128xf32> -> vector<24x128xf32>
    %33 = vector.broadcast %12 : vector<24x1xf32> to vector<24x128xf32>
    %34 = arith.addf %32, %33 : vector<24x128xf32>
    %cst_36 = arith.constant 0.000000e+00 : f32
    %35 = vector.broadcast %cst_36 : f32 to vector<24x128xf32>
    %36 = arith.cmpf oge, %34, %35 : vector<24x128xf32>
    %cst_37 = arith.constant 1.000000e-01 : f32
    %37 = vector.broadcast %cst_37 : f32 to vector<24x128xf32>
    %38 = arith.mulf %37, %34 : vector<24x128xf32>
    %39 = arith.select %36, %34, %38 : vector<24x128xi1>, vector<24x128xf32>
    %40 = vector.broadcast %3 : vector<1x128xf32> to vector<24x128xf32>
    %41 = arith.mulf %39, %40 : vector<24x128xf32>
    %c0_38 = arith.constant 0 : index
    %c7_39 = arith.constant 7 : index
    %42 = vector.load %arg10[%c0_38, %c7_39] : memref<24x146xf32, #tpu.memory_space<vmem>>, vector<24x128xf32>
    tpu.vector_store %arg10[%c0_38, %c7_39], %41 {strides = array<i32>} : memref<24x146xf32, #tpu.memory_space<vmem>>, vector<24x128xf32>,
    %c0_40 = arith.constant 0 : index
    %c0_41 = arith.constant 0 : index
    %43 = vector.load %arg5[%c0_40, %c0_41] : memref<24x216xf32, #tpu.memory_space<vmem>>, vector<24x216xf32>
    %c0_42 = arith.constant 0 : index
    %c0_43 = arith.constant 0 : index
    %44 = vector.load %arg6[%c0_42, %c0_43] : memref<24x1xf32, #tpu.memory_space<vmem>>, vector<24x1xf32>
    %c0_44 = arith.constant 0 : index
    %c0_45 = arith.constant 0 : index
    %45 = vector.load %arg10[%c0_44, %c0_45] : memref<24x146xf32, #tpu.memory_space<vmem>>, vector<24x128xf32>
    %c0_46 = arith.constant 0 : index
    %c1_47 = arith.constant 1 : index
    %46 = vector.load %arg10[%c0_46, %c1_47] : memref<24x146xf32, #tpu.memory_space<vmem>>, vector<24x128xf32>
    %c0_48 = arith.constant 0 : index
    %c2_49 = arith.constant 2 : index
    %47 = vector.load %arg10[%c0_48, %c2_49] : memref<24x146xf32, #tpu.memory_space<vmem>>, vector<24x128xf32>
    %c0_50 = arith.constant 0 : index
    %c6_51 = arith.constant 6 : index
    %48 = vector.load %arg10[%c0_50, %c6_51] : memref<24x146xf32, #tpu.memory_space<vmem>>, vector<24x128xf32>
    %c0_52 = arith.constant 0 : index
    %c7_53 = arith.constant 7 : index
    %49 = vector.load %arg10[%c0_52, %c7_53] : memref<24x146xf32, #tpu.memory_space<vmem>>, vector<24x128xf32>
    %c0_54 = arith.constant 0 : index
    %c8_55 = arith.constant 8 : index
    %50 = vector.load %arg10[%c0_54, %c8_55] : memref<24x146xf32, #tpu.memory_space<vmem>>, vector<24x128xf32>
    %c0_56 = arith.constant 0 : index
    %c12_57 = arith.constant 12 : index
    %51 = vector.load %arg10[%c0_56, %c12_57] : memref<24x146xf32, #tpu.memory_space<vmem>>, vector<24x128xf32>
    %c0_58 = arith.constant 0 : index
    %c13_59 = arith.constant 13 : index
    %52 = vector.load %arg10[%c0_58, %c13_59] : memref<24x146xf32, #tpu.memory_space<vmem>>, vector<24x128xf32>
    %c0_60 = arith.constant 0 : index
    %c14_61 = arith.constant 14 : index
    %53 = vector.load %arg10[%c0_60, %c14_61] : memref<24x146xf32, #tpu.memory_space<vmem>>, vector<24x128xf32>
    %54 = tpu.concatenate %45, %46, %47, %48, %49, %50, %51, %52, %53 in 0 : vector<24x128xf32>, vector<24x128xf32>, vector<24x128xf32>, vector<24x128xf32>, vector<24x128xf32>, vector<24x128xf32>, vector<24x128xf32>, vector<24x128xf32>, vector<24x128xf32> -> vector<216x128xf32>
    %cst_62 = arith.constant dense<0.000000e+00> : vector<24x128xf32>
    %55 = tpu.matmul %43, %54, %cst_62 {dimension_numbers = #tpu.dot_dimension_numbers<[1], [0], [0], [1], [0, 0, 1, 1], [], []>} : vector<24x216xf32>, vector<216x128xf32>, vector<24x128xf32> -> vector<24x128xf32>
    %56 = vector.broadcast %44 : vector<24x1xf32> to vector<24x128xf32>
    %57 = arith.addf %55, %56 : vector<24x128xf32>
    %cst_63 = arith.constant 0.000000e+00 : f32
    %58 = vector.broadcast %cst_63 : f32 to vector<24x128xf32>
    %59 = arith.cmpf oge, %57, %58 : vector<24x128xf32>
    %cst_64 = arith.constant 1.000000e-01 : f32
    %60 = vector.broadcast %cst_64 : f32 to vector<24x128xf32>
    %61 = arith.mulf %60, %57 : vector<24x128xf32>
    %62 = arith.select %59, %57, %61 : vector<24x128xi1>, vector<24x128xf32>
    %63 = arith.addf %62, %10 : vector<24x128xf32>
    %c0_65 = arith.constant 0 : index
    %c0_66 = arith.constant 0 : index
    %c0_67 = arith.constant 0 : index
    %64 = vector.load %arg9[%c0_65, %c0_66, %c0_67] : memref<1x24x128xf32, #tpu.memory_space<vmem>>, vector<1x24x128xf32>
    %65 = vector.shape_cast %64 : vector<1x24x128xf32> to vector<24x128xf32>
    %66 = vector.shape_cast %63 : vector<24x128xf32> to vector<1x24x128xf32>
    tpu.vector_store %arg9[%c0_65, %c0_66, %c0_67], %66 {strides = array<i32>} : memref<1x24x128xf32, #tpu.memory_space<vmem>>, vector<1x24x128xf32>,
    return
  }
  func.func @transform_0(%arg0: i32) -> (i32, i32, i32) {
    %c0_i32 = arith.constant 0 : i32
    %c0_i32_0 = arith.constant 0 : i32
    %c0_i32_1 = arith.constant 0 : i32
    return %arg0, %c0_i32, %c0_i32_0 : i32, i32, i32
  }
  func.func @transform_1(%arg0: i32) -> (i32, i32) {
    %c0_i32 = arith.constant 0 : i32
    %c0_i32_0 = arith.constant 0 : i32
    %c0_i32_1 = arith.constant 0 : i32
    return %c0_i32, %c0_i32_0 : i32, i32
  }
  func.func @transform_2(%arg0: i32) -> (i32, i32) {
    %c0_i32 = arith.constant 0 : i32
    %c0_i32_0 = arith.constant 0 : i32
    %c0_i32_1 = arith.constant 0 : i32
    return %c0_i32, %c0_i32_0 : i32, i32
  }
  func.func @transform_3(%arg0: i32) -> (i32, i32) {
    %c0_i32 = arith.constant 0 : i32
    %c0_i32_0 = arith.constant 0 : i32
    %c0_i32_1 = arith.constant 0 : i32
    return %c0_i32, %c0_i32_0 : i32, i32
  }
  func.func @transform_4(%arg0: i32) -> (i32, i32) {
    %c0_i32 = arith.constant 0 : i32
    %c0_i32_0 = arith.constant 0 : i32
    %c0_i32_1 = arith.constant 0 : i32
    return %c0_i32, %c0_i32_0 : i32, i32
  }
  func.func @transform_5(%arg0: i32) -> (i32, i32) {
    %c0_i32 = arith.constant 0 : i32
    %c0_i32_0 = arith.constant 0 : i32
    %c0_i32_1 = arith.constant 0 : i32
    return %c0_i32, %c0_i32_0 : i32, i32
  }
  func.func @transform_6(%arg0: i32) -> (i32, i32) {
    %c0_i32 = arith.constant 0 : i32
    %c0_i32_0 = arith.constant 0 : i32
    %c0_i32_1 = arith.constant 0 : i32
    return %c0_i32, %c0_i32_0 : i32, i32
  }
  func.func @transform_7(%arg0: i32) -> (i32, i32) {
    %c0_i32 = arith.constant 0 : i32
    %c0_i32_0 = arith.constant 0 : i32
    %c0_i32_1 = arith.constant 0 : i32
    return %c0_i32, %c0_i32_0 : i32, i32
  }
  func.func @transform_8(%arg0: i32) -> (i32, i32, i32) {
    %c0_i32 = arith.constant 0 : i32
    %c0_i32_0 = arith.constant 0 : i32
    %c0_i32_1 = arith.constant 0 : i32
    return %arg0, %c0_i32, %c0_i32_0 : i32, i32, i32
  }
}

module attributes {stable_mosaic.version = 11 : i64} {
  func.func @kernel(%arg0: i32, %arg1: memref<1x48x146xf32, #tpu.memory_space<vmem>>, %arg2: memref<1x128xf32, #tpu.memory_space<vmem>>, %arg3: memref<24x432xf32, #tpu.memory_space<vmem>>, %arg4: memref<24x1xf32, #tpu.memory_space<vmem>>, %arg5: memref<24x216xf32, #tpu.memory_space<vmem>>, %arg6: memref<24x1xf32, #tpu.memory_space<vmem>>, %arg7: memref<24x48xf32, #tpu.memory_space<vmem>>, %arg8: memref<24x1xf32, #tpu.memory_space<vmem>>, %arg9: memref<1x24x128xf32, #tpu.memory_space<vmem>>, %arg10: memref<48x146xf32, #tpu.memory_space<vmem>>) attributes {dimension_semantics = [#tpu.dimension_semantics<parallel>], iteration_bounds = array<i64: 2>, scalar_prefetch = 0 : i64, scratch_operands = 1 : i64, tpu.core_type = #tpu.core_type<tc>, window_params = [{transform_indices = @transform_0, window_bounds = array<i64: 1, 48, 146>}, {pipeline_mode = #tpu.pipeline_mode<synchronous>, transform_indices = @transform_1, window_bounds = array<i64: 1, 128>}, {pipeline_mode = #tpu.pipeline_mode<synchronous>, transform_indices = @transform_2, window_bounds = array<i64: 24, 432>}, {pipeline_mode = #tpu.pipeline_mode<synchronous>, transform_indices = @transform_3, window_bounds = array<i64: 24, 1>}, {pipeline_mode = #tpu.pipeline_mode<synchronous>, transform_indices = @transform_4, window_bounds = array<i64: 24, 216>}, {pipeline_mode = #tpu.pipeline_mode<synchronous>, transform_indices = @transform_5, window_bounds = array<i64: 24, 1>}, {pipeline_mode = #tpu.pipeline_mode<synchronous>, transform_indices = @transform_6, window_bounds = array<i64: 24, 48>}, {pipeline_mode = #tpu.pipeline_mode<synchronous>, transform_indices = @transform_7, window_bounds = array<i64: 24, 1>}, {transform_indices = @transform_8, window_bounds = array<i64: 1, 24, 128>}]} {
    %cst = arith.constant 0.000000e+00 : f32
    %0 = vector.broadcast %cst : f32 to vector<48x12xf32>
    %c0 = arith.constant 0 : index
    %c0_0 = arith.constant 0 : index
    %1 = vector.load %arg10[%c0, %c0_0] : memref<48x146xf32, #tpu.memory_space<vmem>>, vector<48x12xf32>
    tpu.vector_store %arg10[%c0, %c0_0], %0 {strides = array<i32>} : memref<48x146xf32, #tpu.memory_space<vmem>>, vector<48x12xf32>,
    %c0_1 = arith.constant 0 : index
    %c134 = arith.constant 134 : index
    %2 = vector.load %arg10[%c0_1, %c134] : memref<48x146xf32, #tpu.memory_space<vmem>>, vector<48x12xf32>
    tpu.vector_store %arg10[%c0_1, %c134], %0 {strides = array<i32>} : memref<48x146xf32, #tpu.memory_space<vmem>>, vector<48x12xf32>,
    %c0_2 = arith.constant 0 : index
    %c0_3 = arith.constant 0 : index
    %3 = vector.load %arg2[%c0_2, %c0_3] : memref<1x128xf32, #tpu.memory_space<vmem>>, vector<1x128xf32>
    %c0_4 = arith.constant 0 : index
    %c0_5 = arith.constant 0 : index
    %c7 = arith.constant 7 : index
    %4 = vector.load %arg1[%c0_4, %c0_5, %c7] : memref<1x48x146xf32, #tpu.memory_space<vmem>>, vector<1x48x128xf32>
    %5 = vector.shape_cast %4 : vector<1x48x128xf32> to vector<48x128xf32>
    %c0_6 = arith.constant 0 : index
    %c0_7 = arith.constant 0 : index
    %6 = vector.load %arg7[%c0_6, %c0_7] : memref<24x48xf32, #tpu.memory_space<vmem>>, vector<24x48xf32>
    %cst_8 = arith.constant dense<0.000000e+00> : vector<24x128xf32>
    %7 = tpu.matmul %6, %5, %cst_8 {dimension_numbers = #tpu.dot_dimension_numbers<[1], [0], [0], [1], [0, 0, 1, 1], [], []>} : vector<24x48xf32>, vector<48x128xf32>, vector<24x128xf32> -> vector<24x128xf32>
    %c0_9 = arith.constant 0 : index
    %c0_10 = arith.constant 0 : index
    %8 = vector.load %arg8[%c0_9, %c0_10] : memref<24x1xf32, #tpu.memory_space<vmem>>, vector<24x1xf32>
    %9 = vector.broadcast %8 : vector<24x1xf32> to vector<24x128xf32>
    %10 = arith.addf %7, %9 : vector<24x128xf32>
    %c0_11 = arith.constant 0 : index
    %c0_12 = arith.constant 0 : index
    %11 = vector.load %arg3[%c0_11, %c0_12] : memref<24x432xf32, #tpu.memory_space<vmem>>, vector<24x432xf32>
    %c0_13 = arith.constant 0 : index
    %c0_14 = arith.constant 0 : index
    %12 = vector.load %arg4[%c0_13, %c0_14] : memref<24x1xf32, #tpu.memory_space<vmem>>, vector<24x1xf32>
    %c0_15 = arith.constant 0 : index
    %c0_16 = arith.constant 0 : index
    %c0_17 = arith.constant 0 : index
    %13 = vector.load %arg1[%c0_15, %c0_16, %c0_17] : memref<1x48x146xf32, #tpu.memory_space<vmem>>, vector<1x48x128xf32>
    %14 = vector.shape_cast %13 : vector<1x48x128xf32> to vector<48x128xf32>
    %c0_18 = arith.constant 0 : index
    %c0_19 = arith.constant 0 : index
    %c1 = arith.constant 1 : index
    %15 = vector.load %arg1[%c0_18, %c0_19, %c1] : memref<1x48x146xf32, #tpu.memory_space<vmem>>, vector<1x48x128xf32>
    %16 = vector.shape_cast %15 : vector<1x48x128xf32> to vector<48x128xf32>
    %c0_20 = arith.constant 0 : index
    %c0_21 = arith.constant 0 : index
    %c2 = arith.constant 2 : index
    %17 = vector.load %arg1[%c0_20, %c0_21, %c2] : memref<1x48x146xf32, #tpu.memory_space<vmem>>, vector<1x48x128xf32>
    %18 = vector.shape_cast %17 : vector<1x48x128xf32> to vector<48x128xf32>
    %c0_22 = arith.constant 0 : index
    %c0_23 = arith.constant 0 : index
    %c6 = arith.constant 6 : index
    %19 = vector.load %arg1[%c0_22, %c0_23, %c6] : memref<1x48x146xf32, #tpu.memory_space<vmem>>, vector<1x48x128xf32>
    %20 = vector.shape_cast %19 : vector<1x48x128xf32> to vector<48x128xf32>
    %c0_24 = arith.constant 0 : index
    %c0_25 = arith.constant 0 : index
    %c7_26 = arith.constant 7 : index
    %21 = vector.load %arg1[%c0_24, %c0_25, %c7_26] : memref<1x48x146xf32, #tpu.memory_space<vmem>>, vector<1x48x128xf32>
    %22 = vector.shape_cast %21 : vector<1x48x128xf32> to vector<48x128xf32>
    %c0_27 = arith.constant 0 : index
    %c0_28 = arith.constant 0 : index
    %c8 = arith.constant 8 : index
    %23 = vector.load %arg1[%c0_27, %c0_28, %c8] : memref<1x48x146xf32, #tpu.memory_space<vmem>>, vector<1x48x128xf32>
    %24 = vector.shape_cast %23 : vector<1x48x128xf32> to vector<48x128xf32>
    %c0_29 = arith.constant 0 : index
    %c0_30 = arith.constant 0 : index
    %c12 = arith.constant 12 : index
    %25 = vector.load %arg1[%c0_29, %c0_30, %c12] : memref<1x48x146xf32, #tpu.memory_space<vmem>>, vector<1x48x128xf32>
    %26 = vector.shape_cast %25 : vector<1x48x128xf32> to vector<48x128xf32>
    %c0_31 = arith.constant 0 : index
    %c0_32 = arith.constant 0 : index
    %c13 = arith.constant 13 : index
    %27 = vector.load %arg1[%c0_31, %c0_32, %c13] : memref<1x48x146xf32, #tpu.memory_space<vmem>>, vector<1x48x128xf32>
    %28 = vector.shape_cast %27 : vector<1x48x128xf32> to vector<48x128xf32>
    %c0_33 = arith.constant 0 : index
    %c0_34 = arith.constant 0 : index
    %c14 = arith.constant 14 : index
    %29 = vector.load %arg1[%c0_33, %c0_34, %c14] : memref<1x48x146xf32, #tpu.memory_space<vmem>>, vector<1x48x128xf32>
    %30 = vector.shape_cast %29 : vector<1x48x128xf32> to vector<48x128xf32>
    %31 = tpu.concatenate %14, %16, %18, %20, %22, %24, %26, %28, %30 in 0 : vector<48x128xf32>, vector<48x128xf32>, vector<48x128xf32>, vector<48x128xf32>, vector<48x128xf32>, vector<48x128xf32>, vector<48x128xf32>, vector<48x128xf32>, vector<48x128xf32> -> vector<432x128xf32>
    %cst_35 = arith.constant dense<0.000000e+00> : vector<24x128xf32>
    %32 = tpu.matmul %11, %31, %cst_35 {dimension_numbers = #tpu.dot_dimension_numbers<[1], [0], [0], [1], [0, 0, 1, 1], [], []>} : vector<24x432xf32>, vector<432x128xf32>, vector<24x128xf32> -> vector<24x128xf32>
    %33 = vector.broadcast %12 : vector<24x1xf32> to vector<24x128xf32>
    %34 = arith.addf %32, %33 : vector<24x128xf32>
    %cst_36 = arith.constant 0.000000e+00 : f32
    %35 = vector.broadcast %cst_36 : f32 to vector<24x128xf32>
    %36 = arith.cmpf oge, %34, %35 : vector<24x128xf32>
    %cst_37 = arith.constant 1.000000e-01 : f32
    %37 = vector.broadcast %cst_37 : f32 to vector<24x128xf32>
    %38 = arith.mulf %37, %34 : vector<24x128xf32>
    %39 = arith.select %36, %34, %38 : vector<24x128xi1>, vector<24x128xf32>
    %40 = vector.broadcast %3 : vector<1x128xf32> to vector<24x128xf32>
    %41 = arith.mulf %39, %40 : vector<24x128xf32>
    %c0_38 = arith.constant 0 : index
    %c7_39 = arith.constant 7 : index
    %42 = vector.load %arg10[%c0_38, %c7_39] : memref<48x146xf32, #tpu.memory_space<vmem>>, vector<24x128xf32>
    tpu.vector_store %arg10[%c0_38, %c7_39], %41 {strides = array<i32>} : memref<48x146xf32, #tpu.memory_space<vmem>>, vector<24x128xf32>,
    %c0_40 = arith.constant 0 : index
    %c0_41 = arith.constant 0 : index
    %43 = vector.load %arg5[%c0_40, %c0_41] : memref<24x216xf32, #tpu.memory_space<vmem>>, vector<24x216xf32>
    %c0_42 = arith.constant 0 : index
    %c0_43 = arith.constant 0 : index
    %44 = vector.load %arg6[%c0_42, %c0_43] : memref<24x1xf32, #tpu.memory_space<vmem>>, vector<24x1xf32>
    %c0_44 = arith.constant 0 : index
    %c0_45 = arith.constant 0 : index
    %45 = vector.load %arg10[%c0_44, %c0_45] : memref<48x146xf32, #tpu.memory_space<vmem>>, vector<24x128xf32>
    %c0_46 = arith.constant 0 : index
    %c1_47 = arith.constant 1 : index
    %46 = vector.load %arg10[%c0_46, %c1_47] : memref<48x146xf32, #tpu.memory_space<vmem>>, vector<24x128xf32>
    %c0_48 = arith.constant 0 : index
    %c2_49 = arith.constant 2 : index
    %47 = vector.load %arg10[%c0_48, %c2_49] : memref<48x146xf32, #tpu.memory_space<vmem>>, vector<24x128xf32>
    %c0_50 = arith.constant 0 : index
    %c6_51 = arith.constant 6 : index
    %48 = vector.load %arg10[%c0_50, %c6_51] : memref<48x146xf32, #tpu.memory_space<vmem>>, vector<24x128xf32>
    %c0_52 = arith.constant 0 : index
    %c7_53 = arith.constant 7 : index
    %49 = vector.load %arg10[%c0_52, %c7_53] : memref<48x146xf32, #tpu.memory_space<vmem>>, vector<24x128xf32>
    %c0_54 = arith.constant 0 : index
    %c8_55 = arith.constant 8 : index
    %50 = vector.load %arg10[%c0_54, %c8_55] : memref<48x146xf32, #tpu.memory_space<vmem>>, vector<24x128xf32>
    %c0_56 = arith.constant 0 : index
    %c12_57 = arith.constant 12 : index
    %51 = vector.load %arg10[%c0_56, %c12_57] : memref<48x146xf32, #tpu.memory_space<vmem>>, vector<24x128xf32>
    %c0_58 = arith.constant 0 : index
    %c13_59 = arith.constant 13 : index
    %52 = vector.load %arg10[%c0_58, %c13_59] : memref<48x146xf32, #tpu.memory_space<vmem>>, vector<24x128xf32>
    %c0_60 = arith.constant 0 : index
    %c14_61 = arith.constant 14 : index
    %53 = vector.load %arg10[%c0_60, %c14_61] : memref<48x146xf32, #tpu.memory_space<vmem>>, vector<24x128xf32>
    %54 = tpu.concatenate %45, %46, %47, %48, %49, %50, %51, %52, %53 in 0 : vector<24x128xf32>, vector<24x128xf32>, vector<24x128xf32>, vector<24x128xf32>, vector<24x128xf32>, vector<24x128xf32>, vector<24x128xf32>, vector<24x128xf32>, vector<24x128xf32> -> vector<216x128xf32>
    %cst_62 = arith.constant dense<0.000000e+00> : vector<24x128xf32>
    %55 = tpu.matmul %43, %54, %cst_62 {dimension_numbers = #tpu.dot_dimension_numbers<[1], [0], [0], [1], [0, 0, 1, 1], [], []>} : vector<24x216xf32>, vector<216x128xf32>, vector<24x128xf32> -> vector<24x128xf32>
    %56 = vector.broadcast %44 : vector<24x1xf32> to vector<24x128xf32>
    %57 = arith.addf %55, %56 : vector<24x128xf32>
    %cst_63 = arith.constant 0.000000e+00 : f32
    %58 = vector.broadcast %cst_63 : f32 to vector<24x128xf32>
    %59 = arith.cmpf oge, %57, %58 : vector<24x128xf32>
    %cst_64 = arith.constant 1.000000e-01 : f32
    %60 = vector.broadcast %cst_64 : f32 to vector<24x128xf32>
    %61 = arith.mulf %60, %57 : vector<24x128xf32>
    %62 = arith.select %59, %57, %61 : vector<24x128xi1>, vector<24x128xf32>
    %63 = arith.addf %62, %10 : vector<24x128xf32>
    %c0_65 = arith.constant 0 : index
    %c0_66 = arith.constant 0 : index
    %c0_67 = arith.constant 0 : index
    %64 = vector.load %arg9[%c0_65, %c0_66, %c0_67] : memref<1x24x128xf32, #tpu.memory_space<vmem>>, vector<1x24x128xf32>
    %65 = vector.shape_cast %64 : vector<1x24x128xf32> to vector<24x128xf32>
    %66 = vector.shape_cast %63 : vector<24x128xf32> to vector<1x24x128xf32>
    tpu.vector_store %arg9[%c0_65, %c0_66, %c0_67], %66 {strides = array<i32>} : memref<1x24x128xf32, #tpu.memory_space<vmem>>, vector<1x24x128xf32>,
    return
  }
  func.func @transform_0(%arg0: i32) -> (i32, i32, i32) {
    %c0_i32 = arith.constant 0 : i32
    %c0_i32_0 = arith.constant 0 : i32
    %c0_i32_1 = arith.constant 0 : i32
    return %arg0, %c0_i32, %c0_i32_0 : i32, i32, i32
  }
  func.func @transform_1(%arg0: i32) -> (i32, i32) {
    %c0_i32 = arith.constant 0 : i32
    %c0_i32_0 = arith.constant 0 : i32
    %c0_i32_1 = arith.constant 0 : i32
    return %c0_i32, %c0_i32_0 : i32, i32
  }
  func.func @transform_2(%arg0: i32) -> (i32, i32) {
    %c0_i32 = arith.constant 0 : i32
    %c0_i32_0 = arith.constant 0 : i32
    %c0_i32_1 = arith.constant 0 : i32
    return %c0_i32, %c0_i32_0 : i32, i32
  }
  func.func @transform_3(%arg0: i32) -> (i32, i32) {
    %c0_i32 = arith.constant 0 : i32
    %c0_i32_0 = arith.constant 0 : i32
    %c0_i32_1 = arith.constant 0 : i32
    return %c0_i32, %c0_i32_0 : i32, i32
  }
  func.func @transform_4(%arg0: i32) -> (i32, i32) {
    %c0_i32 = arith.constant 0 : i32
    %c0_i32_0 = arith.constant 0 : i32
    %c0_i32_1 = arith.constant 0 : i32
    return %c0_i32, %c0_i32_0 : i32, i32
  }
  func.func @transform_5(%arg0: i32) -> (i32, i32) {
    %c0_i32 = arith.constant 0 : i32
    %c0_i32_0 = arith.constant 0 : i32
    %c0_i32_1 = arith.constant 0 : i32
    return %c0_i32, %c0_i32_0 : i32, i32
  }
  func.func @transform_6(%arg0: i32) -> (i32, i32) {
    %c0_i32 = arith.constant 0 : i32
    %c0_i32_0 = arith.constant 0 : i32
    %c0_i32_1 = arith.constant 0 : i32
    return %c0_i32, %c0_i32_0 : i32, i32
  }
  func.func @transform_7(%arg0: i32) -> (i32, i32) {
    %c0_i32 = arith.constant 0 : i32
    %c0_i32_0 = arith.constant 0 : i32
    %c0_i32_1 = arith.constant 0 : i32
    return %c0_i32, %c0_i32_0 : i32, i32
  }
  func.func @transform_8(%arg0: i32) -> (i32, i32, i32) {
    %c0_i32 = arith.constant 0 : i32
    %c0_i32_0 = arith.constant 0 : i32
    %c0_i32_1 = arith.constant 0 : i32
    return %arg0, %c0_i32, %c0_i32_0 : i32, i32, i32
  }
}

module attributes {stable_mosaic.version = 11 : i64} {
  func.func @kernel(%arg0: i32, %arg1: memref<1x24x438xf32, #tpu.memory_space<vmem>>, %arg2: memref<1x384xf32, #tpu.memory_space<vmem>>, %arg3: memref<8x216xf32, #tpu.memory_space<vmem>>, %arg4: memref<8x1xf32, #tpu.memory_space<vmem>>, %arg5: memref<8x72xf32, #tpu.memory_space<vmem>>, %arg6: memref<8x1xf32, #tpu.memory_space<vmem>>, %arg7: memref<8x72xf32, #tpu.memory_space<vmem>>, %arg8: memref<8x1xf32, #tpu.memory_space<vmem>>, %arg9: memref<1x8x384xf32, #tpu.memory_space<vmem>>, %arg10: memref<8x438xf32, #tpu.memory_space<vmem>>) attributes {dimension_semantics = [#tpu.dimension_semantics<parallel>], iteration_bounds = array<i64: 2>, scalar_prefetch = 0 : i64, scratch_operands = 1 : i64, tpu.core_type = #tpu.core_type<tc>, window_params = [{transform_indices = @transform_0, window_bounds = array<i64: 1, 24, 438>}, {pipeline_mode = #tpu.pipeline_mode<synchronous>, transform_indices = @transform_1, window_bounds = array<i64: 1, 384>}, {pipeline_mode = #tpu.pipeline_mode<synchronous>, transform_indices = @transform_2, window_bounds = array<i64: 8, 216>}, {pipeline_mode = #tpu.pipeline_mode<synchronous>, transform_indices = @transform_3, window_bounds = array<i64: 8, 1>}, {pipeline_mode = #tpu.pipeline_mode<synchronous>, transform_indices = @transform_4, window_bounds = array<i64: 8, 72>}, {pipeline_mode = #tpu.pipeline_mode<synchronous>, transform_indices = @transform_5, window_bounds = array<i64: 8, 1>}, {pipeline_mode = #tpu.pipeline_mode<synchronous>, transform_indices = @transform_6, window_bounds = array<i64: 8, 72>}, {pipeline_mode = #tpu.pipeline_mode<synchronous>, transform_indices = @transform_7, window_bounds = array<i64: 8, 1>}, {transform_indices = @transform_8, window_bounds = array<i64: 1, 8, 384>}]} {
    %cst = arith.constant 0.000000e+00 : f32
    %0 = vector.broadcast %cst : f32 to vector<8x36xf32>
    %c0 = arith.constant 0 : index
    %c0_0 = arith.constant 0 : index
    %1 = vector.load %arg10[%c0, %c0_0] : memref<8x438xf32, #tpu.memory_space<vmem>>, vector<8x36xf32>
    tpu.vector_store %arg10[%c0, %c0_0], %0 {strides = array<i32>} : memref<8x438xf32, #tpu.memory_space<vmem>>, vector<8x36xf32>,
    %c0_1 = arith.constant 0 : index
    %c402 = arith.constant 402 : index
    %2 = vector.load %arg10[%c0_1, %c402] : memref<8x438xf32, #tpu.memory_space<vmem>>, vector<8x36xf32>
    tpu.vector_store %arg10[%c0_1, %c402], %0 {strides = array<i32>} : memref<8x438xf32, #tpu.memory_space<vmem>>, vector<8x36xf32>,
    %c0_2 = arith.constant 0 : index
    %c0_3 = arith.constant 0 : index
    %3 = vector.load %arg2[%c0_2, %c0_3] : memref<1x384xf32, #tpu.memory_space<vmem>>, vector<1x384xf32>
    %c0_4 = arith.constant 0 : index
    %c0_5 = arith.constant 0 : index
    %4 = vector.load %arg3[%c0_4, %c0_5] : memref<8x216xf32, #tpu.memory_space<vmem>>, vector<8x216xf32>
    %c0_6 = arith.constant 0 : index
    %c0_7 = arith.constant 0 : index
    %5 = vector.load %arg4[%c0_6, %c0_7] : memref<8x1xf32, #tpu.memory_space<vmem>>, vector<8x1xf32>
    %c0_8 = arith.constant 0 : index
    %c0_9 = arith.constant 0 : index
    %c0_10 = arith.constant 0 : index
    %6 = vector.load %arg1[%c0_8, %c0_9, %c0_10] : memref<1x24x438xf32, #tpu.memory_space<vmem>>, vector<1x24x384xf32>
    %7 = vector.shape_cast %6 : vector<1x24x384xf32> to vector<24x384xf32>
    %c0_11 = arith.constant 0 : index
    %c0_12 = arith.constant 0 : index
    %c1 = arith.constant 1 : index
    %8 = vector.load %arg1[%c0_11, %c0_12, %c1] : memref<1x24x438xf32, #tpu.memory_space<vmem>>, vector<1x24x384xf32>
    %9 = vector.shape_cast %8 : vector<1x24x384xf32> to vector<24x384xf32>
    %c0_13 = arith.constant 0 : index
    %c0_14 = arith.constant 0 : index
    %c2 = arith.constant 2 : index
    %10 = vector.load %arg1[%c0_13, %c0_14, %c2] : memref<1x24x438xf32, #tpu.memory_space<vmem>>, vector<1x24x384xf32>
    %11 = vector.shape_cast %10 : vector<1x24x384xf32> to vector<24x384xf32>
    %c0_15 = arith.constant 0 : index
    %c0_16 = arith.constant 0 : index
    %c18 = arith.constant 18 : index
    %12 = vector.load %arg1[%c0_15, %c0_16, %c18] : memref<1x24x438xf32, #tpu.memory_space<vmem>>, vector<1x24x384xf32>
    %13 = vector.shape_cast %12 : vector<1x24x384xf32> to vector<24x384xf32>
    %c0_17 = arith.constant 0 : index
    %c0_18 = arith.constant 0 : index
    %c19 = arith.constant 19 : index
    %14 = vector.load %arg1[%c0_17, %c0_18, %c19] : memref<1x24x438xf32, #tpu.memory_space<vmem>>, vector<1x24x384xf32>
    %15 = vector.shape_cast %14 : vector<1x24x384xf32> to vector<24x384xf32>
    %c0_19 = arith.constant 0 : index
    %c0_20 = arith.constant 0 : index
    %c20 = arith.constant 20 : index
    %16 = vector.load %arg1[%c0_19, %c0_20, %c20] : memref<1x24x438xf32, #tpu.memory_space<vmem>>, vector<1x24x384xf32>
    %17 = vector.shape_cast %16 : vector<1x24x384xf32> to vector<24x384xf32>
    %c0_21 = arith.constant 0 : index
    %c0_22 = arith.constant 0 : index
    %c36 = arith.constant 36 : index
    %18 = vector.load %arg1[%c0_21, %c0_22, %c36] : memref<1x24x438xf32, #tpu.memory_space<vmem>>, vector<1x24x384xf32>
    %19 = vector.shape_cast %18 : vector<1x24x384xf32> to vector<24x384xf32>
    %c0_23 = arith.constant 0 : index
    %c0_24 = arith.constant 0 : index
    %c37 = arith.constant 37 : index
    %20 = vector.load %arg1[%c0_23, %c0_24, %c37] : memref<1x24x438xf32, #tpu.memory_space<vmem>>, vector<1x24x384xf32>
    %21 = vector.shape_cast %20 : vector<1x24x384xf32> to vector<24x384xf32>
    %c0_25 = arith.constant 0 : index
    %c0_26 = arith.constant 0 : index
    %c38 = arith.constant 38 : index
    %22 = vector.load %arg1[%c0_25, %c0_26, %c38] : memref<1x24x438xf32, #tpu.memory_space<vmem>>, vector<1x24x384xf32>
    %23 = vector.shape_cast %22 : vector<1x24x384xf32> to vector<24x384xf32>
    %24 = tpu.concatenate %7, %9, %11, %13, %15, %17, %19, %21, %23 in 0 : vector<24x384xf32>, vector<24x384xf32>, vector<24x384xf32>, vector<24x384xf32>, vector<24x384xf32>, vector<24x384xf32>, vector<24x384xf32>, vector<24x384xf32>, vector<24x384xf32> -> vector<216x384xf32>
    %cst_27 = arith.constant dense<0.000000e+00> : vector<8x384xf32>
    %25 = tpu.matmul %4, %24, %cst_27 {dimension_numbers = #tpu.dot_dimension_numbers<[1], [0], [0], [1], [0, 0, 1, 1], [], []>} : vector<8x216xf32>, vector<216x384xf32>, vector<8x384xf32> -> vector<8x384xf32>
    %26 = vector.broadcast %5 : vector<8x1xf32> to vector<8x384xf32>
    %27 = arith.addf %25, %26 : vector<8x384xf32>
    %cst_28 = arith.constant 0.000000e+00 : f32
    %28 = vector.broadcast %cst_28 : f32 to vector<8x384xf32>
    %29 = arith.maximumf %27, %28 : vector<8x384xf32>
    %30 = vector.broadcast %3 : vector<1x384xf32> to vector<8x384xf32>
    %31 = arith.mulf %29, %30 : vector<8x384xf32>
    %c0_29 = arith.constant 0 : index
    %c19_30 = arith.constant 19 : index
    %32 = vector.load %arg10[%c0_29, %c19_30] : memref<8x438xf32, #tpu.memory_space<vmem>>, vector<8x384xf32>
    tpu.vector_store %arg10[%c0_29, %c19_30], %31 {strides = array<i32>} : memref<8x438xf32, #tpu.memory_space<vmem>>, vector<8x384xf32>,
    %c0_31 = arith.constant 0 : index
    %c0_32 = arith.constant 0 : index
    %33 = vector.load %arg5[%c0_31, %c0_32] : memref<8x72xf32, #tpu.memory_space<vmem>>, vector<8x72xf32>
    %c0_33 = arith.constant 0 : index
    %c0_34 = arith.constant 0 : index
    %34 = vector.load %arg6[%c0_33, %c0_34] : memref<8x1xf32, #tpu.memory_space<vmem>>, vector<8x1xf32>
    %c0_35 = arith.constant 0 : index
    %c0_36 = arith.constant 0 : index
    %35 = vector.load %arg10[%c0_35, %c0_36] : memref<8x438xf32, #tpu.memory_space<vmem>>, vector<8x384xf32>
    %c0_37 = arith.constant 0 : index
    %c1_38 = arith.constant 1 : index
    %36 = vector.load %arg10[%c0_37, %c1_38] : memref<8x438xf32, #tpu.memory_space<vmem>>, vector<8x384xf32>
    %c0_39 = arith.constant 0 : index
    %c2_40 = arith.constant 2 : index
    %37 = vector.load %arg10[%c0_39, %c2_40] : memref<8x438xf32, #tpu.memory_space<vmem>>, vector<8x384xf32>
    %c0_41 = arith.constant 0 : index
    %c18_42 = arith.constant 18 : index
    %38 = vector.load %arg10[%c0_41, %c18_42] : memref<8x438xf32, #tpu.memory_space<vmem>>, vector<8x384xf32>
    %c0_43 = arith.constant 0 : index
    %c19_44 = arith.constant 19 : index
    %39 = vector.load %arg10[%c0_43, %c19_44] : memref<8x438xf32, #tpu.memory_space<vmem>>, vector<8x384xf32>
    %c0_45 = arith.constant 0 : index
    %c20_46 = arith.constant 20 : index
    %40 = vector.load %arg10[%c0_45, %c20_46] : memref<8x438xf32, #tpu.memory_space<vmem>>, vector<8x384xf32>
    %c0_47 = arith.constant 0 : index
    %c36_48 = arith.constant 36 : index
    %41 = vector.load %arg10[%c0_47, %c36_48] : memref<8x438xf32, #tpu.memory_space<vmem>>, vector<8x384xf32>
    %c0_49 = arith.constant 0 : index
    %c37_50 = arith.constant 37 : index
    %42 = vector.load %arg10[%c0_49, %c37_50] : memref<8x438xf32, #tpu.memory_space<vmem>>, vector<8x384xf32>
    %c0_51 = arith.constant 0 : index
    %c38_52 = arith.constant 38 : index
    %43 = vector.load %arg10[%c0_51, %c38_52] : memref<8x438xf32, #tpu.memory_space<vmem>>, vector<8x384xf32>
    %44 = tpu.concatenate %35, %36, %37, %38, %39, %40, %41, %42, %43 in 0 : vector<8x384xf32>, vector<8x384xf32>, vector<8x384xf32>, vector<8x384xf32>, vector<8x384xf32>, vector<8x384xf32>, vector<8x384xf32>, vector<8x384xf32>, vector<8x384xf32> -> vector<72x384xf32>
    %cst_53 = arith.constant dense<0.000000e+00> : vector<8x384xf32>
    %45 = tpu.matmul %33, %44, %cst_53 {dimension_numbers = #tpu.dot_dimension_numbers<[1], [0], [0], [1], [0, 0, 1, 1], [], []>} : vector<8x72xf32>, vector<72x384xf32>, vector<8x384xf32> -> vector<8x384xf32>
    %46 = vector.broadcast %34 : vector<8x1xf32> to vector<8x384xf32>
    %47 = arith.addf %45, %46 : vector<8x384xf32>
    %cst_54 = arith.constant 0.000000e+00 : f32
    %48 = vector.broadcast %cst_54 : f32 to vector<8x384xf32>
    %49 = arith.maximumf %47, %48 : vector<8x384xf32>
    %50 = vector.broadcast %3 : vector<1x384xf32> to vector<8x384xf32>
    %51 = arith.mulf %49, %50 : vector<8x384xf32>
    %c0_55 = arith.constant 0 : index
    %c19_56 = arith.constant 19 : index
    %52 = vector.load %arg10[%c0_55, %c19_56] : memref<8x438xf32, #tpu.memory_space<vmem>>, vector<8x384xf32>
    tpu.vector_store %arg10[%c0_55, %c19_56], %51 {strides = array<i32>} : memref<8x438xf32, #tpu.memory_space<vmem>>, vector<8x384xf32>,
    %c0_57 = arith.constant 0 : index
    %c0_58 = arith.constant 0 : index
    %53 = vector.load %arg7[%c0_57, %c0_58] : memref<8x72xf32, #tpu.memory_space<vmem>>, vector<8x72xf32>
    %c0_59 = arith.constant 0 : index
    %c0_60 = arith.constant 0 : index
    %54 = vector.load %arg8[%c0_59, %c0_60] : memref<8x1xf32, #tpu.memory_space<vmem>>, vector<8x1xf32>
    %c0_61 = arith.constant 0 : index
    %c0_62 = arith.constant 0 : index
    %55 = vector.load %arg10[%c0_61, %c0_62] : memref<8x438xf32, #tpu.memory_space<vmem>>, vector<8x384xf32>
    %c0_63 = arith.constant 0 : index
    %c1_64 = arith.constant 1 : index
    %56 = vector.load %arg10[%c0_63, %c1_64] : memref<8x438xf32, #tpu.memory_space<vmem>>, vector<8x384xf32>
    %c0_65 = arith.constant 0 : index
    %c2_66 = arith.constant 2 : index
    %57 = vector.load %arg10[%c0_65, %c2_66] : memref<8x438xf32, #tpu.memory_space<vmem>>, vector<8x384xf32>
    %c0_67 = arith.constant 0 : index
    %c18_68 = arith.constant 18 : index
    %58 = vector.load %arg10[%c0_67, %c18_68] : memref<8x438xf32, #tpu.memory_space<vmem>>, vector<8x384xf32>
    %c0_69 = arith.constant 0 : index
    %c19_70 = arith.constant 19 : index
    %59 = vector.load %arg10[%c0_69, %c19_70] : memref<8x438xf32, #tpu.memory_space<vmem>>, vector<8x384xf32>
    %c0_71 = arith.constant 0 : index
    %c20_72 = arith.constant 20 : index
    %60 = vector.load %arg10[%c0_71, %c20_72] : memref<8x438xf32, #tpu.memory_space<vmem>>, vector<8x384xf32>
    %c0_73 = arith.constant 0 : index
    %c36_74 = arith.constant 36 : index
    %61 = vector.load %arg10[%c0_73, %c36_74] : memref<8x438xf32, #tpu.memory_space<vmem>>, vector<8x384xf32>
    %c0_75 = arith.constant 0 : index
    %c37_76 = arith.constant 37 : index
    %62 = vector.load %arg10[%c0_75, %c37_76] : memref<8x438xf32, #tpu.memory_space<vmem>>, vector<8x384xf32>
    %c0_77 = arith.constant 0 : index
    %c38_78 = arith.constant 38 : index
    %63 = vector.load %arg10[%c0_77, %c38_78] : memref<8x438xf32, #tpu.memory_space<vmem>>, vector<8x384xf32>
    %64 = tpu.concatenate %55, %56, %57, %58, %59, %60, %61, %62, %63 in 0 : vector<8x384xf32>, vector<8x384xf32>, vector<8x384xf32>, vector<8x384xf32>, vector<8x384xf32>, vector<8x384xf32>, vector<8x384xf32>, vector<8x384xf32>, vector<8x384xf32> -> vector<72x384xf32>
    %cst_79 = arith.constant dense<0.000000e+00> : vector<8x384xf32>
    %65 = tpu.matmul %53, %64, %cst_79 {dimension_numbers = #tpu.dot_dimension_numbers<[1], [0], [0], [1], [0, 0, 1, 1], [], []>} : vector<8x72xf32>, vector<72x384xf32>, vector<8x384xf32> -> vector<8x384xf32>
    %66 = vector.broadcast %54 : vector<8x1xf32> to vector<8x384xf32>
    %67 = arith.addf %65, %66 : vector<8x384xf32>
    %cst_80 = arith.constant 0.000000e+00 : f32
    %68 = vector.broadcast %cst_80 : f32 to vector<8x384xf32>
    %69 = arith.subf %68, %67 : vector<8x384xf32>
    %70 = math.exp %69 : vector<8x384xf32>
    %cst_81 = arith.constant 1.000000e+00 : f32
    %71 = vector.broadcast %cst_81 : f32 to vector<8x384xf32>
    %72 = arith.addf %71, %70 : vector<8x384xf32>
    %cst_82 = arith.constant 1.000000e+00 : f32
    %73 = vector.broadcast %cst_82 : f32 to vector<8x384xf32>
    %74 = arith.divf %73, %72 : vector<8x384xf32>
    %c0_83 = arith.constant 0 : index
    %c0_84 = arith.constant 0 : index
    %c0_85 = arith.constant 0 : index
    %75 = vector.load %arg9[%c0_83, %c0_84, %c0_85] : memref<1x8x384xf32, #tpu.memory_space<vmem>>, vector<1x8x384xf32>
    %76 = vector.shape_cast %75 : vector<1x8x384xf32> to vector<8x384xf32>
    %77 = vector.shape_cast %74 : vector<8x384xf32> to vector<1x8x384xf32>
    tpu.vector_store %arg9[%c0_83, %c0_84, %c0_85], %77 {strides = array<i32>} : memref<1x8x384xf32, #tpu.memory_space<vmem>>, vector<1x8x384xf32>,
    return
  }
  func.func @transform_0(%arg0: i32) -> (i32, i32, i32) {
    %c0_i32 = arith.constant 0 : i32
    %c0_i32_0 = arith.constant 0 : i32
    %c0_i32_1 = arith.constant 0 : i32
    return %arg0, %c0_i32, %c0_i32_0 : i32, i32, i32
  }
  func.func @transform_1(%arg0: i32) -> (i32, i32) {
    %c0_i32 = arith.constant 0 : i32
    %c0_i32_0 = arith.constant 0 : i32
    %c0_i32_1 = arith.constant 0 : i32
    return %c0_i32, %c0_i32_0 : i32, i32
  }
  func.func @transform_2(%arg0: i32) -> (i32, i32) {
    %c0_i32 = arith.constant 0 : i32
    %c0_i32_0 = arith.constant 0 : i32
    %c0_i32_1 = arith.constant 0 : i32
    return %c0_i32, %c0_i32_0 : i32, i32
  }
  func.func @transform_3(%arg0: i32) -> (i32, i32) {
    %c0_i32 = arith.constant 0 : i32
    %c0_i32_0 = arith.constant 0 : i32
    %c0_i32_1 = arith.constant 0 : i32
    return %c0_i32, %c0_i32_0 : i32, i32
  }
  func.func @transform_4(%arg0: i32) -> (i32, i32) {
    %c0_i32 = arith.constant 0 : i32
    %c0_i32_0 = arith.constant 0 : i32
    %c0_i32_1 = arith.constant 0 : i32
    return %c0_i32, %c0_i32_0 : i32, i32
  }
  func.func @transform_5(%arg0: i32) -> (i32, i32) {
    %c0_i32 = arith.constant 0 : i32
    %c0_i32_0 = arith.constant 0 : i32
    %c0_i32_1 = arith.constant 0 : i32
    return %c0_i32, %c0_i32_0 : i32, i32
  }
  func.func @transform_6(%arg0: i32) -> (i32, i32) {
    %c0_i32 = arith.constant 0 : i32
    %c0_i32_0 = arith.constant 0 : i32
    %c0_i32_1 = arith.constant 0 : i32
    return %c0_i32, %c0_i32_0 : i32, i32
  }
  func.func @transform_7(%arg0: i32) -> (i32, i32) {
    %c0_i32 = arith.constant 0 : i32
    %c0_i32_0 = arith.constant 0 : i32
    %c0_i32_1 = arith.constant 0 : i32
    return %c0_i32, %c0_i32_0 : i32, i32
  }
  func.func @transform_8(%arg0: i32) -> (i32, i32, i32) {
    %c0_i32 = arith.constant 0 : i32
    %c0_i32_0 = arith.constant 0 : i32
    %c0_i32_1 = arith.constant 0 : i32
    return %arg0, %c0_i32, %c0_i32_0 : i32, i32, i32
  }
}

module attributes {stable_mosaic.version = 11 : i64} {
  func.func @kernel(%arg0: i32, %arg1: memref<1xf32, #tpu.memory_space<smem>>, %arg2: memref<1x1x256xf32, #tpu.memory_space<vmem>>, %arg3: memref<1x3x256xf32, #tpu.memory_space<vmem>>, %arg4: memref<1x3x256xf32, #tpu.memory_space<vmem>>, %arg5: memref<1x3x256xf32, #tpu.memory_space<vmem>>, %arg6: memref<1x3x256xf32, #tpu.memory_space<vmem>>, %arg7: memref<1x1x256xf32, #tpu.memory_space<vmem>>) attributes {dimension_semantics = [#tpu.dimension_semantics<parallel>], iteration_bounds = array<i64: 2>, scalar_prefetch = 0 : i64, scratch_operands = 0 : i64, tpu.core_type = #tpu.core_type<tc>, window_params = [{transform_indices = @transform_0, window_bounds = array<i64: 1>}, {transform_indices = @transform_1, window_bounds = array<i64: 1, 1, 256>}, {transform_indices = @transform_2, window_bounds = array<i64: 1, 3, 256>}, {transform_indices = @transform_3, window_bounds = array<i64: 1, 3, 256>}, {transform_indices = @transform_4, window_bounds = array<i64: 1, 3, 256>}, {transform_indices = @transform_5, window_bounds = array<i64: 1, 3, 256>}, {transform_indices = @transform_6, window_bounds = array<i64: 1, 1, 256>}]} {
    %c0 = arith.constant 0 : index
    %0 = memref.load %arg1[%c0] : memref<1xf32, #tpu.memory_space<smem>>
    %c0_0 = arith.constant 0 : index
    %c0_1 = arith.constant 0 : index
    %c0_2 = arith.constant 0 : index
    %1 = vector.load %arg3[%c0_0, %c0_1, %c0_2] : memref<1x3x256xf32, #tpu.memory_space<vmem>>, vector<1x3x256xf32>
    %2 = vector.shape_cast %1 : vector<1x3x256xf32> to vector<3x256xf32>
    %3 = vector.broadcast %0 : f32 to vector<3x256xf32>
    %4 = arith.mulf %3, %2 : vector<3x256xf32>
    %5 = arith.mulf %4, %2 : vector<3x256xf32>
    %cst = arith.constant 1.000000e+00 : f32
    %6 = vector.broadcast %cst : f32 to vector<3x256xf32>
    %7 = arith.subf %6, %5 : vector<3x256xf32>
    %c0_3 = arith.constant 0 : index
    %c0_4 = arith.constant 0 : index
    %c0_5 = arith.constant 0 : index
    %8 = vector.load %arg2[%c0_3, %c0_4, %c0_5] : memref<1x1x256xf32, #tpu.memory_space<vmem>>, vector<1x1x256xf32>
    %9 = vector.shape_cast %8 : vector<1x1x256xf32> to vector<1x256xf32>
    %10 = vector.broadcast %9 : vector<1x256xf32> to vector<3x256xf32>
    %11 = arith.mulf %7, %10 : vector<3x256xf32>
    %12 = vector.broadcast %0 : f32 to vector<3x256xf32>
    %13 = arith.mulf %12, %2 : vector<3x256xf32>
    %c0_6 = arith.constant 0 : index
    %c0_7 = arith.constant 0 : index
    %c0_8 = arith.constant 0 : index
    %14 = vector.load %arg4[%c0_6, %c0_7, %c0_8] : memref<1x3x256xf32, #tpu.memory_space<vmem>>, vector<1x3x256xf32>
    %15 = vector.shape_cast %14 : vector<1x3x256xf32> to vector<3x256xf32>
    %c0_9 = arith.constant 0 : index
    %c0_10 = arith.constant 0 : index
    %c0_11 = arith.constant 0 : index
    %16 = vector.load %arg5[%c0_9, %c0_10, %c0_11] : memref<1x3x256xf32, #tpu.memory_space<vmem>>, vector<1x3x256xf32>
    %17 = vector.shape_cast %16 : vector<1x3x256xf32> to vector<3x256xf32>
    %18 = arith.subf %15, %17 : vector<3x256xf32>
    %19 = arith.mulf %13, %18 : vector<3x256xf32>
    %20 = arith.subf %11, %19 : vector<3x256xf32>
    %c0_12 = arith.constant 0 : index
    %c0_13 = arith.constant 0 : index
    %c0_14 = arith.constant 0 : index
    %21 = vector.load %arg6[%c0_12, %c0_13, %c0_14] : memref<1x3x256xf32, #tpu.memory_space<vmem>>, vector<1x3x256xf32>
    %22 = vector.shape_cast %21 : vector<1x3x256xf32> to vector<3x256xf32>
    %23 = vector.shape_cast %20 : vector<3x256xf32> to vector<1x3x256xf32>
    tpu.vector_store %arg6[%c0_12, %c0_13, %c0_14], %23 {strides = array<i32>} : memref<1x3x256xf32, #tpu.memory_space<vmem>>, vector<1x3x256xf32>,
    %cst_15 = arith.constant dense<0.000000e+00> : vector<256xf32>
    %24 = vector.multi_reduction <add>, %20, %cst_15 [0] : vector<3x256xf32> to vector<256xf32>
    %25 = vector.shape_cast %24 : vector<256xf32> to vector<1x256xf32>
    %cst_16 = arith.constant 3.000000e+00 : f32
    %26 = vector.broadcast %cst_16 : f32 to vector<1x256xf32>
    %27 = arith.divf %25, %26 : vector<1x256xf32>
    %c0_17 = arith.constant 0 : index
    %c0_18 = arith.constant 0 : index
    %c0_19 = arith.constant 0 : index
    %28 = vector.load %arg7[%c0_17, %c0_18, %c0_19] : memref<1x1x256xf32, #tpu.memory_space<vmem>>, vector<1x1x256xf32>
    %29 = vector.shape_cast %28 : vector<1x1x256xf32> to vector<1x256xf32>
    %30 = vector.shape_cast %27 : vector<1x256xf32> to vector<1x1x256xf32>
    tpu.vector_store %arg7[%c0_17, %c0_18, %c0_19], %30 {strides = array<i32>} : memref<1x1x256xf32, #tpu.memory_space<vmem>>, vector<1x1x256xf32>,
    return
  }
  func.func @transform_0(%arg0: i32) -> i32 {
    %c0_i32 = arith.constant 0 : i32
    %c0_i32_0 = arith.constant 0 : i32
    return %c0_i32 : i32
  }
  func.func @transform_1(%arg0: i32) -> (i32, i32, i32) {
    %c0_i32 = arith.constant 0 : i32
    %c0_i32_0 = arith.constant 0 : i32
    %c0_i32_1 = arith.constant 0 : i32
    return %arg0, %c0_i32, %c0_i32_0 : i32, i32, i32
  }
  func.func @transform_2(%arg0: i32) -> (i32, i32, i32) {
    %c0_i32 = arith.constant 0 : i32
    %c0_i32_0 = arith.constant 0 : i32
    %c0_i32_1 = arith.constant 0 : i32
    return %arg0, %c0_i32, %c0_i32_0 : i32, i32, i32
  }
  func.func @transform_3(%arg0: i32) -> (i32, i32, i32) {
    %c0_i32 = arith.constant 0 : i32
    %c0_i32_0 = arith.constant 0 : i32
    %c0_i32_1 = arith.constant 0 : i32
    return %arg0, %c0_i32, %c0_i32_0 : i32, i32, i32
  }
  func.func @transform_4(%arg0: i32) -> (i32, i32, i32) {
    %c0_i32 = arith.constant 0 : i32
    %c0_i32_0 = arith.constant 0 : i32
    %c0_i32_1 = arith.constant 0 : i32
    return %arg0, %c0_i32, %c0_i32_0 : i32, i32, i32
  }
  func.func @transform_5(%arg0: i32) -> (i32, i32, i32) {
    %c0_i32 = arith.constant 0 : i32
    %c0_i32_0 = arith.constant 0 : i32
    %c0_i32_1 = arith.constant 0 : i32
    return %arg0, %c0_i32, %c0_i32_0 : i32, i32, i32
  }
  func.func @transform_6(%arg0: i32) -> (i32, i32, i32) {
    %c0_i32 = arith.constant 0 : i32
    %c0_i32_0 = arith.constant 0 : i32
    %c0_i32_1 = arith.constant 0 : i32
    return %arg0, %c0_i32, %c0_i32_0 : i32, i32, i32
  }
}

</mosaic_0001>

<bundles_post_ra>
// kernel: illumination_block_pallas.7
= control target key start
LH: loop header
LB: loop body
LE: loop exit
PB: predicated region body
PF: predicated region fallthrough
CT: control target
= control target key end

     0   :  { %s1250_s27 = smov 0   ;;  %s1416_s0 = inlined_call_operand.vmem [shape: f32[2,16,158], index: 0, kind: input, shape index: {}]   ;;  %s1417_s1 = inlined_call_operand.vmem [shape: f32[1,128], index: 1, kind: input, shape index: {}]   ;;  %s1418_s2 = inlined_call_operand.vmem [shape: f32[16,144], index: 2, kind: input, shape index: {}]   ;;  %s1419_s3 = inlined_call_operand.vmem [shape: f32[16,1], index: 3, kind: input, shape index: {}]   ;;  %s1420_s4 = inlined_call_operand.vmem [shape: f32[16,144], index: 4, kind: input, shape index: {}]   ;;  %s1421_s5 = inlined_call_operand.vmem [shape: f32[16,1], index: 5, kind: input, shape index: {}]   ;;  %s1422_s6 = inlined_call_operand.vmem [shape: f32[16,16], index: 6, kind: input, shape index: {}]   ;;  %s1423_s7 = inlined_call_operand.vmem [shape: f32[16,1], index: 7, kind: input, shape index: {}]   ;;  %s1424_s8 = inlined_call_operand.vmem [shape: f32[2,16,128], index: 8, kind: output, shape index: {}]  }
   0x1 LB: > { %s914_s28 = sadd.s32 4294967295, %s1191_s27   ;;  %p918_p0 = scmp.ge.s32.totalorder %s1191_s27, 1  ;;  %s1191_s27 = sphi %s1250_s27, %s18_s27  }
   0x2   : > { %p262_p1 = scmp.lt.s32.totalorder %s1191_s27, 3 }
   0x4   : > { %p263_p2 = pnand %p918_p0, %p262_p1 }
   0x5   : > { %p296_p3 = scmp.lt.s32.totalorder (!%p263_p2), %s914_s28, 1  ;;  %v1193_v0 = vmov (!%p263_p2), 0.0|0.0   ;;  %s1194_s11 = smov (!%p263_p2), 126   ;;  %vm348_vm0 = vcmask (!%p263_p2), 130048   ;;  %v431_v8 = vld [vmem:[%s1418_s2 + $0x8] sm:$0xff] (!%p263_p2)  ;;  %v434_v9 = vld [vmem:[%s1419_s3] sm:$0xff] (!%p263_p2) }
   0x6   : > { %266 = sbr.rel (%p263_p2) target bundleno = 898 (0x382), region = 52  ;;  %949 = vmatprep.subr.bf16.mxu1 (!%p263_p2), %v1193_v0  ;;  %s1195_s12 = smov (!%p263_p2), 127   ;;  %925 = vmatprep.mubr.msk.f32.mxu1 (!%p263_p2), %vm348_vm0, %v431_v8  ;;  %v435_v10 = vld [vmem:[%s1419_s3 + $0x8] sm:$0xff] (!%p263_p2)  ;;  %v1202_v11 = vmov (!%p263_p2), 0   ;;  %vm446_vm1 = vcmask (!%p263_p2), 1039360   ;;  %vm459_vm2 = vcmask (!%p263_p2), 1031168  }
   0x7   : > { %s1196_s13 = smov (!%p263_p2), 118   ;;  %s1197_s14 = smov (!%p263_p2), 117   ;;  %1103 = vset.pattern.permute.xlu0 (!%p263_p2), %v1202_v11  ;;  %1104 = vset.pattern.permute.xlu1 (!%p263_p2), %v1202_v11  ;;  %vm472_vm3 = vcmask (!%p263_p2), 965632   ;;  %vm343_vm4 = vcmask (!%p263_p2), 957440   ;;  %vm485_vm5 = vcmask (!%p263_p2), 949248   ;;  %vm498_vm6 = vcmask (!%p263_p2), 883712  }
   0x8   : > { %s1198_s15 = smov (!%p263_p2), 116   ;;  %s1199_s16 = smov (!%p263_p2), 108   ;;  %vm511_vm7 = vcmask (!%p263_p2), 875520   ;;  %vm524_vm8 = vcmask (!%p263_p2), 867328   ;;  %vm306_vm9 = vcmask (!%p263_p2), 162816   ;;  %vm309_vm10 = vcmask (!%p263_p2), 244816  }
   0x9   : > { %s1200_s17 = smov (!%p263_p2), 107   ;;  %s1201_s20 = smov (!%p263_p2), 106   ;;  %vm642_vm13 = vcmask (!%p263_p2), 1047640   ;;  %vm644_vm14 = vcmask (!%p263_p2), 89088  }
   0xa   : > { %s1204_s25 = smov (!%p263_p2), 11  }
   0xd   : > { %s1426_s28 = smov (!%p296_p3, %s914_s28), 1 }
   0xe   : > { %s932_s29 = sshll.u32 %s1426_s28, 5  ;;  %s933_s22 = sshll.u32 %s1426_s28, 4 }
   0xf   : > { %s300_s10 = scalar_lea.vmem %s1416_s0, %s932_s29 }
  0x10   : > { %v313_v1 = vld [vmem:[%s300_s10] sm:$0xff]  ;;  %v314_v2 = vld [vmem:[%s300_s10 + $0x8] sm:$0xff]  ;;  %v315_v3 = vld [vmem:[%s300_s10 + $0x10] sm:$0xff] }
  0x11   : > { %v1033_v4 = vpack.i.bf16 %v314_v2, %v313_v1  ;;  %v316_v5 = vld [vmem:[%s300_s10 + $0x18] sm:$0xff]  ;;  %v950_v6 = vpack.c.bf16 %v315_v3, %v313_v1 }
  0x12   : > { %v1038_v7 = vpack.i.bf16 %v316_v5, %v315_v3 }
  0x13   : > { %1034 = vrot.lane.b32.xlu1 %v1033_v4, %s1194_s11  ;;  %1024 = vrot.lane.b32.xlu0 %v1033_v4, %s1195_s12 }
  0x14   : > { %951 = vmatpush1.bf16.msra.mxu1 %v950_v6 }
  0x15   : > { %952 = vmatprep.subr.bf16.mxu1 %v1193_v0 }
  0x17   : > { %1039 = vrot.lane.b32.xlu1 %v1038_v7, %s1194_s11  ;;  %1029 = vrot.lane.b32.xlu0 %v1038_v7, %s1195_s12 }
  0x1b   : > { %1049 = vrot.lane.b32.xlu1 %v1038_v7, %s1196_s13  ;;  %1044 = vrot.lane.b32.xlu0 %v1033_v4, %s1196_s13 }
  0x1f   : > { %1059 = vrot.lane.b32.xlu1 %v1038_v7, %s1197_s14  ;;  %1054 = vrot.lane.b32.xlu0 %v1033_v4, %s1197_s14 }
  0x23   : > { %1069 = vrot.lane.b32.xlu1 %v1038_v7, %s1198_s15  ;;  %1064 = vrot.lane.b32.xlu0 %v1033_v4, %s1198_s15 }
  0x27   : > { %1079 = vrot.lane.b32.xlu1 %v1038_v7, %s1199_s16  ;;  %1074 = vrot.lane.b32.xlu0 %v1033_v4, %s1199_s16 }
  0x2b   : > { %1089 = vrot.lane.b32.xlu1 %v1038_v7, %s1200_s17  ;;  %1084 = vrot.lane.b32.xlu0 %v1033_v4, %s1200_s17 }
  0x2f   : > { %1099 = vrot.lane.b32.xlu1 %v1038_v7, %s1201_s20  ;;  %1094 = vrot.lane.b32.xlu0 %v1033_v4, %s1201_s20 }
  0x33   : > { %531 = vperm.xlu0 %1103, %v434_v9   ;;  %536 = vperm.xlu1 %1104, %v435_v10  }
  0x85   : > { %v1035_v12 = vpop.permute.xlu1 %1034  ;;  %v1025_v13 = vpop.permute.xlu0 %1024 }
  0x86   : > { %v1027_v14 = vunpack.i.h.bf16 %v1025_v13  ;;  %v1026_v15 = vunpack.i.l.bf16 %v1025_v13  ;;  %v1037_v16 = vunpack.i.h.bf16 %v1035_v12  ;;  %v1036_v17 = vunpack.i.l.bf16 %v1035_v12 }
  0x88   : > { %v447_v24 = vsel %vm446_vm1, %v1026_v15, %v1027_v14  ;;  %v460_v29 = vsel %vm459_vm2, %v1036_v17, %v1037_v16 }
  0x89   : > { %v1040_v18 = vpop.permute.xlu1 %1039  ;;  %v1030_v19 = vpop.permute.xlu0 %1029 }
  0x8a   : > { %v1042_v20 = vunpack.i.h.bf16 %v1040_v18  ;;  %v1041_v21 = vunpack.i.l.bf16 %v1040_v18  ;;  %v1032_v22 = vunpack.i.h.bf16 %v1030_v19  ;;  %v1031_v23 = vunpack.i.l.bf16 %v1030_v19 }
  0x8c   : > { %v448_v25 = vsel %vm446_vm1, %v1031_v23, %v1032_v22  ;;  %v461_v30 = vsel %vm459_vm2, %v1041_v21, %v1042_v20  ;;  %v430_v21 = vld [vmem:[%s1418_s2] sm:$0xff]  ;;  %v433_v22 = vld [vmem:[%s1418_s2 + $0x18] sm:$0xff]  ;;  %v432_v23 = vld [vmem:[%s1418_s2 + $0x10] sm:$0xff] }
  0x8d   : > { %v953_v26 = vpack.c.bf16 %v448_v25, %v447_v24  ;;  %v1050_v27 = vpop.permute.xlu1 %1049  ;;  %v1045_v28 = vpop.permute.xlu0 %1044  ;;  %v956_v37 = vpack.c.bf16 %v461_v30, %v460_v29  ;;  %v317_v24 = vld [vmem:[%s1422_s6] sm:$0xff]  ;;  %v318_v25 = vld [vmem:[%s1422_s6 + $0x8] sm:$0xff] }
  0x8e   : > { %v1052_v31 = vunpack.i.h.bf16 %v1050_v27  ;;  %v1051_v32 = vunpack.i.l.bf16 %v1050_v27  ;;  %v1047_v33 = vunpack.i.h.bf16 %v1045_v28  ;;  %v1046_v34 = vunpack.i.l.bf16 %v1045_v28  ;;  %942 = vmatprep.mubr.msk.f32.mxu0 %vm348_vm0, %v317_v24 }
  0x8f   : > { %954 = vmatpush1.bf16.msra.mxu1 %v953_v26  ;;  %v1203_v26 = vmov 0.0  }
  0x90   : > { %955 = vmatprep.subr.bf16.mxu1 %v1193_v0  ;;  %v473_v35 = vsel %vm472_vm3, %v1046_v34, %v1047_v33  ;;  %v474_v36 = vsel %vm472_vm3, %v1051_v32, %v1052_v31  ;;  %307 = vst.msk [vmem:[#allocation2] sm:$0xff] %vm306_vm9, %v1203_v26  ;;  %308 = vst.msk [vmem:[#allocation2 + $0x10] sm:$0xff] %vm306_vm9, %v1203_v26  ;;  %v927_v33 = vld [vmem:[%s1417_s1] ss:$0 sm:$0xff] }
  0x91   : > { %v1060_v38 = vpop.permute.xlu1 %1059  ;;  %v1055_v39 = vpop.permute.xlu0 %1054  ;;  %v959_v44 = vpack.c.bf16 %v474_v36, %v473_v35  ;;  %310 = vst.msk [vmem:[#allocation2 + $0x8] sm:$0xff] %vm309_vm10, %v1203_v26  ;;  %311 = vst.msk [vmem:[#allocation2 + $0x18] sm:$0xff] %vm309_vm10, %v1203_v26 }
  0x92   : > { %v1062_v40 = vunpack.i.h.bf16 %v1060_v38  ;;  %v1061_v41 = vunpack.i.l.bf16 %v1060_v38  ;;  %v1057_v42 = vunpack.i.h.bf16 %v1055_v39  ;;  %v1056_v43 = vunpack.i.l.bf16 %v1055_v39 }
  0x93   : > { %957 = vmatpush1.bf16.msra.mxu1 %v956_v37 }
  0x94   : > { %958 = vmatprep.subr.bf16.mxu1 %v1193_v0  ;;  %v344_v45 = vsel %vm343_vm4, %v1056_v43, %v1057_v42  ;;  %v345_v46 = vsel %vm343_vm4, %v1061_v41, %v1062_v40 }
  0x95   : > { %v1070_v47 = vpop.permute.xlu1 %1069  ;;  %v1065_v48 = vpop.permute.xlu0 %1064  ;;  %v945_v49 = vpack.c.bf16 %v345_v46, %v344_v45 }
  0x96   : > { %v1072_v50 = vunpack.i.h.bf16 %v1070_v47  ;;  %v1071_v51 = vunpack.i.l.bf16 %v1070_v47  ;;  %v1067_v52 = vunpack.i.h.bf16 %v1065_v48  ;;  %v1066_v53 = vunpack.i.l.bf16 %v1065_v48 }
  0x97   : > { %960 = vmatpush1.bf16.msra.mxu1 %v959_v44  ;;  %946 = vmatprep.subr.bf16.mxu0 %v945_v49 }
  0x98   : > { %961 = vmatprep.subr.bf16.mxu1 %v1193_v0  ;;  %948 = vmatpush3.bf16.msra.mxu0 %v945_v49  ;;  %v486_v54 = vsel %vm485_vm5, %v1066_v53, %v1067_v52  ;;  %v487_v55 = vsel %vm485_vm5, %v1071_v51, %v1072_v50  ;;  %v649_v51 = vld [vmem:[%s1420_s4 + $0x8] sm:$0xff]  ;;  %v652_v52 = vld [vmem:[%s1421_s5] sm:$0xff] }
  0x99   : > { %v1080_v56 = vpop.permute.xlu1 %1079  ;;  %v1075_v57 = vpop.permute.xlu0 %1074  ;;  %976 = vmatprep.subr.bf16.mxu0 %v1193_v0  ;;  %v965_v62 = vpack.c.bf16 %v487_v55, %v486_v54  ;;  %v653_v55 = vld [vmem:[%s1421_s5 + $0x8] sm:$0xff] }
  0x9a   : > { %v1082_v58 = vunpack.i.h.bf16 %v1080_v56  ;;  %v1081_v59 = vunpack.i.l.bf16 %v1080_v56  ;;  %v1077_v60 = vunpack.i.h.bf16 %v1075_v57  ;;  %v1076_v61 = vunpack.i.l.bf16 %v1075_v57  ;;  %v319_v56 = vld [vmem:[%s1423_s7] sm:$0xff]  ;;  %v320_v57 = vld [vmem:[%s1423_s7 + $0x8] sm:$0xff] }
  0x9b   : > { %963 = vmatpush1.bf16.msra.mxu1 %v945_v49  ;;  %943 = vmatmul.mubr.msk.f32.vlgmr.msra.gmra.mrb[0].mxu0 %vm348_vm0, %v318_v25 }
  0x9c   : > { %964 = vmatprep.subr.bf16.mxu1 %v1193_v0  ;;  %v499_v63 = vsel %vm498_vm6, %v1076_v61, %v1077_v60  ;;  %v500_v1 = vsel %vm498_vm6, %v1081_v59, %v1082_v58  ;;  %928 = vmatprep.mubr.msk.f32.mxu0 %vm348_vm0, %v649_v51 }
  0x9d   : > { %v1090_v2 = vpop.permute.xlu1 %1089  ;;  %v1085_v3 = vpop.permute.xlu0 %1084  ;;  %v968_v8 = vpack.c.bf16 %v500_v1, %v499_v63 }
  0x9e   : > { %v1092_v4 = vunpack.i.h.bf16 %v1090_v2  ;;  %v1091_v5 = vunpack.i.l.bf16 %v1090_v2  ;;  %v1087_v6 = vunpack.i.h.bf16 %v1085_v3  ;;  %v1086_v7 = vunpack.i.l.bf16 %v1085_v3 }
  0x9f   : > { %966 = vmatpush1.bf16.msra.mxu1 %v965_v62 }
  0xa0   : > { %967 = vmatprep.subr.bf16.mxu1 %v1193_v0  ;;  %v512_v9 = vsel %vm511_vm7, %v1086_v7, %v1087_v6  ;;  %v513_v10 = vsel %vm511_vm7, %v1091_v5, %v1092_v4 }
  0xa1   : > { %v1100_v11 = vpop.permute.xlu1 %1099  ;;  %v1095_v12 = vpop.permute.xlu0 %1094  ;;  %v971_v17 = vpack.c.bf16 %v513_v10, %v512_v9 }
  0xa2   : > { %v1102_v13 = vunpack.i.h.bf16 %v1100_v11  ;;  %v1101_v14 = vunpack.i.l.bf16 %v1100_v11  ;;  %v1097_v15 = vunpack.i.h.bf16 %v1095_v12  ;;  %v1096_v16 = vunpack.i.l.bf16 %v1095_v12 }
  0xa3   : > { %969 = vmatpush1.bf16.msra.mxu1 %v968_v8 }
  0xa4   : > { %970 = vmatprep.subr.bf16.mxu1 %v1193_v0  ;;  %v525_v18 = vsel %vm524_vm8, %v1096_v16, %v1097_v15  ;;  %v526_v19 = vsel %vm524_vm8, %v1101_v14, %v1102_v13 }
  0xa5   : > { %v974_v20 = vpack.c.bf16 %v526_v19, %v525_v18 }
  0xa7   : > { %972 = vmatpush1.bf16.msra.mxu1 %v971_v17 }
  0xa8   : > { %973 = vmatprep.subr.bf16.mxu1 %v1193_v0 }
  0xab   : > { %975 = vmatpush1.bf16.msra.mxu1 %v974_v20 }
  0xae   : > { %610 = vmatmul.mubr.f32.vlgmr.msra.gmra.mrb[0].mxu1 %v430_v21 }
  0xaf   : > { %926 = vmatprep.mubr.msk.f32.mxu1 %vm348_vm0, %v433_v22 }
  0xb2   : > { %615 = vmatmul.mubr.f32.gmra.mrb[2].mxu1 %v432_v23  ;;  %v532_v27 = vpop.permute.xlu0 %531  ;;  %v537_v31 = vpop.permute.xlu1 %536 }
 0x16e   : > { %v1360_v53 = vpop.f32.mrb[0].mxu0 }
 0x16f   : > { %v1363_v54 = vpop.f32.mrb[1].mxu0 }
 0x181   : > { %v611_v28 = vpop.f32.mrb[0].mxu1 }
 0x182   : > { %v612_v29 = vadd.f32 %v611_v28, %v532_v27  ;;  %v613_v30 = vpop.f32.mrb[1].mxu1 }
 0x184   : > { %vm620_vm11 = vcmp.ge.f32.partialorder %v612_v29, 0.0  ;;  %v622_v32 = vmul.f32 0.1, %v612_v29 }
 0x185   : > { %v616_v34 = vpop.f32.mrb[2].mxu1 }
 0x186   : > { %v617_v35 = vadd.f32 %v616_v34, %v537_v31  ;;  %v618_v36 = vpop.f32.mrb[3].mxu1  ;;  %v624_v37 = vsel %vm620_vm11, %v612_v29, %v622_v32 }
 0x187   : > { %v632_v38 = vmul.f32 %v927_v33, %v624_v37 }
 0x188   : > { %vm621_vm12 = vcmp.ge.f32.partialorder %v617_v35, 0.0  ;;  %v623_v39 = vmul.f32 0.1, %v617_v35 }
 0x189   : > { %636 = vrot.lane.b32.xlu1 %v632_v38, %s1204_s25 }
 0x18a   : > { %v625_v40 = vsel %vm621_vm12, %v617_v35, %v623_v39 }
 0x18b   : > { %v633_v41 = vmul.f32 %v927_v33, %v625_v40 }
 0x18d   : > { %638 = vrot.lane.b32.xlu0 %v633_v41, %s1204_s25  ;;  %s305_s25 = scalar_lea.vmem %s1424_s8, %s933_s22 }
 0x1fb   : > { %v637_v42 = vpop.permute.xlu1 %636 }
 0x1fc   : > { %643 = vst.msk [vmem:[#allocation2] sm:$0xff] %vm642_vm13, %v637_v42 }
 0x1fd   : > { %645 = vst.msk [vmem:[#allocation2 + $0x8] sm:$0xff] %vm644_vm14, %v637_v42 }
 0x1ff   : > { %v639_v43 = vpop.permute.xlu0 %638 }
 0x200   : > { %646 = vst.msk [vmem:[#allocation2 + $0x10] sm:$0xff] %vm642_vm13, %v639_v43 }
 0x201   : > { %647 = vst.msk [vmem:[#allocation2 + $0x18] sm:$0xff] %vm644_vm14, %v639_v43 }
 0x203   : > { %v654_v44 = vld [vmem:[#allocation2] sm:$0xff] }
 0x204   : > { %v656_v45 = vld [vmem:[#allocation2 + $0x8] sm:$0xff] }
 0x205   : > { %v1105_v46 = vpack.i.bf16 %v656_v45, %v654_v44 }
 0x207   : > { %1106 = vrot.lane.b32.xlu1 %v1105_v46, %s1195_s12  ;;  %v655_v47 = vld [vmem:[#allocation2 + $0x10] sm:$0xff] }
 0x208   : > { %v657_v48 = vld [vmem:[#allocation2 + $0x18] sm:$0xff]  ;;  %v977_v50 = vpack.c.bf16 %v655_v47, %v654_v44 }
 0x209   : > { %v1145_v49 = vpack.i.bf16 %v657_v48, %v655_v47 }
 0x20a   : > { %978 = vmatpush1.bf16.msra.mxu0 %v977_v50 }
 0x20b   : > { %1146 = vrot.lane.b32.xlu0 %v1145_v49, %s1195_s12  ;;  %1111 = vrot.lane.b32.xlu1 %v1105_v46, %s1194_s11 }
 0x20c   : > { %979 = vmatprep.subr.bf16.mxu0 %v1193_v0 }
 0x20f   : > { %1151 = vrot.lane.b32.xlu0 %v1145_v49, %s1194_s11  ;;  %1116 = vrot.lane.b32.xlu1 %v1105_v46, %s1196_s13 }
 0x213   : > { %1156 = vrot.lane.b32.xlu0 %v1145_v49, %s1196_s13  ;;  %1121 = vrot.lane.b32.xlu1 %v1105_v46, %s1197_s14 }
 0x217   : > { %1161 = vrot.lane.b32.xlu0 %v1145_v49, %s1197_s14  ;;  %1126 = vrot.lane.b32.xlu1 %v1105_v46, %s1198_s15 }
 0x21b   : > { %1166 = vrot.lane.b32.xlu0 %v1145_v49, %s1198_s15  ;;  %1131 = vrot.lane.b32.xlu1 %v1105_v46, %s1199_s16 }
 0x21f   : > { %1171 = vrot.lane.b32.xlu0 %v1145_v49, %s1199_s16  ;;  %1136 = vrot.lane.b32.xlu1 %v1105_v46, %s1200_s17 }
 0x223   : > { %1176 = vrot.lane.b32.xlu0 %v1145_v49, %s1200_s17  ;;  %1141 = vrot.lane.b32.xlu1 %v1105_v46, %s1201_s20 }
 0x227   : > { %1181 = vrot.lane.b32.xlu0 %v1145_v49, %s1201_s20  ;;  %760 = vperm.xlu1 %1104, %v652_v52  }
 0x22b   : > { %765 = vperm.xlu0 %1103, %v653_v55   ;;  %323 = vperm.xlu1 %1104, %v319_v56  }
 0x22f   : > { %328 = vperm.xlu0 %1103, %v320_v57  }
 0x279   : > { %v1107_v58 = vpop.permute.xlu1 %1106 }
 0x27a   : > { %v1109_v59 = vunpack.i.h.bf16 %v1107_v58  ;;  %v1108_v60 = vunpack.i.l.bf16 %v1107_v58 }
 0x27c   : > { %v670_v2 = vsel %vm446_vm1, %v1108_v60, %v1109_v59 }
 0x27d   : > { %v1147_v61 = vpop.permute.xlu0 %1146  ;;  %v1112_v62 = vpop.permute.xlu1 %1111 }
 0x27e   : > { %v1149_v63 = vunpack.i.h.bf16 %v1147_v61  ;;  %v1148_v1 = vunpack.i.l.bf16 %v1147_v61  ;;  %v1114_v4 = vunpack.i.h.bf16 %v1112_v62  ;;  %v1113_v5 = vunpack.i.l.bf16 %v1112_v62 }
 0x280   : > { %v671_v3 = vsel %vm446_vm1, %v1148_v1, %v1149_v63  ;;  %v682_v11 = vsel %vm459_vm2, %v1113_v5, %v1114_v4 }
 0x281   : > { %v980_v6 = vpack.c.bf16 %v671_v3, %v670_v2  ;;  %v1152_v7 = vpop.permute.xlu0 %1151  ;;  %v1117_v8 = vpop.permute.xlu1 %1116 }
 0x282   : > { %v1154_v9 = vunpack.i.h.bf16 %v1152_v7  ;;  %v1153_v10 = vunpack.i.l.bf16 %v1152_v7  ;;  %v1119_v13 = vunpack.i.h.bf16 %v1117_v8  ;;  %v1118_v14 = vunpack.i.l.bf16 %v1117_v8  ;;  %v651_v7 = vld [vmem:[%s1420_s4 + $0x18] sm:$0xff]  ;;  %v650_v8 = vld [vmem:[%s1420_s4 + $0x10] sm:$0xff] }
 0x283   : > { %981 = vmatpush1.bf16.msra.mxu0 %v980_v6  ;;  %v648_v6 = vld [vmem:[%s1420_s4] sm:$0xff] }
 0x284   : > { %v683_v12 = vsel %vm459_vm2, %v1153_v10, %v1154_v9  ;;  %982 = vmatprep.subr.bf16.mxu0 %v1193_v0  ;;  %v694_v20 = vsel %vm472_vm3, %v1118_v14, %v1119_v13 }
 0x285   : > { %v983_v15 = vpack.c.bf16 %v683_v12, %v682_v11  ;;  %v1157_v16 = vpop.permute.xlu0 %1156  ;;  %v1122_v17 = vpop.permute.xlu1 %1121 }
 0x286   : > { %v1159_v18 = vunpack.i.h.bf16 %v1157_v16  ;;  %v1158_v19 = vunpack.i.l.bf16 %v1157_v16  ;;  %v1124_v22 = vunpack.i.h.bf16 %v1122_v17  ;;  %v1123_v23 = vunpack.i.l.bf16 %v1122_v17 }
 0x287   : > { %984 = vmatpush1.bf16.msra.mxu0 %v983_v15 }
 0x288   : > { %v695_v21 = vsel %vm472_vm3, %v1158_v19, %v1159_v18  ;;  %985 = vmatprep.subr.bf16.mxu0 %v1193_v0  ;;  %v706_v29 = vsel %vm343_vm4, %v1123_v23, %v1124_v22 }
 0x289   : > { %v986_v24 = vpack.c.bf16 %v695_v21, %v694_v20  ;;  %v1162_v25 = vpop.permute.xlu0 %1161  ;;  %v1127_v26 = vpop.permute.xlu1 %1126 }
 0x28a   : > { %v1164_v27 = vunpack.i.h.bf16 %v1162_v25  ;;  %v1163_v28 = vunpack.i.l.bf16 %v1162_v25  ;;  %v1129_v31 = vunpack.i.h.bf16 %v1127_v26  ;;  %v1128_v32 = vunpack.i.l.bf16 %v1127_v26 }
 0x28b   : > { %987 = vmatpush1.bf16.msra.mxu0 %v986_v24 }
 0x28c   : > { %v707_v30 = vsel %vm343_vm4, %v1163_v28, %v1164_v27  ;;  %988 = vmatprep.subr.bf16.mxu0 %v1193_v0  ;;  %v718_v38 = vsel %vm485_vm5, %v1128_v32, %v1129_v31 }
 0x28d   : > { %v989_v33 = vpack.c.bf16 %v707_v30, %v706_v29  ;;  %v1167_v34 = vpop.permute.xlu0 %1166  ;;  %v1132_v35 = vpop.permute.xlu1 %1131 }
 0x28e   : > { %v1169_v36 = vunpack.i.h.bf16 %v1167_v34  ;;  %v1168_v37 = vunpack.i.l.bf16 %v1167_v34  ;;  %v1134_v40 = vunpack.i.h.bf16 %v1132_v35  ;;  %v1133_v41 = vunpack.i.l.bf16 %v1132_v35 }
 0x28f   : > { %990 = vmatpush1.bf16.msra.mxu0 %v989_v33 }
 0x290   : > { %v719_v39 = vsel %vm485_vm5, %v1168_v37, %v1169_v36  ;;  %991 = vmatprep.subr.bf16.mxu0 %v1193_v0  ;;  %v730_v47 = vsel %vm498_vm6, %v1133_v41, %v1134_v40 }
 0x291   : > { %v992_v42 = vpack.c.bf16 %v719_v39, %v718_v38  ;;  %v1172_v43 = vpop.permute.xlu0 %1171  ;;  %v1137_v44 = vpop.permute.xlu1 %1136 }
 0x292   : > { %v1174_v45 = vunpack.i.h.bf16 %v1172_v43  ;;  %v1173_v46 = vunpack.i.l.bf16 %v1172_v43  ;;  %v1139_v49 = vunpack.i.h.bf16 %v1137_v44  ;;  %v1138_v50 = vunpack.i.l.bf16 %v1137_v44 }
 0x293   : > { %993 = vmatpush1.bf16.msra.mxu0 %v992_v42 }
 0x294   : > { %v731_v48 = vsel %vm498_vm6, %v1173_v46, %v1174_v45  ;;  %994 = vmatprep.subr.bf16.mxu0 %v1193_v0  ;;  %v742_v58 = vsel %vm511_vm7, %v1138_v50, %v1139_v49 }
 0x295   : > { %v995_v51 = vpack.c.bf16 %v731_v48, %v730_v47  ;;  %v1177_v52 = vpop.permute.xlu0 %1176  ;;  %v1142_v55 = vpop.permute.xlu1 %1141 }
 0x296   : > { %v1179_v56 = vunpack.i.h.bf16 %v1177_v52  ;;  %v1178_v57 = vunpack.i.l.bf16 %v1177_v52  ;;  %v1144_v60 = vunpack.i.h.bf16 %v1142_v55  ;;  %v1143_v61 = vunpack.i.l.bf16 %v1142_v55 }
 0x297   : > { %996 = vmatpush1.bf16.msra.mxu0 %v995_v51 }
 0x298   : > { %v743_v59 = vsel %vm511_vm7, %v1178_v57, %v1179_v56  ;;  %997 = vmatprep.subr.bf16.mxu0 %v1193_v0  ;;  %v754_v3 = vsel %vm524_vm8, %v1143_v61, %v1144_v60 }
 0x299   : > { %v998_v62 = vpack.c.bf16 %v743_v59, %v742_v58  ;;  %v1182_v63 = vpop.permute.xlu0 %1181 }
 0x29a   : > { %v1184_v1 = vunpack.i.h.bf16 %v1182_v63  ;;  %v1183_v2 = vunpack.i.l.bf16 %v1182_v63 }
 0x29b   : > { %999 = vmatpush1.bf16.msra.mxu0 %v998_v62 }
 0x29c   : > { %v755_v4 = vsel %vm524_vm8, %v1183_v2, %v1184_v1  ;;  %1000 = vmatprep.subr.bf16.mxu0 %v1193_v0 }
 0x29d   : > { %v1001_v5 = vpack.c.bf16 %v755_v4, %v754_v3 }
 0x29f   : > { %1002 = vmatpush1.bf16.msra.mxu0 %v1001_v5 }
 0x2a2   : > { %839 = vmatmul.mubr.f32.vlgmr.msra.gmra.mrb[2].mxu0 %v648_v6 }
 0x2a3   : > { %929 = vmatprep.mubr.msk.f32.mxu0 %vm348_vm0, %v651_v7 }
 0x2a6   : > { %844 = vmatmul.mubr.f32.gmra.mrb[4].mxu0 %v650_v8  ;;  %v761_v9 = vpop.permute.xlu1 %760 }
 0x2aa   : > { %v766_v0 = vpop.permute.xlu0 %765  ;;  %v324_v11 = vpop.permute.xlu1 %323 }
 0x2ab   : > { %v422_v15 = vadd.f32 %v1363_v54, %v324_v11 }
 0x2ae   : > { %v329_v17 = vpop.permute.xlu0 %328 }
 0x2af   : > { %v427_v23 = vadd.f32 %v1360_v53, %v329_v17 }
 0x375   : > { %v840_v10 = vpop.f32.mrb[2].mxu0 }
 0x376   : > { %v841_v12 = vadd.f32 %v840_v10, %v761_v9  ;;  %v842_v13 = vpop.f32.mrb[3].mxu0 }
 0x378   : > { %vm849_vm15 = vcmp.ge.f32.partialorder %v841_v12, 0.0  ;;  %v851_v14 = vmul.f32 0.1, %v841_v12 }
 0x379   : > { %v845_v16 = vpop.f32.mrb[4].mxu0 }
 0x37a   : > { %v853_v18 = vsel %vm849_vm15, %v841_v12, %v851_v14  ;;  %v846_v19 = vadd.f32 %v845_v16, %v766_v0  ;;  %v847_v20 = vpop.f32.mrb[5].mxu0 }
 0x37b   : > { %v855_v21 = vadd.f32 %v853_v18, %v422_v15 }
 0x37c   : > { %vm850_vm0 = vcmp.ge.f32.partialorder %v846_v19, 0.0  ;;  %v852_v22 = vmul.f32 0.1, %v846_v19 }
 0x37d   : > { %857 = vst [vmem:[%s305_s25] sm:$0xff] %v855_v21 }
 0x37e   : > { %v854_v24 = vsel %vm850_vm0, %v846_v19, %v852_v22 }
 0x37f   : > { %v856_v25 = vadd.f32 %v854_v24, %v427_v23 }
 0x381   : > { %858 = vst [vmem:[%s305_s25 + $0x8] sm:$0xff] %v856_v25 }
 0x382 PF: > { %s18_s27 = sadd.s32 1, %s1191_s27  }
 0x383   : > { %p15_p4 = scmp.ge.s32.totalorder %s18_s27, 4  }
 0x385   :  { %17 = sbr.rel (!%p15_p4) target bundleno = 1 (0x1), region = 82 }

// kernel: illumination_block_pallas.6
= control target key start
LH: loop header
LB: loop body
LE: loop exit
PB: predicated region body
PF: predicated region fallthrough
CT: control target
= control target key end

     0   :  { %s1993_s13 = smov 0   ;;  %s2279_s0 = inlined_call_operand.vmem [shape: f32[2,8,438], index: 0, kind: input, shape index: {}]   ;;  %s2280_s1 = inlined_call_operand.vmem [shape: f32[1,384], index: 1, kind: input, shape index: {}]   ;;  %s2281_s2 = inlined_call_operand.vmem [shape: f32[8,72], index: 2, kind: input, shape index: {}]   ;;  %s2282_s3 = inlined_call_operand.vmem [shape: f32[8,1], index: 3, kind: input, shape index: {}]   ;;  %s2283_s4 = inlined_call_operand.vmem [shape: f32[8,72], index: 4, kind: input, shape index: {}]   ;;  %s2284_s5 = inlined_call_operand.vmem [shape: f32[8,1], index: 5, kind: input, shape index: {}]   ;;  %s2285_s6 = inlined_call_operand.vmem [shape: f32[8,72], index: 6, kind: input, shape index: {}]   ;;  %s2286_s7 = inlined_call_operand.vmem [shape: f32[8,1], index: 7, kind: input, shape index: {}]   ;;  %s2287_s8 = inlined_call_operand.vmem [shape: f32[8,8], index: 8, kind: input, shape index: {}]   ;;  %s2288_s9 = inlined_call_operand.vmem [shape: f32[8,1], index: 9, kind: input, shape index: {}]   ;;  %s2289_s10 = inlined_call_operand.vmem [shape: f32[2,8,384], index: 10, kind: output, shape index: {}]  }
   0x1 LB: > { %s1480_s14 = sadd.s32 4294967295, %s1923_s13   ;;  %p1484_p0 = scmp.ge.s32.totalorder %s1923_s13, 1  ;;  %s1923_s13 = sphi %s1993_s13, %s20_s13  }
   0x2   : > { %p312_p1 = scmp.lt.s32.totalorder %s1923_s13, 3 }
   0x4   : > { %p313_p2 = pnand %p1484_p0, %p312_p1 }
   0x5   : > { %p350_p3 = scmp.lt.s32.totalorder (!%p313_p2), %s1480_s14, 1  ;;  %v1925_v0 = vmov (!%p313_p2), 0.0|0.0   ;;  %s1926_s19 = smov (!%p313_p2), 126   ;;  %v1931_v7 = vmov (!%p313_p2), 0.0   ;;  %vm1934_vm0 = vmmov (!%p313_p2), 0   ;;  %v1935_v8 = vmov (!%p313_p2), 0  }
   0x6   : > { %316 = sbr.rel (%p313_p2) target bundleno = 1383 (0x567), region = 60  ;;  %1615 = vmatprep.subr.bf16.mxu1 (!%p313_p2), %v1925_v0  ;;  %s1927_s20 = smov (!%p313_p2), 127   ;;  %568 = vmatprep.mubr.f32.mxu0 (!%p313_p2), %v1931_v7  ;;  %v366_v9 = vld [vmem:[%s2282_s3] sm:$0xff] (!%p313_p2)  ;;  %vm383_vm1 = vcmask (!%p313_p2), 1039360   ;;  %vm398_vm2 = vcmask (!%p313_p2), 1031168   ;;  %vm413_vm3 = vcmask (!%p313_p2), 900096  }
   0x7   : > { %s1928_s21 = smov (!%p313_p2), 110   ;;  %s1929_s22 = smov (!%p313_p2), 108   ;;  %1549 = vmatprep.mubr.msk.f32.mxu1 (!%p313_p2), %vm1934_vm0, %v1931_v7  ;;  %1775 = vset.pattern.permute.xlu0 (!%p313_p2), %v1935_v8  ;;  %vm428_vm4 = vcmask (!%p313_p2), 891904   ;;  %vm443_vm5 = vcmask (!%p313_p2), 883712   ;;  %vm458_vm6 = vcmask (!%p313_p2), 752640   ;;  %vm473_vm7 = vcmask (!%p313_p2), 744448  }
   0x8   : > { %s1930_s23 = smov (!%p313_p2), 109   ;;  %s1932_s24 = smov (!%p313_p2), 91   ;;  %1846 = vset.pattern.permute.xlu1 (!%p313_p2), %v1935_v8  ;;  %vm488_vm8 = vcmask (!%p313_p2), 736256   ;;  %vm500_vm9 = vcmask (!%p313_p2), 588800   ;;  %vm362_vm10 = vcmask (!%p313_p2), 441488   ;;  %vm360_vm11 = vcmask (!%p313_p2), 293888  }
   0x9   : > { %s1933_s25 = smov (!%p313_p2), 92   ;;  %s1936_s26 = smov (!%p313_p2), 90   ;;  %363 = vst.msk [vmem:[#allocation2 + $0x18] sm:$0xff] (!%p313_p2), %vm362_vm10, %v1931_v7  ;;  %vm673_vm12 = vcmask (!%p313_p2), 154624   ;;  %vm680_vm13 = vcmask (!%p313_p2), 1047704   ;;  %vm692_vm14 = vcmask (!%p313_p2), 64512  }
   0xa   : > { %361 = vst.msk [vmem:[#allocation2] sm:$0xff] (!%p313_p2), %vm360_vm11, %v1931_v7 }
   0xd   : > { %s2291_s14 = smov (!%p350_p3, %s1480_s14), 1 }
   0xe   : > { %s1498_s15 = sshll.u32 %s2291_s14, 5 }
   0xf   : > { %s354_s18 = scalar_lea.vmem %s2279_s0, %s1498_s15  ;;  %s1937_s15 = smov 19  }
  0x10   : > { %v368_v1 = vld [vmem:[%s354_s18 + $0x8] sm:$0xff]  ;;  %v2008_v2 = vld [vmem:[%s354_s18 + $0x10] sm:$0xff]  ;;  %v2010_v3 = vld [vmem:[%s354_s18] sm:$0xff] }
  0x11   : > { %v1715_v4 = vpack.i.bf16 %v2008_v2, %v368_v1  ;;  %v370_v5 = vld [vmem:[%s354_s18 + $0x18] sm:$0xff] }
  0x12   : > { %v1710_v6 = vpack.i.bf16 %v370_v5, %v2010_v3 }
  0x13   : > { %1716 = vrot.lane.b32.xlu1 %v1715_v4, %s1926_s19  ;;  %1706 = vrot.lane.b32.xlu0 %v1715_v4, %s1927_s20 }
  0x17   : > { %1721 = vrot.lane.b32.xlu1 %v1715_v4, %s1928_s21  ;;  %1711 = vrot.lane.b32.xlu0 %v1710_v6, %s1927_s20 }
  0x1b   : > { %1731 = vrot.lane.b32.xlu1 %v1710_v6, %s1928_s21  ;;  %1726 = vrot.lane.b32.xlu0 %v1710_v6, %s1926_s19 }
  0x1f   : > { %1741 = vrot.lane.b32.xlu1 %v1715_v4, %s1929_s22  ;;  %1736 = vrot.lane.b32.xlu0 %v1715_v4, %s1930_s23 }
  0x23   : > { %1751 = vrot.lane.b32.xlu1 %v1710_v6, %s1929_s22  ;;  %1746 = vrot.lane.b32.xlu0 %v1710_v6, %s1930_s23 }
  0x27   : > { %1761 = vrot.lane.b32.xlu1 %v1715_v4, %s1932_s24  ;;  %1756 = vrot.lane.b32.xlu0 %v1715_v4, %s1933_s25 }
  0x2b   : > { %1771 = vrot.lane.b32.xlu1 %v1710_v6, %s1932_s24  ;;  %1766 = vrot.lane.b32.xlu0 %v1710_v6, %s1933_s25 }
  0x2f   : > { %484 = vrot.lane.b32.xlu1 %v2008_v2, %s1936_s26  ;;  %482 = vrot.lane.b32.xlu0 %v368_v1, %s1936_s26 }
  0x33   : > { %486 = vrot.lane.b32.xlu1 %v370_v5, %s1936_s26  ;;  %480 = vrot.lane.b32.xlu0 %v2010_v3, %s1936_s26 }
  0x37   : > { %497 = vperm.xlu0 %1775, %v366_v9  }
  0x85   : > { %v1717_v10 = vpop.permute.xlu1 %1716  ;;  %v1707_v11 = vpop.permute.xlu0 %1706 }
  0x86   : > { %v1709_v12 = vunpack.i.h.bf16 %v1707_v11  ;;  %v1708_v13 = vunpack.i.l.bf16 %v1707_v11  ;;  %v1719_v14 = vunpack.i.h.bf16 %v1717_v10  ;;  %v1718_v15 = vunpack.i.l.bf16 %v1717_v10 }
  0x88   : > { %v385_v16 = vsel %vm383_vm1, %v1708_v13, %v1709_v12  ;;  %v400_v26 = vsel %vm398_vm2, %v1718_v15, %v1719_v14 }
  0x89   : > { %v1722_v17 = vpop.permute.xlu1 %1721  ;;  %v1712_v18 = vpop.permute.xlu0 %1711  ;;  %v1599_v19 = vpack.c.bf16 %v385_v16, %v368_v1 }
  0x8a   : > { %v1724_v20 = vunpack.i.h.bf16 %v1722_v17  ;;  %v1723_v21 = vunpack.i.l.bf16 %v1722_v17  ;;  %v1714_v22 = vunpack.i.h.bf16 %v1712_v18  ;;  %v1713_v23 = vunpack.i.l.bf16 %v1712_v18 }
  0x8b   : > { %1600 = vmatprep.subr.bf16.mxu0 %v1599_v19 }
  0x8c   : > { %v384_v24 = vsel %vm383_vm1, %v1713_v23, %v1708_v13  ;;  %v386_v25 = vsel %vm383_vm1, %v1709_v12, %v1714_v22  ;;  %v415_v27 = vsel %vm413_vm3, %v1723_v21, %v1724_v20 }
  0x8d   : > { %v1732_v28 = vpop.permute.xlu1 %1731  ;;  %v1727_v29 = vpop.permute.xlu0 %1726  ;;  %v1601_v30 = vpack.c.bf16 %v384_v24, %v2010_v3  ;;  %v1616_v31 = vpack.c.bf16 %v386_v25, %v2008_v2  ;;  %v1603_v32 = vpack.c.bf16 %v415_v27, %v400_v26 }
  0x8e   : > { %v1734_v33 = vunpack.i.h.bf16 %v1732_v28  ;;  %v1733_v34 = vunpack.i.l.bf16 %v1732_v28  ;;  %v1729_v35 = vunpack.i.h.bf16 %v1727_v29  ;;  %v1728_v36 = vunpack.i.l.bf16 %v1727_v29  ;;  %v365_v28 = vld [vmem:[%s2281_s2] sm:$0xff] }
  0x8f   : > { %1602 = vmatpush1.bf16.msra.mxu0 %v1601_v30  ;;  %1617 = vmatpush3.bf16.msra.mxu1 %v1616_v31  ;;  %v646_v31 = vlaneseq }
  0x90   : > { %1604 = vmatprep.subr.bf16.mxu0 %v1603_v32  ;;  %1618 = vmatprep.subr.bf16.mxu1 %v1925_v0  ;;  %v399_v37 = vsel %vm398_vm2, %v1728_v36, %v1718_v15  ;;  %v414_v38 = vsel %vm413_vm3, %v1733_v34, %v1723_v21  ;;  %v401_v39 = vsel %vm398_vm2, %v1719_v14, %v1729_v35  ;;  %v364_v35 = vld [vmem:[%s2280_s1] sm:$0x7] }
  0x91   : > { %v1742_v40 = vpop.permute.xlu1 %1741  ;;  %v1737_v41 = vpop.permute.xlu0 %1736  ;;  %v1605_v42 = vpack.c.bf16 %v414_v38, %v399_v37  ;;  %v416_v43 = vsel %vm413_vm3, %v1724_v20, %v1734_v33  ;;  %v647_v32 = vshrl.u32 %v646_v31, 7 }
  0x92   : > { %v1744_v44 = vunpack.i.h.bf16 %v1742_v40  ;;  %v1743_v45 = vunpack.i.l.bf16 %v1742_v40  ;;  %v1739_v46 = vunpack.i.h.bf16 %v1737_v41  ;;  %v1738_v47 = vunpack.i.l.bf16 %v1737_v41 }
  0x93   : > { %1606 = vmatpush1.bf16.msra.mxu0 %v1605_v42  ;;  %v1619_v48 = vpack.c.bf16 %v416_v43, %v401_v39  ;;  %v648_v33 = vsub.s32 0, %v647_v32  ;;  %v656_v34 = vsub.s32 2, %v647_v32  ;;  %v652_v36 = vsub.s32 1, %v647_v32 }
  0x94   : > { %v430_v49 = vsel %vm428_vm4, %v1738_v47, %v1739_v46  ;;  %v445_v50 = vsel %vm443_vm5, %v1743_v45, %v1744_v44 }
  0x95   : > { %1620 = vmatpush3.bf16.msra.mxu1 %v1619_v48  ;;  %v1752_v51 = vpop.permute.xlu1 %1751  ;;  %v1747_v52 = vpop.permute.xlu0 %1746  ;;  %v1607_v53 = vpack.c.bf16 %v445_v50, %v430_v49  ;;  %v2084_v38 = vrot.slane %v364_v35, %v648_v33  ;;  %v2086_v39 = vrot.slane %v364_v35, %v656_v34  ;;  %v2088_v42 = vrot.slane %v364_v35, %v652_v36 }
  0x96   : > { %v1754_v54 = vunpack.i.h.bf16 %v1752_v51  ;;  %v1753_v55 = vunpack.i.l.bf16 %v1752_v51  ;;  %v1749_v56 = vunpack.i.h.bf16 %v1747_v52  ;;  %v1748_v57 = vunpack.i.l.bf16 %v1747_v52  ;;  %1621 = vmatprep.subr.bf16.mxu1 %v1925_v0 }
  0x97   : > { %1608 = vmatprep.subr.bf16.mxu0 %v1607_v53 }
  0x98   : > { %v429_v58 = vsel %vm428_vm4, %v1748_v57, %v1738_v47  ;;  %v444_v59 = vsel %vm443_vm5, %v1753_v55, %v1743_v45  ;;  %v431_v60 = vsel %vm428_vm4, %v1739_v46, %v1749_v56  ;;  %v446_v61 = vsel %vm443_vm5, %v1744_v44, %v1754_v54  ;;  %v685_v57 = vld [vmem:[%s2287_s8] sm:$0xff] }
  0x99   : > { %v1762_v62 = vpop.permute.xlu1 %1761  ;;  %v1757_v63 = vpop.permute.xlu0 %1756  ;;  %v1609_v1 = vpack.c.bf16 %v444_v59, %v429_v58  ;;  %v1622_v2 = vpack.c.bf16 %v446_v61, %v431_v60  ;;  %v838_v61 = vld [vmem:[%s2284_s5] sm:$0xff] }
  0x9a   : > { %v1764_v3 = vunpack.i.h.bf16 %v1762_v62  ;;  %v1763_v4 = vunpack.i.l.bf16 %v1762_v62  ;;  %v1759_v5 = vunpack.i.h.bf16 %v1757_v63  ;;  %v1758_v6 = vunpack.i.l.bf16 %v1757_v63 }
  0x9b   : > { %1610 = vmatpush1.bf16.msra.mxu0 %v1609_v1  ;;  %1623 = vmatpush3.bf16.msra.mxu1 %v1622_v2 }
  0x9c   : > { %v460_v8 = vsel %vm458_vm6, %v1758_v6, %v1759_v5  ;;  %v475_v9 = vsel %vm473_vm7, %v1763_v4, %v1764_v3  ;;  %1624 = vmatprep.subr.bf16.mxu1 %v1925_v0 }
  0x9d   : > { %v1772_v10 = vpop.permute.xlu1 %1771  ;;  %v1767_v11 = vpop.permute.xlu0 %1766  ;;  %v1611_v12 = vpack.c.bf16 %v475_v9, %v460_v8 }
  0x9e   : > { %v1774_v13 = vunpack.i.h.bf16 %v1772_v10  ;;  %v1773_v14 = vunpack.i.l.bf16 %v1772_v10  ;;  %v1769_v15 = vunpack.i.h.bf16 %v1767_v11  ;;  %v1768_v16 = vunpack.i.l.bf16 %v1767_v11 }
  0x9f   : > { %1612 = vmatprep.subr.bf16.mxu0 %v1611_v12 }
  0xa0   : > { %v459_v17 = vsel %vm458_vm6, %v1768_v16, %v1758_v6  ;;  %v474_v18 = vsel %vm473_vm7, %v1773_v14, %v1763_v4  ;;  %v461_v19 = vsel %vm458_vm6, %v1759_v5, %v1769_v15  ;;  %v476_v20 = vsel %vm473_vm7, %v1764_v3, %v1774_v13 }
  0xa1   : > { %v485_v21 = vpop.permute.xlu1 %484  ;;  %v483_v22 = vpop.permute.xlu0 %482  ;;  %v1613_v23 = vpack.c.bf16 %v474_v18, %v459_v17  ;;  %v1625_v24 = vpack.c.bf16 %v476_v20, %v461_v19 }
  0xa2   : > { %v490_v25 = vsel %vm488_vm8, %v483_v22, %v485_v21 }
  0xa3   : > { %1614 = vmatpush1.bf16.msra.mxu0 %v1613_v23  ;;  %1626 = vmatpush3.bf16.msra.mxu1 %v1625_v24 }
  0xa4   : > { %520 = vmatprep.subr.mxu0 %v490_v25  ;;  %1547 = vmatprep.subr.mxu1 %v1931_v7 }
  0xa5   : > { %v487_v26 = vpop.permute.xlu1 %486  ;;  %v481_v27 = vpop.permute.xlu0 %480 }
  0xa6   : > { %v489_v29 = vsel %vm488_vm8, %v481_v27, %v483_v22  ;;  %v491_v30 = vsel %vm488_vm8, %v485_v21, %v487_v26 }
  0xa7   : > { %521 = vmatpush1.msra.mxu0 %v489_v29  ;;  %1548 = vmatpush3.msra.mxu1 %v491_v30 }
  0xa8   : > { %1488 = vmatmul.mubr.msk.f32.vlgmr.msra.gmra.mrb[0].mxu0 %vm500_vm9, %v365_v28  ;;  %1550 = vmatmul.mubr.msk.f32.vlgmr.msra.gmra.mrb[0].mxu1 %vm500_vm9, %v365_v28 }
  0xa9   : > { %1552 = vmatprep.subr.mxu1 %v1931_v7  ;;  %760 = vmatprep.mubr.f32.mxu0 %v1931_v7 }
  0xaa   : > { %1554 = vmatprep.mubr.msk.f32.mxu1 %vm1934_vm0, %v1931_v7 }
  0xb6   : > { %v498_v37 = vpop.permute.xlu0 %497 }
 0x17b   : > { %v570_v40 = vpop.f32.mrb[0].mxu0  ;;  %v641_v41 = vpop.f32.mrb[0].mxu1 }
 0x17c   : > { %v571_v43 = vadd.f32 %v570_v40, %v498_v37  ;;  %v642_v44 = vadd.f32 %v641_v41, %v498_v37  ;;  %v572_v45 = vpop.f32.mrb[1].mxu0  ;;  %v1551_v46 = vpop.f32.mrb[1].mxu1 }
 0x17d   : > { %v573_v47 = vadd.f32 %v572_v45, %v498_v37 }
 0x17e   : > { %v661_v48 = vmul.f32 %v2084_v38, %v571_v43  ;;  %v663_v49 = vmul.f32 %v2086_v39, %v642_v44 }
 0x17f   : > { %v662_v50 = vmul.f32 %v2088_v42, %v573_v47 }
 0x180   : > { %671 = vrot.lane.b32.xlu0 %v663_v49, %s1937_s15  ;;  %1553 = vmatpush3.msra.mxu1 %v663_v49 }
 0x181   : > { %667 = vrot.lane.b32.xlu1 %v661_v48, %s1937_s15  ;;  %696 = vmatprep.subr.mxu0 %v662_v50 }
 0x182   : > { %697 = vmatpush1.msra.mxu0 %v661_v48  ;;  %1643 = vmatprep.subr.bf16.mxu1 %v1925_v0 }
 0x183   : > { %1490 = vmatmul.mubr.msk.f32.vlgmr.msra.gmra.mrb[2].mxu0 %vm692_vm14, %v685_v57  ;;  %1555 = vmatmul.mubr.msk.f32.vlgmr.msra.gmra.mrb[2].mxu1 %vm692_vm14, %v685_v57 }
 0x184   : > { %1575 = vmatprep.mubr.msk.f32.mxu1 %vm1934_vm0, %v1931_v7  ;;  %1031 = vmatprep.mubr.f32.mxu0 %v1931_v7 }
 0x185   : > { %669 = vrot.lane.b32.xlu1 %v662_v50, %s1937_s15 }
 0x1f2   : > { %v672_v51 = vpop.permute.xlu0 %671 }
 0x1f3   : > { %684 = vst.msk [vmem:[#allocation2 + $0x18] sm:$0xff] %vm673_vm12, %v672_v51  ;;  %v668_v52 = vpop.permute.xlu1 %667 }
 0x1f4   : > { %681 = vst.msk [vmem:[#allocation2] sm:$0xff] %vm680_vm13, %v668_v52 }
 0x1f7   : > { %v670_v56 = vpop.permute.xlu1 %669 }
 0x1f8   : > { %v674_v58 = vsel %vm673_vm12, %v668_v52, %v670_v56  ;;  %v675_v59 = vsel %vm673_vm12, %v670_v56, %v672_v51 }
 0x1f9   : > { %v1811_v60 = vpack.i.bf16 %v675_v59, %v674_v58 }
 0x1fa   : > { %v842_v53 = vld [vmem:[#allocation2 + $0x18] sm:$0xff] }
 0x1fb   : > { %v2099_v54 = vld [vmem:[#allocation2] sm:$0xff] }
 0x1fc   : > { %v1781_v55 = vpack.i.bf16 %v842_v53, %v2099_v54 }
 0x1fe   : > { %1782 = vrot.lane.b32.xlu1 %v1781_v55, %s1926_s19  ;;  %1777 = vrot.lane.b32.xlu0 %v1781_v55, %s1927_s20 }
 0x202   : > { %1792 = vrot.lane.b32.xlu1 %v1781_v55, %s1930_s23  ;;  %1787 = vrot.lane.b32.xlu0 %v1781_v55, %s1928_s21 }
 0x206   : > { %1802 = vrot.lane.b32.xlu1 %v1781_v55, %s1933_s25  ;;  %1797 = vrot.lane.b32.xlu0 %v1781_v55, %s1929_s22 }
 0x20a   : > { %1807 = vrot.lane.b32.xlu0 %v1781_v55, %s1932_s24  ;;  %1812 = vrot.lane.b32.xlu1 %v1811_v60, %s1927_s20 }
 0x20e   : > { %1822 = vrot.lane.b32.xlu0 %v1811_v60, %s1928_s21  ;;  %1817 = vrot.lane.b32.xlu1 %v1811_v60, %s1926_s19 }
 0x212   : > { %1832 = vrot.lane.b32.xlu0 %v1811_v60, %s1929_s22  ;;  %1827 = vrot.lane.b32.xlu1 %v1811_v60, %s1930_s23 }
 0x216   : > { %1842 = vrot.lane.b32.xlu0 %v1811_v60, %s1932_s24  ;;  %1837 = vrot.lane.b32.xlu1 %v1811_v60, %s1933_s25 }
 0x21a   : > { %949 = vrot.lane.b32.xlu0 %v675_v59, %s1936_s26  ;;  %947 = vrot.lane.b32.xlu1 %v674_v58, %s1936_s26 }
 0x21e   : > { %951 = vrot.lane.b32.xlu0 %v842_v53, %s1936_s26  ;;  %945 = vrot.lane.b32.xlu1 %v2099_v54, %s1936_s26 }
 0x222   : > { %961 = vperm.xlu1 %1846, %v838_v61  }
 0x270   : > { %v1778_v62 = vpop.permute.xlu0 %1777  ;;  %v1783_v63 = vpop.permute.xlu1 %1782 }
 0x271   : > { %v1780_v8 = vunpack.i.h.bf16 %v1778_v62  ;;  %v1779_v9 = vunpack.i.l.bf16 %v1778_v62  ;;  %v1785_v12 = vunpack.i.h.bf16 %v1783_v63  ;;  %v1784_v13 = vunpack.i.l.bf16 %v1783_v63 }
 0x274   : > { %v1788_v1 = vpop.permute.xlu0 %1787  ;;  %v1793_v2 = vpop.permute.xlu1 %1792 }
 0x275   : > { %v1790_v14 = vunpack.i.h.bf16 %v1788_v1  ;;  %v1789_v15 = vunpack.i.l.bf16 %v1788_v1  ;;  %v1795_v19 = vunpack.i.h.bf16 %v1793_v2  ;;  %v1794_v29 = vunpack.i.l.bf16 %v1793_v2 }
 0x278   : > { %v1798_v3 = vpop.permute.xlu0 %1797  ;;  %v2132_v4 = vpop.permute.xlu1 %1802 }
 0x279   : > { %v1800_v30 = vunpack.i.h.bf16 %v1798_v3  ;;  %v1799_v31 = vunpack.i.l.bf16 %v1798_v3  ;;  %v1805_v32 = vunpack.i.h.bf16 %v2132_v4  ;;  %v1804_v50 = vunpack.i.l.bf16 %v2132_v4 }
 0x27c   : > { %v2134_v5 = vpop.permute.xlu0 %1807  ;;  %v1813_v6 = vpop.permute.xlu1 %1812 }
 0x27d   : > { %v1815_v10 = vunpack.i.h.bf16 %v1813_v6  ;;  %v1814_v11 = vunpack.i.l.bf16 %v1813_v6  ;;  %v1810_v51 = vunpack.i.h.bf16 %v2134_v5  ;;  %v1809_v52 = vunpack.i.l.bf16 %v2134_v5 }
 0x27f   : > { %v857_v16 = vsel %vm383_vm1, %v1815_v10, %v1780_v8  ;;  %v855_v17 = vsel %vm383_vm1, %v1779_v9, %v1814_v11  ;;  %v856_v18 = vsel %vm383_vm1, %v1814_v11, %v1815_v10 }
 0x280   : > { %v1644_v20 = vpack.c.bf16 %v857_v16, %v675_v59  ;;  %v1629_v21 = vpack.c.bf16 %v855_v17, %v2099_v54  ;;  %v1823_v22 = vpop.permute.xlu0 %1822  ;;  %v1818_v23 = vpop.permute.xlu1 %1817  ;;  %v1627_v24 = vpack.c.bf16 %v856_v18, %v674_v58 }
 0x281   : > { %v1825_v25 = vunpack.i.h.bf16 %v1823_v22  ;;  %v1824_v26 = vunpack.i.l.bf16 %v1823_v22  ;;  %v1820_v27 = vunpack.i.h.bf16 %v1818_v23  ;;  %v1819_v28 = vunpack.i.l.bf16 %v1818_v23 }
 0x282   : > { %1628 = vmatprep.subr.bf16.mxu0 %v1627_v24  ;;  %1645 = vmatpush3.bf16.msra.mxu1 %v1644_v20  ;;  %v837_v20 = vld [vmem:[%s2283_s4] sm:$0xff]  ;;  %v2178_v24 = vpop.f32.mrb[2].mxu0 }
 0x283   : > { %v885_v33 = vsel %vm413_vm3, %v1825_v25, %v1790_v14  ;;  %v883_v34 = vsel %vm413_vm3, %v1789_v15, %v1824_v26  ;;  %v869_v35 = vsel %vm398_vm2, %v1784_v13, %v1819_v28  ;;  %v871_v36 = vsel %vm398_vm2, %v1820_v27, %v1785_v12  ;;  %1630 = vmatpush1.bf16.msra.mxu0 %v1629_v21 }
 0x284   : > { %v1633_v37 = vpack.c.bf16 %v883_v34, %v869_v35  ;;  %v1647_v40 = vpack.c.bf16 %v885_v33, %v871_v36  ;;  %v1833_v41 = vpop.permute.xlu0 %1832  ;;  %v1828_v43 = vpop.permute.xlu1 %1827  ;;  %1646 = vmatprep.subr.bf16.mxu1 %v1925_v0  ;;  %v870_v44 = vsel %vm398_vm2, %v1819_v28, %v1820_v27  ;;  %v884_v45 = vsel %vm413_vm3, %v1824_v26, %v1825_v25 }
 0x285   : > { %v1835_v46 = vunpack.i.h.bf16 %v1833_v41  ;;  %v1834_v47 = vunpack.i.l.bf16 %v1833_v41  ;;  %v1830_v48 = vunpack.i.h.bf16 %v1828_v43  ;;  %v1829_v49 = vunpack.i.l.bf16 %v1828_v43  ;;  %v2180_v25 = vpop.f32.mrb[2].mxu1  ;;  %v2182_v26 = vpop.f32.mrb[3].mxu0 }
 0x286   : > { %v1631_v53 = vpack.c.bf16 %v884_v45, %v870_v44  ;;  %1648 = vmatpush3.bf16.msra.mxu1 %v1647_v40  ;;  %v1556_v27 = vpop.f32.mrb[3].mxu1 }
 0x287   : > { %v913_v54 = vsel %vm443_vm5, %v1835_v46, %v1800_v30  ;;  %v911_v55 = vsel %vm443_vm5, %v1799_v31, %v1834_v47  ;;  %v897_v56 = vsel %vm428_vm4, %v1794_v29, %v1829_v49  ;;  %v899_v57 = vsel %vm428_vm4, %v1830_v48, %v1795_v19  ;;  %1649 = vmatprep.subr.bf16.mxu1 %v1925_v0 }
 0x288   : > { %v1637_v58 = vpack.c.bf16 %v911_v55, %v897_v56  ;;  %v1650_v59 = vpack.c.bf16 %v913_v54, %v899_v57  ;;  %1632 = vmatprep.subr.bf16.mxu0 %v1631_v53  ;;  %v1843_v60 = vpop.permute.xlu0 %1842  ;;  %v1838_v61 = vpop.permute.xlu1 %1837  ;;  %v898_v62 = vsel %vm428_vm4, %v1829_v49, %v1830_v48  ;;  %v912_v63 = vsel %vm443_vm5, %v1834_v47, %v1835_v46  ;;  %v686_v54 = vld [vmem:[%s2288_s9] sm:$0xff] }
 0x289   : > { %1634 = vmatpush1.bf16.msra.mxu0 %v1633_v37  ;;  %v1845_v1 = vunpack.i.h.bf16 %v1843_v60  ;;  %v1844_v2 = vunpack.i.l.bf16 %v1843_v60  ;;  %v1840_v3 = vunpack.i.h.bf16 %v1838_v61  ;;  %v1839_v4 = vunpack.i.l.bf16 %v1838_v61  ;;  %v1140_v55 = vld [vmem:[%s2286_s7] sm:$0xff] }
 0x28a   : > { %v1635_v5 = vpack.c.bf16 %v912_v63, %v898_v62  ;;  %1651 = vmatpush3.bf16.msra.mxu1 %v1650_v59 }
 0x28b   : > { %v941_v6 = vsel %vm473_vm7, %v1845_v1, %v1810_v51  ;;  %v939_v8 = vsel %vm473_vm7, %v1809_v52, %v1844_v2  ;;  %v925_v9 = vsel %vm458_vm6, %v1804_v50, %v1839_v4  ;;  %v927_v10 = vsel %vm458_vm6, %v1840_v3, %v1805_v32  ;;  %1652 = vmatprep.subr.bf16.mxu1 %v1925_v0 }
 0x28c   : > { %v1653_v11 = vpack.c.bf16 %v941_v6, %v927_v10  ;;  %1636 = vmatprep.subr.bf16.mxu0 %v1635_v5  ;;  %v950_v12 = vpop.permute.xlu0 %949  ;;  %v948_v13 = vpop.permute.xlu1 %947  ;;  %v926_v14 = vsel %vm458_vm6, %v1839_v4, %v1840_v3  ;;  %v940_v15 = vsel %vm473_vm7, %v1844_v2, %v1845_v1  ;;  %v1641_v16 = vpack.c.bf16 %v939_v8, %v925_v9 }
 0x28d   : > { %1638 = vmatpush1.bf16.msra.mxu0 %v1637_v58  ;;  %v1639_v17 = vpack.c.bf16 %v940_v15, %v926_v14  ;;  %v954_v22 = vsel %vm488_vm8, %v948_v13, %v950_v12 }
 0x28e   : > { %1654 = vmatpush3.bf16.msra.mxu1 %v1653_v11 }
 0x28f   : > { %1640 = vmatprep.subr.bf16.mxu0 %v1639_v17  ;;  %1573 = vmatprep.subr.mxu1 %v1931_v7 }
 0x290   : > { %v952_v18 = vpop.permute.xlu0 %951  ;;  %v946_v19 = vpop.permute.xlu1 %945 }
 0x291   : > { %1642 = vmatpush1.bf16.msra.mxu0 %v1641_v16  ;;  %v955_v21 = vsel %vm488_vm8, %v950_v12, %v952_v18  ;;  %v953_v23 = vsel %vm488_vm8, %v946_v19, %v948_v13 }
 0x292   : > { %983 = vmatprep.subr.mxu0 %v954_v22  ;;  %1574 = vmatpush3.msra.mxu1 %v955_v21 }
 0x293   : > { %1576 = vmatmul.mubr.msk.f32.vlgmr.msra.gmra.mrb[4].mxu1 %vm500_vm9, %v837_v20  ;;  %1671 = vmatprep.subr.bf16.mxu1 %v1925_v0 }
 0x294   : > { %1596 = vmatprep.mubr.msk.f32.mxu1 %vm1934_vm0, %v1931_v7 }
 0x295   : > { %984 = vmatpush1.msra.mxu0 %v953_v23 }
 0x296   : > { %1492 = vmatmul.mubr.msk.f32.vlgmr.msra.gmra.mrb[4].mxu0 %vm500_vm9, %v837_v20 }
 0x297   : > { %1333 = vmatprep.mubr.f32.mxu0 %v1931_v7 }
 0x2a1   : > { %v962_v28 = vpop.permute.xlu1 %961 }
 0x366   : > { %v1104_v29 = vpop.f32.mrb[4].mxu1 }
 0x367   : > { %v1577_v30 = vpop.f32.mrb[5].mxu1  ;;  %v1105_v31 = vadd.f32 %v1104_v29, %v962_v28 }
 0x369   : > { %v1033_v32 = vpop.f32.mrb[4].mxu0  ;;  %v1113_v36 = vmul.f32 0.1, %v1105_v31  ;;  %vm1110_vm0 = vcmp.ge.f32.partialorder %v1105_v31, 0.0 }
 0x36a   : > { %v1034_v33 = vadd.f32 %v1033_v32, %v962_v28  ;;  %v1035_v34 = vpop.f32.mrb[5].mxu0 }
 0x36b   : > { %v1036_v35 = vadd.f32 %v1035_v34, %v962_v28  ;;  %v1116_v46 = vsel %vm1110_vm0, %v1105_v31, %v1113_v36 }
 0x36c   : > { %vm1108_vm15 = vcmp.ge.f32.partialorder %v1034_v33, 0.0  ;;  %v1111_v37 = vmul.f32 0.1, %v1034_v33  ;;  %v1119_v47 = vmul.f32 %v1116_v46, %v2086_v39 }
 0x36d   : > { %vm1109_vm10 = vcmp.ge.f32.partialorder %v1036_v35, 0.0  ;;  %v1112_v40 = vmul.f32 0.1, %v1036_v35 }
 0x36e   : > { %v1114_v41 = vsel %vm1108_vm15, %v1034_v33, %v1111_v37 }
 0x36f   : > { %v1117_v43 = vmul.f32 %v1114_v41, %v2084_v38  ;;  %v1115_v44 = vsel %vm1109_vm10, %v1036_v35, %v1112_v40 }
 0x370   : > { %v1118_v45 = vmul.f32 %v1115_v44, %v2088_v42 }
 0x371   : > { %1123 = vrot.lane.b32.xlu0 %v1117_v43, %s1937_s15 }
 0x372   : > { %1125 = vrot.lane.b32.xlu1 %v1118_v45, %s1937_s15 }
 0x375   : > { %1127 = vrot.lane.b32.xlu0 %v1119_v47, %s1937_s15 }
 0x3e3   : > { %v1124_v48 = vpop.permute.xlu0 %1123 }
 0x3e4   : > { %1135 = vst.msk [vmem:[#allocation2] sm:$0xff] %vm680_vm13, %v1124_v48  ;;  %v1126_v49 = vpop.permute.xlu1 %1125 }
 0x3e5   : > { %v2192_v50 = vsel %vm673_vm12, %v1124_v48, %v1126_v49 }
 0x3e7   : > { %v1128_v38 = vpop.permute.xlu0 %1127 }
 0x3e8   : > { %v1130_v51 = vsel %vm673_vm12, %v1126_v49, %v1128_v38  ;;  %1138 = vst.msk [vmem:[#allocation2 + $0x18] sm:$0xff] %vm673_vm12, %v1128_v38 }
 0x3e9   : > { %v1882_v39 = vpack.i.bf16 %v1130_v51, %v2192_v50 }
 0x3eb   : > { %v2196_v42 = vld [vmem:[#allocation2] sm:$0xff] }
 0x3ef   : > { %v1144_v52 = vld [vmem:[#allocation2 + $0x18] sm:$0xff] }
 0x3f0   : > { %v1852_v53 = vpack.i.bf16 %v1144_v52, %v2196_v42 }
 0x3f2   : > { %1853 = vrot.lane.b32.xlu1 %v1852_v53, %s1926_s19  ;;  %1848 = vrot.lane.b32.xlu0 %v1852_v53, %s1927_s20 }
 0x3f6   : > { %1863 = vrot.lane.b32.xlu1 %v1852_v53, %s1930_s23  ;;  %1858 = vrot.lane.b32.xlu0 %v1852_v53, %s1928_s21 }
 0x3fa   : > { %1873 = vrot.lane.b32.xlu1 %v1852_v53, %s1933_s25  ;;  %1868 = vrot.lane.b32.xlu0 %v1852_v53, %s1929_s22 }
 0x3fe   : > { %1878 = vrot.lane.b32.xlu0 %v1852_v53, %s1932_s24  ;;  %1883 = vrot.lane.b32.xlu1 %v1882_v39, %s1927_s20 }
 0x402   : > { %1893 = vrot.lane.b32.xlu0 %v1882_v39, %s1928_s21  ;;  %1888 = vrot.lane.b32.xlu1 %v1882_v39, %s1926_s19 }
 0x406   : > { %1903 = vrot.lane.b32.xlu0 %v1882_v39, %s1929_s22  ;;  %1898 = vrot.lane.b32.xlu1 %v1882_v39, %s1930_s23 }
 0x40a   : > { %1913 = vrot.lane.b32.xlu0 %v1882_v39, %s1932_s24  ;;  %1908 = vrot.lane.b32.xlu1 %v1882_v39, %s1933_s25  ;;  %s1683_s25 = smul.u32 24, %s2291_s14 }
 0x40c   : > { %s359_s11 = scalar_lea.vmem %s2289_s10, %s1683_s25 }
 0x40e   : > { %1251 = vrot.lane.b32.xlu0 %v1130_v51, %s1936_s26  ;;  %1249 = vrot.lane.b32.xlu1 %v2192_v50, %s1936_s26 }
 0x412   : > { %1253 = vrot.lane.b32.xlu0 %v1144_v52, %s1936_s26  ;;  %1247 = vrot.lane.b32.xlu1 %v2196_v42, %s1936_s26 }
 0x416   : > { %689 = vperm.xlu0 %1775, %v686_v54   ;;  %1263 = vperm.xlu1 %1846, %v1140_v55  }
 0x464   : > { %v1854_v56 = vpop.permute.xlu1 %1853  ;;  %v1849_v57 = vpop.permute.xlu0 %1848 }
 0x465   : > { %v1851_v1 = vunpack.i.h.bf16 %v1849_v57  ;;  %v1850_v2 = vunpack.i.l.bf16 %v1849_v57  ;;  %v1856_v5 = vunpack.i.h.bf16 %v1854_v56  ;;  %v1855_v6 = vunpack.i.l.bf16 %v1854_v56 }
 0x468   : > { %v1864_v58 = vpop.permute.xlu1 %1863  ;;  %v1859_v59 = vpop.permute.xlu0 %1858 }
 0x469   : > { %v1866_v8 = vunpack.i.h.bf16 %v1864_v58  ;;  %v1861_v9 = vunpack.i.h.bf16 %v1859_v59  ;;  %v1860_v13 = vunpack.i.l.bf16 %v1859_v59  ;;  %v1865_v23 = vunpack.i.l.bf16 %v1864_v58 }
 0x46c   : > { %v2226_v60 = vpop.permute.xlu1 %1873  ;;  %v1869_v61 = vpop.permute.xlu0 %1868 }
 0x46d   : > { %v1876_v27 = vunpack.i.h.bf16 %v2226_v60  ;;  %v1871_v28 = vunpack.i.h.bf16 %v1869_v61  ;;  %v1870_v29 = vunpack.i.l.bf16 %v1869_v61  ;;  %v1875_v47 = vunpack.i.l.bf16 %v2226_v60 }
 0x470   : > { %v2228_v62 = vpop.permute.xlu0 %1878  ;;  %v1884_v63 = vpop.permute.xlu1 %1883 }
 0x471   : > { %v1886_v3 = vunpack.i.h.bf16 %v1884_v63  ;;  %v1885_v4 = vunpack.i.l.bf16 %v1884_v63  ;;  %v1881_v48 = vunpack.i.h.bf16 %v2228_v62  ;;  %v1880_v49 = vunpack.i.l.bf16 %v2228_v62 }
 0x473   : > { %v1159_v10 = vsel %vm383_vm1, %v1886_v3, %v1851_v1  ;;  %v1157_v11 = vsel %vm383_vm1, %v1850_v2, %v1885_v4  ;;  %v1158_v12 = vsel %vm383_vm1, %v1885_v4, %v1886_v3 }
 0x474   : > { %v1672_v14 = vpack.c.bf16 %v1159_v10, %v1130_v51  ;;  %v1657_v15 = vpack.c.bf16 %v1157_v11, %v2196_v42  ;;  %v1894_v16 = vpop.permute.xlu0 %1893  ;;  %v1889_v17 = vpop.permute.xlu1 %1888  ;;  %v1655_v18 = vpack.c.bf16 %v1158_v12, %v2192_v50 }
 0x475   : > { %v1896_v19 = vunpack.i.h.bf16 %v1894_v16  ;;  %v1895_v20 = vunpack.i.l.bf16 %v1894_v16  ;;  %v1891_v21 = vunpack.i.h.bf16 %v1889_v17  ;;  %v1890_v22 = vunpack.i.l.bf16 %v1889_v17 }
 0x476   : > { %1656 = vmatprep.subr.bf16.mxu0 %v1655_v18  ;;  %1673 = vmatpush3.bf16.msra.mxu1 %v1672_v14 }
 0x477   : > { %v1187_v30 = vsel %vm413_vm3, %v1896_v19, %v1861_v9  ;;  %v1185_v31 = vsel %vm413_vm3, %v1860_v13, %v1895_v20  ;;  %v1173_v32 = vsel %vm398_vm2, %v1891_v21, %v1856_v5  ;;  %v1171_v33 = vsel %vm398_vm2, %v1855_v6, %v1890_v22  ;;  %1658 = vmatpush1.bf16.msra.mxu0 %v1657_v15 }
 0x478   : > { %v1675_v34 = vpack.c.bf16 %v1187_v30, %v1173_v32  ;;  %v1661_v35 = vpack.c.bf16 %v1185_v31, %v1171_v33  ;;  %v1904_v36 = vpop.permute.xlu0 %1903  ;;  %v1899_v37 = vpop.permute.xlu1 %1898  ;;  %1674 = vmatprep.subr.bf16.mxu1 %v1925_v0  ;;  %v1172_v40 = vsel %vm398_vm2, %v1890_v22, %v1891_v21  ;;  %v1186_v41 = vsel %vm413_vm3, %v1895_v20, %v1896_v19 }
 0x479   : > { %v1906_v43 = vunpack.i.h.bf16 %v1904_v36  ;;  %v1905_v44 = vunpack.i.l.bf16 %v1904_v36  ;;  %v1901_v45 = vunpack.i.h.bf16 %v1899_v37  ;;  %v1900_v46 = vunpack.i.l.bf16 %v1899_v37 }
 0x47a   : > { %v1659_v50 = vpack.c.bf16 %v1186_v41, %v1172_v40  ;;  %1676 = vmatpush3.bf16.msra.mxu1 %v1675_v34 }
 0x47b   : > { %v1215_v38 = vsel %vm443_vm5, %v1906_v43, %v1871_v28  ;;  %v1213_v51 = vsel %vm443_vm5, %v1870_v29, %v1905_v44  ;;  %v1201_v42 = vsel %vm428_vm4, %v1901_v45, %v1866_v8  ;;  %v1199_v52 = vsel %vm428_vm4, %v1865_v23, %v1900_v46  ;;  %1677 = vmatprep.subr.bf16.mxu1 %v1925_v0 }
 0x47c   : > { %v1678_v53 = vpack.c.bf16 %v1215_v38, %v1201_v42  ;;  %v1665_v39 = vpack.c.bf16 %v1213_v51, %v1199_v52  ;;  %1660 = vmatprep.subr.bf16.mxu0 %v1659_v50  ;;  %v1914_v54 = vpop.permute.xlu0 %1913  ;;  %v1909_v55 = vpop.permute.xlu1 %1908  ;;  %v1200_v56 = vsel %vm428_vm4, %v1900_v46, %v1901_v45  ;;  %v1214_v57 = vsel %vm443_vm5, %v1905_v44, %v1906_v43 }
 0x47d   : > { %1662 = vmatpush1.bf16.msra.mxu0 %v1661_v35  ;;  %v1916_v58 = vunpack.i.h.bf16 %v1914_v54  ;;  %v1915_v59 = vunpack.i.l.bf16 %v1914_v54  ;;  %v1911_v60 = vunpack.i.h.bf16 %v1909_v55  ;;  %v1910_v61 = vunpack.i.l.bf16 %v1909_v55 }
 0x47e   : > { %v1663_v62 = vpack.c.bf16 %v1214_v57, %v1200_v56  ;;  %1679 = vmatpush3.bf16.msra.mxu1 %v1678_v53 }
 0x47f   : > { %v1243_v63 = vsel %vm473_vm7, %v1916_v58, %v1881_v48  ;;  %v1241_v1 = vsel %vm473_vm7, %v1880_v49, %v1915_v59  ;;  %v1229_v2 = vsel %vm458_vm6, %v1911_v60, %v1876_v27  ;;  %v1227_v3 = vsel %vm458_vm6, %v1875_v47, %v1910_v61  ;;  %1680 = vmatprep.subr.bf16.mxu1 %v1925_v0  ;;  %v1139_v0 = vld [vmem:[%s2285_s6] sm:$0xff] }
 0x480   : > { %v1681_v4 = vpack.c.bf16 %v1243_v63, %v1229_v2  ;;  %1664 = vmatprep.subr.bf16.mxu0 %v1663_v62  ;;  %v1252_v5 = vpop.permute.xlu0 %1251  ;;  %v1250_v6 = vpop.permute.xlu1 %1249  ;;  %v1228_v8 = vsel %vm458_vm6, %v1910_v61, %v1911_v60  ;;  %v1242_v9 = vsel %vm473_vm7, %v1915_v59, %v1916_v58  ;;  %v1669_v10 = vpack.c.bf16 %v1241_v1, %v1227_v3 }
 0x481   : > { %1666 = vmatpush1.bf16.msra.mxu0 %v1665_v39  ;;  %v1667_v11 = vpack.c.bf16 %v1242_v9, %v1228_v8  ;;  %v1256_v15 = vsel %vm488_vm8, %v1250_v6, %v1252_v5 }
 0x482   : > { %1682 = vmatpush3.bf16.msra.mxu1 %v1681_v4 }
 0x483   : > { %1668 = vmatprep.subr.bf16.mxu0 %v1667_v11  ;;  %1594 = vmatprep.subr.mxu1 %v1931_v7 }
 0x484   : > { %v1254_v12 = vpop.permute.xlu0 %1253  ;;  %v1248_v13 = vpop.permute.xlu1 %1247 }
 0x485   : > { %1670 = vmatpush1.bf16.msra.mxu0 %v1669_v10  ;;  %v1257_v14 = vsel %vm488_vm8, %v1252_v5, %v1254_v12  ;;  %v1255_v16 = vsel %vm488_vm8, %v1248_v13, %v1250_v6 }
 0x486   : > { %1285 = vmatprep.subr.mxu0 %v1256_v15  ;;  %1595 = vmatpush3.msra.mxu1 %v1257_v14 }
 0x487   : > { %1597 = vmatmul.mubr.msk.f32.vlgmr.msra.gmra.mrb[6].mxu1 %vm500_vm9, %v1139_v0 }
 0x489   : > { %1286 = vmatpush1.msra.mxu0 %v1255_v16 }
 0x48a   : > { %1494 = vmatmul.mubr.msk.f32.vlgmr.msra.gmra.mrb[6].mxu0 %vm500_vm9, %v1139_v0 }
 0x495   : > { %v1264_v7 = vpop.permute.xlu1 %1263  ;;  %v690_v18 = vpop.permute.xlu0 %689 }
 0x496   : > { %v834_v23 = vadd.f32 %v2180_v25, %v690_v18  ;;  %v763_v33 = vadd.f32 %v2178_v24, %v690_v18  ;;  %v765_v35 = vadd.f32 %v2182_v26, %v690_v18 }
 0x55a   : > { %v1406_v17 = vpop.f32.mrb[6].mxu1 }
 0x55b   : > { %v1407_v19 = vadd.f32 %v1406_v17, %v1264_v7  ;;  %v1598_v20 = vpop.f32.mrb[7].mxu1 }
 0x55d   : > { %vm1412_vm1 = vcmp.ge.f32.partialorder %v1407_v19, 0.0  ;;  %v1415_v21 = vmul.f32 0.1, %v1407_v19  ;;  %v1335_v22 = vpop.f32.mrb[6].mxu0 }
 0x55e   : > { %v1336_v27 = vadd.f32 %v1335_v22, %v1264_v7  ;;  %v1337_v28 = vpop.f32.mrb[7].mxu0 }
 0x55f   : > { %v1418_v29 = vsel %vm1412_vm1, %v1407_v19, %v1415_v21  ;;  %v1338_v30 = vadd.f32 %v1337_v28, %v1264_v7 }
 0x560   : > { %v1421_v31 = vadd.f32 %v1418_v29, %v834_v23  ;;  %vm1410_vm2 = vcmp.ge.f32.partialorder %v1336_v27, 0.0  ;;  %v1413_v32 = vmul.f32 0.1, %v1336_v27 }
 0x561   : > { %vm1411_vm3 = vcmp.ge.f32.partialorder %v1338_v30, 0.0  ;;  %v1414_v34 = vmul.f32 0.1, %v1338_v30 }
 0x562   : > { %1424 = vst [vmem:[%s359_s11 + $0x10] sm:$0xff] %v1421_v31  ;;  %v1416_v36 = vsel %vm1410_vm2, %v1336_v27, %v1413_v32 }
 0x563   : > { %v1419_v25 = vadd.f32 %v1416_v36, %v763_v33  ;;  %v1417_v37 = vsel %vm1411_vm3, %v1338_v30, %v1414_v34 }
 0x564   : > { %v1420_v40 = vadd.f32 %v1417_v37, %v765_v35 }
 0x565   : > { %1422 = vst [vmem:[%s359_s11] sm:$0xff] %v1419_v25 }
 0x566   : > { %1423 = vst [vmem:[%s359_s11 + $0x8] sm:$0xff] %v1420_v40 }
 0x567 PF: > { %s20_s13 = sadd.s32 1, %s1923_s13  }
 0x568   : > { %p17_p4 = scmp.ge.s32.totalorder %s20_s13, 4  }
 0x56a   :  { %19 = sbr.rel (!%p17_p4) target bundleno = 1 (0x1), region = 90 }

// kernel: illumination_block_pallas.8
= control target key start
LH: loop header
LB: loop body
LE: loop exit
PB: predicated region body
PF: predicated region fallthrough
CT: control target
= control target key end

     0   :  { %s1521_s27 = smov 0   ;;  %s1779_s0 = inlined_call_operand.vmem [shape: f32[2,24,146], index: 0, kind: input, shape index: {}]   ;;  %s1780_s1 = inlined_call_operand.vmem [shape: f32[1,128], index: 1, kind: input, shape index: {}]   ;;  %s1781_s2 = inlined_call_operand.vmem [shape: f32[24,216], index: 2, kind: input, shape index: {}]   ;;  %s1782_s3 = inlined_call_operand.vmem [shape: f32[24,1], index: 3, kind: input, shape index: {}]   ;;  %s1783_s4 = inlined_call_operand.vmem [shape: f32[24,216], index: 4, kind: input, shape index: {}]   ;;  %s1784_s5 = inlined_call_operand.vmem [shape: f32[24,1], index: 5, kind: input, shape index: {}]   ;;  %s1785_s6 = inlined_call_operand.vmem [shape: f32[24,24], index: 6, kind: input, shape index: {}]   ;;  %s1786_s7 = inlined_call_operand.vmem [shape: f32[24,1], index: 7, kind: input, shape index: {}]   ;;  %s1787_s8 = inlined_call_operand.vmem [shape: f32[2,24,128], index: 8, kind: output, shape index: {}]  }
   0x1 LB: > { %s1084_s28 = sadd.s32 4294967295, %s1461_s27   ;;  %p1088_p0 = scmp.ge.s32.totalorder %s1461_s27, 1  ;;  %s1461_s27 = sphi %s1521_s27, %s18_s27  }
   0x2   : > { %p262_p1 = scmp.lt.s32.totalorder %s1461_s27, 3 }
   0x4   : > { %p263_p2 = pnand %p1088_p0, %p262_p1 }
   0x5   : > { %p296_p3 = scmp.lt.s32.totalorder (!%p263_p2), %s1084_s28, 1  ;;  %v1463_v0 = vmov (!%p263_p2), 0.0|0.0   ;;  %s1464_s11 = smov (!%p263_p2), 127   ;;  %v458_v11 = vld [vmem:[%s1781_s2 + $0x8] sm:$0xff] (!%p263_p2)  ;;  %vm617_vm0 = vcmask (!%p263_p2), 719872   ;;  %v463_v13 = vld [vmem:[%s1782_s3] sm:$0xff] (!%p263_p2) }
   0x6   : > { %266 = sbr.rel (%p263_p2) target bundleno = 936 (0x3a8), region = 52  ;;  %1127 = vmatprep.subr.bf16.mxu1 (!%p263_p2), %v1463_v0  ;;  %1124 = vmatprep.subr.bf16.mxu0 (!%p263_p2), %v1463_v0  ;;  %s1465_s12 = smov (!%p263_p2), 126   ;;  %v464_v12 = vld [vmem:[%s1782_s3 + $0x8] sm:$0xff] (!%p263_p2)  ;;  %v1472_v14 = vmov (!%p263_p2), 0   ;;  %v465_v15 = vld [vmem:[%s1782_s3 + $0x10] sm:$0xff] (!%p263_p2)  ;;  %vm481_vm1 = vcmask (!%p263_p2), 1039360  }
   0x7   : > { %s1466_s13 = smov (!%p263_p2), 122   ;;  %s1467_s14 = smov (!%p263_p2), 121   ;;  %1094 = vmatprep.mubr.msk.f32.mxu1 (!%p263_p2), %vm617_vm0, %v458_v11  ;;  %1339 = vset.pattern.permute.xlu1 (!%p263_p2), %v1472_v14  ;;  %vm500_vm2 = vcmask (!%p263_p2), 1031168   ;;  %vm519_vm3 = vcmask (!%p263_p2), 998400   ;;  %vm360_vm4 = vcmask (!%p263_p2), 990208   ;;  %vm538_vm5 = vcmask (!%p263_p2), 982016  }
   0x8   : > { %s1468_s15 = smov (!%p263_p2), 120   ;;  %s1469_s16 = smov (!%p263_p2), 116   ;;  %1338 = vset.pattern.permute.xlu0 (!%p263_p2), %v1472_v14  ;;  %v1473_v11 = vmov (!%p263_p2), 0.0   ;;  %vm557_vm6 = vcmask (!%p263_p2), 949248   ;;  %vm576_vm7 = vcmask (!%p263_p2), 941056   ;;  %vm595_vm8 = vcmask (!%p263_p2), 932864  }
   0x9   : > { %s1470_s17 = smov (!%p263_p2), 115   ;;  %s1471_s20 = smov (!%p263_p2), 114   ;;  %vm367_vm9 = vcmask (!%p263_p2), 195584   ;;  %vm306_vm10 = vcmask (!%p263_p2), 97280   ;;  %vm1474_vm11 = vmmov (!%p263_p2), 0   ;;  %vm310_vm12 = vcmask (!%p263_p2), 146480  }
   0xa   : > { %1115 = vmatprep.mubr.msk.f32.mxu0 (!%p263_p2), %vm1474_vm11, %v1473_v11  ;;  %307 = vst.msk [vmem:[#allocation2] sm:$0xff] (!%p263_p2), %vm306_vm10, %v1473_v11  ;;  %308 = vst.msk [vmem:[#allocation2 + $0x10] sm:$0xff] (!%p263_p2), %vm306_vm10, %v1473_v11  ;;  %s1475_s21 = smov (!%p263_p2), 7  }
   0xb   : > { %309 = vst.msk [vmem:[#allocation2 + $0x20] sm:$0xff] (!%p263_p2), %vm306_vm10, %v1473_v11  ;;  %vm739_vm10 = vcmask (!%p263_p2), 56320  }
   0xc   : > { %311 = vst.msk [vmem:[#allocation2 + $0x8] sm:$0xff] (!%p263_p2), %vm310_vm12, %v1473_v11  ;;  %312 = vst.msk [vmem:[#allocation2 + $0x18] sm:$0xff] (!%p263_p2), %vm310_vm12, %v1473_v11 }
   0xd   : > { %s1789_s28 = smov (!%p296_p3, %s1084_s28), 1  ;;  %313 = vst.msk [vmem:[#allocation2 + $0x28] sm:$0xff] %vm310_vm12, %v1473_v11 }
   0xe   : > { %s1205_s29 = smul.u32 48, %s1789_s28 }
  0x10   : > { %s300_s10 = scalar_lea.vmem %s1779_s0, %s1205_s29 }
  0x11   : > { %v1537_v1 = vld [vmem:[%s300_s10 + $0x20] sm:$0xff]  ;;  %v320_v2 = vld [vmem:[%s300_s10 + $0x28] sm:$0xff]  ;;  %v317_v6 = vld [vmem:[%s300_s10 + $0x10] sm:$0xff] }
  0x12   : > { %v315_v3 = vld [vmem:[%s300_s10] sm:$0xff]  ;;  %v1238_v4 = vpack.i.bf16 %v320_v2, %v1537_v1  ;;  %v316_v5 = vld [vmem:[%s300_s10 + $0x8] sm:$0xff]  ;;  %v318_v7 = vld [vmem:[%s300_s10 + $0x18] sm:$0xff] }
  0x13   : > { %v1228_v8 = vpack.i.bf16 %v316_v5, %v315_v3  ;;  %v1128_v9 = vpack.c.bf16 %v317_v6, %v315_v3  ;;  %v1233_v10 = vpack.i.bf16 %v318_v7, %v317_v6 }
  0x14   : > { %1239 = vrot.lane.b32.xlu1 %v1238_v4, %s1464_s11 }
  0x15   : > { %1229 = vrot.lane.b32.xlu0 %v1228_v8, %s1464_s11  ;;  %1129 = vmatpush1.bf16.msra.mxu1 %v1128_v9 }
  0x16   : > { %1130 = vmatprep.subr.bf16.mxu1 %v1463_v0 }
  0x18   : > { %1244 = vrot.lane.b32.xlu1 %v1228_v8, %s1465_s12 }
  0x19   : > { %1234 = vrot.lane.b32.xlu0 %v1233_v10, %s1464_s11 }
  0x1c   : > { %1254 = vrot.lane.b32.xlu1 %v1238_v4, %s1465_s12 }
  0x1d   : > { %1249 = vrot.lane.b32.xlu0 %v1233_v10, %s1465_s12 }
  0x20   : > { %1264 = vrot.lane.b32.xlu1 %v1233_v10, %s1466_s13 }
  0x21   : > { %1259 = vrot.lane.b32.xlu0 %v1228_v8, %s1466_s13 }
  0x24   : > { %1274 = vrot.lane.b32.xlu1 %v1228_v8, %s1467_s14 }
  0x25   : > { %1269 = vrot.lane.b32.xlu0 %v1238_v4, %s1466_s13 }
  0x28   : > { %356 = vrot.lane.b32.xlu1 %v1537_v1, %s1467_s14 }
  0x29   : > { %1279 = vrot.lane.b32.xlu0 %v1233_v10, %s1467_s14 }
  0x2c   : > { %1284 = vrot.lane.b32.xlu1 %v1228_v8, %s1468_s15 }
  0x2d   : > { %358 = vrot.lane.b32.xlu0 %v320_v2, %s1467_s14 }
  0x30   : > { %1294 = vrot.lane.b32.xlu1 %v1238_v4, %s1468_s15 }
  0x31   : > { %1289 = vrot.lane.b32.xlu0 %v1233_v10, %s1468_s15 }
  0x34   : > { %1304 = vrot.lane.b32.xlu1 %v1233_v10, %s1469_s16 }
  0x35   : > { %1299 = vrot.lane.b32.xlu0 %v1228_v8, %s1469_s16 }
  0x38   : > { %1314 = vrot.lane.b32.xlu1 %v1228_v8, %s1470_s17 }
  0x39   : > { %1309 = vrot.lane.b32.xlu0 %v1238_v4, %s1469_s16 }
  0x3c   : > { %1324 = vrot.lane.b32.xlu1 %v1238_v4, %s1470_s17 }
  0x3d   : > { %1319 = vrot.lane.b32.xlu0 %v1233_v10, %s1470_s17 }
  0x40   : > { %1334 = vrot.lane.b32.xlu1 %v1233_v10, %s1471_s20 }
  0x41   : > { %1329 = vrot.lane.b32.xlu0 %v1228_v8, %s1471_s20 }
  0x44   : > { %593 = vrot.lane.b32.xlu1 %v320_v2, %s1471_s20 }
  0x45   : > { %591 = vrot.lane.b32.xlu0 %v1537_v1, %s1471_s20 }
  0x48   : > { %609 = vperm.xlu1 %1339, %v464_v12  }
  0x49   : > { %604 = vperm.xlu0 %1338, %v463_v13  }
  0x4c   : > { %614 = vperm.xlu1 %1339, %v465_v15  }
  0x86   : > { %v1240_v16 = vpop.permute.xlu1 %1239 }
  0x87   : > { %v1230_v17 = vpop.permute.xlu0 %1229  ;;  %v1242_v20 = vunpack.i.h.bf16 %v1240_v16  ;;  %v1241_v21 = vunpack.i.l.bf16 %v1240_v16 }
  0x88   : > { %v1232_v18 = vunpack.i.h.bf16 %v1230_v17  ;;  %v1231_v19 = vunpack.i.l.bf16 %v1230_v17 }
  0x89   : > { %v484_v32 = vsel %vm481_vm1, %v1241_v21, %v1242_v20 }
  0x8a   : > { %v1245_v22 = vpop.permute.xlu1 %1244  ;;  %v482_v23 = vsel %vm481_vm1, %v1231_v19, %v1232_v18 }
  0x8b   : > { %v1235_v24 = vpop.permute.xlu0 %1234  ;;  %v1131_v25 = vpack.c.bf16 %v482_v23, %v1537_v1  ;;  %v1247_v28 = vunpack.i.h.bf16 %v1245_v22  ;;  %v1246_v29 = vunpack.i.l.bf16 %v1245_v22 }
  0x8c   : > { %v1237_v26 = vunpack.i.h.bf16 %v1235_v24  ;;  %v1236_v27 = vunpack.i.l.bf16 %v1235_v24 }
  0x8d   : > { %1132 = vmatpush1.bf16.msra.mxu1 %v1131_v25  ;;  %v501_v40 = vsel %vm500_vm2, %v1246_v29, %v1247_v28 }
  0x8e   : > { %v1255_v30 = vpop.permute.xlu1 %1254  ;;  %1133 = vmatprep.subr.bf16.mxu1 %v1463_v0  ;;  %v483_v31 = vsel %vm481_vm1, %v1236_v27, %v1237_v26 }
  0x8f   : > { %v1250_v33 = vpop.permute.xlu0 %1249  ;;  %v1134_v34 = vpack.c.bf16 %v484_v32, %v483_v31  ;;  %v1257_v37 = vunpack.i.h.bf16 %v1255_v30  ;;  %v1256_v38 = vunpack.i.l.bf16 %v1255_v30 }
  0x90   : > { %v1252_v35 = vunpack.i.h.bf16 %v1250_v33  ;;  %v1251_v36 = vunpack.i.l.bf16 %v1250_v33 }
  0x91   : > { %1135 = vmatpush1.bf16.msra.mxu1 %v1134_v34  ;;  %v503_v49 = vsel %vm500_vm2, %v1256_v38, %v1257_v37 }
  0x92   : > { %v1265_v39 = vpop.permute.xlu1 %1264  ;;  %1136 = vmatprep.subr.bf16.mxu1 %v1463_v0  ;;  %v502_v41 = vsel %vm500_vm2, %v1251_v36, %v1252_v35 }
  0x93   : > { %v1260_v42 = vpop.permute.xlu0 %1259  ;;  %v1137_v43 = vpack.c.bf16 %v502_v41, %v501_v40  ;;  %v1267_v46 = vunpack.i.h.bf16 %v1265_v39  ;;  %v1266_v47 = vunpack.i.l.bf16 %v1265_v39 }
  0x94   : > { %v1262_v44 = vunpack.i.h.bf16 %v1260_v42  ;;  %v1261_v45 = vunpack.i.l.bf16 %v1260_v42 }
  0x95   : > { %1138 = vmatpush1.bf16.msra.mxu1 %v1137_v43  ;;  %v521_v58 = vsel %vm519_vm3, %v1266_v47, %v1267_v46 }
  0x96   : > { %v1275_v48 = vpop.permute.xlu1 %1274  ;;  %1139 = vmatprep.subr.bf16.mxu1 %v1463_v0  ;;  %v520_v50 = vsel %vm519_vm3, %v1261_v45, %v1262_v44 }
  0x97   : > { %v1270_v51 = vpop.permute.xlu0 %1269  ;;  %v1140_v52 = vpack.c.bf16 %v520_v50, %v503_v49  ;;  %v1277_v55 = vunpack.i.h.bf16 %v1275_v48  ;;  %v1276_v56 = vunpack.i.l.bf16 %v1275_v48 }
  0x98   : > { %v1272_v53 = vunpack.i.h.bf16 %v1270_v51  ;;  %v1271_v54 = vunpack.i.l.bf16 %v1270_v51 }
  0x99   : > { %1141 = vmatpush1.bf16.msra.mxu1 %v1140_v52  ;;  %v361_v2 = vsel %vm360_vm4, %v1276_v56, %v1277_v55 }
  0x9a   : > { %v357_v57 = vpop.permute.xlu1 %356  ;;  %1142 = vmatprep.subr.bf16.mxu1 %v1463_v0  ;;  %v522_v59 = vsel %vm519_vm3, %v1271_v54, %v1272_v53 }
  0x9b   : > { %v1280_v60 = vpop.permute.xlu0 %1279  ;;  %v1143_v61 = vpack.c.bf16 %v522_v59, %v521_v58 }
  0x9c   : > { %v1282_v62 = vunpack.i.h.bf16 %v1280_v60  ;;  %v1281_v63 = vunpack.i.l.bf16 %v1280_v60  ;;  %v457_v60 = vld [vmem:[%s1781_s2] sm:$0xff] }
  0x9d   : > { %1144 = vmatpush1.bf16.msra.mxu1 %v1143_v61  ;;  %v460_v61 = vld [vmem:[%s1781_s2 + $0x18] sm:$0xff] }
  0x9e   : > { %v1285_v1 = vpop.permute.xlu1 %1284  ;;  %1145 = vmatprep.subr.bf16.mxu1 %v1463_v0  ;;  %v362_v3 = vsel %vm360_vm4, %v1281_v63, %v1282_v62  ;;  %v459_v62 = vld [vmem:[%s1781_s2 + $0x10] sm:$0xff]  ;;  %v462_v63 = vld [vmem:[%s1781_s2 + $0x28] sm:$0xff] }
  0x9f   : > { %v1287_v4 = vunpack.i.h.bf16 %v1285_v1  ;;  %v1286_v5 = vunpack.i.l.bf16 %v1285_v1  ;;  %v359_v6 = vpop.permute.xlu0 %358  ;;  %v1125_v7 = vpack.c.bf16 %v362_v3, %v361_v2  ;;  %v461_v1 = vld [vmem:[%s1781_s2 + $0x20] sm:$0xff]  ;;  %v322_v3 = vld [vmem:[%s1785_s6 + $0x8] sm:$0xff] }
  0xa0   : > { %v363_v8 = vsel %vm360_vm4, %v357_v57, %v359_v6  ;;  %v321_v2 = vld [vmem:[%s1785_s6] sm:$0xff] }
  0xa1   : > { %1126 = vmatpush3.bf16.msra.mxu0 %v1125_v7  ;;  %1147 = vmatpush1.bf16.msra.mxu1 %v1125_v7  ;;  %v539_v9 = vsel %vm538_vm5, %v1286_v5, %v1287_v4  ;;  %v323_v4 = vld [vmem:[%s1785_s6 + $0x10] sm:$0xff] }
  0xa2   : > { %v1295_v10 = vpop.permute.xlu1 %1294  ;;  %1113 = vmatprep.subr.mxu0 %v1473_v11  ;;  %1148 = vmatprep.subr.bf16.mxu1 %v1463_v0  ;;  %v1149_v12 = vpack.c.bf16 %v539_v9, %v363_v8 }
  0xa3   : > { %v1297_v13 = vunpack.i.h.bf16 %v1295_v10  ;;  %v1296_v14 = vunpack.i.l.bf16 %v1295_v10  ;;  %v1290_v15 = vpop.permute.xlu0 %1289 }
  0xa4   : > { %v1292_v16 = vunpack.i.h.bf16 %v1290_v15  ;;  %v1291_v17 = vunpack.i.l.bf16 %v1290_v15 }
  0xa5   : > { %1114 = vmatpush3.msra.mxu0 %v363_v8  ;;  %1150 = vmatpush1.bf16.msra.mxu1 %v1149_v12  ;;  %v541_v18 = vsel %vm538_vm5, %v1296_v14, %v1297_v13  ;;  %v1097_v12 = vld [vmem:[%s1780_s1] ss:$0 sm:$0xff] }
  0xa6   : > { %v1305_v19 = vpop.permute.xlu1 %1304  ;;  %1151 = vmatprep.subr.bf16.mxu1 %v1463_v0  ;;  %v540_v20 = vsel %vm538_vm5, %v1291_v17, %v1292_v16  ;;  %1166 = vmatprep.subr.bf16.mxu0 %v1463_v0 }
  0xa7   : > { %v1307_v21 = vunpack.i.h.bf16 %v1305_v19  ;;  %v1306_v22 = vunpack.i.l.bf16 %v1305_v19  ;;  %v1300_v23 = vpop.permute.xlu0 %1299  ;;  %v1152_v24 = vpack.c.bf16 %v541_v18, %v540_v20  ;;  %1116 = vmatmul.mubr.msk.f32.vlgmr.msra.gmra.mrb[0].mxu0 %vm367_vm9, %v321_v2 }
  0xa8   : > { %v1302_v25 = vunpack.i.h.bf16 %v1300_v23  ;;  %v1301_v26 = vunpack.i.l.bf16 %v1300_v23  ;;  %1118 = vmatprep.mubr.msk.f32.mxu0 %vm1474_vm11, %v1473_v11 }
  0xa9   : > { %1153 = vmatpush1.bf16.msra.mxu1 %v1152_v24  ;;  %v559_v27 = vsel %vm557_vm6, %v1306_v22, %v1307_v21 }
  0xaa   : > { %v1315_v28 = vpop.permute.xlu1 %1314  ;;  %1154 = vmatprep.subr.bf16.mxu1 %v1463_v0  ;;  %v558_v29 = vsel %vm557_vm6, %v1301_v26, %v1302_v25 }
  0xab   : > { %v1317_v30 = vunpack.i.h.bf16 %v1315_v28  ;;  %v1316_v31 = vunpack.i.l.bf16 %v1315_v28  ;;  %v1310_v32 = vpop.permute.xlu0 %1309  ;;  %v1155_v33 = vpack.c.bf16 %v559_v27, %v558_v29  ;;  %1119 = vmatmul.mubr.msk.f32.gmra.mrb[2].mxu0 %vm367_vm9, %v322_v3 }
  0xac   : > { %v1312_v34 = vunpack.i.h.bf16 %v1310_v32  ;;  %v1311_v35 = vunpack.i.l.bf16 %v1310_v32  ;;  %1121 = vmatprep.mubr.msk.f32.mxu0 %vm1474_vm11, %v1473_v11 }
  0xad   : > { %1156 = vmatpush1.bf16.msra.mxu1 %v1155_v33  ;;  %v577_v36 = vsel %vm576_vm7, %v1316_v31, %v1317_v30 }
  0xae   : > { %v1325_v37 = vpop.permute.xlu1 %1324  ;;  %1157 = vmatprep.subr.bf16.mxu1 %v1463_v0  ;;  %v560_v38 = vsel %vm557_vm6, %v1311_v35, %v1312_v34 }
  0xaf   : > { %v1327_v39 = vunpack.i.h.bf16 %v1325_v37  ;;  %v1326_v40 = vunpack.i.l.bf16 %v1325_v37  ;;  %v1320_v41 = vpop.permute.xlu0 %1319  ;;  %v1158_v42 = vpack.c.bf16 %v577_v36, %v560_v38  ;;  %1122 = vmatmul.mubr.msk.f32.gmra.mrb[4].mxu0 %vm367_vm9, %v323_v4  ;;  %vm737_vm9 = vcmask 1047608  }
  0xb0   : > { %v1322_v43 = vunpack.i.h.bf16 %v1320_v41  ;;  %v1321_v44 = vunpack.i.l.bf16 %v1320_v41  ;;  %v746_v41 = vld [vmem:[%s1783_s4 + $0x8] sm:$0xff] }
  0xb1   : > { %1159 = vmatpush1.bf16.msra.mxu1 %v1158_v42  ;;  %v579_v45 = vsel %vm576_vm7, %v1326_v40, %v1327_v39  ;;  %1098 = vmatprep.mubr.msk.f32.mxu0 %vm617_vm0, %v746_v41  ;;  %v751_v42 = vld [vmem:[%s1784_s5] sm:$0xff] }
  0xb2   : > { %v1335_v46 = vpop.permute.xlu1 %1334  ;;  %1160 = vmatprep.subr.bf16.mxu1 %v1463_v0  ;;  %v578_v47 = vsel %vm576_vm7, %v1321_v44, %v1322_v43  ;;  %v753_v43 = vld [vmem:[%s1784_s5 + $0x10] sm:$0xff]  ;;  %v752_v44 = vld [vmem:[%s1784_s5 + $0x8] sm:$0xff] }
  0xb3   : > { %v1337_v48 = vunpack.i.h.bf16 %v1335_v46  ;;  %v1336_v49 = vunpack.i.l.bf16 %v1335_v46  ;;  %v1330_v50 = vpop.permute.xlu0 %1329  ;;  %v1161_v51 = vpack.c.bf16 %v579_v45, %v578_v47  ;;  %v325_v47 = vld [vmem:[%s1786_s7 + $0x8] sm:$0xff] }
  0xb4   : > { %v1332_v52 = vunpack.i.h.bf16 %v1330_v50  ;;  %v1331_v53 = vunpack.i.l.bf16 %v1330_v50 }
  0xb5   : > { %1162 = vmatpush1.bf16.msra.mxu1 %v1161_v51  ;;  %v597_v54 = vsel %vm595_vm8, %v1336_v49, %v1337_v48  ;;  %v324_v48 = vld [vmem:[%s1786_s7] sm:$0xff] }
  0xb6   : > { %1163 = vmatprep.subr.bf16.mxu1 %v1463_v0  ;;  %v596_v55 = vsel %vm595_vm8, %v1331_v53, %v1332_v52  ;;  %v594_v57 = vpop.permute.xlu1 %593  ;;  %v326_v52 = vld [vmem:[%s1786_s7 + $0x10] sm:$0xff] }
  0xb7   : > { %v1164_v56 = vpack.c.bf16 %v597_v54, %v596_v55  ;;  %v592_v58 = vpop.permute.xlu0 %591 }
  0xb8   : > { %v598_v59 = vsel %vm595_vm8, %v592_v58, %v594_v57 }
  0xb9   : > { %1165 = vmatpush1.bf16.msra.mxu1 %v1164_v56 }
  0xba   : > { %679 = vmatprep.subr.mxu1 %v1473_v11 }
  0xbd   : > { %680 = vmatpush1.msra.mxu1 %v598_v59 }
  0xbe   : > { %692 = vmatmul.mubr.f32.vlgmr.msra.gmra.mrb[0].mxu1 %v457_v60 }
  0xbf   : > { %1095 = vmatprep.mubr.msk.f32.mxu1 %vm617_vm0, %v460_v61 }
  0xc2   : > { %697 = vmatmul.mubr.f32.gmra.mrb[2].mxu1 %v459_v62 }
  0xc3   : > { %1096 = vmatprep.mubr.msk.f32.mxu1 %vm617_vm0, %v462_v63 }
  0xc6   : > { %702 = vmatmul.mubr.f32.gmra.mrb[4].mxu1 %v461_v1 }
  0xc7   : > { %v610_v9 = vpop.permute.xlu1 %609 }
  0xc8   : > { %v605_v5 = vpop.permute.xlu0 %604 }
  0xcb   : > { %v615_v19 = vpop.permute.xlu1 %614 }
 0x17a   : > { %v1701_v45 = vpop.f32.mrb[0].mxu0 }
 0x17b   : > { %v1117_v46 = vpop.f32.mrb[1].mxu0 }
 0x17e   : > { %v1709_v49 = vpop.f32.mrb[2].mxu0 }
 0x17f   : > { %v1120_v50 = vpop.f32.mrb[3].mxu0 }
 0x182   : > { %v1711_v51 = vpop.f32.mrb[4].mxu0 }
 0x183   : > { %v1123_v53 = vpop.f32.mrb[5].mxu0 }
 0x191   : > { %v693_v6 = vpop.f32.mrb[0].mxu1 }
 0x192   : > { %v694_v7 = vadd.f32 %v693_v6, %v605_v5  ;;  %v695_v8 = vpop.f32.mrb[1].mxu1 }
 0x194   : > { %vm707_vm13 = vcmp.ge.f32.partialorder %v694_v7, 0.0  ;;  %v710_v10 = vmul.f32 0.1, %v694_v7 }
 0x195   : > { %v698_v13 = vpop.f32.mrb[2].mxu1 }
 0x196   : > { %v699_v14 = vadd.f32 %v698_v13, %v610_v9  ;;  %v700_v15 = vpop.f32.mrb[3].mxu1  ;;  %v713_v16 = vsel %vm707_vm13, %v694_v7, %v710_v10 }
 0x197   : > { %v722_v17 = vmul.f32 %v1097_v12, %v713_v16 }
 0x198   : > { %vm708_vm14 = vcmp.ge.f32.partialorder %v699_v14, 0.0  ;;  %v711_v18 = vmul.f32 0.1, %v699_v14 }
 0x199   : > { %v703_v20 = vpop.f32.mrb[4].mxu1  ;;  %728 = vrot.lane.b32.xlu0 %v722_v17, %s1475_s21 }
 0x19a   : > { %v704_v21 = vadd.f32 %v703_v20, %v615_v19  ;;  %v705_v22 = vpop.f32.mrb[5].mxu1  ;;  %v714_v23 = vsel %vm708_vm14, %v699_v14, %v711_v18 }
 0x19b   : > { %v723_v24 = vmul.f32 %v1097_v12, %v714_v23 }
 0x19c   : > { %vm709_vm15 = vcmp.ge.f32.partialorder %v704_v21, 0.0  ;;  %v712_v25 = vmul.f32 0.1, %v704_v21 }
 0x19d   : > { %730 = vrot.lane.b32.xlu1 %v723_v24, %s1475_s21 }
 0x19e   : > { %v715_v26 = vsel %vm709_vm15, %v704_v21, %v712_v25 }
 0x19f   : > { %v724_v27 = vmul.f32 %v1097_v12, %v715_v26 }
 0x1a1   : > { %732 = vrot.lane.b32.xlu0 %v724_v27, %s1475_s21 }
 0x20b   : > { %v729_v28 = vpop.permute.xlu0 %728 }
 0x20c   : > { %738 = vst.msk [vmem:[#allocation2] sm:$0xff] %vm737_vm9, %v729_v28 }
 0x20d   : > { %740 = vst.msk [vmem:[#allocation2 + $0x8] sm:$0xff] %vm739_vm10, %v729_v28 }
 0x20f   : > { %v731_v29 = vpop.permute.xlu1 %730 }
 0x210   : > { %741 = vst.msk [vmem:[#allocation2 + $0x10] sm:$0xff] %vm737_vm9, %v731_v29 }
 0x211   : > { %742 = vst.msk [vmem:[#allocation2 + $0x18] sm:$0xff] %vm739_vm10, %v731_v29 }
 0x213   : > { %v733_v30 = vpop.permute.xlu0 %732  ;;  %v754_v31 = vld [vmem:[#allocation2] sm:$0xff] }
 0x214   : > { %v757_v32 = vld [vmem:[#allocation2 + $0x8] sm:$0xff]  ;;  %743 = vst.msk [vmem:[#allocation2 + $0x20] sm:$0xff] %vm737_vm9, %v733_v30 }
 0x215   : > { %744 = vst.msk [vmem:[#allocation2 + $0x28] sm:$0xff] %vm739_vm10, %v733_v30  ;;  %v1340_v33 = vpack.i.bf16 %v757_v32, %v754_v31 }
 0x217   : > { %1341 = vrot.lane.b32.xlu1 %v1340_v33, %s1464_s11  ;;  %v755_v34 = vld [vmem:[#allocation2 + $0x10] sm:$0xff] }
 0x218   : > { %v758_v35 = vld [vmem:[#allocation2 + $0x18] sm:$0xff]  ;;  %v1167_v37 = vpack.c.bf16 %v755_v34, %v754_v31 }
 0x219   : > { %v1345_v36 = vpack.i.bf16 %v758_v35, %v755_v34 }
 0x21a   : > { %1168 = vmatpush1.bf16.msra.mxu0 %v1167_v37 }
 0x21b   : > { %1346 = vrot.lane.b32.xlu0 %v1345_v36, %s1464_s11  ;;  %v756_v38 = vld [vmem:[#allocation2 + $0x20] sm:$0xff]  ;;  %1169 = vmatprep.subr.bf16.mxu0 %v1463_v0 }
 0x21c   : > { %v759_v39 = vld [vmem:[#allocation2 + $0x28] sm:$0xff] }
 0x21d   : > { %v1355_v40 = vpack.i.bf16 %v759_v39, %v756_v38 }
 0x21f   : > { %1351 = vrot.lane.b32.xlu0 %v1340_v33, %s1465_s12  ;;  %1356 = vrot.lane.b32.xlu1 %v1355_v40, %s1464_s11 }
 0x223   : > { %1371 = vrot.lane.b32.xlu0 %v1355_v40, %s1465_s12  ;;  %1361 = vrot.lane.b32.xlu1 %v1345_v36, %s1465_s12 }
 0x227   : > { %1376 = vrot.lane.b32.xlu0 %v1345_v36, %s1466_s13  ;;  %1366 = vrot.lane.b32.xlu1 %v1340_v33, %s1466_s13 }
 0x22b   : > { %1381 = vrot.lane.b32.xlu0 %v1340_v33, %s1467_s14  ;;  %1386 = vrot.lane.b32.xlu1 %v1355_v40, %s1466_s13 }
 0x22f   : > { %1401 = vrot.lane.b32.xlu0 %v1355_v40, %s1467_s14  ;;  %1391 = vrot.lane.b32.xlu1 %v1345_v36, %s1467_s14 }
 0x233   : > { %1406 = vrot.lane.b32.xlu0 %v1345_v36, %s1468_s15  ;;  %1396 = vrot.lane.b32.xlu1 %v1340_v33, %s1468_s15 }
 0x237   : > { %1411 = vrot.lane.b32.xlu0 %v1340_v33, %s1469_s16  ;;  %1416 = vrot.lane.b32.xlu1 %v1355_v40, %s1468_s15  ;;  %s1206_s15 = smul.u32 24, %s1789_s28 }
 0x239   : > { %s305_s22 = scalar_lea.vmem %s1787_s8, %s1206_s15 }
 0x23b   : > { %1431 = vrot.lane.b32.xlu0 %v1355_v40, %s1469_s16  ;;  %1421 = vrot.lane.b32.xlu1 %v1345_v36, %s1469_s16 }
 0x23f   : > { %1436 = vrot.lane.b32.xlu0 %v1345_v36, %s1470_s17  ;;  %1426 = vrot.lane.b32.xlu1 %v1340_v33, %s1470_s17 }
 0x243   : > { %1441 = vrot.lane.b32.xlu0 %v1340_v33, %s1471_s20  ;;  %1446 = vrot.lane.b32.xlu1 %v1355_v40, %s1470_s17 }
 0x247   : > { %900 = vrot.lane.b32.xlu0 %v756_v38, %s1471_s20  ;;  %1451 = vrot.lane.b32.xlu1 %v1345_v36, %s1471_s20 }
 0x24b   : > { %912 = vperm.xlu0 %1338, %v751_v42   ;;  %902 = vrot.lane.b32.xlu1 %v759_v39, %s1471_s20 }
 0x24f   : > { %922 = vperm.xlu0 %1338, %v753_v43   ;;  %917 = vperm.xlu1 %1339, %v752_v44  }
 0x253   : > { %334 = vperm.xlu0 %1338, %v325_v47   ;;  %329 = vperm.xlu1 %1339, %v324_v48  }
 0x257   : > { %339 = vperm.xlu1 %1339, %v326_v52  }
 0x289   : > { %v1342_v54 = vpop.permute.xlu1 %1341 }
 0x28a   : > { %v1344_v55 = vunpack.i.h.bf16 %v1342_v54  ;;  %v1343_v56 = vunpack.i.l.bf16 %v1342_v54 }
 0x28c   : > { %v778_v57 = vsel %vm481_vm1, %v1343_v56, %v1344_v55 }
 0x28d   : > { %v1170_v58 = vpack.c.bf16 %v778_v57, %v756_v38  ;;  %v1347_v59 = vpop.permute.xlu0 %1346 }
 0x28e   : > { %v1349_v60 = vunpack.i.h.bf16 %v1347_v59  ;;  %v1348_v61 = vunpack.i.l.bf16 %v1347_v59 }
 0x28f   : > { %1171 = vmatpush1.bf16.msra.mxu0 %v1170_v58 }
 0x290   : > { %1172 = vmatprep.subr.bf16.mxu0 %v1463_v0  ;;  %v779_v3 = vsel %vm481_vm1, %v1348_v61, %v1349_v60 }
 0x291   : > { %v1357_v62 = vpop.permute.xlu1 %1356  ;;  %v1352_v63 = vpop.permute.xlu0 %1351 }
 0x292   : > { %v1359_v1 = vunpack.i.h.bf16 %v1357_v62  ;;  %v1358_v2 = vunpack.i.l.bf16 %v1357_v62  ;;  %v1354_v5 = vunpack.i.h.bf16 %v1352_v63  ;;  %v1353_v6 = vunpack.i.l.bf16 %v1352_v63 }
 0x294   : > { %v780_v4 = vsel %vm481_vm1, %v1358_v2, %v1359_v1  ;;  %v796_v13 = vsel %vm500_vm2, %v1353_v6, %v1354_v5 }
 0x295   : > { %v1173_v7 = vpack.c.bf16 %v780_v4, %v779_v3  ;;  %v1362_v8 = vpop.permute.xlu1 %1361  ;;  %v1372_v9 = vpop.permute.xlu0 %1371 }
 0x296   : > { %v1364_v10 = vunpack.i.h.bf16 %v1362_v8  ;;  %v1363_v12 = vunpack.i.l.bf16 %v1362_v8  ;;  %v1374_v15 = vunpack.i.h.bf16 %v1372_v9  ;;  %v1373_v16 = vunpack.i.l.bf16 %v1372_v9 }
 0x297   : > { %1174 = vmatpush1.bf16.msra.mxu0 %v1173_v7 }
 0x298   : > { %v797_v14 = vsel %vm500_vm2, %v1363_v12, %v1364_v10  ;;  %1175 = vmatprep.subr.bf16.mxu0 %v1463_v0  ;;  %v798_v22 = vsel %vm500_vm2, %v1373_v16, %v1374_v15 }
 0x299   : > { %v1176_v17 = vpack.c.bf16 %v797_v14, %v796_v13  ;;  %v1367_v18 = vpop.permute.xlu1 %1366  ;;  %v1377_v19 = vpop.permute.xlu0 %1376 }
 0x29a   : > { %v1369_v20 = vunpack.i.h.bf16 %v1367_v18  ;;  %v1368_v21 = vunpack.i.l.bf16 %v1367_v18  ;;  %v1379_v24 = vunpack.i.h.bf16 %v1377_v19  ;;  %v1378_v25 = vunpack.i.l.bf16 %v1377_v19 }
 0x29b   : > { %1177 = vmatpush1.bf16.msra.mxu0 %v1176_v17 }
 0x29c   : > { %v814_v23 = vsel %vm519_vm3, %v1368_v21, %v1369_v20  ;;  %1178 = vmatprep.subr.bf16.mxu0 %v1463_v0  ;;  %v815_v31 = vsel %vm519_vm3, %v1378_v25, %v1379_v24 }
 0x29d   : > { %v1179_v26 = vpack.c.bf16 %v814_v23, %v798_v22  ;;  %v1387_v27 = vpop.permute.xlu1 %1386  ;;  %v1382_v28 = vpop.permute.xlu0 %1381 }
 0x29e   : > { %v1389_v29 = vunpack.i.h.bf16 %v1387_v27  ;;  %v1388_v30 = vunpack.i.l.bf16 %v1387_v27  ;;  %v1384_v33 = vunpack.i.h.bf16 %v1382_v28  ;;  %v1383_v34 = vunpack.i.l.bf16 %v1382_v28 }
 0x29f   : > { %1180 = vmatpush1.bf16.msra.mxu0 %v1179_v26 }
 0x2a0   : > { %v816_v32 = vsel %vm519_vm3, %v1388_v30, %v1389_v29  ;;  %1181 = vmatprep.subr.bf16.mxu0 %v1463_v0  ;;  %v832_v40 = vsel %vm360_vm4, %v1383_v34, %v1384_v33 }
 0x2a1   : > { %v1182_v35 = vpack.c.bf16 %v816_v32, %v815_v31  ;;  %v1392_v36 = vpop.permute.xlu1 %1391  ;;  %v1402_v37 = vpop.permute.xlu0 %1401 }
 0x2a2   : > { %v1394_v38 = vunpack.i.h.bf16 %v1392_v36  ;;  %v1393_v39 = vunpack.i.l.bf16 %v1392_v36  ;;  %v1404_v42 = vunpack.i.h.bf16 %v1402_v37  ;;  %v1403_v43 = vunpack.i.l.bf16 %v1402_v37 }
 0x2a3   : > { %1183 = vmatpush1.bf16.msra.mxu0 %v1182_v35 }
 0x2a4   : > { %v833_v41 = vsel %vm360_vm4, %v1393_v39, %v1394_v38  ;;  %1184 = vmatprep.subr.bf16.mxu0 %v1463_v0  ;;  %v834_v52 = vsel %vm360_vm4, %v1403_v43, %v1404_v42  ;;  %v745_v39 = vld [vmem:[%s1783_s4] sm:$0xff] }
 0x2a5   : > { %v1185_v44 = vpack.c.bf16 %v833_v41, %v832_v40  ;;  %v1397_v46 = vpop.permute.xlu1 %1396  ;;  %v1407_v47 = vpop.permute.xlu0 %1406  ;;  %v748_v41 = vld [vmem:[%s1783_s4 + $0x18] sm:$0xff]  ;;  %v749_v42 = vld [vmem:[%s1783_s4 + $0x20] sm:$0xff] }
 0x2a6   : > { %v1399_v48 = vunpack.i.h.bf16 %v1397_v46  ;;  %v1398_v50 = vunpack.i.l.bf16 %v1397_v46  ;;  %v1409_v54 = vunpack.i.h.bf16 %v1407_v47  ;;  %v1408_v55 = vunpack.i.l.bf16 %v1407_v47 }
 0x2a7   : > { %1186 = vmatpush1.bf16.msra.mxu0 %v1185_v44 }
 0x2a8   : > { %v850_v53 = vsel %vm538_vm5, %v1398_v50, %v1399_v48  ;;  %1187 = vmatprep.subr.bf16.mxu0 %v1463_v0  ;;  %v851_v61 = vsel %vm538_vm5, %v1408_v55, %v1409_v54 }
 0x2a9   : > { %v1188_v56 = vpack.c.bf16 %v850_v53, %v834_v52  ;;  %v1417_v57 = vpop.permute.xlu1 %1416  ;;  %v1412_v58 = vpop.permute.xlu0 %1411 }
 0x2aa   : > { %v1419_v59 = vunpack.i.h.bf16 %v1417_v57  ;;  %v1418_v60 = vunpack.i.l.bf16 %v1417_v57  ;;  %v1414_v63 = vunpack.i.h.bf16 %v1412_v58  ;;  %v1413_v1 = vunpack.i.l.bf16 %v1412_v58 }
 0x2ab   : > { %1189 = vmatpush1.bf16.msra.mxu0 %v1188_v56 }
 0x2ac   : > { %v852_v62 = vsel %vm538_vm5, %v1418_v60, %v1419_v59  ;;  %1190 = vmatprep.subr.bf16.mxu0 %v1463_v0  ;;  %v868_v7 = vsel %vm557_vm6, %v1413_v1, %v1414_v63 }
 0x2ad   : > { %v1191_v2 = vpack.c.bf16 %v852_v62, %v851_v61  ;;  %v1422_v3 = vpop.permute.xlu1 %1421  ;;  %v1432_v4 = vpop.permute.xlu0 %1431 }
 0x2ae   : > { %v1424_v5 = vunpack.i.h.bf16 %v1422_v3  ;;  %v1423_v6 = vunpack.i.l.bf16 %v1422_v3  ;;  %v1434_v9 = vunpack.i.h.bf16 %v1432_v4  ;;  %v1433_v10 = vunpack.i.l.bf16 %v1432_v4 }
 0x2af   : > { %1192 = vmatpush1.bf16.msra.mxu0 %v1191_v2 }
 0x2b0   : > { %v869_v8 = vsel %vm557_vm6, %v1423_v6, %v1424_v5  ;;  %1193 = vmatprep.subr.bf16.mxu0 %v1463_v0  ;;  %v870_v17 = vsel %vm557_vm6, %v1433_v10, %v1434_v9 }
 0x2b1   : > { %v1194_v12 = vpack.c.bf16 %v869_v8, %v868_v7  ;;  %v1427_v13 = vpop.permute.xlu1 %1426  ;;  %v1437_v14 = vpop.permute.xlu0 %1436 }
 0x2b2   : > { %v1429_v15 = vunpack.i.h.bf16 %v1427_v13  ;;  %v1428_v16 = vunpack.i.l.bf16 %v1427_v13  ;;  %v1439_v19 = vunpack.i.h.bf16 %v1437_v14  ;;  %v1438_v20 = vunpack.i.l.bf16 %v1437_v14 }
 0x2b3   : > { %1195 = vmatpush1.bf16.msra.mxu0 %v1194_v12 }
 0x2b4   : > { %v886_v18 = vsel %vm576_vm7, %v1428_v16, %v1429_v15  ;;  %1196 = vmatprep.subr.bf16.mxu0 %v1463_v0  ;;  %v887_v26 = vsel %vm576_vm7, %v1438_v20, %v1439_v19 }
 0x2b5   : > { %v1197_v21 = vpack.c.bf16 %v886_v18, %v870_v17  ;;  %v1447_v22 = vpop.permute.xlu1 %1446  ;;  %v1442_v23 = vpop.permute.xlu0 %1441 }
 0x2b6   : > { %v1449_v24 = vunpack.i.h.bf16 %v1447_v22  ;;  %v1448_v25 = vunpack.i.l.bf16 %v1447_v22  ;;  %v1444_v28 = vunpack.i.h.bf16 %v1442_v23  ;;  %v1443_v29 = vunpack.i.l.bf16 %v1442_v23 }
 0x2b7   : > { %1198 = vmatpush1.bf16.msra.mxu0 %v1197_v21 }
 0x2b8   : > { %v888_v27 = vsel %vm576_vm7, %v1448_v25, %v1449_v24  ;;  %1199 = vmatprep.subr.bf16.mxu0 %v1463_v0  ;;  %v904_v34 = vsel %vm595_vm8, %v1443_v29, %v1444_v28 }
 0x2b9   : > { %v1200_v30 = vpack.c.bf16 %v888_v27, %v887_v26  ;;  %v1452_v31 = vpop.permute.xlu1 %1451  ;;  %v901_v38 = vpop.permute.xlu0 %900 }
 0x2ba   : > { %v1454_v32 = vunpack.i.h.bf16 %v1452_v31  ;;  %v1453_v33 = vunpack.i.l.bf16 %v1452_v31 }
 0x2bb   : > { %1201 = vmatpush1.bf16.msra.mxu0 %v1200_v30 }
 0x2bc   : > { %v905_v35 = vsel %vm595_vm8, %v1453_v33, %v1454_v32  ;;  %1202 = vmatprep.subr.bf16.mxu0 %v1463_v0  ;;  %v747_v0 = vld [vmem:[%s1783_s4 + $0x10] sm:$0xff] }
 0x2bd   : > { %v1203_v36 = vpack.c.bf16 %v905_v35, %v904_v34  ;;  %v903_v37 = vpop.permute.xlu1 %902 }
 0x2be   : > { %v906_v40 = vsel %vm595_vm8, %v901_v38, %v903_v37 }
 0x2bf   : > { %1204 = vmatpush1.bf16.msra.mxu0 %v1203_v36 }
 0x2c0   : > { %986 = vmatprep.subr.mxu0 %v1473_v11  ;;  %v750_v11 = vld [vmem:[%s1783_s4 + $0x28] sm:$0xff] }
 0x2c3   : > { %987 = vmatpush1.msra.mxu0 %v906_v40 }
 0x2c4   : > { %999 = vmatmul.mubr.f32.vlgmr.msra.gmra.mrb[6].mxu0 %v745_v39 }
 0x2c5   : > { %1099 = vmatprep.mubr.msk.f32.mxu0 %vm617_vm0, %v748_v41 }
 0x2c8   : > { %1004 = vmatmul.mubr.f32.gmra.mrb[8].mxu0 %v747_v0 }
 0x2c9   : > { %1100 = vmatprep.mubr.msk.f32.mxu0 %vm617_vm0, %v750_v11 }
 0x2ca   : > { %v913_v43 = vpop.permute.xlu0 %912 }
 0x2cc   : > { %1009 = vmatmul.mubr.f32.gmra.mrb[10].mxu0 %v749_v42 }
 0x2ce   : > { %v918_v44 = vpop.permute.xlu1 %917  ;;  %v923_v46 = vpop.permute.xlu0 %922 }
 0x2d2   : > { %v330_v48 = vpop.permute.xlu1 %329  ;;  %v335_v56 = vpop.permute.xlu0 %334 }
 0x2d3   : > { %v444_v54 = vadd.f32 %v1701_v45, %v330_v48  ;;  %v449_v62 = vadd.f32 %v1709_v49, %v335_v56 }
 0x2d6   : > { %v340_v1 = vpop.permute.xlu1 %339 }
 0x2d7   : > { %v454_v6 = vadd.f32 %v1711_v51, %v340_v1 }
 0x397   : > { %v1000_v47 = vpop.f32.mrb[6].mxu0 }
 0x398   : > { %v1001_v50 = vadd.f32 %v1000_v47, %v913_v43  ;;  %v1002_v52 = vpop.f32.mrb[7].mxu0 }
 0x39a   : > { %vm1014_vm1 = vcmp.ge.f32.partialorder %v1001_v50, 0.0  ;;  %v1017_v53 = vmul.f32 0.1, %v1001_v50 }
 0x39b   : > { %v1005_v55 = vpop.f32.mrb[8].mxu0 }
 0x39c   : > { %v1020_v57 = vsel %vm1014_vm1, %v1001_v50, %v1017_v53  ;;  %v1006_v58 = vadd.f32 %v1005_v55, %v918_v44  ;;  %v1007_v59 = vpop.f32.mrb[9].mxu0 }
 0x39d   : > { %v1023_v60 = vadd.f32 %v1020_v57, %v444_v54 }
 0x39e   : > { %vm1015_vm0 = vcmp.ge.f32.partialorder %v1006_v58, 0.0  ;;  %v1018_v61 = vmul.f32 0.1, %v1006_v58 }
 0x39f   : > { %1026 = vst [vmem:[%s305_s22] sm:$0xff] %v1023_v60  ;;  %v1010_v63 = vpop.f32.mrb[10].mxu0 }
 0x3a0   : > { %v1021_v2 = vsel %vm1015_vm0, %v1006_v58, %v1018_v61  ;;  %v1011_v3 = vadd.f32 %v1010_v63, %v923_v46  ;;  %v1012_v45 = vpop.f32.mrb[11].mxu0 }
 0x3a1   : > { %v1024_v4 = vadd.f32 %v1021_v2, %v449_v62 }
 0x3a2   : > { %vm1016_vm2 = vcmp.ge.f32.partialorder %v1011_v3, 0.0  ;;  %v1019_v5 = vmul.f32 0.1, %v1011_v3 }
 0x3a3   : > { %1027 = vst [vmem:[%s305_s22 + $0x8] sm:$0xff] %v1024_v4 }
 0x3a4   : > { %v1022_v7 = vsel %vm1016_vm2, %v1011_v3, %v1019_v5 }
 0x3a5   : > { %v1025_v8 = vadd.f32 %v1022_v7, %v454_v6 }
 0x3a7   : > { %1028 = vst [vmem:[%s305_s22 + $0x10] sm:$0xff] %v1025_v8 }
 0x3a8 PF: > { %s18_s27 = sadd.s32 1, %s1461_s27  }
 0x3a9   : > { %p15_p4 = scmp.ge.s32.totalorder %s18_s27, 4  }
 0x3ab   :  { %17 = sbr.rel (!%p15_p4) target bundleno = 1 (0x1), region = 82 }

// kernel: illumination_block_pallas.9
= control target key start
LH: loop header
LB: loop body
LE: loop exit
PB: predicated region body
PF: predicated region fallthrough
CT: control target
= control target key end

     0   :  { %s1984_s27 = smov 0   ;;  %s2376_s0 = inlined_call_operand.vmem [shape: f32[2,48,146], index: 0, kind: input, shape index: {}]   ;;  %s2377_s1 = inlined_call_operand.vmem [shape: f32[1,128], index: 1, kind: input, shape index: {}]   ;;  %s2378_s2 = inlined_call_operand.vmem [shape: f32[24,432], index: 2, kind: input, shape index: {}]   ;;  %s2379_s3 = inlined_call_operand.vmem [shape: f32[24,1], index: 3, kind: input, shape index: {}]   ;;  %s2380_s4 = inlined_call_operand.vmem [shape: f32[24,216], index: 4, kind: input, shape index: {}]   ;;  %s2381_s5 = inlined_call_operand.vmem [shape: f32[24,1], index: 5, kind: input, shape index: {}]   ;;  %s2382_s6 = inlined_call_operand.vmem [shape: f32[24,48], index: 6, kind: input, shape index: {}]   ;;  %s2383_s7 = inlined_call_operand.vmem [shape: f32[24,1], index: 7, kind: input, shape index: {}]   ;;  %s2384_s8 = inlined_call_operand.vmem [shape: f32[2,24,128], index: 8, kind: output, shape index: {}]  }
   0x1 LB: > { %s1335_s28 = sadd.s32 4294967295, %s1924_s27   ;;  %p1339_p0 = scmp.ge.s32.totalorder %s1924_s27, 1  ;;  %s1924_s27 = sphi %s1984_s27, %s18_s27  }
   0x2   : > { %p262_p1 = scmp.lt.s32.totalorder %s1924_s27, 3 }
   0x4   : > { %p263_p2 = pnand %p1339_p0, %p262_p1 }
   0x5   : > { %p296_p3 = scmp.lt.s32.totalorder (!%p263_p2), %s1335_s28, 1  ;;  %v1926_v0 = vmov (!%p263_p2), 0.0|0.0   ;;  %s1927_s11 = smov (!%p263_p2), 121   ;;  %vm1928_vm0 = vmmov (!%p263_p2), 0   ;;  %v1929_v19 = vmov (!%p263_p2), 0.0   ;;  %v494_v23 = vld [vmem:[%s2378_s2 + $0x8] sm:$0xff] (!%p263_p2) }
   0x6   : > { %266 = sbr.rel (%p263_p2) target bundleno = 982 (0x3d6), region = 52  ;;  %1425 = vmatprep.subr.bf16.mxu0 (!%p263_p2), %v1926_v0  ;;  %1416 = vmatprep.mubr.msk.f32.mxu0 (!%p263_p2), %vm1928_vm0, %v1929_v19  ;;  %s1930_s12 = smov (!%p263_p2), 120   ;;  %v505_v24 = vld [vmem:[%s2379_s3] sm:$0xff] (!%p263_p2)  ;;  %v506_v25 = vld [vmem:[%s2379_s3 + $0x8] sm:$0xff] (!%p263_p2)  ;;  %v1937_v26 = vmov (!%p263_p2), 0   ;;  %v507_v27 = vld [vmem:[%s2379_s3 + $0x10] sm:$0xff] (!%p263_p2) }
   0x7   : > { %s1931_s13 = smov (!%p263_p2), 126   ;;  %s1932_s14 = smov (!%p263_p2), 116   ;;  %861 = vmatprep.mubr.f32.mxu1 (!%p263_p2), %v494_v23  ;;  %1801 = vset.pattern.permute.xlu0 (!%p263_p2), %v1937_v26  ;;  %vm390_vm1 = vcmask (!%p263_p2), 990208   ;;  %vm649_vm2 = vcmask (!%p263_p2), 982016   ;;  %vm403_vm3 = vcmask (!%p263_p2), 392192   ;;  %vm575_vm4 = vcmask (!%p263_p2), 1031168  }
   0x8   : > { %s1933_s15 = smov (!%p263_p2), 122   ;;  %s1934_s16 = smov (!%p263_p2), 127   ;;  %1802 = vset.pattern.permute.xlu1 (!%p263_p2), %v1937_v26  ;;  %vm686_vm5 = vcmask (!%p263_p2), 949248   ;;  %vm612_vm6 = vcmask (!%p263_p2), 998400   ;;  %vm538_vm7 = vcmask (!%p263_p2), 1039360   ;;  %vm723_vm8 = vcmask (!%p263_p2), 941056  }
   0x9   : > { %s1935_s17 = smov (!%p263_p2), 115   ;;  %s1936_s18 = smov (!%p263_p2), 114   ;;  %vm760_vm9 = vcmask (!%p263_p2), 932864   ;;  %vm306_vm10 = vcmask (!%p263_p2), 97280   ;;  %vm313_vm11 = vcmask (!%p263_p2), 146480   ;;  %vm987_vm15 = vcmask (!%p263_p2), 1047608  }
   0xa   : > { %307 = vst.msk [vmem:[#allocation2] sm:$0xff] (!%p263_p2), %vm306_vm10, %v1929_v19  ;;  %308 = vst.msk [vmem:[#allocation2 + $0x10] sm:$0xff] (!%p263_p2), %vm306_vm10, %v1929_v19  ;;  %s1938_s21 = smov (!%p263_p2), 7  }
   0xb   : > { %314 = vst.msk [vmem:[#allocation2 + $0x8] sm:$0xff] (!%p263_p2), %vm313_vm11, %v1929_v19  ;;  %315 = vst.msk [vmem:[#allocation2 + $0x18] sm:$0xff] (!%p263_p2), %vm313_vm11, %v1929_v19 }
   0xc   : > { %309 = vst.msk [vmem:[#allocation2 + $0x20] sm:$0xff] (!%p263_p2), %vm306_vm10, %v1929_v19 }
   0xd   : > { %s2386_s28 = smov (!%p296_p3, %s1335_s28), 1  ;;  %316 = vst.msk [vmem:[#allocation2 + $0x28] sm:$0xff] %vm313_vm11, %v1929_v19 }
   0xe   : > { %s1538_s29 = smul.u32 96, %s2386_s28 }
  0x10   : > { %s300_s10 = scalar_lea.vmem %s2376_s0, %s1538_s29 }
  0x11   : > { %v1999_v1 = vld [vmem:[%s300_s10 + $0x20] sm:$0xff]  ;;  %v326_v2 = vld [vmem:[%s300_s10 + $0x28] sm:$0xff]  ;;  %v2006_v6 = vld [vmem:[%s300_s10 + $0x30] sm:$0xff] }
  0x12   : > { %v2001_v3 = vld [vmem:[%s300_s10] sm:$0xff]  ;;  %v2004_v4 = vpack.i.bf16 %v326_v2, %v1999_v1  ;;  %v322_v5 = vld [vmem:[%s300_s10 + $0x8] sm:$0xff]  ;;  %v328_v7 = vld [vmem:[%s300_s10 + $0x38] sm:$0xff]  ;;  %v1440_v21 = vpack.c.bf16 %v2006_v6, %v1999_v1 }
  0x13   : > { %v2009_v8 = vpack.i.bf16 %v322_v5, %v2001_v3  ;;  %v2011_v9 = vld [vmem:[%s300_s10 + $0x10] sm:$0xff]  ;;  %v324_v10 = vld [vmem:[%s300_s10 + $0x18] sm:$0xff]  ;;  %v2016_v11 = vpack.i.bf16 %v328_v7, %v2006_v6  ;;  %v2023_v15 = vld [vmem:[%s300_s10 + $0x40] sm:$0xff] }
  0x14   : > { %1572 = vrot.lane.b32.xlu1 %v2004_v4, %s1927_s11  ;;  %v1566_v12 = vpack.i.bf16 %v324_v10, %v2011_v9  ;;  %v2021_v13 = vld [vmem:[%s300_s10 + $0x50] sm:$0xff]  ;;  %v332_v14 = vld [vmem:[%s300_s10 + $0x58] sm:$0xff]  ;;  %v330_v16 = vld [vmem:[%s300_s10 + $0x48] sm:$0xff]  ;;  %v1436_v20 = vpack.c.bf16 %v2011_v9, %v2001_v3 }
  0x15   : > { %1562 = vrot.lane.b32.xlu0 %v2009_v8, %s1927_s11  ;;  %v1586_v17 = vpack.i.bf16 %v332_v14, %v2021_v13  ;;  %v1581_v18 = vpack.i.bf16 %v330_v16, %v2023_v15  ;;  %v1444_v22 = vpack.c.bf16 %v2021_v13, %v2023_v15  ;;  %v333_v10 = vld [vmem:[%s2382_s6] sm:$0xff] }
  0x18   : > { %1577 = vrot.lane.b32.xlu1 %v2016_v11, %s1927_s11 }
  0x19   : > { %1567 = vrot.lane.b32.xlu0 %v1566_v12, %s1927_s11 }
  0x1c   : > { %1587 = vrot.lane.b32.xlu1 %v1586_v17, %s1927_s11 }
  0x1d   : > { %1582 = vrot.lane.b32.xlu0 %v1581_v18, %s1927_s11 }
  0x20   : > { %1597 = vrot.lane.b32.xlu1 %v2016_v11, %s1930_s12 }
  0x21   : > { %1592 = vrot.lane.b32.xlu0 %v2004_v4, %s1930_s12 }
  0x24   : > { %1607 = vrot.lane.b32.xlu1 %v1586_v17, %s1930_s12 }
  0x25   : > { %1602 = vrot.lane.b32.xlu0 %v1581_v18, %s1930_s12 }
  0x28   : > { %1617 = vrot.lane.b32.xlu1 %v1586_v17, %s1931_s13 }
  0x29   : > { %1612 = vrot.lane.b32.xlu0 %v1581_v18, %s1931_s13 }
  0x2c   : > { %1627 = vrot.lane.b32.xlu1 %v1566_v12, %s1932_s14 }
  0x2d   : > { %1622 = vrot.lane.b32.xlu0 %v2009_v8, %s1932_s14 }
  0x30   : > { %1637 = vrot.lane.b32.xlu1 %v1566_v12, %s1933_s15 }
  0x31   : > { %1632 = vrot.lane.b32.xlu0 %v2009_v8, %s1933_s15 }
  0x34   : > { %1647 = vrot.lane.b32.xlu1 %v2016_v11, %s1932_s14 }
  0x35   : > { %1642 = vrot.lane.b32.xlu0 %v2004_v4, %s1932_s14 }
  0x38   : > { %1657 = vrot.lane.b32.xlu1 %v2016_v11, %s1933_s15 }
  0x39   : > { %1652 = vrot.lane.b32.xlu0 %v2004_v4, %s1933_s15 }
  0x3c   : > { %1667 = vrot.lane.b32.xlu1 %v1586_v17, %s1932_s14 }
  0x3d   : > { %1662 = vrot.lane.b32.xlu0 %v1581_v18, %s1932_s14 }
  0x40   : > { %1677 = vrot.lane.b32.xlu1 %v1586_v17, %s1933_s15 }
  0x41   : > { %1672 = vrot.lane.b32.xlu0 %v1581_v18, %s1933_s15 }
  0x44   : > { %1687 = vrot.lane.b32.xlu1 %v1566_v12, %s1934_s16 }
  0x45   : > { %1682 = vrot.lane.b32.xlu0 %v2009_v8, %s1934_s16 }
  0x48   : > { %1697 = vrot.lane.b32.xlu1 %v1566_v12, %s1935_s17 }
  0x49   : > { %1692 = vrot.lane.b32.xlu0 %v2009_v8, %s1935_s17 }
  0x4c   : > { %1707 = vrot.lane.b32.xlu1 %v2016_v11, %s1934_s16 }
  0x4d   : > { %1702 = vrot.lane.b32.xlu0 %v2004_v4, %s1934_s16 }
  0x50   : > { %1717 = vrot.lane.b32.xlu1 %v2016_v11, %s1935_s17 }
  0x51   : > { %1712 = vrot.lane.b32.xlu0 %v2004_v4, %s1935_s17 }
  0x54   : > { %1727 = vrot.lane.b32.xlu1 %v1586_v17, %s1934_s16 }
  0x55   : > { %1722 = vrot.lane.b32.xlu0 %v1581_v18, %s1934_s16 }
  0x58   : > { %1737 = vrot.lane.b32.xlu1 %v1586_v17, %s1935_s17 }
  0x59   : > { %1732 = vrot.lane.b32.xlu0 %v1581_v18, %s1935_s17 }
  0x5c   : > { %1747 = vrot.lane.b32.xlu1 %v1566_v12, %s1931_s13 }
  0x5d   : > { %1742 = vrot.lane.b32.xlu0 %v2009_v8, %s1931_s13 }
  0x60   : > { %1757 = vrot.lane.b32.xlu1 %v1566_v12, %s1936_s18 }
  0x61   : > { %1752 = vrot.lane.b32.xlu0 %v2009_v8, %s1936_s18 }
  0x64   : > { %1767 = vrot.lane.b32.xlu1 %v1566_v12, %s1930_s12 }
  0x65   : > { %1762 = vrot.lane.b32.xlu0 %v2009_v8, %s1930_s12 }
  0x68   : > { %1777 = vrot.lane.b32.xlu1 %v2016_v11, %s1931_s13 }
  0x69   : > { %1772 = vrot.lane.b32.xlu0 %v2004_v4, %s1931_s13 }
  0x6c   : > { %1787 = vrot.lane.b32.xlu1 %v2016_v11, %s1936_s18 }
  0x6d   : > { %1782 = vrot.lane.b32.xlu0 %v2004_v4, %s1936_s18 }
  0x70   : > { %1797 = vrot.lane.b32.xlu1 %v1586_v17, %s1936_s18 }
  0x71   : > { %1792 = vrot.lane.b32.xlu0 %v1581_v18, %s1936_s18 }
  0x74   : > { %780 = vperm.xlu1 %1802, %v506_v25  }
  0x75   : > { %775 = vperm.xlu0 %1801, %v505_v24  }
  0x78   : > { %785 = vperm.xlu1 %1802, %v507_v27   ;;  %v334_v27 = vld [vmem:[%s2382_s6 + $0x8] sm:$0xff] }
  0x86   : > { %v1573_v28 = vpop.permute.xlu1 %1572 }
  0x87   : > { %v1563_v29 = vpop.permute.xlu0 %1562  ;;  %v1575_v38 = vunpack.i.h.bf16 %v1573_v28  ;;  %v1574_v39 = vunpack.i.l.bf16 %v1573_v28 }
  0x88   : > { %v1565_v30 = vunpack.i.h.bf16 %v1563_v29  ;;  %v1564_v31 = vunpack.i.l.bf16 %v1563_v29 }
  0x89   : > { %v393_v51 = vsel %vm390_vm1, %v1574_v39, %v1575_v38  ;;  %v335_v38 = vld [vmem:[%s2382_s6 + $0x10] sm:$0xff] }
  0x8a   : > { %v1578_v32 = vpop.permute.xlu1 %1577  ;;  %v391_v41 = vsel %vm390_vm1, %v1564_v31, %v1565_v30 }
  0x8b   : > { %v1580_v33 = vunpack.i.h.bf16 %v1578_v32  ;;  %v1579_v34 = vunpack.i.l.bf16 %v1578_v32  ;;  %v1568_v35 = vpop.permute.xlu0 %1567 }
  0x8c   : > { %v1570_v36 = vunpack.i.h.bf16 %v1568_v35  ;;  %v1569_v37 = vunpack.i.l.bf16 %v1568_v35 }
  0x8d   : > { %v394_v45 = vsel %vm390_vm1, %v1579_v34, %v1580_v33 }
  0x8e   : > { %v1588_v40 = vpop.permute.xlu1 %1587  ;;  %v392_v42 = vsel %vm390_vm1, %v1569_v37, %v1570_v36  ;;  %v2123_v55 = vpack.c.bf16 %v394_v45, %v393_v51 }
  0x8f   : > { %v1583_v43 = vpop.permute.xlu0 %1582  ;;  %v2117_v44 = vpack.c.bf16 %v392_v42, %v391_v41  ;;  %v1590_v46 = vunpack.i.h.bf16 %v1588_v40  ;;  %v1589_v47 = vunpack.i.l.bf16 %v1588_v40  ;;  %v496_v41 = vld [vmem:[%s2378_s2 + $0x18] sm:$0xff] }
  0x90   : > { %v1585_v48 = vunpack.i.h.bf16 %v1583_v43  ;;  %v1584_v49 = vunpack.i.l.bf16 %v1583_v43 }
  0x91   : > { %1427 = vmatpush3.bf16.msra.mxu0 %v2117_v44  ;;  %v396_v59 = vsel %vm390_vm1, %v1589_v47, %v1590_v46 }
  0x92   : > { %v1598_v50 = vpop.permute.xlu1 %1597  ;;  %1428 = vmatprep.subr.bf16.mxu0 %v1926_v0  ;;  %v395_v58 = vsel %vm390_vm1, %v1584_v49, %v1585_v48 }
  0x93   : > { %v1600_v52 = vunpack.i.h.bf16 %v1598_v50  ;;  %v1599_v53 = vunpack.i.l.bf16 %v1598_v50  ;;  %v1593_v54 = vpop.permute.xlu0 %1592  ;;  %v2131_v2 = vpack.c.bf16 %v396_v59, %v395_v58 }
  0x94   : > { %v1595_v56 = vunpack.i.h.bf16 %v1593_v54  ;;  %v1594_v57 = vunpack.i.l.bf16 %v1593_v54 }
  0x95   : > { %1430 = vmatpush3.bf16.msra.mxu0 %v2123_v55  ;;  %v653_v61 = vsel %vm649_vm2, %v1599_v53, %v1600_v52 }
  0x96   : > { %v1608_v60 = vpop.permute.xlu1 %1607  ;;  %1431 = vmatprep.subr.bf16.mxu0 %v1926_v0  ;;  %v652_v62 = vsel %vm649_vm2, %v1594_v57, %v1595_v56 }
  0x97   : > { %v1603_v63 = vpop.permute.xlu0 %1602  ;;  %v1610_v4 = vunpack.i.h.bf16 %v1608_v60  ;;  %v1609_v5 = vunpack.i.l.bf16 %v1608_v60  ;;  %v1467_v12 = vpack.c.bf16 %v653_v61, %v652_v62 }
  0x98   : > { %v1605_v7 = vunpack.i.h.bf16 %v1603_v63  ;;  %v1604_v8 = vunpack.i.l.bf16 %v1603_v63 }
  0x99   : > { %1433 = vmatpush3.bf16.msra.mxu0 %v2131_v2  ;;  %v655_v18 = vsel %vm649_vm2, %v1609_v5, %v1610_v4 }
  0x9a   : > { %v1618_v11 = vpop.permute.xlu1 %1617  ;;  %1466 = vmatprep.subr.bf16.mxu0 %v1926_v0  ;;  %v654_v23 = vsel %vm649_vm2, %v1604_v8, %v1605_v7 }
  0x9b   : > { %v1620_v14 = vunpack.i.h.bf16 %v1618_v11  ;;  %v1619_v16 = vunpack.i.l.bf16 %v1618_v11  ;;  %v1613_v17 = vpop.permute.xlu0 %1612  ;;  %v1470_v30 = vpack.c.bf16 %v655_v18, %v654_v23 }
  0x9c   : > { %v1615_v24 = vunpack.i.h.bf16 %v1613_v17  ;;  %v1614_v25 = vunpack.i.l.bf16 %v1613_v17  ;;  %1417 = vmatmul.mubr.msk.f32.vlgmr.msra.gmra.mrb[0].mxu0 %vm403_vm3, %v333_v10 }
  0x9d   : > { %1468 = vmatpush1.bf16.msra.mxu0 %v1467_v12  ;;  %v581_v26 = vsel %vm575_vm4, %v1619_v16, %v1620_v14  ;;  %1419 = vmatprep.mubr.msk.f32.mxu0 %vm1928_vm0, %v1929_v19 }
  0x9e   : > { %v1628_v28 = vpop.permute.xlu1 %1627  ;;  %1469 = vmatprep.subr.bf16.mxu0 %v1926_v0  ;;  %v580_v29 = vsel %vm575_vm4, %v1614_v25, %v1615_v24 }
  0x9f   : > { %v1630_v31 = vunpack.i.h.bf16 %v1628_v28  ;;  %v1629_v32 = vunpack.i.l.bf16 %v1628_v28  ;;  %v1623_v33 = vpop.permute.xlu0 %1622  ;;  %v1434_v34 = vpack.c.bf16 %v581_v26, %v580_v29 }
  0xa0   : > { %v1625_v35 = vunpack.i.h.bf16 %v1623_v33  ;;  %v1624_v36 = vunpack.i.l.bf16 %v1623_v33  ;;  %1420 = vmatmul.mubr.msk.f32.gmra.mrb[2].mxu0 %vm403_vm3, %v334_v27 }
  0xa1   : > { %v688_v37 = vsel %vm686_vm5, %v1629_v32, %v1630_v31  ;;  %1435 = vmatprep.subr.bf16.mxu1 %v1434_v34  ;;  %1471 = vmatpush1.bf16.msra.mxu0 %v1470_v30 }
  0xa2   : > { %v687_v39 = vsel %vm686_vm5, %v1624_v36, %v1625_v35  ;;  %v1638_v40 = vpop.permute.xlu1 %1637  ;;  %1472 = vmatprep.subr.bf16.mxu0 %v1926_v0  ;;  %1437 = vmatpush3.bf16.msra.mxu1 %v1436_v20 }
  0xa3   : > { %v1473_v42 = vpack.c.bf16 %v688_v37, %v687_v39  ;;  %v1640_v43 = vunpack.i.h.bf16 %v1638_v40  ;;  %v1639_v45 = vunpack.i.l.bf16 %v1638_v40  ;;  %v1633_v46 = vpop.permute.xlu0 %1632  ;;  %1422 = vmatprep.mubr.msk.f32.mxu0 %vm1928_vm0, %v1929_v19  ;;  %vm989_vm0 = vcmask 56320  }
  0xa4   : > { %v1635_v47 = vunpack.i.h.bf16 %v1633_v46  ;;  %v1634_v48 = vunpack.i.l.bf16 %v1633_v46  ;;  %1423 = vmatmul.mubr.msk.f32.gmra.mrb[4].mxu0 %vm403_vm3, %v335_v38 }
  0xa5   : > { %1474 = vmatpush1.bf16.msra.mxu0 %v1473_v42  ;;  %v614_v3 = vsel %vm612_vm6, %v1639_v45, %v1640_v43  ;;  %1345 = vmatprep.mubr.msk.f32.mxu0 %vm403_vm3, %v496_v41 }
  0xa6   : > { %v1648_v9 = vpop.permute.xlu1 %1647  ;;  %v613_v20 = vsel %vm612_vm6, %v1634_v48, %v1635_v47  ;;  %1475 = vmatprep.subr.bf16.mxu0 %v1926_v0 }
  0xa7   : > { %v1650_v49 = vunpack.i.h.bf16 %v1648_v9  ;;  %v1649_v50 = vunpack.i.l.bf16 %v1648_v9  ;;  %v1643_v51 = vpop.permute.xlu0 %1642  ;;  %v1438_v52 = vpack.c.bf16 %v614_v3, %v613_v20 }
  0xa8   : > { %v1645_v53 = vunpack.i.h.bf16 %v1643_v51  ;;  %v1644_v54 = vunpack.i.l.bf16 %v1643_v51 }
  0xa9   : > { %v690_v56 = vsel %vm686_vm5, %v1649_v50, %v1650_v49  ;;  %1439 = vmatprep.subr.bf16.mxu1 %v1438_v52 }
  0xaa   : > { %v689_v57 = vsel %vm686_vm5, %v1644_v54, %v1645_v53  ;;  %v1658_v58 = vpop.permute.xlu1 %1657  ;;  %1441 = vmatpush3.bf16.msra.mxu1 %v1440_v21 }
  0xab   : > { %v1476_v59 = vpack.c.bf16 %v690_v56, %v689_v57  ;;  %v1660_v60 = vunpack.i.h.bf16 %v1658_v58  ;;  %v1659_v61 = vunpack.i.l.bf16 %v1658_v58  ;;  %v1653_v62 = vpop.permute.xlu0 %1652 }
  0xac   : > { %v1655_v63 = vunpack.i.h.bf16 %v1653_v62  ;;  %v1654_v4 = vunpack.i.l.bf16 %v1653_v62 }
  0xad   : > { %1477 = vmatpush1.bf16.msra.mxu0 %v1476_v59  ;;  %v616_v5 = vsel %vm612_vm6, %v1659_v61, %v1660_v60 }
  0xae   : > { %v1668_v7 = vpop.permute.xlu1 %1667  ;;  %v615_v8 = vsel %vm612_vm6, %v1654_v4, %v1655_v63  ;;  %1478 = vmatprep.subr.bf16.mxu0 %v1926_v0 }
  0xaf   : > { %v1670_v10 = vunpack.i.h.bf16 %v1668_v7  ;;  %v1669_v11 = vunpack.i.l.bf16 %v1668_v7  ;;  %v1663_v12 = vpop.permute.xlu0 %1662  ;;  %v1442_v14 = vpack.c.bf16 %v616_v5, %v615_v8 }
  0xb0   : > { %v1665_v1 = vunpack.i.h.bf16 %v1663_v12  ;;  %v1664_v6 = vunpack.i.l.bf16 %v1663_v12 }
  0xb1   : > { %v692_v21 = vsel %vm686_vm5, %v1669_v11, %v1670_v10  ;;  %1443 = vmatprep.subr.bf16.mxu1 %v1442_v14 }
  0xb2   : > { %v691_v16 = vsel %vm686_vm5, %v1664_v6, %v1665_v1  ;;  %v1678_v17 = vpop.permute.xlu1 %1677  ;;  %1445 = vmatpush3.bf16.msra.mxu1 %v1444_v22 }
  0xb3   : > { %v1479_v18 = vpack.c.bf16 %v692_v21, %v691_v16  ;;  %v1680_v23 = vunpack.i.h.bf16 %v1678_v17  ;;  %v1679_v24 = vunpack.i.l.bf16 %v1678_v17  ;;  %v1673_v25 = vpop.permute.xlu0 %1672 }
  0xb4   : > { %v1675_v26 = vunpack.i.h.bf16 %v1673_v25  ;;  %v1674_v27 = vunpack.i.l.bf16 %v1673_v25 }
  0xb5   : > { %1480 = vmatpush1.bf16.msra.mxu0 %v1479_v18  ;;  %v618_v28 = vsel %vm612_vm6, %v1679_v24, %v1680_v23 }
  0xb6   : > { %v1688_v29 = vpop.permute.xlu1 %1687  ;;  %v617_v30 = vsel %vm612_vm6, %v1674_v27, %v1675_v26  ;;  %1481 = vmatprep.subr.bf16.mxu0 %v1926_v0 }
  0xb7   : > { %v1690_v31 = vunpack.i.h.bf16 %v1688_v29  ;;  %v1689_v32 = vunpack.i.l.bf16 %v1688_v29  ;;  %v1683_v33 = vpop.permute.xlu0 %1682  ;;  %v1446_v13 = vpack.c.bf16 %v618_v28, %v617_v30 }
  0xb8   : > { %v1685_v15 = vunpack.i.h.bf16 %v1683_v33  ;;  %v1684_v22 = vunpack.i.l.bf16 %v1683_v33 }
  0xb9   : > { %1447 = vmatprep.subr.bf16.mxu1 %v1446_v13  ;;  %v540_v34 = vsel %vm538_vm7, %v1689_v32, %v1690_v31 }
  0xba   : > { %v1698_v35 = vpop.permute.xlu1 %1697  ;;  %v539_v36 = vsel %vm538_vm7, %v1684_v22, %v1685_v15 }
  0xbb   : > { %v1700_v37 = vunpack.i.h.bf16 %v1698_v35  ;;  %v1699_v38 = vunpack.i.l.bf16 %v1698_v35  ;;  %v1693_v39 = vpop.permute.xlu0 %1692  ;;  %v1448_v40 = vpack.c.bf16 %v540_v34, %v539_v36 }
  0xbc   : > { %v1695_v41 = vunpack.i.h.bf16 %v1693_v39  ;;  %v1694_v42 = vunpack.i.l.bf16 %v1693_v39 }
  0xbd   : > { %v725_v43 = vsel %vm723_vm8, %v1699_v38, %v1700_v37  ;;  %1449 = vmatpush3.bf16.msra.mxu1 %v1448_v40 }
  0xbe   : > { %v724_v45 = vsel %vm723_vm8, %v1694_v42, %v1695_v41  ;;  %1451 = vmatprep.subr.bf16.mxu1 %v2117_v44  ;;  %v1708_v46 = vpop.permute.xlu1 %1707 }
  0xbf   : > { %v1482_v47 = vpack.c.bf16 %v725_v43, %v724_v45  ;;  %v1710_v48 = vunpack.i.h.bf16 %v1708_v46  ;;  %v1709_v3 = vunpack.i.l.bf16 %v1708_v46  ;;  %v1703_v9 = vpop.permute.xlu0 %1702 }
  0xc0   : > { %v1705_v20 = vunpack.i.h.bf16 %v1703_v9  ;;  %v1704_v49 = vunpack.i.l.bf16 %v1703_v9 }
  0xc1   : > { %1483 = vmatpush1.bf16.msra.mxu0 %v1482_v47  ;;  %v542_v50 = vsel %vm538_vm7, %v1709_v3, %v1710_v48 }
  0xc2   : > { %v1718_v51 = vpop.permute.xlu1 %1717  ;;  %v541_v52 = vsel %vm538_vm7, %v1704_v49, %v1705_v20  ;;  %1484 = vmatprep.subr.bf16.mxu0 %v1926_v0 }
  0xc3   : > { %v1720_v53 = vunpack.i.h.bf16 %v1718_v51  ;;  %v1719_v54 = vunpack.i.l.bf16 %v1718_v51  ;;  %v1713_v56 = vpop.permute.xlu0 %1712  ;;  %v1452_v57 = vpack.c.bf16 %v542_v50, %v541_v52 }
  0xc4   : > { %v1715_v44 = vunpack.i.h.bf16 %v1713_v56  ;;  %v1714_v58 = vunpack.i.l.bf16 %v1713_v56 }
  0xc5   : > { %v727_v59 = vsel %vm723_vm8, %v1719_v54, %v1720_v53  ;;  %1453 = vmatpush3.bf16.msra.mxu1 %v1452_v57 }
  0xc6   : > { %v726_v60 = vsel %vm723_vm8, %v1714_v58, %v1715_v44  ;;  %1455 = vmatprep.subr.bf16.mxu1 %v2123_v55  ;;  %v1728_v61 = vpop.permute.xlu1 %1727 }
  0xc7   : > { %v1485_v62 = vpack.c.bf16 %v727_v59, %v726_v60  ;;  %v1730_v63 = vunpack.i.h.bf16 %v1728_v61  ;;  %v1729_v4 = vunpack.i.l.bf16 %v1728_v61  ;;  %v1723_v5 = vpop.permute.xlu0 %1722  ;;  %v493_v61 = vld [vmem:[%s2378_s2] sm:$0xff] }
  0xc8   : > { %v1725_v7 = vunpack.i.h.bf16 %v1723_v5  ;;  %v1724_v8 = vunpack.i.l.bf16 %v1723_v5 }
  0xc9   : > { %1486 = vmatpush1.bf16.msra.mxu0 %v1485_v62  ;;  %v544_v10 = vsel %vm538_vm7, %v1729_v4, %v1730_v63  ;;  %v498_v4 = vld [vmem:[%s2378_s2 + $0x28] sm:$0xff] }
  0xca   : > { %v1738_v11 = vpop.permute.xlu1 %1737  ;;  %v543_v12 = vsel %vm538_vm7, %v1724_v8, %v1725_v7  ;;  %1487 = vmatprep.subr.bf16.mxu0 %v1926_v0 }
  0xcb   : > { %v1740_v14 = vunpack.i.h.bf16 %v1738_v11  ;;  %v1739_v1 = vunpack.i.l.bf16 %v1738_v11  ;;  %v1733_v6 = vpop.permute.xlu0 %1732  ;;  %v1456_v21 = vpack.c.bf16 %v544_v10, %v543_v12 }
  0xcc   : > { %v1735_v55 = vunpack.i.h.bf16 %v1733_v6  ;;  %v1734_v16 = vunpack.i.l.bf16 %v1733_v6 }
  0xcd   : > { %v729_v17 = vsel %vm723_vm8, %v1739_v1, %v1740_v14  ;;  %1457 = vmatpush3.bf16.msra.mxu1 %v1456_v21  ;;  %v497_v1 = vld [vmem:[%s2378_s2 + $0x20] sm:$0xff]  ;;  %v502_v21 = vld [vmem:[%s2378_s2 + $0x48] sm:$0xff] }
  0xce   : > { %v728_v18 = vsel %vm723_vm8, %v1734_v16, %v1735_v55  ;;  %1459 = vmatprep.subr.bf16.mxu1 %v2131_v2  ;;  %v1748_v23 = vpop.permute.xlu1 %1747  ;;  %v501_v16 = vld [vmem:[%s2378_s2 + $0x40] sm:$0xff] }
  0xcf   : > { %v1488_v24 = vpack.c.bf16 %v729_v17, %v728_v18  ;;  %v1750_v25 = vunpack.i.h.bf16 %v1748_v23  ;;  %v1749_v26 = vunpack.i.l.bf16 %v1748_v23  ;;  %v1743_v27 = vpop.permute.xlu0 %1742  ;;  %v495_v17 = vld [vmem:[%s2378_s2 + $0x10] sm:$0xff]  ;;  %v500_v18 = vld [vmem:[%s2378_s2 + $0x38] sm:$0xff] }
  0xd0   : > { %v1745_v28 = vunpack.i.h.bf16 %v1743_v27  ;;  %v1744_v29 = vunpack.i.l.bf16 %v1743_v27  ;;  %v499_v23 = vld [vmem:[%s2378_s2 + $0x30] sm:$0xff] }
  0xd1   : > { %1489 = vmatpush1.bf16.msra.mxu0 %v1488_v24  ;;  %v577_v30 = vsel %vm575_vm4, %v1749_v26, %v1750_v25  ;;  %v504_v24 = vld [vmem:[%s2378_s2 + $0x58] sm:$0xff]  ;;  %v503_v25 = vld [vmem:[%s2378_s2 + $0x50] sm:$0xff] }
  0xd2   : > { %v1758_v31 = vpop.permute.xlu1 %1757  ;;  %v576_v32 = vsel %vm575_vm4, %v1744_v29, %v1745_v28  ;;  %1490 = vmatprep.subr.bf16.mxu0 %v1926_v0 }
  0xd3   : > { %v1760_v33 = vunpack.i.h.bf16 %v1758_v31  ;;  %v1759_v13 = vunpack.i.l.bf16 %v1758_v31  ;;  %v1753_v15 = vpop.permute.xlu0 %1752  ;;  %v1460_v2 = vpack.c.bf16 %v577_v30, %v576_v32 }
  0xd4   : > { %v1755_v22 = vunpack.i.h.bf16 %v1753_v15  ;;  %v1754_v34 = vunpack.i.l.bf16 %v1753_v15 }
  0xd5   : > { %v762_v35 = vsel %vm760_vm9, %v1759_v13, %v1760_v33  ;;  %1461 = vmatpush3.bf16.msra.mxu1 %v1460_v2 }
  0xd6   : > { %v761_v36 = vsel %vm760_vm9, %v1754_v34, %v1755_v22  ;;  %v1768_v37 = vpop.permute.xlu1 %1767 }
  0xd7   : > { %v1491_v38 = vpack.c.bf16 %v762_v35, %v761_v36  ;;  %v1770_v39 = vunpack.i.h.bf16 %v1768_v37  ;;  %v1769_v40 = vunpack.i.l.bf16 %v1768_v37  ;;  %v1763_v41 = vpop.permute.xlu0 %1762 }
  0xd8   : > { %v1765_v42 = vunpack.i.h.bf16 %v1763_v41  ;;  %v1764_v43 = vunpack.i.l.bf16 %v1763_v41 }
  0xd9   : > { %1492 = vmatpush1.bf16.msra.mxu0 %v1491_v38  ;;  %v651_v45 = vsel %vm649_vm2, %v1769_v40, %v1770_v39 }
  0xda   : > { %v1778_v46 = vpop.permute.xlu1 %1777  ;;  %v650_v47 = vsel %vm649_vm2, %v1764_v43, %v1765_v42  ;;  %1493 = vmatprep.subr.bf16.mxu0 %v1926_v0 }
  0xdb   : > { %v1780_v48 = vunpack.i.h.bf16 %v1778_v46  ;;  %v1779_v3 = vunpack.i.l.bf16 %v1778_v46  ;;  %v1773_v9 = vpop.permute.xlu0 %1772  ;;  %v1462_v20 = vpack.c.bf16 %v651_v45, %v650_v47  ;;  %v1348_v46 = vld [vmem:[%s2377_s1] ss:$0 sm:$0xff] }
  0xdc   : > { %v1775_v49 = vunpack.i.h.bf16 %v1773_v9  ;;  %v1774_v50 = vunpack.i.l.bf16 %v1773_v9 }
  0xdd   : > { %1463 = vmatprep.subr.bf16.mxu1 %v1462_v20  ;;  %v579_v51 = vsel %vm575_vm4, %v1779_v3, %v1780_v48 }
  0xde   : > { %v1788_v52 = vpop.permute.xlu1 %1787  ;;  %v578_v53 = vsel %vm575_vm4, %v1774_v50, %v1775_v49 }
  0xdf   : > { %v1790_v54 = vunpack.i.h.bf16 %v1788_v52  ;;  %v1789_v56 = vunpack.i.l.bf16 %v1788_v52  ;;  %v1783_v57 = vpop.permute.xlu0 %1782  ;;  %v1464_v44 = vpack.c.bf16 %v579_v51, %v578_v53 }
  0xe0   : > { %v1785_v58 = vunpack.i.h.bf16 %v1783_v57  ;;  %v1784_v59 = vunpack.i.l.bf16 %v1783_v57 }
  0xe1   : > { %v764_v60 = vsel %vm760_vm9, %v1789_v56, %v1790_v54  ;;  %1465 = vmatpush3.bf16.msra.mxu1 %v1464_v44 }
  0xe2   : > { %v763_v62 = vsel %vm760_vm9, %v1784_v59, %v1785_v58  ;;  %v1798_v63 = vpop.permute.xlu1 %1797  ;;  %1499 = vmatprep.subr.bf16.mxu1 %v1926_v0 }
  0xe3   : > { %v1494_v5 = vpack.c.bf16 %v764_v60, %v763_v62  ;;  %v1800_v7 = vunpack.i.h.bf16 %v1798_v63  ;;  %v1799_v8 = vunpack.i.l.bf16 %v1798_v63  ;;  %v1793_v10 = vpop.permute.xlu0 %1792 }
  0xe4   : > { %v1795_v11 = vunpack.i.h.bf16 %v1793_v10  ;;  %v1794_v12 = vunpack.i.l.bf16 %v1793_v10  ;;  %862 = vmatmul.mubr.f32.vlgmr.msra.gmra.mrb[0].mxu1 %v493_v61 }
  0xe5   : > { %v766_v14 = vsel %vm760_vm9, %v1799_v8, %v1800_v7  ;;  %1495 = vmatpush1.bf16.msra.mxu0 %v1494_v5  ;;  %866 = vmatprep.mubr.f32.mxu1 %v498_v4 }
  0xe6   : > { %v765_v6 = vsel %vm760_vm9, %v1794_v12, %v1795_v11  ;;  %1496 = vmatprep.subr.bf16.mxu0 %v1926_v0 }
  0xe7   : > { %v1497_v55 = vpack.c.bf16 %v766_v14, %v765_v6  ;;  %v996_v6 = vld [vmem:[%s2380_s4 + $0x8] sm:$0xff] }
  0xe8   : > { %867 = vmatmul.mubr.f32.gmra.mrb[2].mxu1 %v497_v1 }
  0xe9   : > { %1498 = vmatpush1.bf16.msra.mxu0 %v1497_v55  ;;  %871 = vmatprep.mubr.f32.mxu1 %v502_v21  ;;  %v1001_v21 = vld [vmem:[%s2381_s5] sm:$0xff]  ;;  %v1003_v55 = vld [vmem:[%s2381_s5 + $0x10] sm:$0xff] }
  0xec   : > { %872 = vmatmul.mubr.f32.gmra.mrb[4].mxu1 %v501_v16  ;;  %942 = vmatmul.mubr.f32.vlgmr.msra.gmra.mrb[6].mxu0 %v495_v17  ;;  %v1002_v16 = vld [vmem:[%s2381_s5 + $0x8] sm:$0xff] }
  0xed   : > { %1346 = vmatprep.mubr.msk.f32.mxu0 %vm403_vm3, %v500_v18  ;;  %v337_v17 = vld [vmem:[%s2383_s7 + $0x8] sm:$0xff]  ;;  %v336_v18 = vld [vmem:[%s2383_s7] sm:$0xff] }
  0xf0   : > { %947 = vmatmul.mubr.f32.gmra.mrb[8].mxu0 %v499_v23  ;;  %v338_v23 = vld [vmem:[%s2383_s7 + $0x10] sm:$0xff] }
  0xf1   : > { %1347 = vmatprep.mubr.msk.f32.mxu0 %vm403_vm3, %v504_v24  ;;  %vm1175_vm3 = vcmask 719872  }
  0xf2   : > { %1349 = vmatprep.mubr.msk.f32.mxu1 %vm1175_vm3, %v996_v6 }
  0xf3   : > { %v781_v35 = vpop.permute.xlu1 %780 }
  0xf4   : > { %952 = vmatmul.mubr.f32.gmra.mrb[10].mxu0 %v503_v25  ;;  %v776_v15 = vpop.permute.xlu0 %775 }
  0xf7   : > { %v786_v47 = vpop.permute.xlu1 %785 }
 0x16f   : > { %v2256_v26 = vpop.f32.mrb[0].mxu0 }
 0x170   : > { %v1418_v27 = vpop.f32.mrb[1].mxu0 }
 0x173   : > { %v2258_v28 = vpop.f32.mrb[2].mxu0 }
 0x174   : > { %v1421_v29 = vpop.f32.mrb[3].mxu0 }
 0x177   : > { %v2260_v30 = vpop.f32.mrb[4].mxu0 }
 0x178   : > { %v1424_v31 = vpop.f32.mrb[5].mxu0 }
 0x1b7   : > { %v1395_v32 = vpop.f32.mrb[0].mxu1 }
 0x1b8   : > { %v1396_v33 = vpop.f32.mrb[1].mxu1 }
 0x1b9   : > { %v1397_v13 = vadd.f32 %v1396_v33, %v1395_v32 }
 0x1bb   : > { %v1398_v2 = vpop.f32.mrb[2].mxu1  ;;  %v864_v22 = vadd.f32 %v1397_v13, %v776_v15 }
 0x1bc   : > { %v1399_v34 = vpop.f32.mrb[3].mxu1 }
 0x1bd   : > { %v1400_v36 = vadd.f32 %v1399_v34, %v1398_v2 }
 0x1bf   : > { %v1401_v37 = vpop.f32.mrb[4].mxu1  ;;  %v943_v38 = vpop.f32.mrb[6].mxu0  ;;  %v869_v42 = vadd.f32 %v1400_v36, %v781_v35 }
 0x1c0   : > { %v944_v39 = vadd.f32 %v943_v38, %v864_v22  ;;  %v1402_v40 = vpop.f32.mrb[5].mxu1  ;;  %v945_v41 = vpop.f32.mrb[7].mxu0 }
 0x1c1   : > { %v1403_v43 = vadd.f32 %v1402_v40, %v1401_v37 }
 0x1c2   : > { %vm957_vm12 = vcmp.ge.f32.partialorder %v944_v39, 0.0  ;;  %v960_v45 = vmul.f32 0.1, %v944_v39 }
 0x1c3   : > { %v948_v48 = vpop.f32.mrb[8].mxu0  ;;  %v874_v50 = vadd.f32 %v1403_v43, %v786_v47 }
 0x1c4   : > { %v949_v3 = vadd.f32 %v948_v48, %v869_v42  ;;  %v950_v9 = vpop.f32.mrb[9].mxu0  ;;  %v963_v20 = vsel %vm957_vm12, %v944_v39, %v960_v45 }
 0x1c5   : > { %v972_v49 = vmul.f32 %v1348_v46, %v963_v20 }
 0x1c6   : > { %vm958_vm13 = vcmp.ge.f32.partialorder %v949_v3, 0.0  ;;  %v961_v51 = vmul.f32 0.1, %v949_v3 }
 0x1c7   : > { %v953_v52 = vpop.f32.mrb[10].mxu0  ;;  %978 = vrot.lane.b32.xlu0 %v972_v49, %s1938_s21 }
 0x1c8   : > { %v954_v53 = vadd.f32 %v953_v52, %v874_v50  ;;  %v955_v54 = vpop.f32.mrb[11].mxu0  ;;  %v964_v56 = vsel %vm958_vm13, %v949_v3, %v961_v51 }
 0x1c9   : > { %v973_v57 = vmul.f32 %v1348_v46, %v964_v56 }
 0x1ca   : > { %vm959_vm14 = vcmp.ge.f32.partialorder %v954_v53, 0.0  ;;  %v962_v44 = vmul.f32 0.1, %v954_v53 }
 0x1cb   : > { %980 = vrot.lane.b32.xlu1 %v973_v57, %s1938_s21 }
 0x1cc   : > { %v965_v58 = vsel %vm959_vm14, %v954_v53, %v962_v44 }
 0x1cd   : > { %v974_v59 = vmul.f32 %v1348_v46, %v965_v58 }
 0x1cf   : > { %982 = vrot.lane.b32.xlu0 %v974_v59, %s1938_s21 }
 0x239   : > { %v979_v60 = vpop.permute.xlu0 %978 }
 0x23a   : > { %988 = vst.msk [vmem:[#allocation2] sm:$0xff] %vm987_vm15, %v979_v60 }
 0x23b   : > { %990 = vst.msk [vmem:[#allocation2 + $0x8] sm:$0xff] %vm989_vm0, %v979_v60 }
 0x23d   : > { %v981_v61 = vpop.permute.xlu1 %980 }
 0x23e   : > { %991 = vst.msk [vmem:[#allocation2 + $0x10] sm:$0xff] %vm987_vm15, %v981_v61 }
 0x23f   : > { %992 = vst.msk [vmem:[#allocation2 + $0x18] sm:$0xff] %vm989_vm0, %v981_v61 }
 0x241   : > { %v983_v62 = vpop.permute.xlu0 %982  ;;  %v1004_v63 = vld [vmem:[#allocation2] sm:$0xff] }
 0x242   : > { %v1007_v4 = vld [vmem:[#allocation2 + $0x8] sm:$0xff]  ;;  %993 = vst.msk [vmem:[#allocation2 + $0x20] sm:$0xff] %vm987_vm15, %v983_v62 }
 0x243   : > { %994 = vst.msk [vmem:[#allocation2 + $0x28] sm:$0xff] %vm989_vm0, %v983_v62  ;;  %v1803_v5 = vpack.i.bf16 %v1007_v4, %v1004_v63 }
 0x245   : > { %1804 = vrot.lane.b32.xlu1 %v1803_v5, %s1934_s16  ;;  %v1005_v7 = vld [vmem:[#allocation2 + $0x10] sm:$0xff] }
 0x246   : > { %v1008_v8 = vld [vmem:[#allocation2 + $0x18] sm:$0xff]  ;;  %v1500_v11 = vpack.c.bf16 %v1005_v7, %v1004_v63 }
 0x247   : > { %v1808_v10 = vpack.i.bf16 %v1008_v8, %v1005_v7 }
 0x248   : > { %1501 = vmatpush1.bf16.msra.mxu1 %v1500_v11 }
 0x249   : > { %1809 = vrot.lane.b32.xlu0 %v1808_v10, %s1934_s16  ;;  %v1006_v12 = vld [vmem:[#allocation2 + $0x20] sm:$0xff]  ;;  %1502 = vmatprep.subr.bf16.mxu1 %v1926_v0 }
 0x24a   : > { %v1009_v14 = vld [vmem:[#allocation2 + $0x28] sm:$0xff] }
 0x24b   : > { %v1818_v1 = vpack.i.bf16 %v1009_v14, %v1006_v12 }
 0x24d   : > { %1814 = vrot.lane.b32.xlu0 %v1803_v5, %s1931_s13  ;;  %1819 = vrot.lane.b32.xlu1 %v1818_v1, %s1934_s16 }
 0x251   : > { %1834 = vrot.lane.b32.xlu0 %v1818_v1, %s1931_s13  ;;  %1824 = vrot.lane.b32.xlu1 %v1808_v10, %s1931_s13 }
 0x255   : > { %1839 = vrot.lane.b32.xlu0 %v1808_v10, %s1933_s15  ;;  %1829 = vrot.lane.b32.xlu1 %v1803_v5, %s1933_s15 }
 0x259   : > { %1844 = vrot.lane.b32.xlu0 %v1803_v5, %s1927_s11  ;;  %1849 = vrot.lane.b32.xlu1 %v1818_v1, %s1933_s15  ;;  %s1539_s15 = smul.u32 24, %s2386_s28 }
 0x25b   : > { %s305_s22 = scalar_lea.vmem %s2384_s8, %s1539_s15 }
 0x25d   : > { %1864 = vrot.lane.b32.xlu0 %v1818_v1, %s1927_s11  ;;  %1854 = vrot.lane.b32.xlu1 %v1808_v10, %s1927_s11 }
 0x261   : > { %1869 = vrot.lane.b32.xlu0 %v1808_v10, %s1930_s12  ;;  %1859 = vrot.lane.b32.xlu1 %v1803_v5, %s1930_s12 }
 0x265   : > { %1874 = vrot.lane.b32.xlu0 %v1803_v5, %s1932_s14  ;;  %1879 = vrot.lane.b32.xlu1 %v1818_v1, %s1930_s12 }
 0x269   : > { %1894 = vrot.lane.b32.xlu0 %v1818_v1, %s1932_s14  ;;  %1884 = vrot.lane.b32.xlu1 %v1808_v10, %s1932_s14 }
 0x26d   : > { %1899 = vrot.lane.b32.xlu0 %v1808_v10, %s1935_s17  ;;  %1889 = vrot.lane.b32.xlu1 %v1803_v5, %s1935_s17 }
 0x271   : > { %1904 = vrot.lane.b32.xlu0 %v1803_v5, %s1936_s18  ;;  %1909 = vrot.lane.b32.xlu1 %v1818_v1, %s1935_s17 }
 0x275   : > { %1150 = vrot.lane.b32.xlu0 %v1006_v12, %s1936_s18  ;;  %1914 = vrot.lane.b32.xlu1 %v1808_v10, %s1936_s18 }
 0x279   : > { %1162 = vperm.xlu0 %1801, %v1001_v21   ;;  %1152 = vrot.lane.b32.xlu1 %v1009_v14, %s1936_s18 }
 0x27d   : > { %1172 = vperm.xlu0 %1801, %v1003_v55   ;;  %1167 = vperm.xlu1 %1802, %v1002_v16  }
 0x281   : > { %346 = vperm.xlu0 %1801, %v337_v17   ;;  %341 = vperm.xlu1 %1802, %v336_v18  }
 0x285   : > { %351 = vperm.xlu1 %1802, %v338_v23  }
 0x2b7   : > { %v1805_v24 = vpop.permute.xlu1 %1804 }
 0x2b8   : > { %v1807_v25 = vunpack.i.h.bf16 %v1805_v24  ;;  %v1806_v27 = vunpack.i.l.bf16 %v1805_v24 }
 0x2ba   : > { %v1028_v29 = vsel %vm538_vm7, %v1806_v27, %v1807_v25 }
 0x2bb   : > { %v1503_v31 = vpack.c.bf16 %v1028_v29, %v1006_v12  ;;  %v1810_v32 = vpop.permute.xlu0 %1809 }
 0x2bc   : > { %v1812_v33 = vunpack.i.h.bf16 %v1810_v32  ;;  %v1811_v13 = vunpack.i.l.bf16 %v1810_v32 }
 0x2bd   : > { %1504 = vmatpush1.bf16.msra.mxu1 %v1503_v31 }
 0x2be   : > { %1505 = vmatprep.subr.bf16.mxu1 %v1926_v0  ;;  %v1029_v35 = vsel %vm538_vm7, %v1811_v13, %v1812_v33 }
 0x2bf   : > { %v1820_v15 = vpop.permute.xlu1 %1819  ;;  %v1815_v2 = vpop.permute.xlu0 %1814 }
 0x2c0   : > { %v1822_v22 = vunpack.i.h.bf16 %v1820_v15  ;;  %v1821_v34 = vunpack.i.l.bf16 %v1820_v15  ;;  %v1817_v37 = vunpack.i.h.bf16 %v1815_v2  ;;  %v1816_v38 = vunpack.i.l.bf16 %v1815_v2 }
 0x2c2   : > { %v1030_v36 = vsel %vm538_vm7, %v1821_v34, %v1822_v22  ;;  %v1046_v45 = vsel %vm575_vm4, %v1816_v38, %v1817_v37 }
 0x2c3   : > { %v1506_v39 = vpack.c.bf16 %v1030_v36, %v1029_v35  ;;  %v1825_v40 = vpop.permute.xlu1 %1824  ;;  %v1835_v41 = vpop.permute.xlu0 %1834 }
 0x2c4   : > { %v1827_v42 = vunpack.i.h.bf16 %v1825_v40  ;;  %v1826_v43 = vunpack.i.l.bf16 %v1825_v40  ;;  %v1837_v47 = vunpack.i.h.bf16 %v1835_v41  ;;  %v1836_v48 = vunpack.i.l.bf16 %v1835_v41 }
 0x2c5   : > { %1507 = vmatpush1.bf16.msra.mxu1 %v1506_v39 }
 0x2c6   : > { %v1047_v46 = vsel %vm575_vm4, %v1826_v43, %v1827_v42  ;;  %1508 = vmatprep.subr.bf16.mxu1 %v1926_v0  ;;  %v1048_v51 = vsel %vm575_vm4, %v1836_v48, %v1837_v47 }
 0x2c7   : > { %v1509_v3 = vpack.c.bf16 %v1047_v46, %v1046_v45  ;;  %v1830_v9 = vpop.permute.xlu1 %1829  ;;  %v1840_v20 = vpop.permute.xlu0 %1839 }
 0x2c8   : > { %v1832_v49 = vunpack.i.h.bf16 %v1830_v9  ;;  %v1831_v50 = vunpack.i.l.bf16 %v1830_v9  ;;  %v1842_v53 = vunpack.i.h.bf16 %v1840_v20  ;;  %v1841_v54 = vunpack.i.l.bf16 %v1840_v20 }
 0x2c9   : > { %1510 = vmatpush1.bf16.msra.mxu1 %v1509_v3 }
 0x2ca   : > { %v1064_v52 = vsel %vm612_vm6, %v1831_v50, %v1832_v49  ;;  %1511 = vmatprep.subr.bf16.mxu1 %v1926_v0  ;;  %v1065_v60 = vsel %vm612_vm6, %v1841_v54, %v1842_v53 }
 0x2cb   : > { %v1512_v56 = vpack.c.bf16 %v1064_v52, %v1048_v51  ;;  %v1850_v57 = vpop.permute.xlu1 %1849  ;;  %v1845_v44 = vpop.permute.xlu0 %1844 }
 0x2cc   : > { %v1852_v58 = vunpack.i.h.bf16 %v1850_v57  ;;  %v1851_v59 = vunpack.i.l.bf16 %v1850_v57  ;;  %v1847_v62 = vunpack.i.h.bf16 %v1845_v44  ;;  %v1846_v63 = vunpack.i.l.bf16 %v1845_v44 }
 0x2cd   : > { %1513 = vmatpush1.bf16.msra.mxu1 %v1512_v56 }
 0x2ce   : > { %v1066_v61 = vsel %vm612_vm6, %v1851_v59, %v1852_v58  ;;  %1514 = vmatprep.subr.bf16.mxu1 %v1926_v0  ;;  %v1082_v11 = vsel %vm390_vm1, %v1846_v63, %v1847_v62 }
 0x2cf   : > { %v1515_v4 = vpack.c.bf16 %v1066_v61, %v1065_v60  ;;  %v1855_v5 = vpop.permute.xlu1 %1854  ;;  %v1865_v7 = vpop.permute.xlu0 %1864 }
 0x2d0   : > { %v1857_v8 = vunpack.i.h.bf16 %v1855_v5  ;;  %v1856_v10 = vunpack.i.l.bf16 %v1855_v5  ;;  %v1867_v14 = vunpack.i.h.bf16 %v1865_v7  ;;  %v1866_v1 = vunpack.i.l.bf16 %v1865_v7 }
 0x2d1   : > { %1516 = vmatpush1.bf16.msra.mxu1 %v1515_v4 }
 0x2d2   : > { %v1083_v12 = vsel %vm390_vm1, %v1856_v10, %v1857_v8  ;;  %1517 = vmatprep.subr.bf16.mxu1 %v1926_v0  ;;  %v1084_v18 = vsel %vm390_vm1, %v1866_v1, %v1867_v14  ;;  %v995_v10 = vld [vmem:[%s2380_s4] sm:$0xff] }
 0x2d3   : > { %v1518_v6 = vpack.c.bf16 %v1083_v12, %v1082_v11  ;;  %v1860_v21 = vpop.permute.xlu1 %1859  ;;  %v1870_v55 = vpop.permute.xlu0 %1869  ;;  %v998_v12 = vld [vmem:[%s2380_s4 + $0x18] sm:$0xff]  ;;  %v999_v14 = vld [vmem:[%s2380_s4 + $0x20] sm:$0xff] }
 0x2d4   : > { %v1862_v16 = vunpack.i.h.bf16 %v1860_v21  ;;  %v1861_v17 = vunpack.i.l.bf16 %v1860_v21  ;;  %v1872_v24 = vunpack.i.h.bf16 %v1870_v55  ;;  %v1871_v25 = vunpack.i.l.bf16 %v1870_v55 }
 0x2d5   : > { %1519 = vmatpush1.bf16.msra.mxu1 %v1518_v6 }
 0x2d6   : > { %v1100_v23 = vsel %vm649_vm2, %v1861_v17, %v1862_v16  ;;  %1520 = vmatprep.subr.bf16.mxu1 %v1926_v0  ;;  %v1101_v13 = vsel %vm649_vm2, %v1871_v25, %v1872_v24 }
 0x2d7   : > { %v1521_v27 = vpack.c.bf16 %v1100_v23, %v1084_v18  ;;  %v1880_v29 = vpop.permute.xlu1 %1879  ;;  %v1875_v31 = vpop.permute.xlu0 %1874 }
 0x2d8   : > { %v1882_v32 = vunpack.i.h.bf16 %v1880_v29  ;;  %v1881_v33 = vunpack.i.l.bf16 %v1880_v29  ;;  %v1877_v2 = vunpack.i.h.bf16 %v1875_v31  ;;  %v1876_v22 = vunpack.i.l.bf16 %v1875_v31 }
 0x2d9   : > { %1522 = vmatpush1.bf16.msra.mxu1 %v1521_v27 }
 0x2da   : > { %v1102_v15 = vsel %vm649_vm2, %v1881_v33, %v1882_v32  ;;  %1523 = vmatprep.subr.bf16.mxu1 %v1926_v0  ;;  %v1118_v39 = vsel %vm686_vm5, %v1876_v22, %v1877_v2 }
 0x2db   : > { %v1524_v34 = vpack.c.bf16 %v1102_v15, %v1101_v13  ;;  %v1885_v35 = vpop.permute.xlu1 %1884  ;;  %v1895_v36 = vpop.permute.xlu0 %1894 }
 0x2dc   : > { %v1887_v37 = vunpack.i.h.bf16 %v1885_v35  ;;  %v1886_v38 = vunpack.i.l.bf16 %v1885_v35  ;;  %v1897_v41 = vunpack.i.h.bf16 %v1895_v36  ;;  %v1896_v42 = vunpack.i.l.bf16 %v1895_v36 }
 0x2dd   : > { %1525 = vmatpush1.bf16.msra.mxu1 %v1524_v34 }
 0x2de   : > { %v1119_v40 = vsel %vm686_vm5, %v1886_v38, %v1887_v37  ;;  %1526 = vmatprep.subr.bf16.mxu1 %v1926_v0  ;;  %v1120_v3 = vsel %vm686_vm5, %v1896_v42, %v1897_v41 }
 0x2df   : > { %v1527_v43 = vpack.c.bf16 %v1119_v40, %v1118_v39  ;;  %v1890_v45 = vpop.permute.xlu1 %1889  ;;  %v1900_v46 = vpop.permute.xlu0 %1899 }
 0x2e0   : > { %v1892_v47 = vunpack.i.h.bf16 %v1890_v45  ;;  %v1891_v48 = vunpack.i.l.bf16 %v1890_v45  ;;  %v1902_v20 = vunpack.i.h.bf16 %v1900_v46  ;;  %v1901_v49 = vunpack.i.l.bf16 %v1900_v46 }
 0x2e1   : > { %1528 = vmatpush1.bf16.msra.mxu1 %v1527_v43 }
 0x2e2   : > { %v1136_v9 = vsel %vm723_vm8, %v1891_v48, %v1892_v47  ;;  %1529 = vmatprep.subr.bf16.mxu1 %v1926_v0  ;;  %v1137_v56 = vsel %vm723_vm8, %v1901_v49, %v1902_v20 }
 0x2e3   : > { %v1530_v50 = vpack.c.bf16 %v1136_v9, %v1120_v3  ;;  %v1910_v51 = vpop.permute.xlu1 %1909  ;;  %v1905_v52 = vpop.permute.xlu0 %1904 }
 0x2e4   : > { %v1912_v53 = vunpack.i.h.bf16 %v1910_v51  ;;  %v1911_v54 = vunpack.i.l.bf16 %v1910_v51  ;;  %v1907_v44 = vunpack.i.h.bf16 %v1905_v52  ;;  %v1906_v58 = vunpack.i.l.bf16 %v1905_v52 }
 0x2e5   : > { %1531 = vmatpush1.bf16.msra.mxu1 %v1530_v50 }
 0x2e6   : > { %v1138_v57 = vsel %vm723_vm8, %v1911_v54, %v1912_v53  ;;  %1532 = vmatprep.subr.bf16.mxu1 %v1926_v0  ;;  %v1154_v63 = vsel %vm760_vm9, %v1906_v58, %v1907_v44 }
 0x2e7   : > { %v1533_v59 = vpack.c.bf16 %v1138_v57, %v1137_v56  ;;  %v1915_v60 = vpop.permute.xlu1 %1914  ;;  %v1151_v8 = vpop.permute.xlu0 %1150 }
 0x2e8   : > { %v1917_v61 = vunpack.i.h.bf16 %v1915_v60  ;;  %v1916_v62 = vunpack.i.l.bf16 %v1915_v60 }
 0x2e9   : > { %1534 = vmatpush1.bf16.msra.mxu1 %v1533_v59 }
 0x2ea   : > { %v1155_v4 = vsel %vm760_vm9, %v1916_v62, %v1917_v61  ;;  %1535 = vmatprep.subr.bf16.mxu1 %v1926_v0  ;;  %v997_v0 = vld [vmem:[%s2380_s4 + $0x10] sm:$0xff] }
 0x2eb   : > { %v1536_v5 = vpack.c.bf16 %v1155_v4, %v1154_v63  ;;  %v1153_v7 = vpop.permute.xlu1 %1152 }
 0x2ec   : > { %v1156_v11 = vsel %vm760_vm9, %v1151_v8, %v1153_v7 }
 0x2ed   : > { %1537 = vmatpush1.bf16.msra.mxu1 %v1536_v5 }
 0x2ee   : > { %1237 = vmatprep.subr.mxu1 %v1929_v19  ;;  %v1000_v19 = vld [vmem:[%s2380_s4 + $0x28] sm:$0xff] }
 0x2f1   : > { %1238 = vmatpush1.msra.mxu1 %v1156_v11 }
 0x2f2   : > { %1250 = vmatmul.mubr.f32.vlgmr.msra.gmra.mrb[6].mxu1 %v995_v10 }
 0x2f3   : > { %1350 = vmatprep.mubr.msk.f32.mxu1 %vm1175_vm3, %v998_v12 }
 0x2f6   : > { %1255 = vmatmul.mubr.f32.gmra.mrb[8].mxu1 %v997_v0 }
 0x2f7   : > { %1351 = vmatprep.mubr.msk.f32.mxu1 %vm1175_vm3, %v1000_v19 }
 0x2f8   : > { %v1163_v1 = vpop.permute.xlu0 %1162 }
 0x2fa   : > { %1260 = vmatmul.mubr.f32.gmra.mrb[10].mxu1 %v999_v14 }
 0x2fc   : > { %v1168_v6 = vpop.permute.xlu1 %1167  ;;  %v1173_v21 = vpop.permute.xlu0 %1172 }
 0x300   : > { %v342_v16 = vpop.permute.xlu1 %341  ;;  %v347_v27 = vpop.permute.xlu0 %346 }
 0x301   : > { %v480_v24 = vadd.f32 %v2256_v26, %v342_v16  ;;  %v485_v15 = vadd.f32 %v2258_v28, %v347_v27 }
 0x304   : > { %v352_v22 = vpop.permute.xlu1 %351 }
 0x305   : > { %v490_v38 = vadd.f32 %v2260_v30, %v352_v22 }
 0x3c5   : > { %v1251_v55 = vpop.f32.mrb[6].mxu1 }
 0x3c6   : > { %v1252_v17 = vadd.f32 %v1251_v55, %v1163_v1  ;;  %v1253_v18 = vpop.f32.mrb[7].mxu1 }
 0x3c8   : > { %vm1265_vm1 = vcmp.ge.f32.partialorder %v1252_v17, 0.0  ;;  %v1268_v23 = vmul.f32 0.1, %v1252_v17 }
 0x3c9   : > { %v1256_v25 = vpop.f32.mrb[8].mxu1 }
 0x3ca   : > { %v1271_v29 = vsel %vm1265_vm1, %v1252_v17, %v1268_v23  ;;  %v1257_v31 = vadd.f32 %v1256_v25, %v1168_v6  ;;  %v1258_v32 = vpop.f32.mrb[9].mxu1 }
 0x3cb   : > { %v1274_v33 = vadd.f32 %v1271_v29, %v480_v24 }
 0x3cc   : > { %vm1266_vm2 = vcmp.ge.f32.partialorder %v1257_v31, 0.0  ;;  %v1269_v13 = vmul.f32 0.1, %v1257_v31 }
 0x3cd   : > { %1277 = vst [vmem:[%s305_s22] sm:$0xff] %v1274_v33  ;;  %v1261_v2 = vpop.f32.mrb[10].mxu1 }
 0x3ce   : > { %v1272_v34 = vsel %vm1266_vm2, %v1257_v31, %v1269_v13  ;;  %v1262_v35 = vadd.f32 %v1261_v2, %v1173_v21  ;;  %v1263_v26 = vpop.f32.mrb[11].mxu1 }
 0x3cf   : > { %v1275_v36 = vadd.f32 %v1272_v34, %v485_v15 }
 0x3d0   : > { %vm1267_vm4 = vcmp.ge.f32.partialorder %v1262_v35, 0.0  ;;  %v1270_v37 = vmul.f32 0.1, %v1262_v35 }
 0x3d1   : > { %1278 = vst [vmem:[%s305_s22 + $0x8] sm:$0xff] %v1275_v36 }
 0x3d2   : > { %v1273_v39 = vsel %vm1267_vm4, %v1262_v35, %v1270_v37 }
 0x3d3   : > { %v1276_v40 = vadd.f32 %v1273_v39, %v490_v38 }
 0x3d5   : > { %1279 = vst [vmem:[%s305_s22 + $0x10] sm:$0xff] %v1276_v40 }
 0x3d6 PF: > { %s18_s27 = sadd.s32 1, %s1924_s27  }
 0x3d7   : > { %p15_p4 = scmp.ge.s32.totalorder %s18_s27, 4  }
 0x3d9   :  { %17 = sbr.rel (!%p15_p4) target bundleno = 1 (0x1), region = 82 }

// kernel: illumination_block_pallas.11
= control target key start
LH: loop header
LB: loop body
LE: loop exit
PB: predicated region body
PF: predicated region fallthrough
CT: control target
= control target key end

     0   :  { %s2216_s27 = smov 0   ;;  %s2596_s0 = inlined_call_operand.vmem [shape: f32[2,24,438], index: 0, kind: input, shape index: {}]   ;;  %s2597_s1 = inlined_call_operand.vmem [shape: f32[1,384], index: 1, kind: input, shape index: {}]   ;;  %s2598_s2 = inlined_call_operand.vmem [shape: f32[8,216], index: 2, kind: input, shape index: {}]   ;;  %s2599_s3 = inlined_call_operand.vmem [shape: f32[8,1], index: 3, kind: input, shape index: {}, may-alias: {3,5,7}]   ;;  %s2600_s4 = inlined_call_operand.vmem [shape: f32[8,72], index: 4, kind: input, shape index: {}]   ;;  %s2601_s5 = inlined_call_operand.vmem [shape: f32[8,1], index: 5, kind: input, shape index: {}, may-alias: {3,5,7}]   ;;  %s2602_s6 = inlined_call_operand.vmem [shape: f32[8,72], index: 6, kind: input, shape index: {}]   ;;  %s2603_s7 = inlined_call_operand.vmem [shape: f32[8,1], index: 7, kind: input, shape index: {}, may-alias: {3,5,7}]   ;;  %s2604_s8 = inlined_call_operand.vmem [shape: f32[2,8,384], index: 8, kind: output, shape index: {}]  }
   0x1 LB: > { %s1519_s28 = sadd.s32 4294967295, %s2156_s27   ;;  %p1523_p0 = scmp.ge.s32.totalorder %s2156_s27, 1  ;;  %s2156_s27 = sphi %s2216_s27, %s18_s27  }
   0x2   : > { %p262_p1 = scmp.lt.s32.totalorder %s2156_s27, 3 }
   0x4   : > { %p263_p2 = pnand %p1523_p0, %p262_p1 }
   0x5   : > { %p296_p3 = scmp.lt.s32.totalorder (!%p263_p2), %s1519_s28, 1  ;;  %v2158_v0 = vmov (!%p263_p2), 0.0|0.0   ;;  %s2159_s11 = smov (!%p263_p2), 127   ;;  %v312_v25 = vld [vmem:[%s2598_s2 + $0x8] sm:$0xff] (!%p263_p2)  ;;  %vm687_vm0 = vcmask (!%p263_p2), 719872   ;;  %v2167_v26 = vmov (!%p263_p2), 0  }
   0x6   : > { %266 = sbr.rel (%p263_p2) target bundleno = 1472 (0x5c0), region = 52  ;;  %1648 = vmatprep.subr.bf16.mxu1 (!%p263_p2), %v2158_v0  ;;  %s2160_s12 = smov (!%p263_p2), 126   ;;  %1526 = vmatprep.mubr.msk.f32.mxu0 (!%p263_p2), %vm687_vm0, %v312_v25  ;;  %v313_v27 = vld [vmem:[%s2599_s3] sm:$0xff] (!%p263_p2)  ;;  %vm362_vm1 = vcmask (!%p263_p2), 1039360   ;;  %vm405_vm2 = vcmask (!%p263_p2), 1031168   ;;  %vm448_vm3 = vcmask (!%p263_p2), 900096  }
   0x7   : > { %s2161_s13 = smov (!%p263_p2), 110   ;;  %s2162_s14 = smov (!%p263_p2), 109   ;;  %1527 = vmatprep.mubr.msk.f32.mxu1 (!%p263_p2), %vm687_vm0, %v312_v25  ;;  %1996 = vset.pattern.permute.xlu0 (!%p263_p2), %v2167_v26  ;;  %vm491_vm4 = vcmask (!%p263_p2), 891904   ;;  %vm534_vm5 = vcmask (!%p263_p2), 883712   ;;  %vm577_vm6 = vcmask (!%p263_p2), 752640   ;;  %vm620_vm7 = vcmask (!%p263_p2), 744448  }
   0x8   : > { %s2163_s15 = smov (!%p263_p2), 108   ;;  %s2164_s16 = smov (!%p263_p2), 92   ;;  %2067 = vset.pattern.permute.xlu1 (!%p263_p2), %v2167_v26  ;;  %vm663_vm8 = vcmask (!%p263_p2), 736256   ;;  %vm308_vm9 = vcmask (!%p263_p2), 441488   ;;  %vm306_vm10 = vcmask (!%p263_p2), 293888   ;;  %vm863_vm11 = vcmask (!%p263_p2), 154624  }
   0x9   : > { %s2165_s17 = smov (!%p263_p2), 91   ;;  %s2166_s18 = smov (!%p263_p2), 90   ;;  %vm870_vm12 = vcmask (!%p263_p2), 1047704   ;;  %vm2170_vm13 = vmmov (!%p263_p2), 0   ;;  %vm1002_vm14 = vcmask (!%p263_p2), 588800  }
   0xd   : > { %s2606_s28 = smov (!%p296_p3, %s1519_s28), 1 }
   0xe   : > { %s1743_s29 = smul.u32 96, %s2606_s28 }
  0x10   : > { %s300_s10 = scalar_lea.vmem %s2596_s0, %s1743_s29  ;;  %s2169_s29 = smov 19  }
  0x11   : > { %v318_v1 = vld [vmem:[%s300_s10 + $0x28] sm:$0xff]  ;;  %v319_v2 = vld [vmem:[%s300_s10 + $0x30] sm:$0xff]  ;;  %v314_v9 = vld [vmem:[%s300_s10] sm:$0xff] }
  0x12   : > { %v315_v3 = vld [vmem:[%s300_s10 + $0x8] sm:$0xff]  ;;  %v2231_v4 = vpack.i.bf16 %v319_v2, %v318_v1  ;;  %v316_v5 = vld [vmem:[%s300_s10 + $0x10] sm:$0xff]  ;;  %v323_v10 = vld [vmem:[%s300_s10 + $0x18] sm:$0xff] }
  0x13   : > { %v2233_v6 = vld [vmem:[%s300_s10 + $0x48] sm:$0xff]  ;;  %v2235_v7 = vld [vmem:[%s300_s10 + $0x50] sm:$0xff]  ;;  %v2237_v8 = vpack.i.bf16 %v316_v5, %v315_v3  ;;  %v1771_v12 = vpack.i.bf16 %v323_v10, %v314_v9  ;;  %v324_v13 = vld [vmem:[%s300_s10 + $0x38] sm:$0xff]  ;;  %v1596_v21 = vpack.c.bf16 %v318_v1, %v315_v3  ;;  %v1649_v23 = vpack.c.bf16 %v319_v2, %v316_v5 }
  0x14   : > { %1777 = vrot.lane.b32.xlu1 %v2231_v4, %s2159_s11  ;;  %v1781_v11 = vpack.i.bf16 %v2235_v7, %v2233_v6  ;;  %v2245_v14 = vld [vmem:[%s300_s10 + $0x58] sm:$0xff]  ;;  %v317_v15 = vld [vmem:[%s300_s10 + $0x20] sm:$0xff]  ;;  %v1991_v19 = vpack.i.bf16 %v324_v13, %v323_v10 }
  0x15   : > { %1767 = vrot.lane.b32.xlu0 %v2237_v8, %s2159_s11  ;;  %v2247_v16 = vld [vmem:[%s300_s10 + $0x40] sm:$0xff]  ;;  %v1791_v17 = vpack.i.bf16 %v2245_v14, %v324_v13  ;;  %v1986_v20 = vpack.i.bf16 %v317_v15, %v314_v9  ;;  %v1598_v22 = vpack.c.bf16 %v317_v15, %v314_v9  ;;  %1597 = vmatprep.subr.bf16.mxu0 %v1596_v21 }
  0x16   : > { %v1786_v18 = vpack.i.bf16 %v2247_v16, %v317_v15  ;;  %1650 = vmatpush1.bf16.msra.mxu1 %v1649_v23  ;;  %v1826_v24 = vpack.i.bf16 %v2245_v14, %v2247_v16 }
  0x17   : > { %1599 = vmatpush1.bf16.msra.mxu0 %v1598_v22  ;;  %1651 = vmatprep.subr.bf16.mxu1 %v2158_v0 }
  0x18   : > { %1782 = vrot.lane.b32.xlu1 %v1781_v11, %s2159_s11 }
  0x19   : > { %1772 = vrot.lane.b32.xlu0 %v1771_v12, %s2159_s11 }
  0x1c   : > { %1792 = vrot.lane.b32.xlu1 %v1791_v17, %s2159_s11 }
  0x1d   : > { %1787 = vrot.lane.b32.xlu0 %v1786_v18, %s2159_s11 }
  0x20   : > { %1802 = vrot.lane.b32.xlu1 %v2231_v4, %s2160_s12 }
  0x21   : > { %1797 = vrot.lane.b32.xlu0 %v2237_v8, %s2160_s12 }
  0x24   : > { %1812 = vrot.lane.b32.xlu1 %v1991_v19, %s2160_s12 }
  0x25   : > { %1807 = vrot.lane.b32.xlu0 %v1986_v20, %s2160_s12 }
  0x28   : > { %1822 = vrot.lane.b32.xlu1 %v2237_v8, %s2161_s13 }
  0x29   : > { %1817 = vrot.lane.b32.xlu0 %v1781_v11, %s2160_s12 }
  0x2c   : > { %1832 = vrot.lane.b32.xlu1 %v1771_v12, %s2161_s13 }
  0x2d   : > { %1827 = vrot.lane.b32.xlu0 %v1826_v24, %s2160_s12 }
  0x30   : > { %1842 = vrot.lane.b32.xlu1 %v1781_v11, %s2161_s13 }
  0x31   : > { %1837 = vrot.lane.b32.xlu0 %v2231_v4, %s2161_s13 }
  0x34   : > { %1852 = vrot.lane.b32.xlu1 %v1791_v17, %s2161_s13 }
  0x35   : > { %1847 = vrot.lane.b32.xlu0 %v1786_v18, %s2161_s13 }
  0x38   : > { %1862 = vrot.lane.b32.xlu1 %v2231_v4, %s2162_s14 }
  0x39   : > { %1857 = vrot.lane.b32.xlu0 %v2237_v8, %s2162_s14 }
  0x3c   : > { %1872 = vrot.lane.b32.xlu1 %v1991_v19, %s2162_s14 }
  0x3d   : > { %1867 = vrot.lane.b32.xlu0 %v1986_v20, %s2162_s14 }
  0x40   : > { %1882 = vrot.lane.b32.xlu1 %v2237_v8, %s2163_s15 }
  0x41   : > { %1877 = vrot.lane.b32.xlu0 %v1781_v11, %s2162_s14 }
  0x44   : > { %1892 = vrot.lane.b32.xlu1 %v1771_v12, %s2163_s15 }
  0x45   : > { %1887 = vrot.lane.b32.xlu0 %v1826_v24, %s2162_s14 }
  0x48   : > { %1902 = vrot.lane.b32.xlu1 %v1781_v11, %s2163_s15 }
  0x49   : > { %1897 = vrot.lane.b32.xlu0 %v2231_v4, %s2163_s15 }
  0x4c   : > { %1912 = vrot.lane.b32.xlu1 %v1791_v17, %s2163_s15 }
  0x4d   : > { %1907 = vrot.lane.b32.xlu0 %v1786_v18, %s2163_s15 }
  0x50   : > { %1922 = vrot.lane.b32.xlu1 %v2231_v4, %s2164_s16 }
  0x51   : > { %1917 = vrot.lane.b32.xlu0 %v2237_v8, %s2164_s16 }
  0x54   : > { %1932 = vrot.lane.b32.xlu1 %v1991_v19, %s2164_s16 }
  0x55   : > { %1927 = vrot.lane.b32.xlu0 %v1986_v20, %s2164_s16 }
  0x58   : > { %1942 = vrot.lane.b32.xlu1 %v2237_v8, %s2165_s17 }
  0x59   : > { %1937 = vrot.lane.b32.xlu0 %v1781_v11, %s2164_s16 }
  0x5c   : > { %1952 = vrot.lane.b32.xlu1 %v1771_v12, %s2165_s17 }
  0x5d   : > { %1947 = vrot.lane.b32.xlu0 %v1826_v24, %s2164_s16 }
  0x60   : > { %1962 = vrot.lane.b32.xlu1 %v1781_v11, %s2165_s17 }
  0x61   : > { %1957 = vrot.lane.b32.xlu0 %v2231_v4, %s2165_s17 }
  0x64   : > { %1972 = vrot.lane.b32.xlu1 %v1791_v17, %s2165_s17 }
  0x65   : > { %1967 = vrot.lane.b32.xlu0 %v1786_v18, %s2165_s17 }
  0x68   : > { %1982 = vrot.lane.b32.xlu1 %v2231_v4, %s2166_s18 }
  0x69   : > { %1977 = vrot.lane.b32.xlu0 %v2237_v8, %s2166_s18 }
  0x6c   : > { %1992 = vrot.lane.b32.xlu1 %v1991_v19, %s2166_s18 }
  0x6d   : > { %1987 = vrot.lane.b32.xlu0 %v1986_v20, %s2166_s18 }
  0x70   : > { %659 = vrot.lane.b32.xlu1 %v2235_v7, %s2166_s18 }
  0x71   : > { %657 = vrot.lane.b32.xlu0 %v2233_v6, %s2166_s18 }
  0x74   : > { %661 = vrot.lane.b32.xlu1 %v2245_v14, %s2166_s18 }
  0x75   : > { %655 = vrot.lane.b32.xlu0 %v2247_v16, %s2166_s18 }
  0x79   : > { %684 = vperm.xlu0 %1996, %v313_v27  }
  0x86   : > { %v1778_v28 = vpop.permute.xlu1 %1777 }
  0x87   : > { %v1768_v29 = vpop.permute.xlu0 %1767  ;;  %v1780_v32 = vunpack.i.h.bf16 %v1778_v28  ;;  %v1779_v33 = vunpack.i.l.bf16 %v1778_v28 }
  0x88   : > { %v1770_v30 = vunpack.i.h.bf16 %v1768_v29  ;;  %v1769_v31 = vunpack.i.l.bf16 %v1768_v29 }
  0x89   : > { %v367_v42 = vsel %vm362_vm1, %v1779_v33, %v1780_v32 }
  0x8a   : > { %v1783_v34 = vpop.permute.xlu1 %1782  ;;  %v364_v35 = vsel %vm362_vm1, %v1769_v31, %v1770_v30 }
  0x8b   : > { %v1785_v36 = vunpack.i.h.bf16 %v1783_v34  ;;  %v1784_v37 = vunpack.i.l.bf16 %v1783_v34  ;;  %v1773_v38 = vpop.permute.xlu0 %1772  ;;  %v1600_v39 = vpack.c.bf16 %v364_v35, %v2233_v6 }
  0x8c   : > { %v1775_v40 = vunpack.i.h.bf16 %v1773_v38  ;;  %v1774_v41 = vunpack.i.l.bf16 %v1773_v38 }
  0x8d   : > { %1601 = vmatprep.subr.bf16.mxu0 %v1600_v39  ;;  %v370_v43 = vsel %vm362_vm1, %v1784_v37, %v1785_v36 }
  0x8e   : > { %v1793_v44 = vpop.permute.xlu1 %1792  ;;  %v363_v45 = vsel %vm362_vm1, %v1774_v41, %v1769_v31  ;;  %v365_v46 = vsel %vm362_vm1, %v1770_v30, %v1775_v40  ;;  %v1604_v47 = vpack.c.bf16 %v370_v43, %v367_v42 }
  0x8f   : > { %v1795_v48 = vunpack.i.h.bf16 %v1793_v44  ;;  %v1794_v49 = vunpack.i.l.bf16 %v1793_v44  ;;  %v1788_v50 = vpop.permute.xlu0 %1787  ;;  %v1602_v51 = vpack.c.bf16 %v363_v45, %v2247_v16  ;;  %v1652_v52 = vpack.c.bf16 %v365_v46, %v2235_v7 }
  0x90   : > { %v1790_v53 = vunpack.i.h.bf16 %v1788_v50  ;;  %v1789_v54 = vunpack.i.l.bf16 %v1788_v50 }
  0x91   : > { %1603 = vmatpush1.bf16.msra.mxu0 %v1602_v51  ;;  %1653 = vmatpush1.bf16.msra.mxu1 %v1652_v52  ;;  %v368_v55 = vsel %vm362_vm1, %v1780_v32, %v1794_v49  ;;  %v371_v56 = vsel %vm362_vm1, %v1785_v36, %v1795_v48 }
  0x92   : > { %1605 = vmatprep.subr.bf16.mxu0 %v1604_v47  ;;  %v1803_v57 = vpop.permute.xlu1 %1802  ;;  %1654 = vmatprep.subr.bf16.mxu1 %v2158_v0  ;;  %v366_v58 = vsel %vm362_vm1, %v1789_v54, %v1779_v33  ;;  %v369_v59 = vsel %vm362_vm1, %v1790_v53, %v1784_v37  ;;  %v1655_v60 = vpack.c.bf16 %v371_v56, %v368_v55 }
  0x93   : > { %v1805_v61 = vunpack.i.h.bf16 %v1803_v57  ;;  %v1804_v62 = vunpack.i.l.bf16 %v1803_v57  ;;  %v1798_v63 = vpop.permute.xlu0 %1797  ;;  %v1606_v1 = vpack.c.bf16 %v369_v59, %v366_v58 }
  0x94   : > { %v1800_v2 = vunpack.i.h.bf16 %v1798_v63  ;;  %v1799_v3 = vunpack.i.l.bf16 %v1798_v63 }
  0x95   : > { %1607 = vmatpush1.bf16.msra.mxu0 %v1606_v1  ;;  %1656 = vmatpush1.bf16.msra.mxu1 %v1655_v60  ;;  %v410_v4 = vsel %vm405_vm2, %v1804_v62, %v1805_v61 }
  0x96   : > { %v1813_v5 = vpop.permute.xlu1 %1812  ;;  %v407_v6 = vsel %vm405_vm2, %v1799_v3, %v1800_v2  ;;  %1657 = vmatprep.subr.bf16.mxu1 %v2158_v0 }
  0x97   : > { %v1815_v7 = vunpack.i.h.bf16 %v1813_v5  ;;  %v1814_v8 = vunpack.i.l.bf16 %v1813_v5  ;;  %v1808_v9 = vpop.permute.xlu0 %1807  ;;  %v1608_v10 = vpack.c.bf16 %v410_v4, %v407_v6 }
  0x98   : > { %v1810_v11 = vunpack.i.h.bf16 %v1808_v9  ;;  %v1809_v12 = vunpack.i.l.bf16 %v1808_v9 }
  0x99   : > { %1609 = vmatprep.subr.bf16.mxu0 %v1608_v10  ;;  %v408_v13 = vsel %vm405_vm2, %v1800_v2, %v1814_v8  ;;  %v411_v14 = vsel %vm405_vm2, %v1805_v61, %v1815_v7 }
  0x9a   : > { %v1823_v15 = vpop.permute.xlu1 %1822  ;;  %v406_v16 = vsel %vm405_vm2, %v1809_v12, %v1799_v3  ;;  %v409_v17 = vsel %vm405_vm2, %v1810_v11, %v1804_v62  ;;  %v1658_v18 = vpack.c.bf16 %v411_v14, %v408_v13 }
  0x9b   : > { %v1825_v19 = vunpack.i.h.bf16 %v1823_v15  ;;  %v1824_v20 = vunpack.i.l.bf16 %v1823_v15  ;;  %v1818_v21 = vpop.permute.xlu0 %1817  ;;  %v1610_v22 = vpack.c.bf16 %v409_v17, %v406_v16 }
  0x9c   : > { %v1820_v23 = vunpack.i.h.bf16 %v1818_v21  ;;  %v1819_v24 = vunpack.i.l.bf16 %v1818_v21  ;;  %1659 = vmatpush1.bf16.msra.mxu1 %v1658_v18 }
  0x9d   : > { %1611 = vmatpush1.bf16.msra.mxu0 %v1610_v22  ;;  %v450_v25 = vsel %vm448_vm3, %v1824_v20, %v1825_v19  ;;  %1660 = vmatprep.subr.bf16.mxu1 %v2158_v0 }
  0x9e   : > { %v1833_v26 = vpop.permute.xlu1 %1832  ;;  %v413_v27 = vsel %vm405_vm2, %v1819_v24, %v1820_v23 }
  0x9f   : > { %v1835_v28 = vunpack.i.h.bf16 %v1833_v26  ;;  %v1834_v29 = vunpack.i.l.bf16 %v1833_v26  ;;  %v1828_v30 = vpop.permute.xlu0 %1827  ;;  %v1612_v31 = vpack.c.bf16 %v450_v25, %v413_v27 }
  0xa0   : > { %v1830_v32 = vunpack.i.h.bf16 %v1828_v30  ;;  %v1829_v33 = vunpack.i.l.bf16 %v1828_v30 }
  0xa1   : > { %1613 = vmatprep.subr.bf16.mxu0 %v1612_v31  ;;  %v449_v34 = vsel %vm448_vm3, %v1834_v29, %v1824_v20  ;;  %v451_v35 = vsel %vm448_vm3, %v1825_v19, %v1835_v28 }
  0xa2   : > { %v1843_v36 = vpop.permute.xlu1 %1842  ;;  %v412_v37 = vsel %vm405_vm2, %v1829_v33, %v1819_v24  ;;  %v414_v38 = vsel %vm405_vm2, %v1820_v23, %v1830_v32 }
  0xa3   : > { %v1845_v39 = vunpack.i.h.bf16 %v1843_v36  ;;  %v1844_v40 = vunpack.i.l.bf16 %v1843_v36  ;;  %v1838_v41 = vpop.permute.xlu0 %1837  ;;  %v1614_v42 = vpack.c.bf16 %v449_v34, %v412_v37  ;;  %v1661_v43 = vpack.c.bf16 %v451_v35, %v414_v38 }
  0xa4   : > { %v1840_v44 = vunpack.i.h.bf16 %v1838_v41  ;;  %v1839_v45 = vunpack.i.l.bf16 %v1838_v41 }
  0xa5   : > { %1615 = vmatpush1.bf16.msra.mxu0 %v1614_v42  ;;  %1662 = vmatpush1.bf16.msra.mxu1 %v1661_v43  ;;  %v456_v46 = vsel %vm448_vm3, %v1844_v40, %v1845_v39 }
  0xa6   : > { %v1853_v47 = vpop.permute.xlu1 %1852  ;;  %v453_v48 = vsel %vm448_vm3, %v1839_v45, %v1840_v44  ;;  %1663 = vmatprep.subr.bf16.mxu1 %v2158_v0 }
  0xa7   : > { %v1855_v49 = vunpack.i.h.bf16 %v1853_v47  ;;  %v1854_v50 = vunpack.i.l.bf16 %v1853_v47  ;;  %v1848_v51 = vpop.permute.xlu0 %1847  ;;  %v1616_v52 = vpack.c.bf16 %v456_v46, %v453_v48 }
  0xa8   : > { %v1850_v53 = vunpack.i.h.bf16 %v1848_v51  ;;  %v1849_v54 = vunpack.i.l.bf16 %v1848_v51 }
  0xa9   : > { %1617 = vmatprep.subr.bf16.mxu0 %v1616_v52  ;;  %v454_v55 = vsel %vm448_vm3, %v1840_v44, %v1854_v50  ;;  %v457_v56 = vsel %vm448_vm3, %v1845_v39, %v1855_v49 }
  0xaa   : > { %v1863_v57 = vpop.permute.xlu1 %1862  ;;  %v452_v58 = vsel %vm448_vm3, %v1849_v54, %v1839_v45  ;;  %v455_v59 = vsel %vm448_vm3, %v1850_v53, %v1844_v40  ;;  %v1664_v60 = vpack.c.bf16 %v457_v56, %v454_v55 }
  0xab   : > { %v1865_v61 = vunpack.i.h.bf16 %v1863_v57  ;;  %v1864_v62 = vunpack.i.l.bf16 %v1863_v57  ;;  %v1858_v63 = vpop.permute.xlu0 %1857  ;;  %v1618_v1 = vpack.c.bf16 %v455_v59, %v452_v58 }
  0xac   : > { %v1860_v2 = vunpack.i.h.bf16 %v1858_v63  ;;  %v1859_v3 = vunpack.i.l.bf16 %v1858_v63  ;;  %1665 = vmatpush1.bf16.msra.mxu1 %v1664_v60 }
  0xad   : > { %1619 = vmatpush1.bf16.msra.mxu0 %v1618_v1  ;;  %v496_v4 = vsel %vm491_vm4, %v1864_v62, %v1865_v61  ;;  %1666 = vmatprep.subr.bf16.mxu1 %v2158_v0 }
  0xae   : > { %v1873_v5 = vpop.permute.xlu1 %1872  ;;  %v493_v6 = vsel %vm491_vm4, %v1859_v3, %v1860_v2 }
  0xaf   : > { %v1875_v7 = vunpack.i.h.bf16 %v1873_v5  ;;  %v1874_v8 = vunpack.i.l.bf16 %v1873_v5  ;;  %v1868_v9 = vpop.permute.xlu0 %1867  ;;  %v1620_v10 = vpack.c.bf16 %v496_v4, %v493_v6 }
  0xb0   : > { %v1870_v11 = vunpack.i.h.bf16 %v1868_v9  ;;  %v1869_v12 = vunpack.i.l.bf16 %v1868_v9 }
  0xb1   : > { %1621 = vmatprep.subr.bf16.mxu0 %v1620_v10  ;;  %v494_v13 = vsel %vm491_vm4, %v1860_v2, %v1874_v8  ;;  %v497_v14 = vsel %vm491_vm4, %v1865_v61, %v1875_v7 }
  0xb2   : > { %v1883_v15 = vpop.permute.xlu1 %1882  ;;  %v492_v16 = vsel %vm491_vm4, %v1869_v12, %v1859_v3  ;;  %v495_v17 = vsel %vm491_vm4, %v1870_v11, %v1864_v62  ;;  %v1667_v18 = vpack.c.bf16 %v497_v14, %v494_v13 }
  0xb3   : > { %v1885_v19 = vunpack.i.h.bf16 %v1883_v15  ;;  %v1884_v20 = vunpack.i.l.bf16 %v1883_v15  ;;  %v1878_v21 = vpop.permute.xlu0 %1877  ;;  %v1622_v22 = vpack.c.bf16 %v495_v17, %v492_v16 }
  0xb4   : > { %v1880_v23 = vunpack.i.h.bf16 %v1878_v21  ;;  %v1879_v24 = vunpack.i.l.bf16 %v1878_v21  ;;  %1668 = vmatpush1.bf16.msra.mxu1 %v1667_v18 }
  0xb5   : > { %1623 = vmatpush1.bf16.msra.mxu0 %v1622_v22  ;;  %v536_v25 = vsel %vm534_vm5, %v1884_v20, %v1885_v19  ;;  %1669 = vmatprep.subr.bf16.mxu1 %v2158_v0 }
  0xb6   : > { %v1893_v26 = vpop.permute.xlu1 %1892  ;;  %v499_v27 = vsel %vm491_vm4, %v1879_v24, %v1880_v23 }
  0xb7   : > { %v1895_v28 = vunpack.i.h.bf16 %v1893_v26  ;;  %v1894_v29 = vunpack.i.l.bf16 %v1893_v26  ;;  %v1888_v30 = vpop.permute.xlu0 %1887  ;;  %v1624_v31 = vpack.c.bf16 %v536_v25, %v499_v27 }
  0xb8   : > { %v1890_v32 = vunpack.i.h.bf16 %v1888_v30  ;;  %v1889_v33 = vunpack.i.l.bf16 %v1888_v30 }
  0xb9   : > { %1625 = vmatprep.subr.bf16.mxu0 %v1624_v31  ;;  %v535_v34 = vsel %vm534_vm5, %v1894_v29, %v1884_v20  ;;  %v537_v35 = vsel %vm534_vm5, %v1885_v19, %v1895_v28 }
  0xba   : > { %v1903_v36 = vpop.permute.xlu1 %1902  ;;  %v498_v37 = vsel %vm491_vm4, %v1889_v33, %v1879_v24  ;;  %v500_v38 = vsel %vm491_vm4, %v1880_v23, %v1890_v32 }
  0xbb   : > { %v1905_v39 = vunpack.i.h.bf16 %v1903_v36  ;;  %v1904_v40 = vunpack.i.l.bf16 %v1903_v36  ;;  %v1898_v41 = vpop.permute.xlu0 %1897  ;;  %v1626_v42 = vpack.c.bf16 %v535_v34, %v498_v37  ;;  %v1670_v43 = vpack.c.bf16 %v537_v35, %v500_v38 }
  0xbc   : > { %v1900_v44 = vunpack.i.h.bf16 %v1898_v41  ;;  %v1899_v45 = vunpack.i.l.bf16 %v1898_v41 }
  0xbd   : > { %1627 = vmatpush1.bf16.msra.mxu0 %v1626_v42  ;;  %1671 = vmatpush1.bf16.msra.mxu1 %v1670_v43  ;;  %v542_v46 = vsel %vm534_vm5, %v1904_v40, %v1905_v39 }
  0xbe   : > { %v1913_v47 = vpop.permute.xlu1 %1912  ;;  %v539_v48 = vsel %vm534_vm5, %v1899_v45, %v1900_v44  ;;  %1672 = vmatprep.subr.bf16.mxu1 %v2158_v0 }
  0xbf   : > { %v1915_v49 = vunpack.i.h.bf16 %v1913_v47  ;;  %v1914_v50 = vunpack.i.l.bf16 %v1913_v47  ;;  %v1908_v51 = vpop.permute.xlu0 %1907  ;;  %v1628_v52 = vpack.c.bf16 %v542_v46, %v539_v48 }
  0xc0   : > { %v1910_v53 = vunpack.i.h.bf16 %v1908_v51  ;;  %v1909_v54 = vunpack.i.l.bf16 %v1908_v51 }
  0xc1   : > { %1629 = vmatprep.subr.bf16.mxu0 %v1628_v52  ;;  %v540_v55 = vsel %vm534_vm5, %v1900_v44, %v1914_v50  ;;  %v543_v56 = vsel %vm534_vm5, %v1905_v39, %v1915_v49 }
  0xc2   : > { %v1923_v57 = vpop.permute.xlu1 %1922  ;;  %v538_v58 = vsel %vm534_vm5, %v1909_v54, %v1899_v45  ;;  %v541_v59 = vsel %vm534_vm5, %v1910_v53, %v1904_v40  ;;  %v1673_v60 = vpack.c.bf16 %v543_v56, %v540_v55 }
  0xc3   : > { %v1925_v61 = vunpack.i.h.bf16 %v1923_v57  ;;  %v1924_v62 = vunpack.i.l.bf16 %v1923_v57  ;;  %v1918_v63 = vpop.permute.xlu0 %1917  ;;  %v1630_v1 = vpack.c.bf16 %v541_v59, %v538_v58 }
  0xc4   : > { %v1920_v2 = vunpack.i.h.bf16 %v1918_v63  ;;  %v1919_v3 = vunpack.i.l.bf16 %v1918_v63  ;;  %1674 = vmatpush1.bf16.msra.mxu1 %v1673_v60 }
  0xc5   : > { %1631 = vmatpush1.bf16.msra.mxu0 %v1630_v1  ;;  %v582_v4 = vsel %vm577_vm6, %v1924_v62, %v1925_v61  ;;  %1675 = vmatprep.subr.bf16.mxu1 %v2158_v0 }
  0xc6   : > { %v1933_v5 = vpop.permute.xlu1 %1932  ;;  %v579_v6 = vsel %vm577_vm6, %v1919_v3, %v1920_v2 }
  0xc7   : > { %v1935_v7 = vunpack.i.h.bf16 %v1933_v5  ;;  %v1934_v8 = vunpack.i.l.bf16 %v1933_v5  ;;  %v1928_v9 = vpop.permute.xlu0 %1927  ;;  %v1632_v10 = vpack.c.bf16 %v582_v4, %v579_v6 }
  0xc8   : > { %v1930_v11 = vunpack.i.h.bf16 %v1928_v9  ;;  %v1929_v12 = vunpack.i.l.bf16 %v1928_v9 }
  0xc9   : > { %1633 = vmatprep.subr.bf16.mxu0 %v1632_v10  ;;  %v580_v13 = vsel %vm577_vm6, %v1920_v2, %v1934_v8  ;;  %v583_v14 = vsel %vm577_vm6, %v1925_v61, %v1935_v7 }
  0xca   : > { %v1943_v15 = vpop.permute.xlu1 %1942  ;;  %v578_v16 = vsel %vm577_vm6, %v1929_v12, %v1919_v3  ;;  %v581_v17 = vsel %vm577_vm6, %v1930_v11, %v1924_v62  ;;  %v1676_v18 = vpack.c.bf16 %v583_v14, %v580_v13 }
  0xcb   : > { %v1945_v19 = vunpack.i.h.bf16 %v1943_v15  ;;  %v1944_v20 = vunpack.i.l.bf16 %v1943_v15  ;;  %v1938_v21 = vpop.permute.xlu0 %1937  ;;  %v1634_v22 = vpack.c.bf16 %v581_v17, %v578_v16 }
  0xcc   : > { %v1940_v23 = vunpack.i.h.bf16 %v1938_v21  ;;  %v1939_v24 = vunpack.i.l.bf16 %v1938_v21  ;;  %1677 = vmatpush1.bf16.msra.mxu1 %v1676_v18 }
  0xcd   : > { %1635 = vmatpush1.bf16.msra.mxu0 %v1634_v22  ;;  %v622_v25 = vsel %vm620_vm7, %v1944_v20, %v1945_v19  ;;  %1678 = vmatprep.subr.bf16.mxu1 %v2158_v0  ;;  %v2168_v22 = vmov 0.0  }
  0xce   : > { %v1953_v26 = vpop.permute.xlu1 %1952  ;;  %v585_v27 = vsel %vm577_vm6, %v1939_v24, %v1940_v23  ;;  %309 = vst.msk [vmem:[#allocation2 + $0x18] sm:$0xff] %vm308_vm9, %v2168_v22 }
  0xcf   : > { %v1955_v28 = vunpack.i.h.bf16 %v1953_v26  ;;  %v1954_v29 = vunpack.i.l.bf16 %v1953_v26  ;;  %v1948_v30 = vpop.permute.xlu0 %1947  ;;  %v1636_v31 = vpack.c.bf16 %v622_v25, %v585_v27  ;;  %307 = vst.msk [vmem:[#allocation2] sm:$0xff] %vm306_vm10, %v2168_v22 }
  0xd0   : > { %v1950_v32 = vunpack.i.h.bf16 %v1948_v30  ;;  %v1949_v33 = vunpack.i.l.bf16 %v1948_v30 }
  0xd1   : > { %1637 = vmatprep.subr.bf16.mxu0 %v1636_v31  ;;  %v621_v34 = vsel %vm620_vm7, %v1954_v29, %v1944_v20  ;;  %v623_v35 = vsel %vm620_vm7, %v1945_v19, %v1955_v28  ;;  %v836_v28 = vlaneseq }
  0xd2   : > { %v1963_v36 = vpop.permute.xlu1 %1962  ;;  %v584_v37 = vsel %vm577_vm6, %v1949_v33, %v1939_v24  ;;  %v586_v38 = vsel %vm577_vm6, %v1940_v23, %v1950_v32  ;;  %v311_v24 = vld [vmem:[%s2598_s2] sm:$0xff] }
  0xd3   : > { %v1965_v39 = vunpack.i.h.bf16 %v1963_v36  ;;  %v1964_v40 = vunpack.i.l.bf16 %v1963_v36  ;;  %v1958_v41 = vpop.permute.xlu0 %1957  ;;  %v1638_v42 = vpack.c.bf16 %v621_v34, %v584_v37  ;;  %v1679_v43 = vpack.c.bf16 %v623_v35, %v586_v38  ;;  %v310_v32 = vld [vmem:[%s2597_s1] sm:$0x7] }
  0xd4   : > { %v1960_v44 = vunpack.i.h.bf16 %v1958_v41  ;;  %v1959_v45 = vunpack.i.l.bf16 %v1958_v41  ;;  %v837_v29 = vshrl.u32 %v836_v28, 7 }
  0xd5   : > { %1639 = vmatpush1.bf16.msra.mxu0 %v1638_v42  ;;  %1680 = vmatpush1.bf16.msra.mxu1 %v1679_v43  ;;  %v628_v46 = vsel %vm620_vm7, %v1964_v40, %v1965_v39 }
  0xd6   : > { %v1973_v47 = vpop.permute.xlu1 %1972  ;;  %v625_v48 = vsel %vm620_vm7, %v1959_v45, %v1960_v44  ;;  %1681 = vmatprep.subr.bf16.mxu1 %v2158_v0  ;;  %v846_v30 = vsub.s32 2, %v837_v29  ;;  %v838_v33 = vsub.s32 0, %v837_v29  ;;  %v842_v42 = vsub.s32 1, %v837_v29 }
  0xd7   : > { %v1975_v49 = vunpack.i.h.bf16 %v1973_v47  ;;  %v1974_v50 = vunpack.i.l.bf16 %v1973_v47  ;;  %v1968_v51 = vpop.permute.xlu0 %1967  ;;  %v1640_v52 = vpack.c.bf16 %v628_v46, %v625_v48 }
  0xd8   : > { %v1970_v53 = vunpack.i.h.bf16 %v1968_v51  ;;  %v1969_v54 = vunpack.i.l.bf16 %v1968_v51  ;;  %v2423_v37 = vrot.slane %v310_v32, %v846_v30 }
  0xd9   : > { %1641 = vmatprep.subr.bf16.mxu0 %v1640_v52  ;;  %v626_v55 = vsel %vm620_vm7, %v1960_v44, %v1974_v50  ;;  %v629_v56 = vsel %vm620_vm7, %v1965_v39, %v1975_v49  ;;  %v2429_v49 = vrot.slane %v310_v32, %v842_v42 }
  0xda   : > { %v1983_v57 = vpop.permute.xlu1 %1982  ;;  %v624_v58 = vsel %vm620_vm7, %v1969_v54, %v1959_v45  ;;  %v627_v59 = vsel %vm620_vm7, %v1970_v53, %v1964_v40  ;;  %v1682_v60 = vpack.c.bf16 %v629_v56, %v626_v55  ;;  %v2425_v40 = vrot.slane %v310_v32, %v838_v33 }
  0xdb   : > { %v1985_v61 = vunpack.i.h.bf16 %v1983_v57  ;;  %v1984_v62 = vunpack.i.l.bf16 %v1983_v57  ;;  %v1978_v63 = vpop.permute.xlu0 %1977  ;;  %v1642_v1 = vpack.c.bf16 %v627_v59, %v624_v58 }
  0xdc   : > { %v1980_v2 = vunpack.i.h.bf16 %v1978_v63  ;;  %v1979_v3 = vunpack.i.l.bf16 %v1978_v63  ;;  %1683 = vmatpush1.bf16.msra.mxu1 %v1682_v60  ;;  %v876_v60 = vld [vmem:[%s2601_s5] sm:$0xff] }
  0xdd   : > { %1643 = vmatpush1.bf16.msra.mxu0 %v1642_v1  ;;  %v668_v4 = vsel %vm663_vm8, %v1984_v62, %v1985_v61  ;;  %1684 = vmatprep.subr.bf16.mxu1 %v2158_v0 }
  0xde   : > { %v1993_v5 = vpop.permute.xlu1 %1992  ;;  %v665_v6 = vsel %vm663_vm8, %v1979_v3, %v1980_v2 }
  0xdf   : > { %v1995_v7 = vunpack.i.h.bf16 %v1993_v5  ;;  %v1994_v8 = vunpack.i.l.bf16 %v1993_v5  ;;  %v1988_v9 = vpop.permute.xlu0 %1987  ;;  %v1644_v10 = vpack.c.bf16 %v668_v4, %v665_v6 }
  0xe0   : > { %v1990_v11 = vunpack.i.h.bf16 %v1988_v9  ;;  %v1989_v12 = vunpack.i.l.bf16 %v1988_v9 }
  0xe1   : > { %1645 = vmatprep.subr.bf16.mxu0 %v1644_v10  ;;  %v666_v13 = vsel %vm663_vm8, %v1980_v2, %v1994_v8  ;;  %v669_v14 = vsel %vm663_vm8, %v1985_v61, %v1995_v7 }
  0xe2   : > { %v660_v15 = vpop.permute.xlu1 %659  ;;  %v664_v16 = vsel %vm663_vm8, %v1989_v12, %v1979_v3  ;;  %v667_v17 = vsel %vm663_vm8, %v1990_v11, %v1984_v62  ;;  %v1685_v18 = vpack.c.bf16 %v669_v14, %v666_v13 }
  0xe3   : > { %v658_v19 = vpop.permute.xlu0 %657  ;;  %v1646_v20 = vpack.c.bf16 %v667_v17, %v664_v16 }
  0xe4   : > { %1686 = vmatpush1.bf16.msra.mxu1 %v1685_v18  ;;  %v671_v21 = vsel %vm663_vm8, %v658_v19, %v660_v15 }
  0xe5   : > { %1647 = vmatpush1.bf16.msra.mxu0 %v1646_v20  ;;  %814 = vmatprep.subr.mxu1 %v2168_v22 }
  0xe6   : > { %743 = vmatprep.subr.mxu0 %v671_v21  ;;  %v662_v23 = vpop.permute.xlu1 %661 }
  0xe7   : > { %v656_v25 = vpop.permute.xlu0 %655  ;;  %v672_v26 = vsel %vm663_vm8, %v660_v15, %v662_v23 }
  0xe8   : > { %v670_v27 = vsel %vm663_vm8, %v656_v25, %v658_v19  ;;  %815 = vmatpush1.msra.mxu1 %v672_v26 }
  0xe9   : > { %744 = vmatpush1.msra.mxu0 %v670_v27  ;;  %827 = vmatmul.mubr.f32.vlgmr.msra.gmra.mrb[0].mxu1 %v311_v24 }
  0xea   : > { %756 = vmatmul.mubr.f32.vlgmr.msra.gmra.mrb[0].mxu0 %v311_v24  ;;  %1703 = vmatprep.subr.bf16.mxu1 %v2158_v0 }
  0xeb   : > { %1070 = vmatprep.mubr.f32.mxu0 %v2168_v22  ;;  %1572 = vmatprep.mubr.msk.f32.mxu1 %vm2170_vm13, %v2168_v22 }
  0xf8   : > { %v685_v31 = vpop.permute.xlu0 %684 }
 0x1bc   : > { %v828_v34 = vpop.f32.mrb[0].mxu1 }
 0x1bd   : > { %v757_v35 = vpop.f32.mrb[0].mxu0  ;;  %v829_v36 = vadd.f32 %v828_v34, %v685_v31  ;;  %v830_v38 = vpop.f32.mrb[1].mxu1 }
 0x1be   : > { %v758_v39 = vadd.f32 %v757_v35, %v685_v31  ;;  %v759_v41 = vpop.f32.mrb[1].mxu0 }
 0x1bf   : > { %v834_v43 = vmax.f32 %v829_v36, 0.0  ;;  %v760_v44 = vadd.f32 %v759_v41, %v685_v31 }
 0x1c0   : > { %v832_v45 = vmax.f32 %v758_v39, 0.0 }
 0x1c1   : > { %v853_v46 = vmul.f32 %v2423_v37, %v834_v43  ;;  %v833_v48 = vmax.f32 %v760_v44, 0.0 }
 0x1c2   : > { %v851_v47 = vmul.f32 %v2425_v40, %v832_v45 }
 0x1c3   : > { %861 = vrot.lane.b32.xlu0 %v853_v46, %s2169_s29  ;;  %v852_v50 = vmul.f32 %v2429_v49, %v833_v48 }
 0x1c4   : > { %857 = vrot.lane.b32.xlu1 %v851_v47, %s2169_s29 }
 0x1c8   : > { %859 = vrot.lane.b32.xlu1 %v852_v50, %s2169_s29 }
 0x235   : > { %v862_v51 = vpop.permute.xlu0 %861 }
 0x236   : > { %874 = vst.msk [vmem:[#allocation2 + $0x18] sm:$0xff] %vm863_vm11, %v862_v51  ;;  %v858_v52 = vpop.permute.xlu1 %857 }
 0x237   : > { %871 = vst.msk [vmem:[#allocation2] sm:$0xff] %vm870_vm12, %v858_v52 }
 0x23a   : > { %v860_v56 = vpop.permute.xlu1 %859 }
 0x23b   : > { %v864_v57 = vsel %vm863_vm11, %v858_v52, %v860_v56  ;;  %v865_v58 = vsel %vm863_vm11, %v860_v56, %v862_v51 }
 0x23c   : > { %v2032_v59 = vpack.i.bf16 %v865_v58, %v864_v57 }
 0x23d   : > { %v880_v53 = vld [vmem:[#allocation2 + $0x18] sm:$0xff] }
 0x23e   : > { %v2437_v54 = vld [vmem:[#allocation2] sm:$0xff] }
 0x23f   : > { %v2002_v55 = vpack.i.bf16 %v880_v53, %v2437_v54 }
 0x241   : > { %2003 = vrot.lane.b32.xlu1 %v2002_v55, %s2160_s12  ;;  %1998 = vrot.lane.b32.xlu0 %v2002_v55, %s2159_s11 }
 0x245   : > { %2013 = vrot.lane.b32.xlu1 %v2002_v55, %s2162_s14  ;;  %2008 = vrot.lane.b32.xlu0 %v2002_v55, %s2161_s13 }
 0x249   : > { %2023 = vrot.lane.b32.xlu1 %v2002_v55, %s2164_s16  ;;  %2018 = vrot.lane.b32.xlu0 %v2002_v55, %s2163_s15 }
 0x24d   : > { %2028 = vrot.lane.b32.xlu0 %v2002_v55, %s2165_s17  ;;  %2033 = vrot.lane.b32.xlu1 %v2032_v59, %s2159_s11 }
 0x251   : > { %2043 = vrot.lane.b32.xlu0 %v2032_v59, %s2161_s13  ;;  %2038 = vrot.lane.b32.xlu1 %v2032_v59, %s2160_s12 }
 0x255   : > { %2053 = vrot.lane.b32.xlu0 %v2032_v59, %s2163_s15  ;;  %2048 = vrot.lane.b32.xlu1 %v2032_v59, %s2162_s14 }
 0x259   : > { %2063 = vrot.lane.b32.xlu0 %v2032_v59, %s2165_s17  ;;  %2058 = vrot.lane.b32.xlu1 %v2032_v59, %s2164_s16 }
 0x25d   : > { %987 = vrot.lane.b32.xlu0 %v865_v58, %s2166_s18  ;;  %985 = vrot.lane.b32.xlu1 %v864_v57, %s2166_s18 }
 0x261   : > { %989 = vrot.lane.b32.xlu0 %v880_v53, %s2166_s18  ;;  %983 = vrot.lane.b32.xlu1 %v2437_v54, %s2166_s18 }
 0x265   : > { %999 = vperm.xlu1 %2067, %v876_v60  }
 0x2b3   : > { %v1999_v61 = vpop.permute.xlu0 %1998  ;;  %v2004_v62 = vpop.permute.xlu1 %2003 }
 0x2b4   : > { %v2001_v6 = vunpack.i.h.bf16 %v1999_v61  ;;  %v2000_v7 = vunpack.i.l.bf16 %v1999_v61  ;;  %v2006_v10 = vunpack.i.h.bf16 %v2004_v62  ;;  %v2005_v11 = vunpack.i.l.bf16 %v2004_v62 }
 0x2b7   : > { %v2009_v63 = vpop.permute.xlu0 %2008  ;;  %v2014_v1 = vpop.permute.xlu1 %2013 }
 0x2b8   : > { %v2011_v12 = vunpack.i.h.bf16 %v2009_v63  ;;  %v2010_v13 = vunpack.i.l.bf16 %v2009_v63  ;;  %v2016_v17 = vunpack.i.h.bf16 %v2014_v1  ;;  %v2015_v28 = vunpack.i.l.bf16 %v2014_v1 }
 0x2bb   : > { %v2019_v2 = vpop.permute.xlu0 %2018  ;;  %v2466_v3 = vpop.permute.xlu1 %2023 }
 0x2bc   : > { %v2021_v29 = vunpack.i.h.bf16 %v2019_v2  ;;  %v2020_v30 = vunpack.i.l.bf16 %v2019_v2  ;;  %v2026_v31 = vunpack.i.h.bf16 %v2466_v3  ;;  %v2025_v48 = vunpack.i.l.bf16 %v2466_v3 }
 0x2bf   : > { %v2468_v4 = vpop.permute.xlu0 %2028  ;;  %v2034_v5 = vpop.permute.xlu1 %2033 }
 0x2c0   : > { %v2036_v8 = vunpack.i.h.bf16 %v2034_v5  ;;  %v2035_v9 = vunpack.i.l.bf16 %v2034_v5  ;;  %v2031_v50 = vunpack.i.h.bf16 %v2468_v4  ;;  %v2030_v51 = vunpack.i.l.bf16 %v2468_v4 }
 0x2c2   : > { %v895_v14 = vsel %vm362_vm1, %v2036_v8, %v2001_v6  ;;  %v893_v15 = vsel %vm362_vm1, %v2000_v7, %v2035_v9  ;;  %v894_v16 = vsel %vm362_vm1, %v2035_v9, %v2036_v8 }
 0x2c3   : > { %v1704_v18 = vpack.c.bf16 %v895_v14, %v865_v58  ;;  %v1689_v19 = vpack.c.bf16 %v893_v15, %v2437_v54  ;;  %v2044_v20 = vpop.permute.xlu0 %2043  ;;  %v2039_v21 = vpop.permute.xlu1 %2038  ;;  %v1687_v23 = vpack.c.bf16 %v894_v16, %v864_v57 }
 0x2c4   : > { %v2046_v24 = vunpack.i.h.bf16 %v2044_v20  ;;  %v2045_v25 = vunpack.i.l.bf16 %v2044_v20  ;;  %v2041_v26 = vunpack.i.h.bf16 %v2039_v21  ;;  %v2040_v27 = vunpack.i.l.bf16 %v2039_v21 }
 0x2c5   : > { %1688 = vmatprep.subr.bf16.mxu0 %v1687_v23  ;;  %1705 = vmatpush3.bf16.msra.mxu1 %v1704_v18  ;;  %v875_v18 = vld [vmem:[%s2600_s4] sm:$0xff] }
 0x2c6   : > { %v923_v32 = vsel %vm448_vm3, %v2046_v24, %v2011_v12  ;;  %v921_v33 = vsel %vm448_vm3, %v2010_v13, %v2045_v25  ;;  %v907_v34 = vsel %vm405_vm2, %v2005_v11, %v2040_v27  ;;  %v909_v35 = vsel %vm405_vm2, %v2041_v26, %v2006_v10  ;;  %1690 = vmatpush1.bf16.msra.mxu0 %v1689_v19 }
 0x2c7   : > { %v1693_v36 = vpack.c.bf16 %v921_v33, %v907_v34  ;;  %v1707_v38 = vpack.c.bf16 %v923_v32, %v909_v35  ;;  %v2054_v39 = vpop.permute.xlu0 %2053  ;;  %v2049_v41 = vpop.permute.xlu1 %2048  ;;  %1706 = vmatprep.subr.bf16.mxu1 %v2158_v0  ;;  %v908_v42 = vsel %vm405_vm2, %v2040_v27, %v2041_v26  ;;  %v922_v43 = vsel %vm448_vm3, %v2045_v25, %v2046_v24 }
 0x2c8   : > { %v2056_v44 = vunpack.i.h.bf16 %v2054_v39  ;;  %v2055_v45 = vunpack.i.l.bf16 %v2054_v39  ;;  %v2051_v46 = vunpack.i.h.bf16 %v2049_v41  ;;  %v2050_v47 = vunpack.i.l.bf16 %v2049_v41 }
 0x2c9   : > { %v1691_v52 = vpack.c.bf16 %v922_v43, %v908_v42  ;;  %1708 = vmatpush3.bf16.msra.mxu1 %v1707_v38 }
 0x2ca   : > { %v951_v53 = vsel %vm534_vm5, %v2056_v44, %v2021_v29  ;;  %v949_v54 = vsel %vm534_vm5, %v2020_v30, %v2055_v45  ;;  %v935_v55 = vsel %vm491_vm4, %v2015_v28, %v2050_v47  ;;  %v937_v56 = vsel %vm491_vm4, %v2051_v46, %v2016_v17  ;;  %1709 = vmatprep.subr.bf16.mxu1 %v2158_v0 }
 0x2cb   : > { %v1697_v57 = vpack.c.bf16 %v949_v54, %v935_v55  ;;  %v1710_v58 = vpack.c.bf16 %v951_v53, %v937_v56  ;;  %1692 = vmatprep.subr.bf16.mxu0 %v1691_v52  ;;  %v2064_v59 = vpop.permute.xlu0 %2063  ;;  %v2059_v60 = vpop.permute.xlu1 %2058  ;;  %v936_v61 = vsel %vm491_vm4, %v2050_v47, %v2051_v46  ;;  %v950_v62 = vsel %vm534_vm5, %v2055_v45, %v2056_v44  ;;  %v1173_v45 = vld [vmem:[%s2603_s7] sm:$0xff] }
 0x2cc   : > { %1694 = vmatpush1.bf16.msra.mxu0 %v1693_v36  ;;  %v2066_v63 = vunpack.i.h.bf16 %v2064_v59  ;;  %v2065_v1 = vunpack.i.l.bf16 %v2064_v59  ;;  %v2061_v2 = vunpack.i.h.bf16 %v2059_v60  ;;  %v2060_v3 = vunpack.i.l.bf16 %v2059_v60 }
 0x2cd   : > { %v1695_v4 = vpack.c.bf16 %v950_v62, %v936_v61  ;;  %1711 = vmatpush3.bf16.msra.mxu1 %v1710_v58 }
 0x2ce   : > { %v979_v5 = vsel %vm620_vm7, %v2066_v63, %v2031_v50  ;;  %v977_v6 = vsel %vm620_vm7, %v2030_v51, %v2065_v1  ;;  %v963_v7 = vsel %vm577_vm6, %v2025_v48, %v2060_v3  ;;  %v965_v8 = vsel %vm577_vm6, %v2061_v2, %v2026_v31  ;;  %1712 = vmatprep.subr.bf16.mxu1 %v2158_v0 }
 0x2cf   : > { %v1713_v9 = vpack.c.bf16 %v979_v5, %v965_v8  ;;  %1696 = vmatprep.subr.bf16.mxu0 %v1695_v4  ;;  %v988_v10 = vpop.permute.xlu0 %987  ;;  %v986_v11 = vpop.permute.xlu1 %985  ;;  %v964_v12 = vsel %vm577_vm6, %v2060_v3, %v2061_v2  ;;  %v978_v13 = vsel %vm620_vm7, %v2065_v1, %v2066_v63  ;;  %v1701_v14 = vpack.c.bf16 %v977_v6, %v963_v7 }
 0x2d0   : > { %1698 = vmatpush1.bf16.msra.mxu0 %v1697_v57  ;;  %v1699_v15 = vpack.c.bf16 %v978_v13, %v964_v12  ;;  %v992_v20 = vsel %vm663_vm8, %v986_v11, %v988_v10 }
 0x2d1   : > { %1714 = vmatpush3.bf16.msra.mxu1 %v1713_v9 }
 0x2d2   : > { %1700 = vmatprep.subr.bf16.mxu0 %v1699_v15  ;;  %1570 = vmatprep.subr.mxu1 %v2168_v22 }
 0x2d3   : > { %v990_v16 = vpop.permute.xlu0 %989  ;;  %v984_v17 = vpop.permute.xlu1 %983 }
 0x2d4   : > { %1702 = vmatpush1.bf16.msra.mxu0 %v1701_v14  ;;  %v993_v19 = vsel %vm663_vm8, %v988_v10, %v990_v16  ;;  %v991_v21 = vsel %vm663_vm8, %v984_v17, %v986_v11 }
 0x2d5   : > { %1022 = vmatprep.subr.mxu0 %v992_v20  ;;  %1571 = vmatpush3.msra.mxu1 %v993_v19 }
 0x2d6   : > { %1573 = vmatmul.mubr.msk.f32.vlgmr.msra.gmra.mrb[2].mxu1 %vm1002_vm14, %v875_v18  ;;  %1731 = vmatprep.subr.bf16.mxu1 %v2158_v0 }
 0x2d7   : > { %1593 = vmatprep.mubr.msk.f32.mxu1 %vm2170_vm13, %v2168_v22 }
 0x2d8   : > { %1023 = vmatpush1.msra.mxu0 %v991_v21 }
 0x2d9   : > { %1528 = vmatmul.mubr.msk.f32.vlgmr.msra.gmra.mrb[2].mxu0 %vm1002_vm14, %v875_v18 }
 0x2da   : > { %1366 = vmatprep.mubr.f32.mxu0 %v2168_v22 }
 0x2e4   : > { %v1000_v24 = vpop.permute.xlu1 %999 }
 0x3a9   : > { %v1143_v23 = vpop.f32.mrb[2].mxu1 }
 0x3aa   : > { %v1574_v25 = vpop.f32.mrb[3].mxu1  ;;  %v1144_v28 = vadd.f32 %v1143_v23, %v1000_v24 }
 0x3ac   : > { %v1072_v26 = vpop.f32.mrb[2].mxu0  ;;  %v1149_v34 = vmax.f32 %v1144_v28, 0.0 }
 0x3ad   : > { %v1073_v27 = vadd.f32 %v1072_v26, %v1000_v24  ;;  %v1074_v29 = vpop.f32.mrb[3].mxu0 }
 0x3ae   : > { %v1075_v30 = vadd.f32 %v1074_v29, %v1000_v24  ;;  %v1152_v36 = vmul.f32 %v1149_v34, %v2423_v37 }
 0x3af   : > { %v1147_v31 = vmax.f32 %v1073_v27, 0.0 }
 0x3b0   : > { %v1148_v32 = vmax.f32 %v1075_v30, 0.0 }
 0x3b1   : > { %v1150_v33 = vmul.f32 %v1147_v31, %v2425_v40 }
 0x3b2   : > { %v1151_v35 = vmul.f32 %v1148_v32, %v2429_v49 }
 0x3b3   : > { %1156 = vrot.lane.b32.xlu0 %v1150_v33, %s2169_s29 }
 0x3b4   : > { %1158 = vrot.lane.b32.xlu1 %v1151_v35, %s2169_s29 }
 0x3b7   : > { %1160 = vrot.lane.b32.xlu0 %v1152_v36, %s2169_s29 }
 0x425   : > { %v1157_v38 = vpop.permute.xlu0 %1156 }
 0x426   : > { %1168 = vst.msk [vmem:[#allocation2] sm:$0xff] %vm870_vm12, %v1157_v38  ;;  %v1159_v39 = vpop.permute.xlu1 %1158 }
 0x427   : > { %v1162_v41 = vsel %vm863_vm11, %v1157_v38, %v1159_v39 }
 0x429   : > { %v1161_v42 = vpop.permute.xlu0 %1160 }
 0x42a   : > { %v1163_v40 = vsel %vm863_vm11, %v1159_v39, %v1161_v42  ;;  %1171 = vst.msk [vmem:[#allocation2 + $0x18] sm:$0xff] %vm863_vm11, %v1161_v42 }
 0x42b   : > { %v2103_v37 = vpack.i.bf16 %v1163_v40, %v1162_v41 }
 0x42d   : > { %v2522_v49 = vld [vmem:[#allocation2] sm:$0xff] }
 0x431   : > { %v1177_v43 = vld [vmem:[#allocation2 + $0x18] sm:$0xff] }
 0x432   : > { %v2073_v44 = vpack.i.bf16 %v1177_v43, %v2522_v49 }
 0x434   : > { %2074 = vrot.lane.b32.xlu1 %v2073_v44, %s2160_s12  ;;  %2069 = vrot.lane.b32.xlu0 %v2073_v44, %s2159_s11 }
 0x438   : > { %2084 = vrot.lane.b32.xlu1 %v2073_v44, %s2162_s14  ;;  %2079 = vrot.lane.b32.xlu0 %v2073_v44, %s2161_s13 }
 0x43c   : > { %2094 = vrot.lane.b32.xlu1 %v2073_v44, %s2164_s16  ;;  %2089 = vrot.lane.b32.xlu0 %v2073_v44, %s2163_s15 }
 0x440   : > { %2099 = vrot.lane.b32.xlu0 %v2073_v44, %s2165_s17  ;;  %2104 = vrot.lane.b32.xlu1 %v2103_v37, %s2159_s11 }
 0x444   : > { %2114 = vrot.lane.b32.xlu0 %v2103_v37, %s2161_s13  ;;  %2109 = vrot.lane.b32.xlu1 %v2103_v37, %s2160_s12 }
 0x448   : > { %2124 = vrot.lane.b32.xlu0 %v2103_v37, %s2163_s15  ;;  %2119 = vrot.lane.b32.xlu1 %v2103_v37, %s2162_s14  ;;  %s1744_s15 = smul.u32 24, %s2606_s28 }
 0x44c   : > { %2134 = vrot.lane.b32.xlu0 %v2103_v37, %s2165_s17  ;;  %2129 = vrot.lane.b32.xlu1 %v2103_v37, %s2164_s16 }
 0x450   : > { %1284 = vrot.lane.b32.xlu0 %v1163_v40, %s2166_s18  ;;  %1282 = vrot.lane.b32.xlu1 %v1162_v41, %s2166_s18 }
 0x454   : > { %1286 = vrot.lane.b32.xlu0 %v1177_v43, %s2166_s18  ;;  %1280 = vrot.lane.b32.xlu1 %v2522_v49, %s2166_s18  ;;  %s305_s18 = scalar_lea.vmem %s2604_s8, %s1744_s15 }
 0x458   : > { %1296 = vperm.xlu1 %2067, %v1173_v45  }
 0x4a6   : > { %v2075_v46 = vpop.permute.xlu1 %2074  ;;  %v2070_v47 = vpop.permute.xlu0 %2069 }
 0x4a7   : > { %v2072_v55 = vunpack.i.h.bf16 %v2070_v47  ;;  %v2071_v56 = vunpack.i.l.bf16 %v2070_v47  ;;  %v2077_v59 = vunpack.i.h.bf16 %v2075_v46  ;;  %v2076_v60 = vunpack.i.l.bf16 %v2075_v46 }
 0x4aa   : > { %v2085_v48 = vpop.permute.xlu1 %2084  ;;  %v2080_v50 = vpop.permute.xlu0 %2079 }
 0x4ab   : > { %v2087_v61 = vunpack.i.h.bf16 %v2085_v48  ;;  %v2082_v62 = vunpack.i.h.bf16 %v2080_v50  ;;  %v2081_v3 = vunpack.i.l.bf16 %v2080_v50  ;;  %v2086_v13 = vunpack.i.l.bf16 %v2085_v48 }
 0x4ae   : > { %v2547_v51 = vpop.permute.xlu1 %2094  ;;  %v2090_v52 = vpop.permute.xlu0 %2089 }
 0x4af   : > { %v2097_v14 = vunpack.i.h.bf16 %v2547_v51  ;;  %v2092_v15 = vunpack.i.h.bf16 %v2090_v52  ;;  %v2091_v16 = vunpack.i.l.bf16 %v2090_v52  ;;  %v2096_v32 = vunpack.i.l.bf16 %v2547_v51 }
 0x4b2   : > { %v2549_v53 = vpop.permute.xlu0 %2099  ;;  %v2105_v54 = vpop.permute.xlu1 %2104 }
 0x4b3   : > { %v2107_v57 = vunpack.i.h.bf16 %v2105_v54  ;;  %v2106_v58 = vunpack.i.l.bf16 %v2105_v54  ;;  %v2102_v33 = vunpack.i.h.bf16 %v2549_v53  ;;  %v2101_v34 = vunpack.i.l.bf16 %v2549_v53 }
 0x4b5   : > { %v1192_v63 = vsel %vm362_vm1, %v2107_v57, %v2072_v55  ;;  %v1190_v1 = vsel %vm362_vm1, %v2071_v56, %v2106_v58  ;;  %v1191_v2 = vsel %vm362_vm1, %v2106_v58, %v2107_v57 }
 0x4b6   : > { %v1732_v4 = vpack.c.bf16 %v1192_v63, %v1163_v40  ;;  %v1717_v5 = vpack.c.bf16 %v1190_v1, %v2522_v49  ;;  %v2115_v6 = vpop.permute.xlu0 %2114  ;;  %v2110_v7 = vpop.permute.xlu1 %2109  ;;  %v1715_v8 = vpack.c.bf16 %v1191_v2, %v1162_v41 }
 0x4b7   : > { %v2117_v9 = vunpack.i.h.bf16 %v2115_v6  ;;  %v2116_v10 = vunpack.i.l.bf16 %v2115_v6  ;;  %v2112_v11 = vunpack.i.h.bf16 %v2110_v7  ;;  %v2111_v12 = vunpack.i.l.bf16 %v2110_v7 }
 0x4b8   : > { %1716 = vmatprep.subr.bf16.mxu0 %v1715_v8  ;;  %1733 = vmatpush3.bf16.msra.mxu1 %v1732_v4 }
 0x4b9   : > { %v1220_v17 = vsel %vm448_vm3, %v2117_v9, %v2082_v62  ;;  %v1218_v18 = vsel %vm448_vm3, %v2081_v3, %v2116_v10  ;;  %v1206_v19 = vsel %vm405_vm2, %v2112_v11, %v2077_v59  ;;  %v1204_v20 = vsel %vm405_vm2, %v2076_v60, %v2111_v12  ;;  %1718 = vmatpush1.bf16.msra.mxu0 %v1717_v5 }
 0x4ba   : > { %v1735_v21 = vpack.c.bf16 %v1220_v17, %v1206_v19  ;;  %v1721_v23 = vpack.c.bf16 %v1218_v18, %v1204_v20  ;;  %v2125_v24 = vpop.permute.xlu0 %2124  ;;  %v2120_v25 = vpop.permute.xlu1 %2119  ;;  %1734 = vmatprep.subr.bf16.mxu1 %v2158_v0  ;;  %v1205_v26 = vsel %vm405_vm2, %v2111_v12, %v2112_v11  ;;  %v1219_v27 = vsel %vm448_vm3, %v2116_v10, %v2117_v9 }
 0x4bb   : > { %v2127_v28 = vunpack.i.h.bf16 %v2125_v24  ;;  %v2126_v29 = vunpack.i.l.bf16 %v2125_v24  ;;  %v2122_v30 = vunpack.i.h.bf16 %v2120_v25  ;;  %v2121_v31 = vunpack.i.l.bf16 %v2120_v25 }
 0x4bc   : > { %v1719_v35 = vpack.c.bf16 %v1219_v27, %v1205_v26  ;;  %1736 = vmatpush3.bf16.msra.mxu1 %v1735_v21 }
 0x4bd   : > { %v1248_v36 = vsel %vm534_vm5, %v2127_v28, %v2092_v15  ;;  %v1246_v38 = vsel %vm534_vm5, %v2091_v16, %v2126_v29  ;;  %v1234_v39 = vsel %vm491_vm4, %v2122_v30, %v2087_v61  ;;  %v1232_v41 = vsel %vm491_vm4, %v2086_v13, %v2121_v31  ;;  %1737 = vmatprep.subr.bf16.mxu1 %v2158_v0 }
 0x4be   : > { %v1738_v42 = vpack.c.bf16 %v1248_v36, %v1234_v39  ;;  %v1725_v40 = vpack.c.bf16 %v1246_v38, %v1232_v41  ;;  %1720 = vmatprep.subr.bf16.mxu0 %v1719_v35  ;;  %v2135_v49 = vpop.permute.xlu0 %2134  ;;  %v2130_v43 = vpop.permute.xlu1 %2129  ;;  %v1233_v44 = vsel %vm491_vm4, %v2121_v31, %v2122_v30  ;;  %v1247_v37 = vsel %vm534_vm5, %v2126_v29, %v2127_v28 }
 0x4bf   : > { %1722 = vmatpush1.bf16.msra.mxu0 %v1721_v23  ;;  %v2137_v45 = vunpack.i.h.bf16 %v2135_v49  ;;  %v2136_v46 = vunpack.i.l.bf16 %v2135_v49  ;;  %v2132_v47 = vunpack.i.h.bf16 %v2130_v43  ;;  %v2131_v48 = vunpack.i.l.bf16 %v2130_v43 }
 0x4c0   : > { %v1723_v50 = vpack.c.bf16 %v1247_v37, %v1233_v44  ;;  %1739 = vmatpush3.bf16.msra.mxu1 %v1738_v42 }
 0x4c1   : > { %v1276_v51 = vsel %vm620_vm7, %v2137_v45, %v2102_v33  ;;  %v1274_v52 = vsel %vm620_vm7, %v2101_v34, %v2136_v46  ;;  %v1262_v53 = vsel %vm577_vm6, %v2132_v47, %v2097_v14  ;;  %v1260_v54 = vsel %vm577_vm6, %v2096_v32, %v2131_v48  ;;  %1740 = vmatprep.subr.bf16.mxu1 %v2158_v0  ;;  %v1172_v0 = vld [vmem:[%s2602_s6] sm:$0xff] }
 0x4c2   : > { %v1741_v55 = vpack.c.bf16 %v1276_v51, %v1262_v53  ;;  %1724 = vmatprep.subr.bf16.mxu0 %v1723_v50  ;;  %v1285_v56 = vpop.permute.xlu0 %1284  ;;  %v1283_v57 = vpop.permute.xlu1 %1282  ;;  %v1261_v58 = vsel %vm577_vm6, %v2131_v48, %v2132_v47  ;;  %v1275_v59 = vsel %vm620_vm7, %v2136_v46, %v2137_v45  ;;  %v1729_v60 = vpack.c.bf16 %v1274_v52, %v1260_v54 }
 0x4c3   : > { %1726 = vmatpush1.bf16.msra.mxu0 %v1725_v40  ;;  %v1727_v61 = vpack.c.bf16 %v1275_v59, %v1261_v58  ;;  %v1289_v2 = vsel %vm663_vm8, %v1283_v57, %v1285_v56 }
 0x4c4   : > { %1742 = vmatpush3.bf16.msra.mxu1 %v1741_v55 }
 0x4c5   : > { %1728 = vmatprep.subr.bf16.mxu0 %v1727_v61  ;;  %1591 = vmatprep.subr.mxu1 %v2168_v22 }
 0x4c6   : > { %v1287_v62 = vpop.permute.xlu0 %1286  ;;  %v1281_v63 = vpop.permute.xlu1 %1280 }
 0x4c7   : > { %1730 = vmatpush1.bf16.msra.mxu0 %v1729_v60  ;;  %v1290_v1 = vsel %vm663_vm8, %v1285_v56, %v1287_v62  ;;  %v1288_v3 = vsel %vm663_vm8, %v1281_v63, %v1283_v57 }
 0x4c8   : > { %1318 = vmatprep.subr.mxu0 %v1289_v2  ;;  %1592 = vmatpush3.msra.mxu1 %v1290_v1 }
 0x4c9   : > { %1594 = vmatmul.mubr.msk.f32.vlgmr.msra.gmra.mrb[4].mxu1 %vm1002_vm14, %v1172_v0 }
 0x4cb   : > { %1319 = vmatpush1.msra.mxu0 %v1288_v3 }
 0x4cc   : > { %1530 = vmatmul.mubr.msk.f32.vlgmr.msra.gmra.mrb[4].mxu0 %vm1002_vm14, %v1172_v0 }
 0x4d7   : > { %v1297_v22 = vpop.permute.xlu1 %1296 }
 0x59c   : > { %v1439_v4 = vpop.f32.mrb[4].mxu1 }
 0x59d   : > { %v1440_v5 = vadd.f32 %v1439_v4, %v1297_v22  ;;  %v1595_v6 = vpop.f32.mrb[5].mxu1 }
 0x59f   : > { %v1445_v7 = vsub.f32 0.0, %v1440_v5  ;;  %v1368_v8 = vpop.f32.mrb[4].mxu0 }
 0x5a0   : > { %v1369_v9 = vadd.f32 %v1368_v8, %v1297_v22  ;;  %v1370_v10 = vpop.f32.mrb[5].mxu0 }
 0x5a1   : > { %v1450_v11 = vmul.f32 1.442695, %v1445_v7  ;;  %v1371_v12 = vadd.f32 %v1370_v10, %v1297_v22 }
 0x5a2   : > { %v1443_v13 = vsub.f32 0.0, %v1369_v9 }
 0x5a3   : > { %2138 = vpow2.f32 %v1450_v11  ;;  %v1444_v14 = vsub.f32 0.0, %v1371_v12 }
 0x5a4   : > { %v1446_v15 = vmul.f32 1.442695, %v1443_v13 }
 0x5a5   : > { %v1448_v16 = vmul.f32 1.442695, %v1444_v14 }
 0x5a6   : > { %2140 = vpow2.f32 %v1446_v15 }
 0x5a7   : > { %2142 = vpow2.f32 %v1448_v16 }
 0x5ad   : > { %v2139_v17 = vpop.eup %2138 }
 0x5ae   : > { %v1454_v18 = vadd.f32 1.0, %v2139_v17 }
 0x5b0   : > { %v2141_v19 = vpop.eup %2140  ;;  %2144 = vrcp.f32 %v1454_v18 }
 0x5b1   : > { %v2143_v20 = vpop.eup %2142  ;;  %v1452_v21 = vadd.f32 1.0, %v2141_v19 }
 0x5b2   : > { %v1453_v23 = vadd.f32 1.0, %v2143_v20 }
 0x5b3   : > { %2146 = vrcp.f32 %v1452_v21 }
 0x5b4   : > { %2148 = vrcp.f32 %v1453_v23 }
 0x5ba   : > { %v2145_v24 = vpop.eup %2144 }
 0x5bb   : > { %1463 = vst [vmem:[%s305_s18 + $0x10] sm:$0xff] %v2145_v24 }
 0x5bd   : > { %v2147_v25 = vpop.eup %2146 }
 0x5be   : > { %v2149_v26 = vpop.eup %2148  ;;  %1461 = vst [vmem:[%s305_s18] sm:$0xff] %v2147_v25 }
 0x5bf   : > { %1462 = vst [vmem:[%s305_s18 + $0x8] sm:$0xff] %v2149_v26 }
 0x5c0 PF: > { %s18_s27 = sadd.s32 1, %s2156_s27  }
 0x5c1   : > { %p15_p4 = scmp.ge.s32.totalorder %s18_s27, 4  }
 0x5c3   :  { %17 = sbr.rel (!%p15_p4) target bundleno = 1 (0x1), region = 82 }

// kernel: illumination_block_pallas.10
= control target key start
LH: loop header
LB: loop body
LE: loop exit
PB: predicated region body
PF: predicated region fallthrough
CT: control target
= control target key end

     0   :  { %s589_s23 = smov 0   ;;  %s626_s0 = inlined_call_operand.<no memory space> [shape: f32[1], index: 0, kind: input, shape index: {}]   ;;  %s627_s1 = inlined_call_operand.vmem [shape: f32[2,1,256], index: 1, kind: input, shape index: {}]   ;;  %s628_s2 = inlined_call_operand.vmem [shape: f32[2,3,256], index: 2, kind: input, shape index: {}]   ;;  %s629_s3 = inlined_call_operand.vmem [shape: f32[2,3,256], index: 3, kind: input, shape index: {}]   ;;  %s630_s4 = inlined_call_operand.vmem [shape: f32[2,3,256], index: 4, kind: input, shape index: {}]   ;;  %s631_s5 = inlined_call_operand.vmem [shape: f32[2,3,256], index: 5, kind: output, shape index: {0}]   ;;  %s632_s6 = inlined_call_operand.vmem [shape: f32[2,1,256], index: 6, kind: output, shape index: {1}]  }
   0x1   :  { %12 = sst [smem:[#allocation2]] %s626_s0 }
   0x2 LB: > { %s512_s24 = sadd.s32 4294967295, %s548_s23   ;;  %p516_p0 = scmp.ge.s32.totalorder %s548_s23, 1  ;;  %s548_s23 = sphi %s589_s23, %s18_s23  }
   0x3   : > { %p245_p1 = scmp.lt.s32.totalorder %s548_s23, 3 }
   0x5   : > { %p246_p2 = pnand %p516_p0, %p245_p1 }
   0x6   : > { %p293_p3 = scmp.lt.s32.totalorder (!%p246_p2), %s512_s24, 1  ;;  %s321_s25 = sld [smem:[#allocation2]] (!%p246_p2)  ;;  %v329_v0 = vlaneseq (!%p246_p2)  ;;  %vm349_vm0 = vcmask (!%p246_p2), 1042432   ;;  %v550_v29 = vmov (!%p246_p2), 1966171168  }
   0x7   : > { %249 = sbr.rel (%p246_p2) target bundleno = 52 (0x34), region = 40  ;;  %v371_v30 = vunpack.c.l.s4 (!%p246_p2), %v550_v29 }
   0x8   : > { %v330_v1 = vshrl.u32 (!%p246_p2), %v329_v0, 7  ;;  %vm387_vm1 = vcmp.lt.s32.totalorder (!%p246_p2), %v329_v0, 256 }
   0x9   : > { %v372_v35 = vunpack.c.0.s8 (!%p246_p2), %v371_v30 }
   0xa   : > { %v331_v2 = vsub.s32 (!%p246_p2), 0, %v330_v1  ;;  %v335_v3 = vsub.s32 (!%p246_p2), 1, %v330_v1 }
   0xb   : > { %v375_v39 = vsub.s32 (!%p246_p2), %v372_v35, %v330_v1 }
   0xc   : > { %v323_v5 = vstv (!%p246_p2), %s321_s25 }
   0xe   : > { %s634_s24 = smov (!%p293_p3, %s512_s24), 1 }
   0xf   : > { %s517_s0 = sshll.u32 %s634_s24, 1  ;;  %s529_s26 = sshll.u32 %s634_s24, 3 }
  0x10   : > { %s296_s29 = scalar_lea.vmem %s627_s1, %s517_s0  ;;  %s301_s8 = scalar_lea.vmem %s628_s2, %s529_s26 }
  0x11   : > { %s306_s11 = scalar_lea.vmem %s629_s3, %s529_s26  ;;  %s311_s14 = scalar_lea.vmem %s630_s4, %s529_s26  ;;  %v322_v4 = vld [vmem:[%s301_s8] sm:$0x77] }
  0x12   : > { %v327_v6 = vld [vmem:[%s296_s29] sm:$0x3]  ;;  %v324_v7 = vmul.f32 %v323_v5, %v322_v4  ;;  %s316_s17 = scalar_lea.vmem %s631_s5, %s529_s26  ;;  %s320_s20 = scalar_lea.vmem %s632_s6, %s517_s0 }
  0x13   : > { %v332_v8 = vrot.slane %v327_v6, %v331_v2  ;;  %v336_v9 = vrot.slane %v327_v6, %v335_v3  ;;  %v340_v10 = vld [vmem:[%s306_s11] sm:$0x77] }
  0x14   : > { %v341_v11 = vld [vmem:[%s311_s14] sm:$0x77]  ;;  %v325_v13 = vmul.f32 %v324_v7, %v322_v4 }
  0x15   : > { %v342_v12 = vsub.f32 %v340_v10, %v341_v11  ;;  %v337_v14 = vcombine.low %v332_v8, %v336_v9 }
  0x16   : > { %v326_v15 = vsub.f32 1.0, %v325_v13 }
  0x17   : > { %v343_v16 = vmul.f32 %v342_v12, %v324_v7 }
  0x18   : > { %v339_v17 = vmul.f32 %v337_v14, %v326_v15 }
  0x1a   : > { %v344_v18 = vsub.f32 %v339_v17, %v343_v16 }
  0x1c   : > { %345 = vst [vmem:[%s316_s17] sm:$0x77] %v344_v18  ;;  %v347_v19 = vcombine.high %v344_v18, %v344_v18  ;;  %v350_v20 = vsel %vm349_vm0, %v344_v18, 0.0 }
  0x1d   : > { %v351_v21 = vrot.slane %v350_v20, 4 }
  0x1e   : > { %v357_v22 = vsel %vm349_vm0, %v347_v19, 0.0 }
  0x1f   : > { %v352_v23 = vadd.f32 %v351_v21, %v350_v20  ;;  %v358_v24 = vrot.slane %v357_v22, 4 }
  0x21   : > { %v353_v25 = vrot.slane %v352_v23, 2  ;;  %v359_v26 = vadd.f32 %v358_v24, %v357_v22 }
  0x23   : > { %v354_v27 = vadd.f32 %v353_v25, %v352_v23  ;;  %v360_v28 = vrot.slane %v359_v26, 2 }
  0x25   : > { %v355_v31 = vrot.slane %v354_v27, 1  ;;  %v361_v32 = vadd.f32 %v360_v28, %v359_v26 }
  0x27   : > { %v356_v33 = vadd.f32 %v355_v31, %v354_v27  ;;  %v362_v34 = vrot.slane %v361_v32, 1 }
  0x29   : > { %v363_v36 = vadd.f32 %v362_v34, %v361_v32  ;;  %v365_v37 = vmul.f32 0.33333334, %v356_v33 }
  0x2b   : > { %v366_v38 = vmul.f32 0.33333334, %v363_v36 }
  0x2d   : > { %v369_v40 = vcombine.low %v365_v37, %v366_v38 }
  0x2f   : > { %v376_v41 = vrot.slane %v369_v40, %v375_v39 }
  0x31   : > { %v383_v42 = vrot.slane %v376_v41, %v375_v39 }
  0x33   : > { %389 = vst.msk [vmem:[%s320_s20] sm:$0x3] %vm387_vm1, %v383_v42 }
  0x34 PF: > { %s18_s23 = sadd.s32 1, %s548_s23  }
  0x35   : > { %p15_p4 = scmp.ge.s32.totalorder %s18_s23, 4  }
  0x37   :  { %17 = sbr.rel (!%p15_p4) target bundleno = 2 (0x2), region = 91 }

</bundles_post_ra>
